<compile_context>
chip_gen: v6e
topology: v6e:2x2x1
jax: 0.10.0
libtpu: 0.0.40
codegen_flags: <defaults>
</compile_context>

<pallas_src>
import functools
import math

import jax
import jax.numpy as jnp
import numpy as np
from jax.experimental import pallas as pl
from jax.experimental.pallas import tpu as pltpu


# ----------------------------- Pallas kernel -------------------------------
def transformer_kernel(pe_ref, x_ref,
                       w_qkv_ref, b_qkv_ref, w_o_ref, b_o_ref,
                       ln1_w_ref, ln1_b_ref, w1_ref, b1_ref,
                       w2_ref, b2_ref, ln2_w_ref, ln2_b_ref,
                       o_ref, *, nheads, nlayers):
    """All encoder layers fused.

    x_ref : (L, S, E)  L attention batches, seq S, embed E (f32)
    pe_ref: (S, E)     positional encoding, broadcast over L
    o_ref : (L*S, E)   lane-dense output slab (E is a multiple of 128 here)
    """
    L, S, E = x_ref.shape
    N = L * S
    H = nheads
    Dh = E // H
    eps = 1e-5
    bf16 = jnp.bfloat16
    f32 = jnp.float32

    def layer_norm(v, w, b):
        # Single-pass LN: one lane-reduction pass (var = E[x^2] - mu^2).
        mu = jnp.mean(v, axis=-1, keepdims=True)
        var = jnp.mean(v * v, axis=-1, keepdims=True) - mu * mu
        return (v - mu) * jax.lax.rsqrt(var + eps) * w + b

    # Positional encoding: (S, E) broadcast over the L attention batches, then the
    # (L, S, E) slab is viewed as (N, E).  Groups of S rows are tile-aligned
    # (S = 8, E = multiple of 128), so the reshape is pure re-indexing.
    x = (x_ref[...] + pe_ref[...]).reshape(N, E)            # f32 residual stream

    for l in range(nlayers):                                # static unroll over layers
        w_qkv = w_qkv_ref[l]                                # (E, 3E) bf16, q-scale baked
        b_qkv = b_qkv_ref[l]                                # (1, 3E) f32
        w_o = w_o_ref[l]                                    # (E, E)  bf16, pre-transposed
        b_o = b_o_ref[l]                                    # (1, E)
        ln1_w, ln1_b = ln1_w_ref[l], ln1_b_ref[l]
        w1, b1 = w1_ref[l], b1_ref[l]                       # (E, F) bf16, (1, F)
        w2, b2 = w2_ref[l], b2_ref[l]                       # (F, E) bf16, (1, E)
        ln2_w, ln2_b = ln2_w_ref[l], ln2_b_ref[l]

        # ---- self-attention --------------------------------------------------
        # Fused QKV projection: one full-slab MXU matmul over all N rows.
        qkv = jnp.dot(x.astype(bf16), w_qkv,
                      preferred_element_type=f32) + b_qkv                     # (N, 3E)
        # One bf16 cast for the whole qkv slab; per-head views slice from it.
        qkv3 = qkv.reshape(L, S, 3 * E).astype(bf16)                          # (L, S, 3E)

        # True batched attention over the L attention batches (no (N,N) mask,
        # no iota / where, L-times less exp / max / sum work).
        head_ctx = []
        for h in range(H):
            qh = qkv3[..., h * Dh:(h + 1) * Dh]                               # (L, S, Dh)
            kh = qkv3[..., E + h * Dh:E + (h + 1) * Dh]
            vh = qkv3[..., 2 * E + h * Dh:2 * E + (h + 1) * Dh]
            s = jnp.einsum('lsd,ltd->lst', qh, kh,
                           preferred_element_type=f32)                        # (L, S, S)
            s = s - jnp.max(s, axis=-1, keepdims=True)
            p = jnp.exp(s)
            p = p * pl.reciprocal(jnp.sum(p, axis=-1, keepdims=True), approx=True)
            head_ctx.append(jnp.einsum('lst,ltd->lsd', p.astype(bf16), vh,
                                       preferred_element_type=f32))           # (L, S, Dh)
        # One lane-concat re-assembles heads; out-projection is a single
        # full-width (N,E)@(E,E) MXU push.
        ctx = jnp.concatenate(head_ctx, axis=-1).reshape(N, E)                # (N, E)
        attn = jnp.dot(ctx.astype(bf16), w_o, preferred_element_type=f32) + b_o
        src = layer_norm(x + attn, ln1_w, ln1_b)

        # ---- feed-forward: linear1 -> relu -> linear2 -------------------------
        hdn = jnp.maximum(
            jnp.dot(src.astype(bf16), w1, preferred_element_type=f32) + b1, 0.0)
        ffn = jnp.dot(hdn.astype(bf16), w2, preferred_element_type=f32) + b2
        x = layer_norm(src + ffn, ln2_w, ln2_b)

    # Lane-dense single contiguous store (E multiple of 128 -> unmasked vst).
    o_ref[...] = x


# ------------------------------ glue (plain JAX) ----------------------------
def positional_encoding(seq_len, d_model):
    position = np.arange(seq_len, dtype=np.float32)[:, None]
    div_term = np.exp(np.arange(0, d_model, 2, dtype=np.float32)
                      * (-math.log(10000.0) / d_model))
    pe = np.zeros((seq_len, d_model), dtype=np.float32)
    pe[:, 0::2] = np.sin(position * div_term)
    pe[:, 1::2] = np.cos(position * div_term)
    return jnp.asarray(pe)


def transformer_forward(x_bcl, packed_params, nheads, nlayers):
    """Mirrors _transformer.forward: (B, C, L) -> (B, C, L).  One pallas_call total."""
    B, C, L = x_bcl.shape
    # (B, C, L) -> (L, B, C) = (attn_batch, seq, embed); the kernel views it as
    # (L*B, C) internally (tile-aligned regrouping, no extra data movement).
    x3 = jnp.transpose(x_bcl, (2, 0, 1))
    pe = positional_encoding(B, C)                        # (seq, embed), not pre-tiled
    vmem = lambda: pl.BlockSpec(memory_space=pltpu.MemorySpace.VMEM)
    n_in = 2 + len(packed_params)
    out2 = pl.pallas_call(
        functools.partial(transformer_kernel, nheads=nheads, nlayers=nlayers),
        out_shape=jax.ShapeDtypeStruct((L * B, C), jnp.float32),
        in_specs=[vmem() for _ in range(n_in)],
        out_specs=vmem(),
    )(pe, x3, *packed_params)
    return jnp.transpose(out2.reshape(L, B, C), (1, 2, 0))


def init_layer_params(key, d_model, hidden):
    """Per-layer params in PyTorch convention (weights as (out, in))."""
    E, H = d_model, hidden
    ks = jax.random.split(key, 6)
    s = 0.05
    return dict(
        w_in=jax.random.normal(ks[0], (3 * E, E), jnp.float32) * s,
        b_in=jax.random.normal(ks[1], (3 * E,), jnp.float32) * s,
        w_o=jax.random.normal(ks[2], (E, E), jnp.float32) * s,
        b_o=jnp.zeros((E,), jnp.float32),
        ln1_w=jnp.ones((E,), jnp.float32), ln1_b=jnp.zeros((E,), jnp.float32),
        w1=jax.random.normal(ks[3], (H, E), jnp.float32) * s,
        b1=jax.random.normal(ks[4], (H,), jnp.float32) * s,
        w2=jax.random.normal(ks[5], (E, H), jnp.float32) * s,
        b2=jnp.zeros((E,), jnp.float32),
        ln2_w=jnp.ones((E,), jnp.float32), ln2_b=jnp.zeros((E,), jnp.float32),
    )


def pack_params(layer_params, nheads):
    """Stack all layers, pre-transpose weights (bf16), bake q-scale into W_qkv/b_qkv."""
    E = layer_params[0]['w_o'].shape[0]
    Dh = E // nheads
    scale = 1.0 / math.sqrt(Dh)
    bf16 = jnp.bfloat16

    def stack(fn, dtype=jnp.float32):
        return jnp.stack([fn(p) for p in layer_params]).astype(dtype)

    def qkv_w(p):                       # (E, 3E); q = scale*(x@Wq.T + bq) baked in
        w = p['w_in'].T
        return jnp.concatenate([w[:, :E] * scale, w[:, E:]], axis=1)

    def qkv_b(p):                       # (1, 3E)
        return jnp.concatenate([p['b_in'][:E] * scale, p['b_in'][E:]])[None, :]

    return (
        stack(qkv_w, bf16),                      # (nl, E, 3E)
        stack(qkv_b),                            # (nl, 1, 3E)
        stack(lambda p: p['w_o'].T, bf16),       # (nl, E, E)
        stack(lambda p: p['b_o'][None, :]),      # (nl, 1, E)
        stack(lambda p: p['ln1_w'][None, :]),
        stack(lambda p: p['ln1_b'][None, :]),
        stack(lambda p: p['w1'].T, bf16),        # (nl, E, H)
        stack(lambda p: p['b1'][None, :]),       # (nl, 1, H)
        stack(lambda p: p['w2'].T, bf16),        # (nl, H, E)
        stack(lambda p: p['b2'][None, :]),       # (nl, 1, E)
        stack(lambda p: p['ln2_w'][None, :]),
        stack(lambda p: p['ln2_b'][None, :]),
    )


# ----------------------------- pure-JAX reference ---------------------------
def reference_forward(x_bcl, layer_params, nheads):
    def layer_norm(v, w, b, eps=1e-5):
        mu = jnp.mean(v, axis=-1, keepdims=True)
        var = jnp.mean((v - mu) ** 2, axis=-1, keepdims=True)
        return (v - mu) * jax.lax.rsqrt(var + eps) * w + b

    B, C, L = x_bcl.shape
    E = C
    Dh = E // nheads
    src = jnp.transpose(x_bcl, (0, 2, 1))          # (seq=B, batch=L, embed=C)
    pe = positional_encoding(B, C)
    src = src + pe[:, None, :]
    for p in layer_params:
        w_in, b_in = p['w_in'], p['b_in']
        q = jnp.einsum('sbe,fe->sbf', src, w_in[:E]) + b_in[:E]
        k = jnp.einsum('sbe,fe->sbf', src, w_in[E:2 * E]) + b_in[E:2 * E]
        v = jnp.einsum('sbe,fe->sbf', src, w_in[2 * E:]) + b_in[2 * E:]
        q = q * (1.0 / math.sqrt(Dh))
        qh = q.reshape(B, L, nheads, Dh)
        kh = k.reshape(B, L, nheads, Dh)
        vh = v.reshape(B, L, nheads, Dh)
        scores = jnp.einsum('sbhd,tbhd->bhst', qh, kh)
        attn = jax.nn.softmax(scores, axis=-1)
        o = jnp.einsum('bhst,tbhd->sbhd', attn, vh).reshape(B, L, E)
        o = jnp.einsum('sbe,fe->sbf', o, p['w_o']) + p['b_o']
        src = layer_norm(src + o, p['ln1_w'], p['ln1_b'])
        hdn = jax.nn.relu(jnp.einsum('sbe,he->sbh', src, p['w1']) + p['b1'])
        ffn = jnp.einsum('sbh,eh->sbe', hdn, p['w2']) + p['b2']
        src = layer_norm(src + ffn, p['ln2_w'], p['ln2_b'])
    return jnp.transpose(src, (0, 2, 1))


# ---------------------------------- main -------------------------------------
if __name__ == "__main__":
    # Small shapes consistent with the module: x is (batch, in_channels, length) in
    # PyTorch NCL convention.  The channel dim (= d_model) is a lane multiple (128)
    # — exactly what the real 4001-channel model would be padded to on TPU — and is
    # divisible by nheads.  seq (= batch dim fed to MHA) = 8, attention batches = 4.
    B, C, L = 8, 128, 4
    nheads, hidden, nlayers = 8, 256, 3

    key = jax.random.PRNGKey(0)
    kx, kp = jax.random.split(key)
    x = jax.random.normal(kx, (B, C, L), jnp.float32)
    layer_keys = jax.random.split(kp, nlayers)
    layer_params = [init_layer_params(k, C, hidden) for k in layer_keys]
    packed = pack_params(layer_params, nheads)

    fwd = jax.jit(functools.partial(transformer_forward,
                                    nheads=nheads, nlayers=nlayers))
    out = jax.block_until_ready(fwd(x, packed))
    assert out.shape == (B, C, L)

    # Tolerance set by bf16 MXU operands over K=128/256 contractions (f32 acc) and
    # the approx softmax reciprocal; the f32 reference matches well inside 3e-2.
    ref = reference_forward(x, layer_params, nheads)
    np.testing.assert_allclose(np.asarray(out), np.asarray(ref),
                               rtol=3e-2, atol=3e-2)
    print("KERNEL_OK")
</pallas_src>

<mosaic_0001>
module attributes {stable_mosaic.version = 11 : i64} {
  func.func @transformer_kernel(%arg0: memref<8x128xf32, #tpu.memory_space<vmem>>, %arg1: memref<4x8x128xf32, #tpu.memory_space<vmem>>, %arg2: memref<3x128x384xbf16, #tpu.memory_space<vmem>>, %arg3: memref<3x1x384xf32, #tpu.memory_space<vmem>>, %arg4: memref<3x128x128xbf16, #tpu.memory_space<vmem>>, %arg5: memref<3x1x128xf32, #tpu.memory_space<vmem>>, %arg6: memref<3x1x128xf32, #tpu.memory_space<vmem>>, %arg7: memref<3x1x128xf32, #tpu.memory_space<vmem>>, %arg8: memref<3x128x256xbf16, #tpu.memory_space<vmem>>, %arg9: memref<3x1x256xf32, #tpu.memory_space<vmem>>, %arg10: memref<3x256x128xbf16, #tpu.memory_space<vmem>>, %arg11: memref<3x1x128xf32, #tpu.memory_space<vmem>>, %arg12: memref<3x1x128xf32, #tpu.memory_space<vmem>>, %arg13: memref<3x1x128xf32, #tpu.memory_space<vmem>>, %arg14: memref<32x128xf32, #tpu.memory_space<vmem>>) attributes {dimension_semantics = [], scalar_prefetch = 0 : i64, scratch_operands = 0 : i64, tpu.core_type = #tpu.core_type<tc>} {
    %c0 = arith.constant 0 : index
    %c0_0 = arith.constant 0 : index
    %c0_1 = arith.constant 0 : index
    %0 = vector.load %arg1[%c0, %c0_0, %c0_1] : memref<4x8x128xf32, #tpu.memory_space<vmem>>, vector<4x8x128xf32>
    %c0_2 = arith.constant 0 : index
    %c0_3 = arith.constant 0 : index
    %1 = vector.load %arg0[%c0_2, %c0_3] : memref<8x128xf32, #tpu.memory_space<vmem>>, vector<8x128xf32>
    %2 = vector.shape_cast %1 : vector<8x128xf32> to vector<1x8x128xf32>
    %3 = vector.broadcast %2 : vector<1x8x128xf32> to vector<4x8x128xf32>
    %4 = arith.addf %0, %3 : vector<4x8x128xf32>
    %5 = vector.shape_cast %4 : vector<4x8x128xf32> to vector<32x128xf32>
    %c0_4 = arith.constant 0 : index
    %c0_5 = arith.constant 0 : index
    %c0_6 = arith.constant 0 : index
    %6 = vector.load %arg2[%c0_4, %c0_5, %c0_6] : memref<3x128x384xbf16, #tpu.memory_space<vmem>>, vector<1x128x384xbf16>
    %7 = vector.shape_cast %6 : vector<1x128x384xbf16> to vector<128x384xbf16>
    %c0_7 = arith.constant 0 : index
    %c0_8 = arith.constant 0 : index
    %c0_9 = arith.constant 0 : index
    %8 = vector.load %arg3[%c0_7, %c0_8, %c0_9] : memref<3x1x384xf32, #tpu.memory_space<vmem>>, vector<1x1x384xf32>
    %9 = vector.shape_cast %8 : vector<1x1x384xf32> to vector<1x384xf32>
    %c0_10 = arith.constant 0 : index
    %c0_11 = arith.constant 0 : index
    %c0_12 = arith.constant 0 : index
    %10 = vector.load %arg4[%c0_10, %c0_11, %c0_12] : memref<3x128x128xbf16, #tpu.memory_space<vmem>>, vector<1x128x128xbf16>
    %11 = vector.shape_cast %10 : vector<1x128x128xbf16> to vector<128x128xbf16>
    %c0_13 = arith.constant 0 : index
    %c0_14 = arith.constant 0 : index
    %c0_15 = arith.constant 0 : index
    %12 = vector.load %arg5[%c0_13, %c0_14, %c0_15] : memref<3x1x128xf32, #tpu.memory_space<vmem>>, vector<1x1x128xf32>
    %13 = vector.shape_cast %12 : vector<1x1x128xf32> to vector<1x128xf32>
    %c0_16 = arith.constant 0 : index
    %c0_17 = arith.constant 0 : index
    %c0_18 = arith.constant 0 : index
    %14 = vector.load %arg6[%c0_16, %c0_17, %c0_18] : memref<3x1x128xf32, #tpu.memory_space<vmem>>, vector<1x1x128xf32>
    %15 = vector.shape_cast %14 : vector<1x1x128xf32> to vector<1x128xf32>
    %c0_19 = arith.constant 0 : index
    %c0_20 = arith.constant 0 : index
    %c0_21 = arith.constant 0 : index
    %16 = vector.load %arg7[%c0_19, %c0_20, %c0_21] : memref<3x1x128xf32, #tpu.memory_space<vmem>>, vector<1x1x128xf32>
    %17 = vector.shape_cast %16 : vector<1x1x128xf32> to vector<1x128xf32>
    %c0_22 = arith.constant 0 : index
    %c0_23 = arith.constant 0 : index
    %c0_24 = arith.constant 0 : index
    %18 = vector.load %arg8[%c0_22, %c0_23, %c0_24] : memref<3x128x256xbf16, #tpu.memory_space<vmem>>, vector<1x128x256xbf16>
    %19 = vector.shape_cast %18 : vector<1x128x256xbf16> to vector<128x256xbf16>
    %c0_25 = arith.constant 0 : index
    %c0_26 = arith.constant 0 : index
    %c0_27 = arith.constant 0 : index
    %20 = vector.load %arg9[%c0_25, %c0_26, %c0_27] : memref<3x1x256xf32, #tpu.memory_space<vmem>>, vector<1x1x256xf32>
    %21 = vector.shape_cast %20 : vector<1x1x256xf32> to vector<1x256xf32>
    %c0_28 = arith.constant 0 : index
    %c0_29 = arith.constant 0 : index
    %c0_30 = arith.constant 0 : index
    %22 = vector.load %arg10[%c0_28, %c0_29, %c0_30] : memref<3x256x128xbf16, #tpu.memory_space<vmem>>, vector<1x256x128xbf16>
    %23 = vector.shape_cast %22 : vector<1x256x128xbf16> to vector<256x128xbf16>
    %c0_31 = arith.constant 0 : index
    %c0_32 = arith.constant 0 : index
    %c0_33 = arith.constant 0 : index
    %24 = vector.load %arg11[%c0_31, %c0_32, %c0_33] : memref<3x1x128xf32, #tpu.memory_space<vmem>>, vector<1x1x128xf32>
    %25 = vector.shape_cast %24 : vector<1x1x128xf32> to vector<1x128xf32>
    %c0_34 = arith.constant 0 : index
    %c0_35 = arith.constant 0 : index
    %c0_36 = arith.constant 0 : index
    %26 = vector.load %arg12[%c0_34, %c0_35, %c0_36] : memref<3x1x128xf32, #tpu.memory_space<vmem>>, vector<1x1x128xf32>
    %27 = vector.shape_cast %26 : vector<1x1x128xf32> to vector<1x128xf32>
    %c0_37 = arith.constant 0 : index
    %c0_38 = arith.constant 0 : index
    %c0_39 = arith.constant 0 : index
    %28 = vector.load %arg13[%c0_37, %c0_38, %c0_39] : memref<3x1x128xf32, #tpu.memory_space<vmem>>, vector<1x1x128xf32>
    %29 = vector.shape_cast %28 : vector<1x1x128xf32> to vector<1x128xf32>
    %30 = arith.truncf %5 : vector<32x128xf32> to vector<32x128xbf16>
    %cst = arith.constant dense<0.000000e+00> : vector<32x384xf32>
    %31 = tpu.matmul %30, %7, %cst {dimension_numbers = #tpu.dot_dimension_numbers<[1], [0], [0], [1], [0, 0, 1, 1], [], []>} : vector<32x128xbf16>, vector<128x384xbf16>, vector<32x384xf32> -> vector<32x384xf32>
    %32 = vector.broadcast %9 : vector<1x384xf32> to vector<32x384xf32>
    %33 = arith.addf %31, %32 : vector<32x384xf32>
    %34 = vector.shape_cast %33 : vector<32x384xf32> to vector<4x8x384xf32>
    %35 = arith.truncf %34 : vector<4x8x384xf32> to vector<4x8x384xbf16>
    %36 = vector.extract_strided_slice %35 {offsets = [0, 0, 0], sizes = [4, 8, 16], strides = [1, 1, 1]} : vector<4x8x384xbf16> to vector<4x8x16xbf16>
    %37 = vector.extract_strided_slice %35 {offsets = [0, 0, 128], sizes = [4, 8, 16], strides = [1, 1, 1]} : vector<4x8x384xbf16> to vector<4x8x16xbf16>
    %38 = vector.extract_strided_slice %35 {offsets = [0, 0, 256], sizes = [4, 8, 16], strides = [1, 1, 1]} : vector<4x8x384xbf16> to vector<4x8x16xbf16>
    "tpu.trace_start"() <{level = 10 : i32, message = "lsd,ltd->lst"}> : () -> ()
    %cst_40 = arith.constant dense<0.000000e+00> : vector<4x8x8xf32>
    %39 = tpu.matmul %36, %37, %cst_40 {dimension_numbers = #tpu.dot_dimension_numbers<[2], [2], [1], [1], [0, 0, 0, 1, 1, 1], [0], [0]>} : vector<4x8x16xbf16>, vector<4x8x16xbf16>, vector<4x8x8xf32> -> vector<4x8x8xf32>
    "tpu.trace_stop"() : () -> ()
    %cst_41 = arith.constant dense<0xFF800000> : vector<4x8xf32>
    %40 = vector.multi_reduction <maximumf>, %39, %cst_41 [2] : vector<4x8x8xf32> to vector<4x8xf32>
    %41 = vector.shape_cast %40 : vector<4x8xf32> to vector<4x8x1xf32>
    %42 = vector.broadcast %41 : vector<4x8x1xf32> to vector<4x8x8xf32>
    %43 = arith.subf %39, %42 : vector<4x8x8xf32>
    %44 = math.exp %43 : vector<4x8x8xf32>
    %cst_42 = arith.constant dense<0.000000e+00> : vector<4x8xf32>
    %45 = vector.multi_reduction <add>, %44, %cst_42 [2] : vector<4x8x8xf32> to vector<4x8xf32>
    %46 = vector.shape_cast %45 : vector<4x8xf32> to vector<4x8x1xf32>
    %47 = tpu.reciprocal %46 {approx = true} : vector<4x8x1xf32> -> vector<4x8x1xf32>
    %48 = vector.broadcast %47 : vector<4x8x1xf32> to vector<4x8x8xf32>
    %49 = arith.mulf %44, %48 : vector<4x8x8xf32>
    %50 = arith.truncf %49 : vector<4x8x8xf32> to vector<4x8x8xbf16>
    "tpu.trace_start"() <{level = 10 : i32, message = "lst,ltd->lsd"}> : () -> ()
    %cst_43 = arith.constant dense<0.000000e+00> : vector<4x8x16xf32>
    %51 = tpu.matmul %50, %38, %cst_43 {dimension_numbers = #tpu.dot_dimension_numbers<[2], [1], [1], [2], [0, 0, 0, 1, 1, 2], [0], [0]>} : vector<4x8x8xbf16>, vector<4x8x16xbf16>, vector<4x8x16xf32> -> vector<4x8x16xf32>
    "tpu.trace_stop"() : () -> ()
    %52 = vector.extract_strided_slice %35 {offsets = [0, 0, 16], sizes = [4, 8, 16], strides = [1, 1, 1]} : vector<4x8x384xbf16> to vector<4x8x16xbf16>
    %53 = vector.extract_strided_slice %35 {offsets = [0, 0, 144], sizes = [4, 8, 16], strides = [1, 1, 1]} : vector<4x8x384xbf16> to vector<4x8x16xbf16>
    %54 = vector.extract_strided_slice %35 {offsets = [0, 0, 272], sizes = [4, 8, 16], strides = [1, 1, 1]} : vector<4x8x384xbf16> to vector<4x8x16xbf16>
    "tpu.trace_start"() <{level = 10 : i32, message = "lsd,ltd->lst"}> : () -> ()
    %cst_44 = arith.constant dense<0.000000e+00> : vector<4x8x8xf32>
    %55 = tpu.matmul %52, %53, %cst_44 {dimension_numbers = #tpu.dot_dimension_numbers<[2], [2], [1], [1], [0, 0, 0, 1, 1, 1], [0], [0]>} : vector<4x8x16xbf16>, vector<4x8x16xbf16>, vector<4x8x8xf32> -> vector<4x8x8xf32>
    "tpu.trace_stop"() : () -> ()
    %cst_45 = arith.constant dense<0xFF800000> : vector<4x8xf32>
    %56 = vector.multi_reduction <maximumf>, %55, %cst_45 [2] : vector<4x8x8xf32> to vector<4x8xf32>
    %57 = vector.shape_cast %56 : vector<4x8xf32> to vector<4x8x1xf32>
    %58 = vector.broadcast %57 : vector<4x8x1xf32> to vector<4x8x8xf32>
    %59 = arith.subf %55, %58 : vector<4x8x8xf32>
    %60 = math.exp %59 : vector<4x8x8xf32>
    %cst_46 = arith.constant dense<0.000000e+00> : vector<4x8xf32>
    %61 = vector.multi_reduction <add>, %60, %cst_46 [2] : vector<4x8x8xf32> to vector<4x8xf32>
    %62 = vector.shape_cast %61 : vector<4x8xf32> to vector<4x8x1xf32>
    %63 = tpu.reciprocal %62 {approx = true} : vector<4x8x1xf32> -> vector<4x8x1xf32>
    %64 = vector.broadcast %63 : vector<4x8x1xf32> to vector<4x8x8xf32>
    %65 = arith.mulf %60, %64 : vector<4x8x8xf32>
    %66 = arith.truncf %65 : vector<4x8x8xf32> to vector<4x8x8xbf16>
    "tpu.trace_start"() <{level = 10 : i32, message = "lst,ltd->lsd"}> : () -> ()
    %cst_47 = arith.constant dense<0.000000e+00> : vector<4x8x16xf32>
    %67 = tpu.matmul %66, %54, %cst_47 {dimension_numbers = #tpu.dot_dimension_numbers<[2], [1], [1], [2], [0, 0, 0, 1, 1, 2], [0], [0]>} : vector<4x8x8xbf16>, vector<4x8x16xbf16>, vector<4x8x16xf32> -> vector<4x8x16xf32>
    "tpu.trace_stop"() : () -> ()
    %68 = vector.extract_strided_slice %35 {offsets = [0, 0, 32], sizes = [4, 8, 16], strides = [1, 1, 1]} : vector<4x8x384xbf16> to vector<4x8x16xbf16>
    %69 = vector.extract_strided_slice %35 {offsets = [0, 0, 160], sizes = [4, 8, 16], strides = [1, 1, 1]} : vector<4x8x384xbf16> to vector<4x8x16xbf16>
    %70 = vector.extract_strided_slice %35 {offsets = [0, 0, 288], sizes = [4, 8, 16], strides = [1, 1, 1]} : vector<4x8x384xbf16> to vector<4x8x16xbf16>
    "tpu.trace_start"() <{level = 10 : i32, message = "lsd,ltd->lst"}> : () -> ()
    %cst_48 = arith.constant dense<0.000000e+00> : vector<4x8x8xf32>
    %71 = tpu.matmul %68, %69, %cst_48 {dimension_numbers = #tpu.dot_dimension_numbers<[2], [2], [1], [1], [0, 0, 0, 1, 1, 1], [0], [0]>} : vector<4x8x16xbf16>, vector<4x8x16xbf16>, vector<4x8x8xf32> -> vector<4x8x8xf32>
    "tpu.trace_stop"() : () -> ()
    %cst_49 = arith.constant dense<0xFF800000> : vector<4x8xf32>
    %72 = vector.multi_reduction <maximumf>, %71, %cst_49 [2] : vector<4x8x8xf32> to vector<4x8xf32>
    %73 = vector.shape_cast %72 : vector<4x8xf32> to vector<4x8x1xf32>
    %74 = vector.broadcast %73 : vector<4x8x1xf32> to vector<4x8x8xf32>
    %75 = arith.subf %71, %74 : vector<4x8x8xf32>
    %76 = math.exp %75 : vector<4x8x8xf32>
    %cst_50 = arith.constant dense<0.000000e+00> : vector<4x8xf32>
    %77 = vector.multi_reduction <add>, %76, %cst_50 [2] : vector<4x8x8xf32> to vector<4x8xf32>
    %78 = vector.shape_cast %77 : vector<4x8xf32> to vector<4x8x1xf32>
    %79 = tpu.reciprocal %78 {approx = true} : vector<4x8x1xf32> -> vector<4x8x1xf32>
    %80 = vector.broadcast %79 : vector<4x8x1xf32> to vector<4x8x8xf32>
    %81 = arith.mulf %76, %80 : vector<4x8x8xf32>
    %82 = arith.truncf %81 : vector<4x8x8xf32> to vector<4x8x8xbf16>
    "tpu.trace_start"() <{level = 10 : i32, message = "lst,ltd->lsd"}> : () -> ()
    %cst_51 = arith.constant dense<0.000000e+00> : vector<4x8x16xf32>
    %83 = tpu.matmul %82, %70, %cst_51 {dimension_numbers = #tpu.dot_dimension_numbers<[2], [1], [1], [2], [0, 0, 0, 1, 1, 2], [0], [0]>} : vector<4x8x8xbf16>, vector<4x8x16xbf16>, vector<4x8x16xf32> -> vector<4x8x16xf32>
    "tpu.trace_stop"() : () -> ()
    %84 = vector.extract_strided_slice %35 {offsets = [0, 0, 48], sizes = [4, 8, 16], strides = [1, 1, 1]} : vector<4x8x384xbf16> to vector<4x8x16xbf16>
    %85 = vector.extract_strided_slice %35 {offsets = [0, 0, 176], sizes = [4, 8, 16], strides = [1, 1, 1]} : vector<4x8x384xbf16> to vector<4x8x16xbf16>
    %86 = vector.extract_strided_slice %35 {offsets = [0, 0, 304], sizes = [4, 8, 16], strides = [1, 1, 1]} : vector<4x8x384xbf16> to vector<4x8x16xbf16>
    "tpu.trace_start"() <{level = 10 : i32, message = "lsd,ltd->lst"}> : () -> ()
    %cst_52 = arith.constant dense<0.000000e+00> : vector<4x8x8xf32>
    %87 = tpu.matmul %84, %85, %cst_52 {dimension_numbers = #tpu.dot_dimension_numbers<[2], [2], [1], [1], [0, 0, 0, 1, 1, 1], [0], [0]>} : vector<4x8x16xbf16>, vector<4x8x16xbf16>, vector<4x8x8xf32> -> vector<4x8x8xf32>
    "tpu.trace_stop"() : () -> ()
    %cst_53 = arith.constant dense<0xFF800000> : vector<4x8xf32>
    %88 = vector.multi_reduction <maximumf>, %87, %cst_53 [2] : vector<4x8x8xf32> to vector<4x8xf32>
    %89 = vector.shape_cast %88 : vector<4x8xf32> to vector<4x8x1xf32>
    %90 = vector.broadcast %89 : vector<4x8x1xf32> to vector<4x8x8xf32>
    %91 = arith.subf %87, %90 : vector<4x8x8xf32>
    %92 = math.exp %91 : vector<4x8x8xf32>
    %cst_54 = arith.constant dense<0.000000e+00> : vector<4x8xf32>
    %93 = vector.multi_reduction <add>, %92, %cst_54 [2] : vector<4x8x8xf32> to vector<4x8xf32>
    %94 = vector.shape_cast %93 : vector<4x8xf32> to vector<4x8x1xf32>
    %95 = tpu.reciprocal %94 {approx = true} : vector<4x8x1xf32> -> vector<4x8x1xf32>
    %96 = vector.broadcast %95 : vector<4x8x1xf32> to vector<4x8x8xf32>
    %97 = arith.mulf %92, %96 : vector<4x8x8xf32>
    %98 = arith.truncf %97 : vector<4x8x8xf32> to vector<4x8x8xbf16>
    "tpu.trace_start"() <{level = 10 : i32, message = "lst,ltd->lsd"}> : () -> ()
    %cst_55 = arith.constant dense<0.000000e+00> : vector<4x8x16xf32>
    %99 = tpu.matmul %98, %86, %cst_55 {dimension_numbers = #tpu.dot_dimension_numbers<[2], [1], [1], [2], [0, 0, 0, 1, 1, 2], [0], [0]>} : vector<4x8x8xbf16>, vector<4x8x16xbf16>, vector<4x8x16xf32> -> vector<4x8x16xf32>
    "tpu.trace_stop"() : () -> ()
    %100 = vector.extract_strided_slice %35 {offsets = [0, 0, 64], sizes = [4, 8, 16], strides = [1, 1, 1]} : vector<4x8x384xbf16> to vector<4x8x16xbf16>
    %101 = vector.extract_strided_slice %35 {offsets = [0, 0, 192], sizes = [4, 8, 16], strides = [1, 1, 1]} : vector<4x8x384xbf16> to vector<4x8x16xbf16>
    %102 = vector.extract_strided_slice %35 {offsets = [0, 0, 320], sizes = [4, 8, 16], strides = [1, 1, 1]} : vector<4x8x384xbf16> to vector<4x8x16xbf16>
    "tpu.trace_start"() <{level = 10 : i32, message = "lsd,ltd->lst"}> : () -> ()
    %cst_56 = arith.constant dense<0.000000e+00> : vector<4x8x8xf32>
    %103 = tpu.matmul %100, %101, %cst_56 {dimension_numbers = #tpu.dot_dimension_numbers<[2], [2], [1], [1], [0, 0, 0, 1, 1, 1], [0], [0]>} : vector<4x8x16xbf16>, vector<4x8x16xbf16>, vector<4x8x8xf32> -> vector<4x8x8xf32>
    "tpu.trace_stop"() : () -> ()
    %cst_57 = arith.constant dense<0xFF800000> : vector<4x8xf32>
    %104 = vector.multi_reduction <maximumf>, %103, %cst_57 [2] : vector<4x8x8xf32> to vector<4x8xf32>
    %105 = vector.shape_cast %104 : vector<4x8xf32> to vector<4x8x1xf32>
    %106 = vector.broadcast %105 : vector<4x8x1xf32> to vector<4x8x8xf32>
    %107 = arith.subf %103, %106 : vector<4x8x8xf32>
    %108 = math.exp %107 : vector<4x8x8xf32>
    %cst_58 = arith.constant dense<0.000000e+00> : vector<4x8xf32>
    %109 = vector.multi_reduction <add>, %108, %cst_58 [2] : vector<4x8x8xf32> to vector<4x8xf32>
    %110 = vector.shape_cast %109 : vector<4x8xf32> to vector<4x8x1xf32>
    %111 = tpu.reciprocal %110 {approx = true} : vector<4x8x1xf32> -> vector<4x8x1xf32>
    %112 = vector.broadcast %111 : vector<4x8x1xf32> to vector<4x8x8xf32>
    %113 = arith.mulf %108, %112 : vector<4x8x8xf32>
    %114 = arith.truncf %113 : vector<4x8x8xf32> to vector<4x8x8xbf16>
    "tpu.trace_start"() <{level = 10 : i32, message = "lst,ltd->lsd"}> : () -> ()
    %cst_59 = arith.constant dense<0.000000e+00> : vector<4x8x16xf32>
    %115 = tpu.matmul %114, %102, %cst_59 {dimension_numbers = #tpu.dot_dimension_numbers<[2], [1], [1], [2], [0, 0, 0, 1, 1, 2], [0], [0]>} : vector<4x8x8xbf16>, vector<4x8x16xbf16>, vector<4x8x16xf32> -> vector<4x8x16xf32>
    "tpu.trace_stop"() : () -> ()
    %116 = vector.extract_strided_slice %35 {offsets = [0, 0, 80], sizes = [4, 8, 16], strides = [1, 1, 1]} : vector<4x8x384xbf16> to vector<4x8x16xbf16>
    %117 = vector.extract_strided_slice %35 {offsets = [0, 0, 208], sizes = [4, 8, 16], strides = [1, 1, 1]} : vector<4x8x384xbf16> to vector<4x8x16xbf16>
    %118 = vector.extract_strided_slice %35 {offsets = [0, 0, 336], sizes = [4, 8, 16], strides = [1, 1, 1]} : vector<4x8x384xbf16> to vector<4x8x16xbf16>
    "tpu.trace_start"() <{level = 10 : i32, message = "lsd,ltd->lst"}> : () -> ()
    %cst_60 = arith.constant dense<0.000000e+00> : vector<4x8x8xf32>
    %119 = tpu.matmul %116, %117, %cst_60 {dimension_numbers = #tpu.dot_dimension_numbers<[2], [2], [1], [1], [0, 0, 0, 1, 1, 1], [0], [0]>} : vector<4x8x16xbf16>, vector<4x8x16xbf16>, vector<4x8x8xf32> -> vector<4x8x8xf32>
    "tpu.trace_stop"() : () -> ()
    %cst_61 = arith.constant dense<0xFF800000> : vector<4x8xf32>
    %120 = vector.multi_reduction <maximumf>, %119, %cst_61 [2] : vector<4x8x8xf32> to vector<4x8xf32>
    %121 = vector.shape_cast %120 : vector<4x8xf32> to vector<4x8x1xf32>
    %122 = vector.broadcast %121 : vector<4x8x1xf32> to vector<4x8x8xf32>
    %123 = arith.subf %119, %122 : vector<4x8x8xf32>
    %124 = math.exp %123 : vector<4x8x8xf32>
    %cst_62 = arith.constant dense<0.000000e+00> : vector<4x8xf32>
    %125 = vector.multi_reduction <add>, %124, %cst_62 [2] : vector<4x8x8xf32> to vector<4x8xf32>
    %126 = vector.shape_cast %125 : vector<4x8xf32> to vector<4x8x1xf32>
    %127 = tpu.reciprocal %126 {approx = true} : vector<4x8x1xf32> -> vector<4x8x1xf32>
    %128 = vector.broadcast %127 : vector<4x8x1xf32> to vector<4x8x8xf32>
    %129 = arith.mulf %124, %128 : vector<4x8x8xf32>
    %130 = arith.truncf %129 : vector<4x8x8xf32> to vector<4x8x8xbf16>
    "tpu.trace_start"() <{level = 10 : i32, message = "lst,ltd->lsd"}> : () -> ()
    %cst_63 = arith.constant dense<0.000000e+00> : vector<4x8x16xf32>
    %131 = tpu.matmul %130, %118, %cst_63 {dimension_numbers = #tpu.dot_dimension_numbers<[2], [1], [1], [2], [0, 0, 0, 1, 1, 2], [0], [0]>} : vector<4x8x8xbf16>, vector<4x8x16xbf16>, vector<4x8x16xf32> -> vector<4x8x16xf32>
    "tpu.trace_stop"() : () -> ()
    %132 = vector.extract_strided_slice %35 {offsets = [0, 0, 96], sizes = [4, 8, 16], strides = [1, 1, 1]} : vector<4x8x384xbf16> to vector<4x8x16xbf16>
    %133 = vector.extract_strided_slice %35 {offsets = [0, 0, 224], sizes = [4, 8, 16], strides = [1, 1, 1]} : vector<4x8x384xbf16> to vector<4x8x16xbf16>
    %134 = vector.extract_strided_slice %35 {offsets = [0, 0, 352], sizes = [4, 8, 16], strides = [1, 1, 1]} : vector<4x8x384xbf16> to vector<4x8x16xbf16>
    "tpu.trace_start"() <{level = 10 : i32, message = "lsd,ltd->lst"}> : () -> ()
    %cst_64 = arith.constant dense<0.000000e+00> : vector<4x8x8xf32>
    %135 = tpu.matmul %132, %133, %cst_64 {dimension_numbers = #tpu.dot_dimension_numbers<[2], [2], [1], [1], [0, 0, 0, 1, 1, 1], [0], [0]>} : vector<4x8x16xbf16>, vector<4x8x16xbf16>, vector<4x8x8xf32> -> vector<4x8x8xf32>
    "tpu.trace_stop"() : () -> ()
    %cst_65 = arith.constant dense<0xFF800000> : vector<4x8xf32>
    %136 = vector.multi_reduction <maximumf>, %135, %cst_65 [2] : vector<4x8x8xf32> to vector<4x8xf32>
    %137 = vector.shape_cast %136 : vector<4x8xf32> to vector<4x8x1xf32>
    %138 = vector.broadcast %137 : vector<4x8x1xf32> to vector<4x8x8xf32>
    %139 = arith.subf %135, %138 : vector<4x8x8xf32>
    %140 = math.exp %139 : vector<4x8x8xf32>
    %cst_66 = arith.constant dense<0.000000e+00> : vector<4x8xf32>
    %141 = vector.multi_reduction <add>, %140, %cst_66 [2] : vector<4x8x8xf32> to vector<4x8xf32>
    %142 = vector.shape_cast %141 : vector<4x8xf32> to vector<4x8x1xf32>
    %143 = tpu.reciprocal %142 {approx = true} : vector<4x8x1xf32> -> vector<4x8x1xf32>
    %144 = vector.broadcast %143 : vector<4x8x1xf32> to vector<4x8x8xf32>
    %145 = arith.mulf %140, %144 : vector<4x8x8xf32>
    %146 = arith.truncf %145 : vector<4x8x8xf32> to vector<4x8x8xbf16>
    "tpu.trace_start"() <{level = 10 : i32, message = "lst,ltd->lsd"}> : () -> ()
    %cst_67 = arith.constant dense<0.000000e+00> : vector<4x8x16xf32>
    %147 = tpu.matmul %146, %134, %cst_67 {dimension_numbers = #tpu.dot_dimension_numbers<[2], [1], [1], [2], [0, 0, 0, 1, 1, 2], [0], [0]>} : vector<4x8x8xbf16>, vector<4x8x16xbf16>, vector<4x8x16xf32> -> vector<4x8x16xf32>
    "tpu.trace_stop"() : () -> ()
    %148 = vector.extract_strided_slice %35 {offsets = [0, 0, 112], sizes = [4, 8, 16], strides = [1, 1, 1]} : vector<4x8x384xbf16> to vector<4x8x16xbf16>
    %149 = vector.extract_strided_slice %35 {offsets = [0, 0, 240], sizes = [4, 8, 16], strides = [1, 1, 1]} : vector<4x8x384xbf16> to vector<4x8x16xbf16>
    %150 = vector.extract_strided_slice %35 {offsets = [0, 0, 368], sizes = [4, 8, 16], strides = [1, 1, 1]} : vector<4x8x384xbf16> to vector<4x8x16xbf16>
    "tpu.trace_start"() <{level = 10 : i32, message = "lsd,ltd->lst"}> : () -> ()
    %cst_68 = arith.constant dense<0.000000e+00> : vector<4x8x8xf32>
    %151 = tpu.matmul %148, %149, %cst_68 {dimension_numbers = #tpu.dot_dimension_numbers<[2], [2], [1], [1], [0, 0, 0, 1, 1, 1], [0], [0]>} : vector<4x8x16xbf16>, vector<4x8x16xbf16>, vector<4x8x8xf32> -> vector<4x8x8xf32>
    "tpu.trace_stop"() : () -> ()
    %cst_69 = arith.constant dense<0xFF800000> : vector<4x8xf32>
    %152 = vector.multi_reduction <maximumf>, %151, %cst_69 [2] : vector<4x8x8xf32> to vector<4x8xf32>
    %153 = vector.shape_cast %152 : vector<4x8xf32> to vector<4x8x1xf32>
    %154 = vector.broadcast %153 : vector<4x8x1xf32> to vector<4x8x8xf32>
    %155 = arith.subf %151, %154 : vector<4x8x8xf32>
    %156 = math.exp %155 : vector<4x8x8xf32>
    %cst_70 = arith.constant dense<0.000000e+00> : vector<4x8xf32>
    %157 = vector.multi_reduction <add>, %156, %cst_70 [2] : vector<4x8x8xf32> to vector<4x8xf32>
    %158 = vector.shape_cast %157 : vector<4x8xf32> to vector<4x8x1xf32>
    %159 = tpu.reciprocal %158 {approx = true} : vector<4x8x1xf32> -> vector<4x8x1xf32>
    %160 = vector.broadcast %159 : vector<4x8x1xf32> to vector<4x8x8xf32>
    %161 = arith.mulf %156, %160 : vector<4x8x8xf32>
    %162 = arith.truncf %161 : vector<4x8x8xf32> to vector<4x8x8xbf16>
    "tpu.trace_start"() <{level = 10 : i32, message = "lst,ltd->lsd"}> : () -> ()
    %cst_71 = arith.constant dense<0.000000e+00> : vector<4x8x16xf32>
    %163 = tpu.matmul %162, %150, %cst_71 {dimension_numbers = #tpu.dot_dimension_numbers<[2], [1], [1], [2], [0, 0, 0, 1, 1, 2], [0], [0]>} : vector<4x8x8xbf16>, vector<4x8x16xbf16>, vector<4x8x16xf32> -> vector<4x8x16xf32>
    "tpu.trace_stop"() : () -> ()
    %164 = tpu.concatenate %51, %67, %83, %99, %115, %131, %147, %163 in 2 : vector<4x8x16xf32>, vector<4x8x16xf32>, vector<4x8x16xf32>, vector<4x8x16xf32>, vector<4x8x16xf32>, vector<4x8x16xf32>, vector<4x8x16xf32>, vector<4x8x16xf32> -> vector<4x8x128xf32>
    %165 = vector.shape_cast %164 : vector<4x8x128xf32> to vector<32x128xf32>
    %166 = arith.truncf %165 : vector<32x128xf32> to vector<32x128xbf16>
    %cst_72 = arith.constant dense<0.000000e+00> : vector<32x128xf32>
    %167 = tpu.matmul %166, %11, %cst_72 {dimension_numbers = #tpu.dot_dimension_numbers<[1], [0], [0], [1], [0, 0, 1, 1], [], []>} : vector<32x128xbf16>, vector<128x128xbf16>, vector<32x128xf32> -> vector<32x128xf32>
    %168 = vector.broadcast %13 : vector<1x128xf32> to vector<32x128xf32>
    %169 = arith.addf %167, %168 : vector<32x128xf32>
    %170 = arith.addf %5, %169 : vector<32x128xf32>
    %cst_73 = arith.constant dense<0.000000e+00> : vector<32xf32>
    %171 = vector.multi_reduction <add>, %170, %cst_73 [1] : vector<32x128xf32> to vector<32xf32>
    %172 = vector.shape_cast %171 : vector<32xf32> to vector<32x1xf32>
    %cst_74 = arith.constant 1.280000e+02 : f32
    %173 = vector.broadcast %cst_74 : f32 to vector<32x1xf32>
    %174 = arith.divf %172, %173 : vector<32x1xf32>
    %175 = arith.mulf %170, %170 : vector<32x128xf32>
    %cst_75 = arith.constant dense<0.000000e+00> : vector<32xf32>
    %176 = vector.multi_reduction <add>, %175, %cst_75 [1] : vector<32x128xf32> to vector<32xf32>
    %177 = vector.shape_cast %176 : vector<32xf32> to vector<32x1xf32>
    %cst_76 = arith.constant 1.280000e+02 : f32
    %178 = vector.broadcast %cst_76 : f32 to vector<32x1xf32>
    %179 = arith.divf %177, %178 : vector<32x1xf32>
    %180 = arith.mulf %174, %174 : vector<32x1xf32>
    %181 = arith.subf %179, %180 : vector<32x1xf32>
    %182 = vector.broadcast %174 : vector<32x1xf32> to vector<32x128xf32>
    %183 = arith.subf %170, %182 : vector<32x128xf32>
    %cst_77 = arith.constant 9.99999974E-6 : f32
    %184 = vector.broadcast %cst_77 : f32 to vector<32x1xf32>
    %185 = arith.addf %181, %184 : vector<32x1xf32>
    %186 = math.rsqrt %185 : vector<32x1xf32>
    %187 = vector.broadcast %186 : vector<32x1xf32> to vector<32x128xf32>
    %188 = arith.mulf %183, %187 : vector<32x128xf32>
    %189 = vector.broadcast %15 : vector<1x128xf32> to vector<32x128xf32>
    %190 = arith.mulf %188, %189 : vector<32x128xf32>
    %191 = vector.broadcast %17 : vector<1x128xf32> to vector<32x128xf32>
    %192 = arith.addf %190, %191 : vector<32x128xf32>
    %193 = arith.truncf %192 : vector<32x128xf32> to vector<32x128xbf16>
    %cst_78 = arith.constant dense<0.000000e+00> : vector<32x256xf32>
    %194 = tpu.matmul %193, %19, %cst_78 {dimension_numbers = #tpu.dot_dimension_numbers<[1], [0], [0], [1], [0, 0, 1, 1], [], []>} : vector<32x128xbf16>, vector<128x256xbf16>, vector<32x256xf32> -> vector<32x256xf32>
    %195 = vector.broadcast %21 : vector<1x256xf32> to vector<32x256xf32>
    %196 = arith.addf %194, %195 : vector<32x256xf32>
    %cst_79 = arith.constant 0.000000e+00 : f32
    %197 = vector.broadcast %cst_79 : f32 to vector<32x256xf32>
    %198 = arith.maximumf %196, %197 : vector<32x256xf32>
    %199 = arith.truncf %198 : vector<32x256xf32> to vector<32x256xbf16>
    %cst_80 = arith.constant dense<0.000000e+00> : vector<32x128xf32>
    %200 = tpu.matmul %199, %23, %cst_80 {dimension_numbers = #tpu.dot_dimension_numbers<[1], [0], [0], [1], [0, 0, 1, 1], [], []>} : vector<32x256xbf16>, vector<256x128xbf16>, vector<32x128xf32> -> vector<32x128xf32>
    %201 = vector.broadcast %25 : vector<1x128xf32> to vector<32x128xf32>
    %202 = arith.addf %200, %201 : vector<32x128xf32>
    %203 = arith.addf %192, %202 : vector<32x128xf32>
    %cst_81 = arith.constant dense<0.000000e+00> : vector<32xf32>
    %204 = vector.multi_reduction <add>, %203, %cst_81 [1] : vector<32x128xf32> to vector<32xf32>
    %205 = vector.shape_cast %204 : vector<32xf32> to vector<32x1xf32>
    %cst_82 = arith.constant 1.280000e+02 : f32
    %206 = vector.broadcast %cst_82 : f32 to vector<32x1xf32>
    %207 = arith.divf %205, %206 : vector<32x1xf32>
    %208 = arith.mulf %203, %203 : vector<32x128xf32>
    %cst_83 = arith.constant dense<0.000000e+00> : vector<32xf32>
    %209 = vector.multi_reduction <add>, %208, %cst_83 [1] : vector<32x128xf32> to vector<32xf32>
    %210 = vector.shape_cast %209 : vector<32xf32> to vector<32x1xf32>
    %cst_84 = arith.constant 1.280000e+02 : f32
    %211 = vector.broadcast %cst_84 : f32 to vector<32x1xf32>
    %212 = arith.divf %210, %211 : vector<32x1xf32>
    %213 = arith.mulf %207, %207 : vector<32x1xf32>
    %214 = arith.subf %212, %213 : vector<32x1xf32>
    %215 = vector.broadcast %207 : vector<32x1xf32> to vector<32x128xf32>
    %216 = arith.subf %203, %215 : vector<32x128xf32>
    %cst_85 = arith.constant 9.99999974E-6 : f32
    %217 = vector.broadcast %cst_85 : f32 to vector<32x1xf32>
    %218 = arith.addf %214, %217 : vector<32x1xf32>
    %219 = math.rsqrt %218 : vector<32x1xf32>
    %220 = vector.broadcast %219 : vector<32x1xf32> to vector<32x128xf32>
    %221 = arith.mulf %216, %220 : vector<32x128xf32>
    %222 = vector.broadcast %27 : vector<1x128xf32> to vector<32x128xf32>
    %223 = arith.mulf %221, %222 : vector<32x128xf32>
    %224 = vector.broadcast %29 : vector<1x128xf32> to vector<32x128xf32>
    %225 = arith.addf %223, %224 : vector<32x128xf32>
    %c1 = arith.constant 1 : index
    %c0_86 = arith.constant 0 : index
    %c0_87 = arith.constant 0 : index
    %226 = vector.load %arg2[%c1, %c0_86, %c0_87] : memref<3x128x384xbf16, #tpu.memory_space<vmem>>, vector<1x128x384xbf16>
    %227 = vector.shape_cast %226 : vector<1x128x384xbf16> to vector<128x384xbf16>
    %c1_88 = arith.constant 1 : index
    %c0_89 = arith.constant 0 : index
    %c0_90 = arith.constant 0 : index
    %228 = vector.load %arg3[%c1_88, %c0_89, %c0_90] : memref<3x1x384xf32, #tpu.memory_space<vmem>>, vector<1x1x384xf32>
    %229 = vector.shape_cast %228 : vector<1x1x384xf32> to vector<1x384xf32>
    %c1_91 = arith.constant 1 : index
    %c0_92 = arith.constant 0 : index
    %c0_93 = arith.constant 0 : index
    %230 = vector.load %arg4[%c1_91, %c0_92, %c0_93] : memref<3x128x128xbf16, #tpu.memory_space<vmem>>, vector<1x128x128xbf16>
    %231 = vector.shape_cast %230 : vector<1x128x128xbf16> to vector<128x128xbf16>
    %c1_94 = arith.constant 1 : index
    %c0_95 = arith.constant 0 : index
    %c0_96 = arith.constant 0 : index
    %232 = vector.load %arg5[%c1_94, %c0_95, %c0_96] : memref<3x1x128xf32, #tpu.memory_space<vmem>>, vector<1x1x128xf32>
    %233 = vector.shape_cast %232 : vector<1x1x128xf32> to vector<1x128xf32>
    %c1_97 = arith.constant 1 : index
    %c0_98 = arith.constant 0 : index
    %c0_99 = arith.constant 0 : index
    %234 = vector.load %arg6[%c1_97, %c0_98, %c0_99] : memref<3x1x128xf32, #tpu.memory_space<vmem>>, vector<1x1x128xf32>
    %235 = vector.shape_cast %234 : vector<1x1x128xf32> to vector<1x128xf32>
    %c1_100 = arith.constant 1 : index
    %c0_101 = arith.constant 0 : index
    %c0_102 = arith.constant 0 : index
    %236 = vector.load %arg7[%c1_100, %c0_101, %c0_102] : memref<3x1x128xf32, #tpu.memory_space<vmem>>, vector<1x1x128xf32>
    %237 = vector.shape_cast %236 : vector<1x1x128xf32> to vector<1x128xf32>
    %c1_103 = arith.constant 1 : index
    %c0_104 = arith.constant 0 : index
    %c0_105 = arith.constant 0 : index
    %238 = vector.load %arg8[%c1_103, %c0_104, %c0_105] : memref<3x128x256xbf16, #tpu.memory_space<vmem>>, vector<1x128x256xbf16>
    %239 = vector.shape_cast %238 : vector<1x128x256xbf16> to vector<128x256xbf16>
    %c1_106 = arith.constant 1 : index
    %c0_107 = arith.constant 0 : index
    %c0_108 = arith.constant 0 : index
    %240 = vector.load %arg9[%c1_106, %c0_107, %c0_108] : memref<3x1x256xf32, #tpu.memory_space<vmem>>, vector<1x1x256xf32>
    %241 = vector.shape_cast %240 : vector<1x1x256xf32> to vector<1x256xf32>
    %c1_109 = arith.constant 1 : index
    %c0_110 = arith.constant 0 : index
    %c0_111 = arith.constant 0 : index
    %242 = vector.load %arg10[%c1_109, %c0_110, %c0_111] : memref<3x256x128xbf16, #tpu.memory_space<vmem>>, vector<1x256x128xbf16>
    %243 = vector.shape_cast %242 : vector<1x256x128xbf16> to vector<256x128xbf16>
    %c1_112 = arith.constant 1 : index
    %c0_113 = arith.constant 0 : index
    %c0_114 = arith.constant 0 : index
    %244 = vector.load %arg11[%c1_112, %c0_113, %c0_114] : memref<3x1x128xf32, #tpu.memory_space<vmem>>, vector<1x1x128xf32>
    %245 = vector.shape_cast %244 : vector<1x1x128xf32> to vector<1x128xf32>
    %c1_115 = arith.constant 1 : index
    %c0_116 = arith.constant 0 : index
    %c0_117 = arith.constant 0 : index
    %246 = vector.load %arg12[%c1_115, %c0_116, %c0_117] : memref<3x1x128xf32, #tpu.memory_space<vmem>>, vector<1x1x128xf32>
    %247 = vector.shape_cast %246 : vector<1x1x128xf32> to vector<1x128xf32>
    %c1_118 = arith.constant 1 : index
    %c0_119 = arith.constant 0 : index
    %c0_120 = arith.constant 0 : index
    %248 = vector.load %arg13[%c1_118, %c0_119, %c0_120] : memref<3x1x128xf32, #tpu.memory_space<vmem>>, vector<1x1x128xf32>
    %249 = vector.shape_cast %248 : vector<1x1x128xf32> to vector<1x128xf32>
    %250 = arith.truncf %225 : vector<32x128xf32> to vector<32x128xbf16>
    %cst_121 = arith.constant dense<0.000000e+00> : vector<32x384xf32>
    %251 = tpu.matmul %250, %227, %cst_121 {dimension_numbers = #tpu.dot_dimension_numbers<[1], [0], [0], [1], [0, 0, 1, 1], [], []>} : vector<32x128xbf16>, vector<128x384xbf16>, vector<32x384xf32> -> vector<32x384xf32>
    %252 = vector.broadcast %229 : vector<1x384xf32> to vector<32x384xf32>
    %253 = arith.addf %251, %252 : vector<32x384xf32>
    %254 = vector.shape_cast %253 : vector<32x384xf32> to vector<4x8x384xf32>
    %255 = arith.truncf %254 : vector<4x8x384xf32> to vector<4x8x384xbf16>
    %256 = vector.extract_strided_slice %255 {offsets = [0, 0, 0], sizes = [4, 8, 16], strides = [1, 1, 1]} : vector<4x8x384xbf16> to vector<4x8x16xbf16>
    %257 = vector.extract_strided_slice %255 {offsets = [0, 0, 128], sizes = [4, 8, 16], strides = [1, 1, 1]} : vector<4x8x384xbf16> to vector<4x8x16xbf16>
    %258 = vector.extract_strided_slice %255 {offsets = [0, 0, 256], sizes = [4, 8, 16], strides = [1, 1, 1]} : vector<4x8x384xbf16> to vector<4x8x16xbf16>
    "tpu.trace_start"() <{level = 10 : i32, message = "lsd,ltd->lst"}> : () -> ()
    %cst_122 = arith.constant dense<0.000000e+00> : vector<4x8x8xf32>
    %259 = tpu.matmul %256, %257, %cst_122 {dimension_numbers = #tpu.dot_dimension_numbers<[2], [2], [1], [1], [0, 0, 0, 1, 1, 1], [0], [0]>} : vector<4x8x16xbf16>, vector<4x8x16xbf16>, vector<4x8x8xf32> -> vector<4x8x8xf32>
    "tpu.trace_stop"() : () -> ()
    %cst_123 = arith.constant dense<0xFF800000> : vector<4x8xf32>
    %260 = vector.multi_reduction <maximumf>, %259, %cst_123 [2] : vector<4x8x8xf32> to vector<4x8xf32>
    %261 = vector.shape_cast %260 : vector<4x8xf32> to vector<4x8x1xf32>
    %262 = vector.broadcast %261 : vector<4x8x1xf32> to vector<4x8x8xf32>
    %263 = arith.subf %259, %262 : vector<4x8x8xf32>
    %264 = math.exp %263 : vector<4x8x8xf32>
    %cst_124 = arith.constant dense<0.000000e+00> : vector<4x8xf32>
    %265 = vector.multi_reduction <add>, %264, %cst_124 [2] : vector<4x8x8xf32> to vector<4x8xf32>
    %266 = vector.shape_cast %265 : vector<4x8xf32> to vector<4x8x1xf32>
    %267 = tpu.reciprocal %266 {approx = true} : vector<4x8x1xf32> -> vector<4x8x1xf32>
    %268 = vector.broadcast %267 : vector<4x8x1xf32> to vector<4x8x8xf32>
    %269 = arith.mulf %264, %268 : vector<4x8x8xf32>
    %270 = arith.truncf %269 : vector<4x8x8xf32> to vector<4x8x8xbf16>
    "tpu.trace_start"() <{level = 10 : i32, message = "lst,ltd->lsd"}> : () -> ()
    %cst_125 = arith.constant dense<0.000000e+00> : vector<4x8x16xf32>
    %271 = tpu.matmul %270, %258, %cst_125 {dimension_numbers = #tpu.dot_dimension_numbers<[2], [1], [1], [2], [0, 0, 0, 1, 1, 2], [0], [0]>} : vector<4x8x8xbf16>, vector<4x8x16xbf16>, vector<4x8x16xf32> -> vector<4x8x16xf32>
    "tpu.trace_stop"() : () -> ()
    %272 = vector.extract_strided_slice %255 {offsets = [0, 0, 16], sizes = [4, 8, 16], strides = [1, 1, 1]} : vector<4x8x384xbf16> to vector<4x8x16xbf16>
    %273 = vector.extract_strided_slice %255 {offsets = [0, 0, 144], sizes = [4, 8, 16], strides = [1, 1, 1]} : vector<4x8x384xbf16> to vector<4x8x16xbf16>
    %274 = vector.extract_strided_slice %255 {offsets = [0, 0, 272], sizes = [4, 8, 16], strides = [1, 1, 1]} : vector<4x8x384xbf16> to vector<4x8x16xbf16>
    "tpu.trace_start"() <{level = 10 : i32, message = "lsd,ltd->lst"}> : () -> ()
    %cst_126 = arith.constant dense<0.000000e+00> : vector<4x8x8xf32>
    %275 = tpu.matmul %272, %273, %cst_126 {dimension_numbers = #tpu.dot_dimension_numbers<[2], [2], [1], [1], [0, 0, 0, 1, 1, 1], [0], [0]>} : vector<4x8x16xbf16>, vector<4x8x16xbf16>, vector<4x8x8xf32> -> vector<4x8x8xf32>
    "tpu.trace_stop"() : () -> ()
    %cst_127 = arith.constant dense<0xFF800000> : vector<4x8xf32>
    %276 = vector.multi_reduction <maximumf>, %275, %cst_127 [2] : vector<4x8x8xf32> to vector<4x8xf32>
    %277 = vector.shape_cast %276 : vector<4x8xf32> to vector<4x8x1xf32>
    %278 = vector.broadcast %277 : vector<4x8x1xf32> to vector<4x8x8xf32>
    %279 = arith.subf %275, %278 : vector<4x8x8xf32>
    %280 = math.exp %279 : vector<4x8x8xf32>
    %cst_128 = arith.constant dense<0.000000e+00> : vector<4x8xf32>
    %281 = vector.multi_reduction <add>, %280, %cst_128 [2] : vector<4x8x8xf32> to vector<4x8xf32>
    %282 = vector.shape_cast %281 : vector<4x8xf32> to vector<4x8x1xf32>
    %283 = tpu.reciprocal %282 {approx = true} : vector<4x8x1xf32> -> vector<4x8x1xf32>
    %284 = vector.broadcast %283 : vector<4x8x1xf32> to vector<4x8x8xf32>
    %285 = arith.mulf %280, %284 : vector<4x8x8xf32>
    %286 = arith.truncf %285 : vector<4x8x8xf32> to vector<4x8x8xbf16>
    "tpu.trace_start"() <{level = 10 : i32, message = "lst,ltd->lsd"}> : () -> ()
    %cst_129 = arith.constant dense<0.000000e+00> : vector<4x8x16xf32>
    %287 = tpu.matmul %286, %274, %cst_129 {dimension_numbers = #tpu.dot_dimension_numbers<[2], [1], [1], [2], [0, 0, 0, 1, 1, 2], [0], [0]>} : vector<4x8x8xbf16>, vector<4x8x16xbf16>, vector<4x8x16xf32> -> vector<4x8x16xf32>
    "tpu.trace_stop"() : () -> ()
    %288 = vector.extract_strided_slice %255 {offsets = [0, 0, 32], sizes = [4, 8, 16], strides = [1, 1, 1]} : vector<4x8x384xbf16> to vector<4x8x16xbf16>
    %289 = vector.extract_strided_slice %255 {offsets = [0, 0, 160], sizes = [4, 8, 16], strides = [1, 1, 1]} : vector<4x8x384xbf16> to vector<4x8x16xbf16>
    %290 = vector.extract_strided_slice %255 {offsets = [0, 0, 288], sizes = [4, 8, 16], strides = [1, 1, 1]} : vector<4x8x384xbf16> to vector<4x8x16xbf16>
    "tpu.trace_start"() <{level = 10 : i32, message = "lsd,ltd->lst"}> : () -> ()
    %cst_130 = arith.constant dense<0.000000e+00> : vector<4x8x8xf32>
    %291 = tpu.matmul %288, %289, %cst_130 {dimension_numbers = #tpu.dot_dimension_numbers<[2], [2], [1], [1], [0, 0, 0, 1, 1, 1], [0], [0]>} : vector<4x8x16xbf16>, vector<4x8x16xbf16>, vector<4x8x8xf32> -> vector<4x8x8xf32>
    "tpu.trace_stop"() : () -> ()
    %cst_131 = arith.constant dense<0xFF800000> : vector<4x8xf32>
    %292 = vector.multi_reduction <maximumf>, %291, %cst_131 [2] : vector<4x8x8xf32> to vector<4x8xf32>
    %293 = vector.shape_cast %292 : vector<4x8xf32> to vector<4x8x1xf32>
    %294 = vector.broadcast %293 : vector<4x8x1xf32> to vector<4x8x8xf32>
    %295 = arith.subf %291, %294 : vector<4x8x8xf32>
    %296 = math.exp %295 : vector<4x8x8xf32>
    %cst_132 = arith.constant dense<0.000000e+00> : vector<4x8xf32>
    %297 = vector.multi_reduction <add>, %296, %cst_132 [2] : vector<4x8x8xf32> to vector<4x8xf32>
    %298 = vector.shape_cast %297 : vector<4x8xf32> to vector<4x8x1xf32>
    %299 = tpu.reciprocal %298 {approx = true} : vector<4x8x1xf32> -> vector<4x8x1xf32>
    %300 = vector.broadcast %299 : vector<4x8x1xf32> to vector<4x8x8xf32>
    %301 = arith.mulf %296, %300 : vector<4x8x8xf32>
    %302 = arith.truncf %301 : vector<4x8x8xf32> to vector<4x8x8xbf16>
    "tpu.trace_start"() <{level = 10 : i32, message = "lst,ltd->lsd"}> : () -> ()
    %cst_133 = arith.constant dense<0.000000e+00> : vector<4x8x16xf32>
    %303 = tpu.matmul %302, %290, %cst_133 {dimension_numbers = #tpu.dot_dimension_numbers<[2], [1], [1], [2], [0, 0, 0, 1, 1, 2], [0], [0]>} : vector<4x8x8xbf16>, vector<4x8x16xbf16>, vector<4x8x16xf32> -> vector<4x8x16xf32>
    "tpu.trace_stop"() : () -> ()
    %304 = vector.extract_strided_slice %255 {offsets = [0, 0, 48], sizes = [4, 8, 16], strides = [1, 1, 1]} : vector<4x8x384xbf16> to vector<4x8x16xbf16>
    %305 = vector.extract_strided_slice %255 {offsets = [0, 0, 176], sizes = [4, 8, 16], strides = [1, 1, 1]} : vector<4x8x384xbf16> to vector<4x8x16xbf16>
    %306 = vector.extract_strided_slice %255 {offsets = [0, 0, 304], sizes = [4, 8, 16], strides = [1, 1, 1]} : vector<4x8x384xbf16> to vector<4x8x16xbf16>
    "tpu.trace_start"() <{level = 10 : i32, message = "lsd,ltd->lst"}> : () -> ()
    %cst_134 = arith.constant dense<0.000000e+00> : vector<4x8x8xf32>
    %307 = tpu.matmul %304, %305, %cst_134 {dimension_numbers = #tpu.dot_dimension_numbers<[2], [2], [1], [1], [0, 0, 0, 1, 1, 1], [0], [0]>} : vector<4x8x16xbf16>, vector<4x8x16xbf16>, vector<4x8x8xf32> -> vector<4x8x8xf32>
    "tpu.trace_stop"() : () -> ()
    %cst_135 = arith.constant dense<0xFF800000> : vector<4x8xf32>
    %308 = vector.multi_reduction <maximumf>, %307, %cst_135 [2] : vector<4x8x8xf32> to vector<4x8xf32>
    %309 = vector.shape_cast %308 : vector<4x8xf32> to vector<4x8x1xf32>
    %310 = vector.broadcast %309 : vector<4x8x1xf32> to vector<4x8x8xf32>
    %311 = arith.subf %307, %310 : vector<4x8x8xf32>
    %312 = math.exp %311 : vector<4x8x8xf32>
    %cst_136 = arith.constant dense<0.000000e+00> : vector<4x8xf32>
    %313 = vector.multi_reduction <add>, %312, %cst_136 [2] : vector<4x8x8xf32> to vector<4x8xf32>
    %314 = vector.shape_cast %313 : vector<4x8xf32> to vector<4x8x1xf32>
    %315 = tpu.reciprocal %314 {approx = true} : vector<4x8x1xf32> -> vector<4x8x1xf32>
    %316 = vector.broadcast %315 : vector<4x8x1xf32> to vector<4x8x8xf32>
    %317 = arith.mulf %312, %316 : vector<4x8x8xf32>
    %318 = arith.truncf %317 : vector<4x8x8xf32> to vector<4x8x8xbf16>
    "tpu.trace_start"() <{level = 10 : i32, message = "lst,ltd->lsd"}> : () -> ()
    %cst_137 = arith.constant dense<0.000000e+00> : vector<4x8x16xf32>
    %319 = tpu.matmul %318, %306, %cst_137 {dimension_numbers = #tpu.dot_dimension_numbers<[2], [1], [1], [2], [0, 0, 0, 1, 1, 2], [0], [0]>} : vector<4x8x8xbf16>, vector<4x8x16xbf16>, vector<4x8x16xf32> -> vector<4x8x16xf32>
    "tpu.trace_stop"() : () -> ()
    %320 = vector.extract_strided_slice %255 {offsets = [0, 0, 64], sizes = [4, 8, 16], strides = [1, 1, 1]} : vector<4x8x384xbf16> to vector<4x8x16xbf16>
    %321 = vector.extract_strided_slice %255 {offsets = [0, 0, 192], sizes = [4, 8, 16], strides = [1, 1, 1]} : vector<4x8x384xbf16> to vector<4x8x16xbf16>
    %322 = vector.extract_strided_slice %255 {offsets = [0, 0, 320], sizes = [4, 8, 16], strides = [1, 1, 1]} : vector<4x8x384xbf16> to vector<4x8x16xbf16>
    "tpu.trace_start"() <{level = 10 : i32, message = "lsd,ltd->lst"}> : () -> ()
    %cst_138 = arith.constant dense<0.000000e+00> : vector<4x8x8xf32>
    %323 = tpu.matmul %320, %321, %cst_138 {dimension_numbers = #tpu.dot_dimension_numbers<[2], [2], [1], [1], [0, 0, 0, 1, 1, 1], [0], [0]>} : vector<4x8x16xbf16>, vector<4x8x16xbf16>, vector<4x8x8xf32> -> vector<4x8x8xf32>
    "tpu.trace_stop"() : () -> ()
    %cst_139 = arith.constant dense<0xFF800000> : vector<4x8xf32>
    %324 = vector.multi_reduction <maximumf>, %323, %cst_139 [2] : vector<4x8x8xf32> to vector<4x8xf32>
    %325 = vector.shape_cast %324 : vector<4x8xf32> to vector<4x8x1xf32>
    %326 = vector.broadcast %325 : vector<4x8x1xf32> to vector<4x8x8xf32>
    %327 = arith.subf %323, %326 : vector<4x8x8xf32>
    %328 = math.exp %327 : vector<4x8x8xf32>
    %cst_140 = arith.constant dense<0.000000e+00> : vector<4x8xf32>
    %329 = vector.multi_reduction <add>, %328, %cst_140 [2] : vector<4x8x8xf32> to vector<4x8xf32>
    %330 = vector.shape_cast %329 : vector<4x8xf32> to vector<4x8x1xf32>
    %331 = tpu.reciprocal %330 {approx = true} : vector<4x8x1xf32> -> vector<4x8x1xf32>
    %332 = vector.broadcast %331 : vector<4x8x1xf32> to vector<4x8x8xf32>
    %333 = arith.mulf %328, %332 : vector<4x8x8xf32>
    %334 = arith.truncf %333 : vector<4x8x8xf32> to vector<4x8x8xbf16>
    "tpu.trace_start"() <{level = 10 : i32, message = "lst,ltd->lsd"}> : () -> ()
    %cst_141 = arith.constant dense<0.000000e+00> : vector<4x8x16xf32>
    %335 = tpu.matmul %334, %322, %cst_141 {dimension_numbers = #tpu.dot_dimension_numbers<[2], [1], [1], [2], [0, 0, 0, 1, 1, 2], [0], [0]>} : vector<4x8x8xbf16>, vector<4x8x16xbf16>, vector<4x8x16xf32> -> vector<4x8x16xf32>
    "tpu.trace_stop"() : () -> ()
    %336 = vector.extract_strided_slice %255 {offsets = [0, 0, 80], sizes = [4, 8, 16], strides = [1, 1, 1]} : vector<4x8x384xbf16> to vector<4x8x16xbf16>
    %337 = vector.extract_strided_slice %255 {offsets = [0, 0, 208], sizes = [4, 8, 16], strides = [1, 1, 1]} : vector<4x8x384xbf16> to vector<4x8x16xbf16>
    %338 = vector.extract_strided_slice %255 {offsets = [0, 0, 336], sizes = [4, 8, 16], strides = [1, 1, 1]} : vector<4x8x384xbf16> to vector<4x8x16xbf16>
    "tpu.trace_start"() <{level = 10 : i32, message = "lsd,ltd->lst"}> : () -> ()
    %cst_142 = arith.constant dense<0.000000e+00> : vector<4x8x8xf32>
    %339 = tpu.matmul %336, %337, %cst_142 {dimension_numbers = #tpu.dot_dimension_numbers<[2], [2], [1], [1], [0, 0, 0, 1, 1, 1], [0], [0]>} : vector<4x8x16xbf16>, vector<4x8x16xbf16>, vector<4x8x8xf32> -> vector<4x8x8xf32>
    "tpu.trace_stop"() : () -> ()
    %cst_143 = arith.constant dense<0xFF800000> : vector<4x8xf32>
    %340 = vector.multi_reduction <maximumf>, %339, %cst_143 [2] : vector<4x8x8xf32> to vector<4x8xf32>
    %341 = vector.shape_cast %340 : vector<4x8xf32> to vector<4x8x1xf32>
    %342 = vector.broadcast %341 : vector<4x8x1xf32> to vector<4x8x8xf32>
    %343 = arith.subf %339, %342 : vector<4x8x8xf32>
    %344 = math.exp %343 : vector<4x8x8xf32>
    %cst_144 = arith.constant dense<0.000000e+00> : vector<4x8xf32>
    %345 = vector.multi_reduction <add>, %344, %cst_144 [2] : vector<4x8x8xf32> to vector<4x8xf32>
    %346 = vector.shape_cast %345 : vector<4x8xf32> to vector<4x8x1xf32>
    %347 = tpu.reciprocal %346 {approx = true} : vector<4x8x1xf32> -> vector<4x8x1xf32>
    %348 = vector.broadcast %347 : vector<4x8x1xf32> to vector<4x8x8xf32>
    %349 = arith.mulf %344, %348 : vector<4x8x8xf32>
    %350 = arith.truncf %349 : vector<4x8x8xf32> to vector<4x8x8xbf16>
    "tpu.trace_start"() <{level = 10 : i32, message = "lst,ltd->lsd"}> : () -> ()
    %cst_145 = arith.constant dense<0.000000e+00> : vector<4x8x16xf32>
    %351 = tpu.matmul %350, %338, %cst_145 {dimension_numbers = #tpu.dot_dimension_numbers<[2], [1], [1], [2], [0, 0, 0, 1, 1, 2], [0], [0]>} : vector<4x8x8xbf16>, vector<4x8x16xbf16>, vector<4x8x16xf32> -> vector<4x8x16xf32>
    "tpu.trace_stop"() : () -> ()
    %352 = vector.extract_strided_slice %255 {offsets = [0, 0, 96], sizes = [4, 8, 16], strides = [1, 1, 1]} : vector<4x8x384xbf16> to vector<4x8x16xbf16>
    %353 = vector.extract_strided_slice %255 {offsets = [0, 0, 224], sizes = [4, 8, 16], strides = [1, 1, 1]} : vector<4x8x384xbf16> to vector<4x8x16xbf16>
    %354 = vector.extract_strided_slice %255 {offsets = [0, 0, 352], sizes = [4, 8, 16], strides = [1, 1, 1]} : vector<4x8x384xbf16> to vector<4x8x16xbf16>
    "tpu.trace_start"() <{level = 10 : i32, message = "lsd,ltd->lst"}> : () -> ()
    %cst_146 = arith.constant dense<0.000000e+00> : vector<4x8x8xf32>
    %355 = tpu.matmul %352, %353, %cst_146 {dimension_numbers = #tpu.dot_dimension_numbers<[2], [2], [1], [1], [0, 0, 0, 1, 1, 1], [0], [0]>} : vector<4x8x16xbf16>, vector<4x8x16xbf16>, vector<4x8x8xf32> -> vector<4x8x8xf32>
    "tpu.trace_stop"() : () -> ()
    %cst_147 = arith.constant dense<0xFF800000> : vector<4x8xf32>
    %356 = vector.multi_reduction <maximumf>, %355, %cst_147 [2] : vector<4x8x8xf32> to vector<4x8xf32>
    %357 = vector.shape_cast %356 : vector<4x8xf32> to vector<4x8x1xf32>
    %358 = vector.broadcast %357 : vector<4x8x1xf32> to vector<4x8x8xf32>
    %359 = arith.subf %355, %358 : vector<4x8x8xf32>
    %360 = math.exp %359 : vector<4x8x8xf32>
    %cst_148 = arith.constant dense<0.000000e+00> : vector<4x8xf32>
    %361 = vector.multi_reduction <add>, %360, %cst_148 [2] : vector<4x8x8xf32> to vector<4x8xf32>
    %362 = vector.shape_cast %361 : vector<4x8xf32> to vector<4x8x1xf32>
    %363 = tpu.reciprocal %362 {approx = true} : vector<4x8x1xf32> -> vector<4x8x1xf32>
    %364 = vector.broadcast %363 : vector<4x8x1xf32> to vector<4x8x8xf32>
    %365 = arith.mulf %360, %364 : vector<4x8x8xf32>
    %366 = arith.truncf %365 : vector<4x8x8xf32> to vector<4x8x8xbf16>
    "tpu.trace_start"() <{level = 10 : i32, message = "lst,ltd->lsd"}> : () -> ()
    %cst_149 = arith.constant dense<0.000000e+00> : vector<4x8x16xf32>
    %367 = tpu.matmul %366, %354, %cst_149 {dimension_numbers = #tpu.dot_dimension_numbers<[2], [1], [1], [2], [0, 0, 0, 1, 1, 2], [0], [0]>} : vector<4x8x8xbf16>, vector<4x8x16xbf16>, vector<4x8x16xf32> -> vector<4x8x16xf32>
    "tpu.trace_stop"() : () -> ()
    %368 = vector.extract_strided_slice %255 {offsets = [0, 0, 112], sizes = [4, 8, 16], strides = [1, 1, 1]} : vector<4x8x384xbf16> to vector<4x8x16xbf16>
    %369 = vector.extract_strided_slice %255 {offsets = [0, 0, 240], sizes = [4, 8, 16], strides = [1, 1, 1]} : vector<4x8x384xbf16> to vector<4x8x16xbf16>
    %370 = vector.extract_strided_slice %255 {offsets = [0, 0, 368], sizes = [4, 8, 16], strides = [1, 1, 1]} : vector<4x8x384xbf16> to vector<4x8x16xbf16>
    "tpu.trace_start"() <{level = 10 : i32, message = "lsd,ltd->lst"}> : () -> ()
    %cst_150 = arith.constant dense<0.000000e+00> : vector<4x8x8xf32>
    %371 = tpu.matmul %368, %369, %cst_150 {dimension_numbers = #tpu.dot_dimension_numbers<[2], [2], [1], [1], [0, 0, 0, 1, 1, 1], [0], [0]>} : vector<4x8x16xbf16>, vector<4x8x16xbf16>, vector<4x8x8xf32> -> vector<4x8x8xf32>
    "tpu.trace_stop"() : () -> ()
    %cst_151 = arith.constant dense<0xFF800000> : vector<4x8xf32>
    %372 = vector.multi_reduction <maximumf>, %371, %cst_151 [2] : vector<4x8x8xf32> to vector<4x8xf32>
    %373 = vector.shape_cast %372 : vector<4x8xf32> to vector<4x8x1xf32>
    %374 = vector.broadcast %373 : vector<4x8x1xf32> to vector<4x8x8xf32>
    %375 = arith.subf %371, %374 : vector<4x8x8xf32>
    %376 = math.exp %375 : vector<4x8x8xf32>
    %cst_152 = arith.constant dense<0.000000e+00> : vector<4x8xf32>
    %377 = vector.multi_reduction <add>, %376, %cst_152 [2] : vector<4x8x8xf32> to vector<4x8xf32>
    %378 = vector.shape_cast %377 : vector<4x8xf32> to vector<4x8x1xf32>
    %379 = tpu.reciprocal %378 {approx = true} : vector<4x8x1xf32> -> vector<4x8x1xf32>
    %380 = vector.broadcast %379 : vector<4x8x1xf32> to vector<4x8x8xf32>
    %381 = arith.mulf %376, %380 : vector<4x8x8xf32>
    %382 = arith.truncf %381 : vector<4x8x8xf32> to vector<4x8x8xbf16>
    "tpu.trace_start"() <{level = 10 : i32, message = "lst,ltd->lsd"}> : () -> ()
    %cst_153 = arith.constant dense<0.000000e+00> : vector<4x8x16xf32>
    %383 = tpu.matmul %382, %370, %cst_153 {dimension_numbers = #tpu.dot_dimension_numbers<[2], [1], [1], [2], [0, 0, 0, 1, 1, 2], [0], [0]>} : vector<4x8x8xbf16>, vector<4x8x16xbf16>, vector<4x8x16xf32> -> vector<4x8x16xf32>
    "tpu.trace_stop"() : () -> ()
    %384 = tpu.concatenate %271, %287, %303, %319, %335, %351, %367, %383 in 2 : vector<4x8x16xf32>, vector<4x8x16xf32>, vector<4x8x16xf32>, vector<4x8x16xf32>, vector<4x8x16xf32>, vector<4x8x16xf32>, vector<4x8x16xf32>, vector<4x8x16xf32> -> vector<4x8x128xf32>
    %385 = vector.shape_cast %384 : vector<4x8x128xf32> to vector<32x128xf32>
    %386 = arith.truncf %385 : vector<32x128xf32> to vector<32x128xbf16>
    %cst_154 = arith.constant dense<0.000000e+00> : vector<32x128xf32>
    %387 = tpu.matmul %386, %231, %cst_154 {dimension_numbers = #tpu.dot_dimension_numbers<[1], [0], [0], [1], [0, 0, 1, 1], [], []>} : vector<32x128xbf16>, vector<128x128xbf16>, vector<32x128xf32> -> vector<32x128xf32>
    %388 = vector.broadcast %233 : vector<1x128xf32> to vector<32x128xf32>
    %389 = arith.addf %387, %388 : vector<32x128xf32>
    %390 = arith.addf %225, %389 : vector<32x128xf32>
    %cst_155 = arith.constant dense<0.000000e+00> : vector<32xf32>
    %391 = vector.multi_reduction <add>, %390, %cst_155 [1] : vector<32x128xf32> to vector<32xf32>
    %392 = vector.shape_cast %391 : vector<32xf32> to vector<32x1xf32>
    %cst_156 = arith.constant 1.280000e+02 : f32
    %393 = vector.broadcast %cst_156 : f32 to vector<32x1xf32>
    %394 = arith.divf %392, %393 : vector<32x1xf32>
    %395 = arith.mulf %390, %390 : vector<32x128xf32>
    %cst_157 = arith.constant dense<0.000000e+00> : vector<32xf32>
    %396 = vector.multi_reduction <add>, %395, %cst_157 [1] : vector<32x128xf32> to vector<32xf32>
    %397 = vector.shape_cast %396 : vector<32xf32> to vector<32x1xf32>
    %cst_158 = arith.constant 1.280000e+02 : f32
    %398 = vector.broadcast %cst_158 : f32 to vector<32x1xf32>
    %399 = arith.divf %397, %398 : vector<32x1xf32>
    %400 = arith.mulf %394, %394 : vector<32x1xf32>
    %401 = arith.subf %399, %400 : vector<32x1xf32>
    %402 = vector.broadcast %394 : vector<32x1xf32> to vector<32x128xf32>
    %403 = arith.subf %390, %402 : vector<32x128xf32>
    %cst_159 = arith.constant 9.99999974E-6 : f32
    %404 = vector.broadcast %cst_159 : f32 to vector<32x1xf32>
    %405 = arith.addf %401, %404 : vector<32x1xf32>
    %406 = math.rsqrt %405 : vector<32x1xf32>
    %407 = vector.broadcast %406 : vector<32x1xf32> to vector<32x128xf32>
    %408 = arith.mulf %403, %407 : vector<32x128xf32>
    %409 = vector.broadcast %235 : vector<1x128xf32> to vector<32x128xf32>
    %410 = arith.mulf %408, %409 : vector<32x128xf32>
    %411 = vector.broadcast %237 : vector<1x128xf32> to vector<32x128xf32>
    %412 = arith.addf %410, %411 : vector<32x128xf32>
    %413 = arith.truncf %412 : vector<32x128xf32> to vector<32x128xbf16>
    %cst_160 = arith.constant dense<0.000000e+00> : vector<32x256xf32>
    %414 = tpu.matmul %413, %239, %cst_160 {dimension_numbers = #tpu.dot_dimension_numbers<[1], [0], [0], [1], [0, 0, 1, 1], [], []>} : vector<32x128xbf16>, vector<128x256xbf16>, vector<32x256xf32> -> vector<32x256xf32>
    %415 = vector.broadcast %241 : vector<1x256xf32> to vector<32x256xf32>
    %416 = arith.addf %414, %415 : vector<32x256xf32>
    %cst_161 = arith.constant 0.000000e+00 : f32
    %417 = vector.broadcast %cst_161 : f32 to vector<32x256xf32>
    %418 = arith.maximumf %416, %417 : vector<32x256xf32>
    %419 = arith.truncf %418 : vector<32x256xf32> to vector<32x256xbf16>
    %cst_162 = arith.constant dense<0.000000e+00> : vector<32x128xf32>
    %420 = tpu.matmul %419, %243, %cst_162 {dimension_numbers = #tpu.dot_dimension_numbers<[1], [0], [0], [1], [0, 0, 1, 1], [], []>} : vector<32x256xbf16>, vector<256x128xbf16>, vector<32x128xf32> -> vector<32x128xf32>
    %421 = vector.broadcast %245 : vector<1x128xf32> to vector<32x128xf32>
    %422 = arith.addf %420, %421 : vector<32x128xf32>
    %423 = arith.addf %412, %422 : vector<32x128xf32>
    %cst_163 = arith.constant dense<0.000000e+00> : vector<32xf32>
    %424 = vector.multi_reduction <add>, %423, %cst_163 [1] : vector<32x128xf32> to vector<32xf32>
    %425 = vector.shape_cast %424 : vector<32xf32> to vector<32x1xf32>
    %cst_164 = arith.constant 1.280000e+02 : f32
    %426 = vector.broadcast %cst_164 : f32 to vector<32x1xf32>
    %427 = arith.divf %425, %426 : vector<32x1xf32>
    %428 = arith.mulf %423, %423 : vector<32x128xf32>
    %cst_165 = arith.constant dense<0.000000e+00> : vector<32xf32>
    %429 = vector.multi_reduction <add>, %428, %cst_165 [1] : vector<32x128xf32> to vector<32xf32>
    %430 = vector.shape_cast %429 : vector<32xf32> to vector<32x1xf32>
    %cst_166 = arith.constant 1.280000e+02 : f32
    %431 = vector.broadcast %cst_166 : f32 to vector<32x1xf32>
    %432 = arith.divf %430, %431 : vector<32x1xf32>
    %433 = arith.mulf %427, %427 : vector<32x1xf32>
    %434 = arith.subf %432, %433 : vector<32x1xf32>
    %435 = vector.broadcast %427 : vector<32x1xf32> to vector<32x128xf32>
    %436 = arith.subf %423, %435 : vector<32x128xf32>
    %cst_167 = arith.constant 9.99999974E-6 : f32
    %437 = vector.broadcast %cst_167 : f32 to vector<32x1xf32>
    %438 = arith.addf %434, %437 : vector<32x1xf32>
    %439 = math.rsqrt %438 : vector<32x1xf32>
    %440 = vector.broadcast %439 : vector<32x1xf32> to vector<32x128xf32>
    %441 = arith.mulf %436, %440 : vector<32x128xf32>
    %442 = vector.broadcast %247 : vector<1x128xf32> to vector<32x128xf32>
    %443 = arith.mulf %441, %442 : vector<32x128xf32>
    %444 = vector.broadcast %249 : vector<1x128xf32> to vector<32x128xf32>
    %445 = arith.addf %443, %444 : vector<32x128xf32>
    %c2 = arith.constant 2 : index
    %c0_168 = arith.constant 0 : index
    %c0_169 = arith.constant 0 : index
    %446 = vector.load %arg2[%c2, %c0_168, %c0_169] : memref<3x128x384xbf16, #tpu.memory_space<vmem>>, vector<1x128x384xbf16>
    %447 = vector.shape_cast %446 : vector<1x128x384xbf16> to vector<128x384xbf16>
    %c2_170 = arith.constant 2 : index
    %c0_171 = arith.constant 0 : index
    %c0_172 = arith.constant 0 : index
    %448 = vector.load %arg3[%c2_170, %c0_171, %c0_172] : memref<3x1x384xf32, #tpu.memory_space<vmem>>, vector<1x1x384xf32>
    %449 = vector.shape_cast %448 : vector<1x1x384xf32> to vector<1x384xf32>
    %c2_173 = arith.constant 2 : index
    %c0_174 = arith.constant 0 : index
    %c0_175 = arith.constant 0 : index
    %450 = vector.load %arg4[%c2_173, %c0_174, %c0_175] : memref<3x128x128xbf16, #tpu.memory_space<vmem>>, vector<1x128x128xbf16>
    %451 = vector.shape_cast %450 : vector<1x128x128xbf16> to vector<128x128xbf16>
    %c2_176 = arith.constant 2 : index
    %c0_177 = arith.constant 0 : index
    %c0_178 = arith.constant 0 : index
    %452 = vector.load %arg5[%c2_176, %c0_177, %c0_178] : memref<3x1x128xf32, #tpu.memory_space<vmem>>, vector<1x1x128xf32>
    %453 = vector.shape_cast %452 : vector<1x1x128xf32> to vector<1x128xf32>
    %c2_179 = arith.constant 2 : index
    %c0_180 = arith.constant 0 : index
    %c0_181 = arith.constant 0 : index
    %454 = vector.load %arg6[%c2_179, %c0_180, %c0_181] : memref<3x1x128xf32, #tpu.memory_space<vmem>>, vector<1x1x128xf32>
    %455 = vector.shape_cast %454 : vector<1x1x128xf32> to vector<1x128xf32>
    %c2_182 = arith.constant 2 : index
    %c0_183 = arith.constant 0 : index
    %c0_184 = arith.constant 0 : index
    %456 = vector.load %arg7[%c2_182, %c0_183, %c0_184] : memref<3x1x128xf32, #tpu.memory_space<vmem>>, vector<1x1x128xf32>
    %457 = vector.shape_cast %456 : vector<1x1x128xf32> to vector<1x128xf32>
    %c2_185 = arith.constant 2 : index
    %c0_186 = arith.constant 0 : index
    %c0_187 = arith.constant 0 : index
    %458 = vector.load %arg8[%c2_185, %c0_186, %c0_187] : memref<3x128x256xbf16, #tpu.memory_space<vmem>>, vector<1x128x256xbf16>
    %459 = vector.shape_cast %458 : vector<1x128x256xbf16> to vector<128x256xbf16>
    %c2_188 = arith.constant 2 : index
    %c0_189 = arith.constant 0 : index
    %c0_190 = arith.constant 0 : index
    %460 = vector.load %arg9[%c2_188, %c0_189, %c0_190] : memref<3x1x256xf32, #tpu.memory_space<vmem>>, vector<1x1x256xf32>
    %461 = vector.shape_cast %460 : vector<1x1x256xf32> to vector<1x256xf32>
    %c2_191 = arith.constant 2 : index
    %c0_192 = arith.constant 0 : index
    %c0_193 = arith.constant 0 : index
    %462 = vector.load %arg10[%c2_191, %c0_192, %c0_193] : memref<3x256x128xbf16, #tpu.memory_space<vmem>>, vector<1x256x128xbf16>
    %463 = vector.shape_cast %462 : vector<1x256x128xbf16> to vector<256x128xbf16>
    %c2_194 = arith.constant 2 : index
    %c0_195 = arith.constant 0 : index
    %c0_196 = arith.constant 0 : index
    %464 = vector.load %arg11[%c2_194, %c0_195, %c0_196] : memref<3x1x128xf32, #tpu.memory_space<vmem>>, vector<1x1x128xf32>
    %465 = vector.shape_cast %464 : vector<1x1x128xf32> to vector<1x128xf32>
    %c2_197 = arith.constant 2 : index
    %c0_198 = arith.constant 0 : index
    %c0_199 = arith.constant 0 : index
    %466 = vector.load %arg12[%c2_197, %c0_198, %c0_199] : memref<3x1x128xf32, #tpu.memory_space<vmem>>, vector<1x1x128xf32>
    %467 = vector.shape_cast %466 : vector<1x1x128xf32> to vector<1x128xf32>
    %c2_200 = arith.constant 2 : index
    %c0_201 = arith.constant 0 : index
    %c0_202 = arith.constant 0 : index
    %468 = vector.load %arg13[%c2_200, %c0_201, %c0_202] : memref<3x1x128xf32, #tpu.memory_space<vmem>>, vector<1x1x128xf32>
    %469 = vector.shape_cast %468 : vector<1x1x128xf32> to vector<1x128xf32>
    %470 = arith.truncf %445 : vector<32x128xf32> to vector<32x128xbf16>
    %cst_203 = arith.constant dense<0.000000e+00> : vector<32x384xf32>
    %471 = tpu.matmul %470, %447, %cst_203 {dimension_numbers = #tpu.dot_dimension_numbers<[1], [0], [0], [1], [0, 0, 1, 1], [], []>} : vector<32x128xbf16>, vector<128x384xbf16>, vector<32x384xf32> -> vector<32x384xf32>
    %472 = vector.broadcast %449 : vector<1x384xf32> to vector<32x384xf32>
    %473 = arith.addf %471, %472 : vector<32x384xf32>
    %474 = vector.shape_cast %473 : vector<32x384xf32> to vector<4x8x384xf32>
    %475 = arith.truncf %474 : vector<4x8x384xf32> to vector<4x8x384xbf16>
    %476 = vector.extract_strided_slice %475 {offsets = [0, 0, 0], sizes = [4, 8, 16], strides = [1, 1, 1]} : vector<4x8x384xbf16> to vector<4x8x16xbf16>
    %477 = vector.extract_strided_slice %475 {offsets = [0, 0, 128], sizes = [4, 8, 16], strides = [1, 1, 1]} : vector<4x8x384xbf16> to vector<4x8x16xbf16>
    %478 = vector.extract_strided_slice %475 {offsets = [0, 0, 256], sizes = [4, 8, 16], strides = [1, 1, 1]} : vector<4x8x384xbf16> to vector<4x8x16xbf16>
    "tpu.trace_start"() <{level = 10 : i32, message = "lsd,ltd->lst"}> : () -> ()
    %cst_204 = arith.constant dense<0.000000e+00> : vector<4x8x8xf32>
    %479 = tpu.matmul %476, %477, %cst_204 {dimension_numbers = #tpu.dot_dimension_numbers<[2], [2], [1], [1], [0, 0, 0, 1, 1, 1], [0], [0]>} : vector<4x8x16xbf16>, vector<4x8x16xbf16>, vector<4x8x8xf32> -> vector<4x8x8xf32>
    "tpu.trace_stop"() : () -> ()
    %cst_205 = arith.constant dense<0xFF800000> : vector<4x8xf32>
    %480 = vector.multi_reduction <maximumf>, %479, %cst_205 [2] : vector<4x8x8xf32> to vector<4x8xf32>
    %481 = vector.shape_cast %480 : vector<4x8xf32> to vector<4x8x1xf32>
    %482 = vector.broadcast %481 : vector<4x8x1xf32> to vector<4x8x8xf32>
    %483 = arith.subf %479, %482 : vector<4x8x8xf32>
    %484 = math.exp %483 : vector<4x8x8xf32>
    %cst_206 = arith.constant dense<0.000000e+00> : vector<4x8xf32>
    %485 = vector.multi_reduction <add>, %484, %cst_206 [2] : vector<4x8x8xf32> to vector<4x8xf32>
    %486 = vector.shape_cast %485 : vector<4x8xf32> to vector<4x8x1xf32>
    %487 = tpu.reciprocal %486 {approx = true} : vector<4x8x1xf32> -> vector<4x8x1xf32>
    %488 = vector.broadcast %487 : vector<4x8x1xf32> to vector<4x8x8xf32>
    %489 = arith.mulf %484, %488 : vector<4x8x8xf32>
    %490 = arith.truncf %489 : vector<4x8x8xf32> to vector<4x8x8xbf16>
    "tpu.trace_start"() <{level = 10 : i32, message = "lst,ltd->lsd"}> : () -> ()
    %cst_207 = arith.constant dense<0.000000e+00> : vector<4x8x16xf32>
    %491 = tpu.matmul %490, %478, %cst_207 {dimension_numbers = #tpu.dot_dimension_numbers<[2], [1], [1], [2], [0, 0, 0, 1, 1, 2], [0], [0]>} : vector<4x8x8xbf16>, vector<4x8x16xbf16>, vector<4x8x16xf32> -> vector<4x8x16xf32>
    "tpu.trace_stop"() : () -> ()
    %492 = vector.extract_strided_slice %475 {offsets = [0, 0, 16], sizes = [4, 8, 16], strides = [1, 1, 1]} : vector<4x8x384xbf16> to vector<4x8x16xbf16>
    %493 = vector.extract_strided_slice %475 {offsets = [0, 0, 144], sizes = [4, 8, 16], strides = [1, 1, 1]} : vector<4x8x384xbf16> to vector<4x8x16xbf16>
    %494 = vector.extract_strided_slice %475 {offsets = [0, 0, 272], sizes = [4, 8, 16], strides = [1, 1, 1]} : vector<4x8x384xbf16> to vector<4x8x16xbf16>
    "tpu.trace_start"() <{level = 10 : i32, message = "lsd,ltd->lst"}> : () -> ()
    %cst_208 = arith.constant dense<0.000000e+00> : vector<4x8x8xf32>
    %495 = tpu.matmul %492, %493, %cst_208 {dimension_numbers = #tpu.dot_dimension_numbers<[2], [2], [1], [1], [0, 0, 0, 1, 1, 1], [0], [0]>} : vector<4x8x16xbf16>, vector<4x8x16xbf16>, vector<4x8x8xf32> -> vector<4x8x8xf32>
    "tpu.trace_stop"() : () -> ()
    %cst_209 = arith.constant dense<0xFF800000> : vector<4x8xf32>
    %496 = vector.multi_reduction <maximumf>, %495, %cst_209 [2] : vector<4x8x8xf32> to vector<4x8xf32>
    %497 = vector.shape_cast %496 : vector<4x8xf32> to vector<4x8x1xf32>
    %498 = vector.broadcast %497 : vector<4x8x1xf32> to vector<4x8x8xf32>
    %499 = arith.subf %495, %498 : vector<4x8x8xf32>
    %500 = math.exp %499 : vector<4x8x8xf32>
    %cst_210 = arith.constant dense<0.000000e+00> : vector<4x8xf32>
    %501 = vector.multi_reduction <add>, %500, %cst_210 [2] : vector<4x8x8xf32> to vector<4x8xf32>
    %502 = vector.shape_cast %501 : vector<4x8xf32> to vector<4x8x1xf32>
    %503 = tpu.reciprocal %502 {approx = true} : vector<4x8x1xf32> -> vector<4x8x1xf32>
    %504 = vector.broadcast %503 : vector<4x8x1xf32> to vector<4x8x8xf32>
    %505 = arith.mulf %500, %504 : vector<4x8x8xf32>
    %506 = arith.truncf %505 : vector<4x8x8xf32> to vector<4x8x8xbf16>
    "tpu.trace_start"() <{level = 10 : i32, message = "lst,ltd->lsd"}> : () -> ()
    %cst_211 = arith.constant dense<0.000000e+00> : vector<4x8x16xf32>
    %507 = tpu.matmul %506, %494, %cst_211 {dimension_numbers = #tpu.dot_dimension_numbers<[2], [1], [1], [2], [0, 0, 0, 1, 1, 2], [0], [0]>} : vector<4x8x8xbf16>, vector<4x8x16xbf16>, vector<4x8x16xf32> -> vector<4x8x16xf32>
    "tpu.trace_stop"() : () -> ()
    %508 = vector.extract_strided_slice %475 {offsets = [0, 0, 32], sizes = [4, 8, 16], strides = [1, 1, 1]} : vector<4x8x384xbf16> to vector<4x8x16xbf16>
    %509 = vector.extract_strided_slice %475 {offsets = [0, 0, 160], sizes = [4, 8, 16], strides = [1, 1, 1]} : vector<4x8x384xbf16> to vector<4x8x16xbf16>
    %510 = vector.extract_strided_slice %475 {offsets = [0, 0, 288], sizes = [4, 8, 16], strides = [1, 1, 1]} : vector<4x8x384xbf16> to vector<4x8x16xbf16>
    "tpu.trace_start"() <{level = 10 : i32, message = "lsd,ltd->lst"}> : () -> ()
    %cst_212 = arith.constant dense<0.000000e+00> : vector<4x8x8xf32>
    %511 = tpu.matmul %508, %509, %cst_212 {dimension_numbers = #tpu.dot_dimension_numbers<[2], [2], [1], [1], [0, 0, 0, 1, 1, 1], [0], [0]>} : vector<4x8x16xbf16>, vector<4x8x16xbf16>, vector<4x8x8xf32> -> vector<4x8x8xf32>
    "tpu.trace_stop"() : () -> ()
    %cst_213 = arith.constant dense<0xFF800000> : vector<4x8xf32>
    %512 = vector.multi_reduction <maximumf>, %511, %cst_213 [2] : vector<4x8x8xf32> to vector<4x8xf32>
    %513 = vector.shape_cast %512 : vector<4x8xf32> to vector<4x8x1xf32>
    %514 = vector.broadcast %513 : vector<4x8x1xf32> to vector<4x8x8xf32>
    %515 = arith.subf %511, %514 : vector<4x8x8xf32>
    %516 = math.exp %515 : vector<4x8x8xf32>
    %cst_214 = arith.constant dense<0.000000e+00> : vector<4x8xf32>
    %517 = vector.multi_reduction <add>, %516, %cst_214 [2] : vector<4x8x8xf32> to vector<4x8xf32>
    %518 = vector.shape_cast %517 : vector<4x8xf32> to vector<4x8x1xf32>
    %519 = tpu.reciprocal %518 {approx = true} : vector<4x8x1xf32> -> vector<4x8x1xf32>
    %520 = vector.broadcast %519 : vector<4x8x1xf32> to vector<4x8x8xf32>
    %521 = arith.mulf %516, %520 : vector<4x8x8xf32>
    %522 = arith.truncf %521 : vector<4x8x8xf32> to vector<4x8x8xbf16>
    "tpu.trace_start"() <{level = 10 : i32, message = "lst,ltd->lsd"}> : () -> ()
    %cst_215 = arith.constant dense<0.000000e+00> : vector<4x8x16xf32>
    %523 = tpu.matmul %522, %510, %cst_215 {dimension_numbers = #tpu.dot_dimension_numbers<[2], [1], [1], [2], [0, 0, 0, 1, 1, 2], [0], [0]>} : vector<4x8x8xbf16>, vector<4x8x16xbf16>, vector<4x8x16xf32> -> vector<4x8x16xf32>
    "tpu.trace_stop"() : () -> ()
    %524 = vector.extract_strided_slice %475 {offsets = [0, 0, 48], sizes = [4, 8, 16], strides = [1, 1, 1]} : vector<4x8x384xbf16> to vector<4x8x16xbf16>
    %525 = vector.extract_strided_slice %475 {offsets = [0, 0, 176], sizes = [4, 8, 16], strides = [1, 1, 1]} : vector<4x8x384xbf16> to vector<4x8x16xbf16>
    %526 = vector.extract_strided_slice %475 {offsets = [0, 0, 304], sizes = [4, 8, 16], strides = [1, 1, 1]} : vector<4x8x384xbf16> to vector<4x8x16xbf16>
    "tpu.trace_start"() <{level = 10 : i32, message = "lsd,ltd->lst"}> : () -> ()
    %cst_216 = arith.constant dense<0.000000e+00> : vector<4x8x8xf32>
    %527 = tpu.matmul %524, %525, %cst_216 {dimension_numbers = #tpu.dot_dimension_numbers<[2], [2], [1], [1], [0, 0, 0, 1, 1, 1], [0], [0]>} : vector<4x8x16xbf16>, vector<4x8x16xbf16>, vector<4x8x8xf32> -> vector<4x8x8xf32>
    "tpu.trace_stop"() : () -> ()
    %cst_217 = arith.constant dense<0xFF800000> : vector<4x8xf32>
    %528 = vector.multi_reduction <maximumf>, %527, %cst_217 [2] : vector<4x8x8xf32> to vector<4x8xf32>
    %529 = vector.shape_cast %528 : vector<4x8xf32> to vector<4x8x1xf32>
    %530 = vector.broadcast %529 : vector<4x8x1xf32> to vector<4x8x8xf32>
    %531 = arith.subf %527, %530 : vector<4x8x8xf32>
    %532 = math.exp %531 : vector<4x8x8xf32>
    %cst_218 = arith.constant dense<0.000000e+00> : vector<4x8xf32>
    %533 = vector.multi_reduction <add>, %532, %cst_218 [2] : vector<4x8x8xf32> to vector<4x8xf32>
    %534 = vector.shape_cast %533 : vector<4x8xf32> to vector<4x8x1xf32>
    %535 = tpu.reciprocal %534 {approx = true} : vector<4x8x1xf32> -> vector<4x8x1xf32>
    %536 = vector.broadcast %535 : vector<4x8x1xf32> to vector<4x8x8xf32>
    %537 = arith.mulf %532, %536 : vector<4x8x8xf32>
    %538 = arith.truncf %537 : vector<4x8x8xf32> to vector<4x8x8xbf16>
    "tpu.trace_start"() <{level = 10 : i32, message = "lst,ltd->lsd"}> : () -> ()
    %cst_219 = arith.constant dense<0.000000e+00> : vector<4x8x16xf32>
    %539 = tpu.matmul %538, %526, %cst_219 {dimension_numbers = #tpu.dot_dimension_numbers<[2], [1], [1], [2], [0, 0, 0, 1, 1, 2], [0], [0]>} : vector<4x8x8xbf16>, vector<4x8x16xbf16>, vector<4x8x16xf32> -> vector<4x8x16xf32>
    "tpu.trace_stop"() : () -> ()
    %540 = vector.extract_strided_slice %475 {offsets = [0, 0, 64], sizes = [4, 8, 16], strides = [1, 1, 1]} : vector<4x8x384xbf16> to vector<4x8x16xbf16>
    %541 = vector.extract_strided_slice %475 {offsets = [0, 0, 192], sizes = [4, 8, 16], strides = [1, 1, 1]} : vector<4x8x384xbf16> to vector<4x8x16xbf16>
    %542 = vector.extract_strided_slice %475 {offsets = [0, 0, 320], sizes = [4, 8, 16], strides = [1, 1, 1]} : vector<4x8x384xbf16> to vector<4x8x16xbf16>
    "tpu.trace_start"() <{level = 10 : i32, message = "lsd,ltd->lst"}> : () -> ()
    %cst_220 = arith.constant dense<0.000000e+00> : vector<4x8x8xf32>
    %543 = tpu.matmul %540, %541, %cst_220 {dimension_numbers = #tpu.dot_dimension_numbers<[2], [2], [1], [1], [0, 0, 0, 1, 1, 1], [0], [0]>} : vector<4x8x16xbf16>, vector<4x8x16xbf16>, vector<4x8x8xf32> -> vector<4x8x8xf32>
    "tpu.trace_stop"() : () -> ()
    %cst_221 = arith.constant dense<0xFF800000> : vector<4x8xf32>
    %544 = vector.multi_reduction <maximumf>, %543, %cst_221 [2] : vector<4x8x8xf32> to vector<4x8xf32>
    %545 = vector.shape_cast %544 : vector<4x8xf32> to vector<4x8x1xf32>
    %546 = vector.broadcast %545 : vector<4x8x1xf32> to vector<4x8x8xf32>
    %547 = arith.subf %543, %546 : vector<4x8x8xf32>
    %548 = math.exp %547 : vector<4x8x8xf32>
    %cst_222 = arith.constant dense<0.000000e+00> : vector<4x8xf32>
    %549 = vector.multi_reduction <add>, %548, %cst_222 [2] : vector<4x8x8xf32> to vector<4x8xf32>
    %550 = vector.shape_cast %549 : vector<4x8xf32> to vector<4x8x1xf32>
    %551 = tpu.reciprocal %550 {approx = true} : vector<4x8x1xf32> -> vector<4x8x1xf32>
    %552 = vector.broadcast %551 : vector<4x8x1xf32> to vector<4x8x8xf32>
    %553 = arith.mulf %548, %552 : vector<4x8x8xf32>
    %554 = arith.truncf %553 : vector<4x8x8xf32> to vector<4x8x8xbf16>
    "tpu.trace_start"() <{level = 10 : i32, message = "lst,ltd->lsd"}> : () -> ()
    %cst_223 = arith.constant dense<0.000000e+00> : vector<4x8x16xf32>
    %555 = tpu.matmul %554, %542, %cst_223 {dimension_numbers = #tpu.dot_dimension_numbers<[2], [1], [1], [2], [0, 0, 0, 1, 1, 2], [0], [0]>} : vector<4x8x8xbf16>, vector<4x8x16xbf16>, vector<4x8x16xf32> -> vector<4x8x16xf32>
    "tpu.trace_stop"() : () -> ()
    %556 = vector.extract_strided_slice %475 {offsets = [0, 0, 80], sizes = [4, 8, 16], strides = [1, 1, 1]} : vector<4x8x384xbf16> to vector<4x8x16xbf16>
    %557 = vector.extract_strided_slice %475 {offsets = [0, 0, 208], sizes = [4, 8, 16], strides = [1, 1, 1]} : vector<4x8x384xbf16> to vector<4x8x16xbf16>
    %558 = vector.extract_strided_slice %475 {offsets = [0, 0, 336], sizes = [4, 8, 16], strides = [1, 1, 1]} : vector<4x8x384xbf16> to vector<4x8x16xbf16>
    "tpu.trace_start"() <{level = 10 : i32, message = "lsd,ltd->lst"}> : () -> ()
    %cst_224 = arith.constant dense<0.000000e+00> : vector<4x8x8xf32>
    %559 = tpu.matmul %556, %557, %cst_224 {dimension_numbers = #tpu.dot_dimension_numbers<[2], [2], [1], [1], [0, 0, 0, 1, 1, 1], [0], [0]>} : vector<4x8x16xbf16>, vector<4x8x16xbf16>, vector<4x8x8xf32> -> vector<4x8x8xf32>
    "tpu.trace_stop"() : () -> ()
    %cst_225 = arith.constant dense<0xFF800000> : vector<4x8xf32>
    %560 = vector.multi_reduction <maximumf>, %559, %cst_225 [2] : vector<4x8x8xf32> to vector<4x8xf32>
    %561 = vector.shape_cast %560 : vector<4x8xf32> to vector<4x8x1xf32>
    %562 = vector.broadcast %561 : vector<4x8x1xf32> to vector<4x8x8xf32>
    %563 = arith.subf %559, %562 : vector<4x8x8xf32>
    %564 = math.exp %563 : vector<4x8x8xf32>
    %cst_226 = arith.constant dense<0.000000e+00> : vector<4x8xf32>
    %565 = vector.multi_reduction <add>, %564, %cst_226 [2] : vector<4x8x8xf32> to vector<4x8xf32>
    %566 = vector.shape_cast %565 : vector<4x8xf32> to vector<4x8x1xf32>
    %567 = tpu.reciprocal %566 {approx = true} : vector<4x8x1xf32> -> vector<4x8x1xf32>
    %568 = vector.broadcast %567 : vector<4x8x1xf32> to vector<4x8x8xf32>
    %569 = arith.mulf %564, %568 : vector<4x8x8xf32>
    %570 = arith.truncf %569 : vector<4x8x8xf32> to vector<4x8x8xbf16>
    "tpu.trace_start"() <{level = 10 : i32, message = "lst,ltd->lsd"}> : () -> ()
    %cst_227 = arith.constant dense<0.000000e+00> : vector<4x8x16xf32>
    %571 = tpu.matmul %570, %558, %cst_227 {dimension_numbers = #tpu.dot_dimension_numbers<[2], [1], [1], [2], [0, 0, 0, 1, 1, 2], [0], [0]>} : vector<4x8x8xbf16>, vector<4x8x16xbf16>, vector<4x8x16xf32> -> vector<4x8x16xf32>
    "tpu.trace_stop"() : () -> ()
    %572 = vector.extract_strided_slice %475 {offsets = [0, 0, 96], sizes = [4, 8, 16], strides = [1, 1, 1]} : vector<4x8x384xbf16> to vector<4x8x16xbf16>
    %573 = vector.extract_strided_slice %475 {offsets = [0, 0, 224], sizes = [4, 8, 16], strides = [1, 1, 1]} : vector<4x8x384xbf16> to vector<4x8x16xbf16>
    %574 = vector.extract_strided_slice %475 {offsets = [0, 0, 352], sizes = [4, 8, 16], strides = [1, 1, 1]} : vector<4x8x384xbf16> to vector<4x8x16xbf16>
    "tpu.trace_start"() <{level = 10 : i32, message = "lsd,ltd->lst"}> : () -> ()
    %cst_228 = arith.constant dense<0.000000e+00> : vector<4x8x8xf32>
    %575 = tpu.matmul %572, %573, %cst_228 {dimension_numbers = #tpu.dot_dimension_numbers<[2], [2], [1], [1], [0, 0, 0, 1, 1, 1], [0], [0]>} : vector<4x8x16xbf16>, vector<4x8x16xbf16>, vector<4x8x8xf32> -> vector<4x8x8xf32>
    "tpu.trace_stop"() : () -> ()
    %cst_229 = arith.constant dense<0xFF800000> : vector<4x8xf32>
    %576 = vector.multi_reduction <maximumf>, %575, %cst_229 [2] : vector<4x8x8xf32> to vector<4x8xf32>
    %577 = vector.shape_cast %576 : vector<4x8xf32> to vector<4x8x1xf32>
    %578 = vector.broadcast %577 : vector<4x8x1xf32> to vector<4x8x8xf32>
    %579 = arith.subf %575, %578 : vector<4x8x8xf32>
    %580 = math.exp %579 : vector<4x8x8xf32>
    %cst_230 = arith.constant dense<0.000000e+00> : vector<4x8xf32>
    %581 = vector.multi_reduction <add>, %580, %cst_230 [2] : vector<4x8x8xf32> to vector<4x8xf32>
    %582 = vector.shape_cast %581 : vector<4x8xf32> to vector<4x8x1xf32>
    %583 = tpu.reciprocal %582 {approx = true} : vector<4x8x1xf32> -> vector<4x8x1xf32>
    %584 = vector.broadcast %583 : vector<4x8x1xf32> to vector<4x8x8xf32>
    %585 = arith.mulf %580, %584 : vector<4x8x8xf32>
    %586 = arith.truncf %585 : vector<4x8x8xf32> to vector<4x8x8xbf16>
    "tpu.trace_start"() <{level = 10 : i32, message = "lst,ltd->lsd"}> : () -> ()
    %cst_231 = arith.constant dense<0.000000e+00> : vector<4x8x16xf32>
    %587 = tpu.matmul %586, %574, %cst_231 {dimension_numbers = #tpu.dot_dimension_numbers<[2], [1], [1], [2], [0, 0, 0, 1, 1, 2], [0], [0]>} : vector<4x8x8xbf16>, vector<4x8x16xbf16>, vector<4x8x16xf32> -> vector<4x8x16xf32>
    "tpu.trace_stop"() : () -> ()
    %588 = vector.extract_strided_slice %475 {offsets = [0, 0, 112], sizes = [4, 8, 16], strides = [1, 1, 1]} : vector<4x8x384xbf16> to vector<4x8x16xbf16>
    %589 = vector.extract_strided_slice %475 {offsets = [0, 0, 240], sizes = [4, 8, 16], strides = [1, 1, 1]} : vector<4x8x384xbf16> to vector<4x8x16xbf16>
    %590 = vector.extract_strided_slice %475 {offsets = [0, 0, 368], sizes = [4, 8, 16], strides = [1, 1, 1]} : vector<4x8x384xbf16> to vector<4x8x16xbf16>
    "tpu.trace_start"() <{level = 10 : i32, message = "lsd,ltd->lst"}> : () -> ()
    %cst_232 = arith.constant dense<0.000000e+00> : vector<4x8x8xf32>
    %591 = tpu.matmul %588, %589, %cst_232 {dimension_numbers = #tpu.dot_dimension_numbers<[2], [2], [1], [1], [0, 0, 0, 1, 1, 1], [0], [0]>} : vector<4x8x16xbf16>, vector<4x8x16xbf16>, vector<4x8x8xf32> -> vector<4x8x8xf32>
    "tpu.trace_stop"() : () -> ()
    %cst_233 = arith.constant dense<0xFF800000> : vector<4x8xf32>
    %592 = vector.multi_reduction <maximumf>, %591, %cst_233 [2] : vector<4x8x8xf32> to vector<4x8xf32>
    %593 = vector.shape_cast %592 : vector<4x8xf32> to vector<4x8x1xf32>
    %594 = vector.broadcast %593 : vector<4x8x1xf32> to vector<4x8x8xf32>
    %595 = arith.subf %591, %594 : vector<4x8x8xf32>
    %596 = math.exp %595 : vector<4x8x8xf32>
    %cst_234 = arith.constant dense<0.000000e+00> : vector<4x8xf32>
    %597 = vector.multi_reduction <add>, %596, %cst_234 [2] : vector<4x8x8xf32> to vector<4x8xf32>
    %598 = vector.shape_cast %597 : vector<4x8xf32> to vector<4x8x1xf32>
    %599 = tpu.reciprocal %598 {approx = true} : vector<4x8x1xf32> -> vector<4x8x1xf32>
    %600 = vector.broadcast %599 : vector<4x8x1xf32> to vector<4x8x8xf32>
    %601 = arith.mulf %596, %600 : vector<4x8x8xf32>
    %602 = arith.truncf %601 : vector<4x8x8xf32> to vector<4x8x8xbf16>
    "tpu.trace_start"() <{level = 10 : i32, message = "lst,ltd->lsd"}> : () -> ()
    %cst_235 = arith.constant dense<0.000000e+00> : vector<4x8x16xf32>
    %603 = tpu.matmul %602, %590, %cst_235 {dimension_numbers = #tpu.dot_dimension_numbers<[2], [1], [1], [2], [0, 0, 0, 1, 1, 2], [0], [0]>} : vector<4x8x8xbf16>, vector<4x8x16xbf16>, vector<4x8x16xf32> -> vector<4x8x16xf32>
    "tpu.trace_stop"() : () -> ()
    %604 = tpu.concatenate %491, %507, %523, %539, %555, %571, %587, %603 in 2 : vector<4x8x16xf32>, vector<4x8x16xf32>, vector<4x8x16xf32>, vector<4x8x16xf32>, vector<4x8x16xf32>, vector<4x8x16xf32>, vector<4x8x16xf32>, vector<4x8x16xf32> -> vector<4x8x128xf32>
    %605 = vector.shape_cast %604 : vector<4x8x128xf32> to vector<32x128xf32>
    %606 = arith.truncf %605 : vector<32x128xf32> to vector<32x128xbf16>
    %cst_236 = arith.constant dense<0.000000e+00> : vector<32x128xf32>
    %607 = tpu.matmul %606, %451, %cst_236 {dimension_numbers = #tpu.dot_dimension_numbers<[1], [0], [0], [1], [0, 0, 1, 1], [], []>} : vector<32x128xbf16>, vector<128x128xbf16>, vector<32x128xf32> -> vector<32x128xf32>
    %608 = vector.broadcast %453 : vector<1x128xf32> to vector<32x128xf32>
    %609 = arith.addf %607, %608 : vector<32x128xf32>
    %610 = arith.addf %445, %609 : vector<32x128xf32>
    %cst_237 = arith.constant dense<0.000000e+00> : vector<32xf32>
    %611 = vector.multi_reduction <add>, %610, %cst_237 [1] : vector<32x128xf32> to vector<32xf32>
    %612 = vector.shape_cast %611 : vector<32xf32> to vector<32x1xf32>
    %cst_238 = arith.constant 1.280000e+02 : f32
    %613 = vector.broadcast %cst_238 : f32 to vector<32x1xf32>
    %614 = arith.divf %612, %613 : vector<32x1xf32>
    %615 = arith.mulf %610, %610 : vector<32x128xf32>
    %cst_239 = arith.constant dense<0.000000e+00> : vector<32xf32>
    %616 = vector.multi_reduction <add>, %615, %cst_239 [1] : vector<32x128xf32> to vector<32xf32>
    %617 = vector.shape_cast %616 : vector<32xf32> to vector<32x1xf32>
    %cst_240 = arith.constant 1.280000e+02 : f32
    %618 = vector.broadcast %cst_240 : f32 to vector<32x1xf32>
    %619 = arith.divf %617, %618 : vector<32x1xf32>
    %620 = arith.mulf %614, %614 : vector<32x1xf32>
    %621 = arith.subf %619, %620 : vector<32x1xf32>
    %622 = vector.broadcast %614 : vector<32x1xf32> to vector<32x128xf32>
    %623 = arith.subf %610, %622 : vector<32x128xf32>
    %cst_241 = arith.constant 9.99999974E-6 : f32
    %624 = vector.broadcast %cst_241 : f32 to vector<32x1xf32>
    %625 = arith.addf %621, %624 : vector<32x1xf32>
    %626 = math.rsqrt %625 : vector<32x1xf32>
    %627 = vector.broadcast %626 : vector<32x1xf32> to vector<32x128xf32>
    %628 = arith.mulf %623, %627 : vector<32x128xf32>
    %629 = vector.broadcast %455 : vector<1x128xf32> to vector<32x128xf32>
    %630 = arith.mulf %628, %629 : vector<32x128xf32>
    %631 = vector.broadcast %457 : vector<1x128xf32> to vector<32x128xf32>
    %632 = arith.addf %630, %631 : vector<32x128xf32>
    %633 = arith.truncf %632 : vector<32x128xf32> to vector<32x128xbf16>
    %cst_242 = arith.constant dense<0.000000e+00> : vector<32x256xf32>
    %634 = tpu.matmul %633, %459, %cst_242 {dimension_numbers = #tpu.dot_dimension_numbers<[1], [0], [0], [1], [0, 0, 1, 1], [], []>} : vector<32x128xbf16>, vector<128x256xbf16>, vector<32x256xf32> -> vector<32x256xf32>
    %635 = vector.broadcast %461 : vector<1x256xf32> to vector<32x256xf32>
    %636 = arith.addf %634, %635 : vector<32x256xf32>
    %cst_243 = arith.constant 0.000000e+00 : f32
    %637 = vector.broadcast %cst_243 : f32 to vector<32x256xf32>
    %638 = arith.maximumf %636, %637 : vector<32x256xf32>
    %639 = arith.truncf %638 : vector<32x256xf32> to vector<32x256xbf16>
    %cst_244 = arith.constant dense<0.000000e+00> : vector<32x128xf32>
    %640 = tpu.matmul %639, %463, %cst_244 {dimension_numbers = #tpu.dot_dimension_numbers<[1], [0], [0], [1], [0, 0, 1, 1], [], []>} : vector<32x256xbf16>, vector<256x128xbf16>, vector<32x128xf32> -> vector<32x128xf32>
    %641 = vector.broadcast %465 : vector<1x128xf32> to vector<32x128xf32>
    %642 = arith.addf %640, %641 : vector<32x128xf32>
    %643 = arith.addf %632, %642 : vector<32x128xf32>
    %cst_245 = arith.constant dense<0.000000e+00> : vector<32xf32>
    %644 = vector.multi_reduction <add>, %643, %cst_245 [1] : vector<32x128xf32> to vector<32xf32>
    %645 = vector.shape_cast %644 : vector<32xf32> to vector<32x1xf32>
    %cst_246 = arith.constant 1.280000e+02 : f32
    %646 = vector.broadcast %cst_246 : f32 to vector<32x1xf32>
    %647 = arith.divf %645, %646 : vector<32x1xf32>
    %648 = arith.mulf %643, %643 : vector<32x128xf32>
    %cst_247 = arith.constant dense<0.000000e+00> : vector<32xf32>
    %649 = vector.multi_reduction <add>, %648, %cst_247 [1] : vector<32x128xf32> to vector<32xf32>
    %650 = vector.shape_cast %649 : vector<32xf32> to vector<32x1xf32>
    %cst_248 = arith.constant 1.280000e+02 : f32
    %651 = vector.broadcast %cst_248 : f32 to vector<32x1xf32>
    %652 = arith.divf %650, %651 : vector<32x1xf32>
    %653 = arith.mulf %647, %647 : vector<32x1xf32>
    %654 = arith.subf %652, %653 : vector<32x1xf32>
    %655 = vector.broadcast %647 : vector<32x1xf32> to vector<32x128xf32>
    %656 = arith.subf %643, %655 : vector<32x128xf32>
    %cst_249 = arith.constant 9.99999974E-6 : f32
    %657 = vector.broadcast %cst_249 : f32 to vector<32x1xf32>
    %658 = arith.addf %654, %657 : vector<32x1xf32>
    %659 = math.rsqrt %658 : vector<32x1xf32>
    %660 = vector.broadcast %659 : vector<32x1xf32> to vector<32x128xf32>
    %661 = arith.mulf %656, %660 : vector<32x128xf32>
    %662 = vector.broadcast %467 : vector<1x128xf32> to vector<32x128xf32>
    %663 = arith.mulf %661, %662 : vector<32x128xf32>
    %664 = vector.broadcast %469 : vector<1x128xf32> to vector<32x128xf32>
    %665 = arith.addf %663, %664 : vector<32x128xf32>
    %c0_250 = arith.constant 0 : index
    %c0_251 = arith.constant 0 : index
    %666 = vector.load %arg14[%c0_250, %c0_251] : memref<32x128xf32, #tpu.memory_space<vmem>>, vector<32x128xf32>
    tpu.vector_store %arg14[%c0_250, %c0_251], %665 {strides = array<i32>} : memref<32x128xf32, #tpu.memory_space<vmem>>, vector<32x128xf32>,
    return
  }
}

</mosaic_0001>

<bundles_post_ra>
// kernel: transformer_forward.1
= control target key start
LH: loop header
LB: loop body
LE: loop exit
PB: predicated region body
PF: predicated region fallthrough
CT: control target
= control target key end

     0   :  { %19 = vsyncpa [#allocation3], 0  ;;  %s19824_s0 = inlined_call_operand.vmem [shape: f32[8,128], index: 0, kind: input, shape index: {}]   ;;  %s19825_s1 = inlined_call_operand.vmem [shape: f32[4,8,128], index: 1, kind: input, shape index: {}]   ;;  %s19826_s2 = inlined_call_operand.hbm [shape: bf16[3,128,384], index: 2, kind: input, shape index: {}]   ;;  %s19827_s3 = inlined_call_operand.vmem [shape: f32[3,1,384], index: 3, kind: input, shape index: {}]   ;;  %s19828_s4 = inlined_call_operand.hbm [shape: bf16[3,128,128], index: 4, kind: input, shape index: {}]   ;;  %s19829_s5 = inlined_call_operand.vmem [shape: f32[3,1,128], index: 5, kind: input, shape index: {}]   ;;  %s19830_s6 = inlined_call_operand.vmem [shape: f32[3,1,128], index: 6, kind: input, shape index: {}]   ;;  %s19831_s7 = inlined_call_operand.vmem [shape: f32[3,1,128], index: 7, kind: input, shape index: {}]   ;;  %s19832_s8 = inlined_call_operand.hbm [shape: bf16[3,128,256], index: 8, kind: input, shape index: {}]   ;;  %s19833_s9 = inlined_call_operand.vmem [shape: f32[3,1,256], index: 9, kind: input, shape index: {}]   ;;  %s19834_s10 = inlined_call_operand.hbm [shape: bf16[3,256,128], index: 10, kind: input, shape index: {}]   ;;  %s19835_s11 = inlined_call_operand.vmem [shape: f32[3,1,128], index: 11, kind: input, shape index: {}]   ;;  %s19836_s12 = inlined_call_operand.vmem [shape: f32[3,1,128], index: 12, kind: input, shape index: {}]   ;;  %s19837_s13 = inlined_call_operand.vmem [shape: f32[3,1,128], index: 13, kind: input, shape index: {}]   ;;  %s19838_s14 = inlined_call_operand.vmem [shape: f32[32,128], index: 14, kind: output, shape index: {}]  }
   0x1   :  { %20 = vsyncpa [#allocation5], 0 }
   0x2   :  { %21 = vsyncpa [#allocation8], 0  ;;  %s17096_s29 = smov [#allocation4]  }
   0x3   :  { %s45_s30 = sshll.u32 %s17096_s29, 4  ;;  %s46_s30 = int_to_ptr.vmem [resolvable:$true] %s45_s30 }
   0x4   :  { %s17018_s15 = scalar_lea.vmem %s46_s30, 3072  ;;  %p17023_p1 = scmp.lt.s32.totalorder %s46_s30, %s46_s30 }
   0x5   :  { %p17019_p0 = scmp.ne.s32.totalorder %s46_s30, %s17018_s15  ;;  %p17024_p2 = scmp.lt.s32.totalorder %s17018_s15, %s17018_s15 }
   0x7   :  { %p17025_p3 = por %p17024_p2, %p17023_p1 }
   0x9   :  { %p17026_p4 = pnand %p17025_p3, %p17019_p0 }
   0xb   :  { %17029 = shalt.err (!%p17026_p4)
}
   0xc   :  { %s17097_s16 = smov 64   ;;  %s17098_s17 = smov 4  }
   0xd   :  { %51 = dma.hbm_to_vmem [thread:$0]  %s19828_s4, 3072, %s46_s30, [#allocation5], %s17097_s16, %s17097_s16, %s17098_s17  }
   0xe   :  { %s17099_s20 = smov [#allocation2]  }
   0xf   :  { %s31_s21 = sshll.u32 %s17099_s20, 4  ;;  %s32_s21 = int_to_ptr.vmem [resolvable:$true] %s31_s21 }
  0x10   :  { %s17038_s22 = scalar_lea.vmem %s32_s21, 9216  ;;  %p17043_p6 = scmp.lt.s32.totalorder %s32_s21, %s32_s21 }
  0x11   :  { %p17039_p5 = scmp.ne.s32.totalorder %s32_s21, %s17038_s22  ;;  %p17044_p7 = scmp.lt.s32.totalorder %s17038_s22, %s17038_s22 }
  0x13   :  { %p17045_p8 = por %p17044_p7, %p17043_p6 }
  0x15   :  { %p17046_p9 = pnand %p17045_p8, %p17039_p5 }
  0x17   :  { %17049 = shalt.err (!%p17046_p9)
}
  0x18   :  { %s17100_s23 = smov 192   ;;  %s17101_s24 = smov 12  }
  0x19   :  { %37 = dma.hbm_to_vmem [thread:$0]  %s19826_s2, 9216, %s32_s21, [#allocation3], %s17100_s23, %s17100_s23, %s17101_s24  }
  0x1a   :  { %s17102_s27 = smov [#allocation6]  }
  0x1b   :  { %s63_s28 = sshll.u32 %s17102_s27, 4  ;;  %s64_s28 = int_to_ptr.vmem [resolvable:$true] %s63_s28 }
  0x1c   :  { %s17058_s4 = scalar_lea.vmem %s64_s28, 6144  ;;  %p17063_p11 = scmp.lt.s32.totalorder %s64_s28, %s64_s28 }
  0x1d   :  { %p17059_p10 = scmp.ne.s32.totalorder %s64_s28, %s17058_s4  ;;  %p17064_p12 = scmp.lt.s32.totalorder %s17058_s4, %s17058_s4 }
  0x1f   :  { %p17065_p13 = por %p17064_p12, %p17063_p11 }
  0x21   :  { %p17066_p0 = pnand %p17065_p13, %p17059_p10 }
  0x23   :  { %17069 = shalt.err (!%p17066_p0)
}
  0x24   :  { %s17103_s29 = smov 128   ;;  %s17104_s30 = smov 8  }
  0x25   :  { %69 = dma.hbm_to_vmem [thread:$0]  %s19832_s8, 6144, %s64_s28, [#allocation5], %s17103_s29, %s17103_s29, %s17104_s30  }
  0x26   :  { %s17105_s19 = smov [#allocation7]  }
  0x27   :  { %s77_s20 = sshll.u32 %s17105_s19, 4  ;;  %s78_s20 = int_to_ptr.vmem [resolvable:$true] %s77_s20 }
  0x28   :  { %s17078_s2 = scalar_lea.vmem %s78_s20, 6144  ;;  %p17083_p2 = scmp.lt.s32.totalorder %s78_s20, %s78_s20 }
  0x29   :  { %p17079_p1 = scmp.ne.s32.totalorder %s78_s20, %s17078_s2  ;;  %p17084_p3 = scmp.lt.s32.totalorder %s17078_s2, %s17078_s2 }
  0x2b   :  { %p17085_p4 = por %p17084_p3, %p17083_p2 }
  0x2d   :  { %p17086_p5 = pnand %p17085_p4, %p17079_p1 }
  0x2f   :  { %17089 = shalt.err (!%p17086_p5)
}
  0x30   :  { %83 = dma.hbm_to_vmem [thread:$0]  %s19834_s10, 6144, %s78_s20, [#allocation8], %s17097_s16, %s17097_s16, %s17098_s17  }
  0x31   :  { %17090 = dma.done.wait [#allocation3], 9216  }
  0x32   :  { %17091 = vsyncadd [#allocation3], 4294958080 }
  0x33   :  { %17092 = dma.done.wait [#allocation5], 9216  }
  0x34   :  { %17093 = vsyncadd [#allocation5], 4294958080 }
  0x35   :  { %17094 = dma.done.wait [#allocation8], 6144  }
  0x36   :  { %17095 = vsyncadd [#allocation8], 4294961152  ;;  %v19839_v0 = vmov 0   ;;  %v16338_v1 = vld [vmem:[#allocation2 + $0xac] ss:$12 sps:$4 sm:$0xff]   ;;  %v103_v8 = vld [vmem:[%s19825_s1] sm:$0xff]  ;;  %v219_v37 = vlaneseq }
  0x37   :  { %394 = vmatprep.mubr.bf16.mxu0 %v19839_v0  ;;  %v16340_v2 = vld [vmem:[#allocation2 + $0xa8] ss:$12 sps:$4 sm:$0xff]   ;;  %362 = vmatprep.subr.bf16.mxu0 %v16338_v1  ;;  %v16343_v4 = vld [vmem:[#allocation2 + $0x90] ss:$12 sps:$4 sm:$0xff]   ;;  %v16346_v6 = vld [vmem:[#allocation2 + $0x78] ss:$12 sps:$4 sm:$0xff]  }
  0x38   :  { %v16341_v3 = vld [vmem:[#allocation2 + $0x94] ss:$12 sps:$4 sm:$0xff]   ;;  %363 = vmatpush1.bf16.msra.mxu0 %v16340_v2  ;;  %v16344_v5 = vld [vmem:[#allocation2 + $0x7c] ss:$12 sps:$4 sm:$0xff]   ;;  %v16347_v7 = vld [vmem:[#allocation2 + $0x64] ss:$12 sps:$4 sm:$0xff]  }
  0x39   :  { %364 = vmatprep.subr.bf16.mxu0 %v16341_v3  ;;  %v16349_v9 = vld [vmem:[#allocation2 + $0x60] ss:$12 sps:$4 sm:$0xff]   ;;  %v16362_v15 = vld [vmem:[#allocation2 + $0xb0] ss:$12 sps:$4 sm:$0xff]   ;;  %v16363_v16 = vld [vmem:[#allocation2 + $0x98] ss:$12 sps:$4 sm:$0xff]  }
  0x3a   :  { %v104_v10 = vld [vmem:[%s19825_s1 + $0x8] sm:$0xff]  ;;  %v107_v11 = vld [vmem:[%s19824_s0] sm:$0xff]  ;;  %14837 = vmatprep.subr.bf16.mxu1 %v16362_v15  ;;  %v16355_v20 = vld [vmem:[#allocation2 + $0x30] ss:$12 sps:$4 sm:$0xff]   ;;  %v17107_v35 = vmov 0.0   ;;  %vm17108_vm0 = vmmov 0  }
  0x3b   :  { %v16350_v12 = vld [vmem:[#allocation2 + $0x4c] ss:$12 sps:$4 sm:$0xff]   ;;  %v17218_v13 = vadd.f32 %v107_v11, %v103_v8  ;;  %v17220_v14 = vadd.f32 %v107_v11, %v104_v10  ;;  %v16352_v17 = vld [vmem:[#allocation2 + $0x48] ss:$12 sps:$4 sm:$0xff]   ;;  %14838 = vmatpush3.bf16.msra.mxu1 %v16362_v15  ;;  %v16359_v25 = vld [vmem:[#allocation2 + $0x4] ss:$12 sps:$4 sm:$0xff]  }
  0x3c   :  { %365 = vmatpush1.bf16.msra.mxu0 %v16343_v4  ;;  %v16353_v19 = vld [vmem:[#allocation2 + $0x34] ss:$12 sps:$4 sm:$0xff]   ;;  %14839 = vmatprep.subr.bf16.mxu1 %v16363_v16  ;;  %v16356_v22 = vld [vmem:[#allocation2 + $0x1c] ss:$12 sps:$4 sm:$0xff]   ;;  %v16358_v24 = vld [vmem:[#allocation2 + $0x18] ss:$12 sps:$4 sm:$0xff]  }
  0x3d   :  { %366 = vmatprep.subr.bf16.mxu0 %v16344_v5  ;;  %v216_v18 = vpack.c.bf16 %v17220_v14, %v17218_v13  ;;  %v16364_v21 = vld [vmem:[#allocation2 + $0x80] ss:$12 sps:$4 sm:$0xff]   ;;  %v16365_v23 = vld [vmem:[#allocation2 + $0x68] ss:$12 sps:$4 sm:$0xff]   ;;  %v16366_v26 = vld [vmem:[#allocation2 + $0x50] ss:$12 sps:$4 sm:$0xff]  }
  0x3e   :  { %v16361_v27 = vld [vmem:[#allocation2] ss:$12 sps:$4 sm:$0xff]   ;;  %v105_v28 = vld [vmem:[%s19825_s1 + $0x10] sm:$0xff]  ;;  %v106_v29 = vld [vmem:[%s19825_s1 + $0x18] sm:$0xff]  ;;  %v220_v38 = vshrl.u32 %v219_v37, 7  ;;  %vm476_vm1 = vcmask 130048  }
  0x3f   :  { %14853 = vmatprep.mubr.bf16.mxu1 %v216_v18  ;;  %14840 = vmatpush3.bf16.msra.mxu1 %v16363_v16  ;;  %v17230_v30 = vadd.f32 %v107_v11, %v105_v28  ;;  %v17232_v31 = vadd.f32 %v107_v11, %v106_v29  ;;  %v16367_v33 = vld [vmem:[#allocation2 + $0x38] ss:$12 sps:$4 sm:$0xff]   ;;  %v16368_v34 = vld [vmem:[#allocation2 + $0x20] ss:$12 sps:$4 sm:$0xff]   ;;  %v16369_v36 = vld [vmem:[#allocation2 + $0x8] ss:$12 sps:$4 sm:$0xff]  }
  0x40   :  { %367 = vmatpush1.bf16.msra.mxu0 %v16346_v6  ;;  %14841 = vmatprep.subr.bf16.mxu1 %v16364_v21  ;;  %v17243_v39 = vsub.s32 1, %v220_v38  ;;  %v144_v40 = vld [vmem:[%s19827_s3] sm:$0x7]  ;;  %v17249_v43 = vsub.s32 0, %v220_v38  ;;  %vm713_vm2 = vcmask 1043456   ;;  %vm661_vm3 = vcmask 64512  }
  0x41   :  { %368 = vmatprep.subr.bf16.mxu0 %v16347_v7  ;;  %v217_v32 = vpack.c.bf16 %v17232_v31, %v17230_v30  ;;  %s17109_s29 = smov 112   ;;  %s17110_s30 = smov 96   ;;  %vm4103_vm4 = vcmask 261120   ;;  %vm4108_vm5 = vcmask 392192   ;;  %vm4113_vm6 = vcmask 523264  }
  0x42   :  { %v226_v41 = vrot.slane %v144_v40, %v17243_v39  ;;  %v222_v47 = vrot.slane %v144_v40, %v17249_v43  ;;  %s17111_s15 = smov 80   ;;  %s17112_s18 = smov 48   ;;  %vm4118_vm7 = vcmask 654336   ;;  %vm4123_vm8 = vcmask 785408  }
  0x43   :  { %14842 = vmatpush3.bf16.msra.mxu1 %v16364_v21  ;;  %s17113_s19 = smov 32   ;;  %s17114_s20 = smov 16   ;;  %vm4128_vm9 = vcmask 916480  }
  0x44   :  { %369 = vmatpush1.bf16.msra.mxu0 %v16349_v9  ;;  %14843 = vmatprep.subr.bf16.mxu1 %v16365_v23  ;;  %v17296_v9 = vsub.s32 2, %v220_v38 }
  0x45   :  { %370 = vmatprep.subr.bf16.mxu0 %v16350_v12 }
  0x46   :  { %v230_v10 = vrot.slane %v144_v40, %v17296_v9 }
  0x47   :  { %14844 = vmatpush3.bf16.msra.mxu1 %v16365_v23 }
  0x48   :  { %371 = vmatpush1.bf16.msra.mxu0 %v16352_v17  ;;  %14845 = vmatprep.subr.bf16.mxu1 %v16366_v26 }
  0x49   :  { %372 = vmatprep.subr.bf16.mxu0 %v16353_v19 }
  0x4b   :  { %14846 = vmatpush3.bf16.msra.mxu1 %v16366_v26 }
  0x4c   :  { %373 = vmatpush1.bf16.msra.mxu0 %v16355_v20  ;;  %14847 = vmatprep.subr.bf16.mxu1 %v16367_v33 }
  0x4d   :  { %374 = vmatprep.subr.bf16.mxu0 %v16356_v22 }
  0x4f   :  { %14848 = vmatpush3.bf16.msra.mxu1 %v16367_v33 }
  0x50   :  { %375 = vmatpush1.bf16.msra.mxu0 %v16358_v24  ;;  %14849 = vmatprep.subr.bf16.mxu1 %v16368_v34 }
  0x51   :  { %376 = vmatprep.subr.bf16.mxu0 %v16359_v25 }
  0x53   :  { %14850 = vmatpush3.bf16.msra.mxu1 %v16368_v34 }
  0x54   :  { %377 = vmatpush1.bf16.msra.mxu0 %v16361_v27  ;;  %14851 = vmatprep.subr.bf16.mxu1 %v16369_v36 }
  0x55   :  { %14857 = vmatprep.subr.bf16.mxu0 %v17107_v35 }
  0x57   :  { %395 = vmatmul.mubr.bf16.vlgmr.msra.gmra.mxu0 %v216_v18  ;;  %14852 = vmatpush3.bf16.msra.mxu1 %v16369_v36 }
  0x58   :  { %404 = vmatprep.mubr.bf16.mxu0 %v19839_v0  ;;  %14869 = vmatprep.subr.bf16.mxu1 %v17107_v35 }
  0x5a   :  { %14854 = vmatmul.mubr.bf16.vlgmr.msra.gmra.mxu1 %v217_v32 }
  0x5b   :  { %14871 = vmatprep.mubr.msk.bf16.mxu1 %vm17108_vm0, %v17107_v35 }
  0x5f   :  { %405 = vmatmul.mubr.bf16.gmra.mxu0 %v217_v32 }
  0x60   :  { %14859 = vmatprep.mubr.msk.bf16.mxu0 %vm17108_vm0, %v17107_v35 }
 0x117   :  { %v396_v42 = vpop.f32.mrf.mxu0 }
 0x118   :  { %v397_v53 = vadd.f32 %v396_v42, %v222_v47 }
 0x119   :  { %v398_v44 = vpop.f32.mrf.mxu0 }
 0x11a   :  { %v399_v45 = vadd.f32 %v398_v44, %v226_v41  ;;  %v17259_v58 = vpack.c.bf16 %v397_v53, %v397_v53  ;;  %v14855_v11 = vpop.f32.mrf.mxu1 }
 0x11b   :  { %v400_v46 = vpop.f32.mrf.mxu0  ;;  %v17299_v12 = vadd.f32 %v14855_v11, %v230_v10 }
 0x11c   :  { %v17252_v48 = vpack.c.bf16 %v399_v45, %v399_v45  ;;  %v401_v2 = vadd.f32 %v400_v46, %v222_v47  ;;  %v449_v15 = vpop.f32.mrf.mxu1 }
 0x11d   :  { %v402_v49 = vpop.f32.mrf.mxu0  ;;  %v450_v19 = vadd.f32 %v449_v15, %v230_v10 }
 0x11e   :  { %v403_v50 = vadd.f32 %v402_v49, %v226_v41  ;;  %v481_v51 = vsel %vm476_vm1, %v17252_v48, 0  ;;  %v17277_v5 = vpack.c.bf16 %v401_v2, %v401_v2  ;;  %v14856_v16 = vpop.f32.mrf.mxu1 }
 0x11f   :  { %v406_v52 = vpop.f32.mrf.mxu0  ;;  %14858 = vmatpush3.bf16.xpose.msra.mxu0 %v481_v51  ;;  %v17301_v17 = vadd.f32 %v14856_v16, %v230_v10  ;;  %v17303_v21 = vpack.c.bf16 %v450_v19, %v450_v19 }
 0x120   :  { %14863 = vmatprep.subr.bf16.mxu0 %v17107_v35  ;;  %v17257_v55 = vpack.c.bf16 %v403_v50, %v403_v50  ;;  %v407_v61 = vadd.f32 %v406_v52, %v222_v47  ;;  %v452_v18 = vpop.f32.mrf.mxu1 }
 0x121   :  { %v408_v54 = vpop.f32.mrf.mxu0  ;;  %v453_v20 = vadd.f32 %v452_v18, %v230_v10  ;;  %v715_v23 = vsel %vm713_vm2, %v17303_v21, 0 }
 0x122   :  { %v409_v56 = vadd.f32 %v408_v54, %v226_v41  ;;  %v527_v62 = vsel %vm476_vm1, %v17257_v55, 0  ;;  %v17275_v4 = vpack.c.bf16 %v407_v61, %v407_v61 }
 0x123   :  { %v410_v57 = vpop.f32.mrf.mxu0  ;;  %v17305_v22 = vpack.c.bf16 %v453_v20, %v453_v20 }
 0x124   :  { %v17261_v59 = vpack.c.bf16 %v409_v56, %v409_v56  ;;  %v411_v7 = vadd.f32 %v410_v57, %v222_v47 }
 0x125   :  { %v412_v60 = vpop.f32.mrf.mxu0  ;;  %v761_v24 = vsel %vm713_vm2, %v17305_v22, 0 }
 0x126   :  { %14860 = vmatmul.mubr.msk.bf16.vlgmr.msra.gmra.mxu0 %vm476_vm1, %v17259_v58  ;;  %v573_v63 = vsel %vm476_vm1, %v17261_v59, 0  ;;  %v413_v1 = vadd.f32 %v412_v60, %v226_v41  ;;  %v17290_v8 = vpack.c.bf16 %v411_v7, %v411_v7 }
 0x127   :  { %14864 = vmatpush3.bf16.xpose.msra.mxu0 %v527_v62  ;;  %14870 = vmatpush3.bf16.xpose.msra.mxu1 %v573_v63 }
 0x128   :  { %v17269_v3 = vpack.c.bf16 %v413_v1, %v413_v1  ;;  %14865 = vmatprep.mubr.msk.bf16.mxu0 %vm17108_vm0, %v17107_v35  ;;  %14875 = vmatprep.subr.bf16.mxu0 %v17107_v35 }
 0x129   :  { %14881 = vmatprep.subr.bf16.mxu1 %v17107_v35 }
 0x12a   :  { %v619_v6 = vsel %vm476_vm1, %v17269_v3, 0 }
 0x12e   :  { %14866 = vmatmul.mubr.msk.bf16.vlgmr.msra.gmra.mxu0 %vm476_vm1, %v17277_v5  ;;  %14872 = vmatmul.mubr.msk.bf16.vlgmr.msra.gmra.mxu1 %vm476_vm1, %v17275_v4 }
 0x12f   :  { %14876 = vmatpush3.bf16.xpose.msra.mxu0 %v619_v6  ;;  %14877 = vmatprep.mubr.msk.bf16.mxu0 %vm17108_vm0, %v17107_v35 }
 0x130   :  { %14887 = vmatprep.subr.bf16.mxu0 %v17107_v35  ;;  %14883 = vmatprep.mubr.msk.bf16.mxu1 %vm17108_vm0, %v17107_v35 }
 0x131   :  { %14882 = vmatpush3.bf16.msra.mxu1 %v715_v23 }
 0x132   :  { %14893 = vmatprep.subr.bf16.mxu1 %v17107_v35 }
 0x136   :  { %14878 = vmatmul.mubr.msk.bf16.vlgmr.msra.gmra.mxu0 %vm476_vm1, %v17290_v8 }
 0x137   :  { %14889 = vmatprep.mubr.msk.bf16.mxu0 %vm17108_vm0, %v17107_v35  ;;  %14888 = vmatpush3.bf16.msra.mxu0 %v761_v24 }
 0x138   :  { %14899 = vmatprep.subr.bf16.mxu0 %v17107_v35 }
 0x1e6   :  { %v517_v25 = vpop.f32.mrf.mxu0 }
 0x1e7   :  { %v662_v26 = vsel %vm661_vm3, %v517_v25, -inf }
 0x1e8   :  { %663 = vmax.xlane.f32.xlu0 %v662_v26  ;;  %v14861_v27 = vpop.f32.mrf.mxu0  ;;  %v17339_v26 = vpack.c.bf16 %v17299_v12, %v17299_v12  ;;  %v17349_v12 = vpack.c.bf16 %v17301_v17, %v17301_v17 }
 0x1ea   :  { %v520_v28 = vpop.f32.mrf.mxu0 }
 0x1ec   :  { %v14862_v29 = vpop.f32.mrf.mxu0 }
 0x1ed   :  { %v807_v29 = vsel %vm713_vm2, %v17339_v26, 0 }
 0x1ee   :  { %v563_v32 = vpop.f32.mrf.mxu0  ;;  %v609_v33 = vpop.f32.mrf.mxu1 }
 0x1ef   :  { %v668_v34 = vsel %vm661_vm3, %v609_v33, -inf  ;;  %v665_v36 = vsel %vm661_vm3, %v563_v32, -inf }
 0x1f0   :  { %669 = vmax.xlane.f32.xlu1 %v668_v34  ;;  %666 = vmax.xlane.f32.xlu0 %v665_v36  ;;  %v14867_v37 = vpop.f32.mrf.mxu0  ;;  %v14873_v38 = vpop.f32.mrf.mxu1 }
 0x1f2   :  { %v566_v40 = vpop.f32.mrf.mxu0  ;;  %v612_v41 = vpop.f32.mrf.mxu1 }
 0x1f4   :  { %v14868_v42 = vpop.f32.mrf.mxu0  ;;  %v14874_v44 = vpop.f32.mrf.mxu1 }
 0x1f5   :  { %v853_v44 = vsel %vm713_vm2, %v17349_v12, 0 }
 0x1f6   :  { %v655_v45 = vpop.f32.mrf.mxu0 }
 0x1f7   :  { %v671_v46 = vsel %vm661_vm3, %v655_v45, -inf }
 0x1f8   :  { %672 = vmax.xlane.f32.xlu1 %v671_v46  ;;  %v14879_v47 = vpop.f32.mrf.mxu0 }
 0x1fa   :  { %v658_v49 = vpop.f32.mrf.mxu0 }
 0x1fc   :  { %v14880_v50 = vpop.f32.mrf.mxu0 }
 0x271   :  { %v664_v51 = vpop.xlane.xlu0 %663 }
 0x272   :  { %v674_v52 = vsub.f32 %v517_v25, %v664_v51 }
 0x274   :  { %v678_v53 = vmul.f32 1.442695, %v674_v52 }
 0x276   :  { %16578 = vpow2.f32 %v678_v53 }
 0x279   :  { %v670_v54 = vpop.xlane.xlu1 %669  ;;  %v667_v56 = vpop.xlane.xlu0 %666 }
 0x27a   :  { %v676_v57 = vsub.f32 %v609_v33, %v670_v54  ;;  %v675_v60 = vsub.f32 %v563_v32, %v667_v56 }
 0x27c   :  { %v682_v61 = vmul.f32 1.442695, %v676_v57  ;;  %v680_v62 = vmul.f32 1.442695, %v675_v60 }
 0x27e   :  { %16580 = vpow2.f32 %v682_v61 }
 0x27f   :  { %16582 = vpow2.f32 %v680_v62 }
 0x281   :  { %v673_v11 = vpop.xlane.xlu1 %672 }
 0x282   :  { %v677_v15 = vsub.f32 %v655_v45, %v673_v11 }
 0x283   :  { %v16579_v63 = vpop.eup %16578 }
 0x284   :  { %v686_v1 = vsel %vm661_vm3, %v16579_v63, 0.0  ;;  %v684_v16 = vmul.f32 1.442695, %v677_v15 }
 0x285   :  { %687 = vadd.xlane.f32.xlu0 %v686_v1 }
 0x286   :  { %16584 = vpow2.f32 %v684_v16 }
 0x28b   :  { %v16581_v2 = vpop.eup %16580 }
 0x28c   :  { %v16583_v6 = vpop.eup %16582  ;;  %v692_v7 = vsel %vm661_vm3, %v16581_v2, 0.0 }
 0x28d   :  { %693 = vadd.xlane.f32.xlu0 %v692_v7  ;;  %v689_v10 = vsel %vm661_vm3, %v16583_v6, 0.0 }
 0x28e   :  { %690 = vadd.xlane.f32.xlu1 %v689_v10 }
 0x293   :  { %v16585_v18 = vpop.eup %16584 }
 0x294   :  { %v695_v19 = vsel %vm661_vm3, %v16585_v18, 0.0 }
 0x29f   :  { %951 = vrot.lane.b32.xlu1 %v17257_v55, %s17109_s29 }
 0x2a3   :  { %896 = vrot.lane.b32.xlu1 %v17259_v58, %s17109_s29  ;;  %899 = vrot.lane.b32.xlu0 %v17252_v48, %s17109_s29 }
 0x2a7   :  { %1003 = vrot.lane.b32.xlu0 %v17261_v59, %s17109_s29 }
 0x2ab   :  { %1000 = vrot.lane.b32.xlu0 %v17275_v4, %s17109_s29 }
 0x2c7   :  { %696 = vadd.xlane.f32.xlu1 %v695_v19 }
 0x2d8   :  { %948 = vrot.lane.b32.xlu1 %v17277_v5, %s17109_s29 }
 0x2dc   :  { %1055 = vrot.lane.b32.xlu1 %v17269_v3, %s17109_s29 }
 0x2e0   :  { %1052 = vrot.lane.b32.xlu1 %v17290_v8, %s17109_s29 }
 0x30e   :  { %v688_v20 = vpop.xlane.xlu0 %687 }
 0x30f   :  { %16586 = vrcp.f32 %v688_v20 }
 0x316   :  { %v694_v23 = vpop.xlane.xlu0 %693 }
 0x317   :  { %16588 = vrcp.f32 %v694_v23  ;;  %v691_v24 = vpop.xlane.xlu1 %690 }
 0x318   :  { %16590 = vrcp.f32 %v691_v24 }
 0x31a   :  { %v900_v36 = vpop.permute.xlu0 %899 }
 0x31b   :  { %v905_v41 = vsel %vm476_vm1, %v900_v36, 0  ;;  %v952_v42 = vpop.permute.xlu1 %951 }
 0x31c   :  { %v16587_v25 = vpop.eup %16586  ;;  %v957_v54 = vsel %vm476_vm1, %v952_v42, 0 }
 0x31d   :  { %v702_v27 = vmul.f32 %v16587_v25, %v16579_v63 }
 0x31e   :  { %v1004_v17 = vpop.permute.xlu0 %1003 }
 0x31f   :  { %v706_v28 = vpack.c.bf16 %v702_v27, %v702_v27  ;;  %v897_v45 = vpop.permute.xlu1 %896  ;;  %v1009_v46 = vsel %vm476_vm1, %v1004_v17, 0 }
 0x321   :  { %14884 = vmatmul.mubr.msk.bf16.vlgmr.msra.gmra.mxu1 %vm661_vm3, %v706_v28 }
 0x322   :  { %14894 = vmatpush3.bf16.msra.mxu1 %v807_v29  ;;  %14895 = vmatprep.mubr.msk.bf16.mxu1 %vm17108_vm0, %v17107_v35  ;;  %v1001_v47 = vpop.permute.xlu0 %1000 }
 0x323   :  { %14905 = vmatprep.subr.bf16.mxu1 %v17107_v35 }
 0x324   :  { %v16589_v32 = vpop.eup %16588 }
 0x325   :  { %v16591_v33 = vpop.eup %16590  ;;  %v704_v34 = vmul.f32 %v16589_v32, %v16581_v2 }
 0x326   :  { %v703_v37 = vmul.f32 %v16591_v33, %v16583_v6 }
 0x327   :  { %v708_v38 = vpack.c.bf16 %v704_v34, %v704_v34 }
 0x328   :  { %v707_v40 = vpack.c.bf16 %v703_v37, %v703_v37 }
 0x329   :  { %14896 = vmatmul.mubr.msk.bf16.vlgmr.msra.gmra.mxu1 %vm661_vm3, %v708_v38 }
 0x32a   :  { %14890 = vmatmul.mubr.msk.bf16.vlgmr.msra.gmra.mxu0 %vm661_vm3, %v707_v40  ;;  %14906 = vmatpush3.bf16.xpose.msra.mxu1 %v905_v41 }
 0x32b   :  { %14900 = vmatpush3.bf16.msra.mxu0 %v853_v44  ;;  %14907 = vmatprep.mubr.msk.bf16.mxu1 %vm17108_vm0, %v17107_v35 }
 0x32c   :  { %14917 = vmatprep.subr.bf16.mxu1 %v17107_v35  ;;  %14901 = vmatprep.mubr.msk.bf16.mxu0 %vm17108_vm0, %v17107_v35 }
 0x32d   :  { %14911 = vmatprep.subr.bf16.mxu0 %v17107_v35 }
 0x331   :  { %14908 = vmatmul.mubr.msk.bf16.vlgmr.msra.gmra.mxu1 %vm476_vm1, %v897_v45 }
 0x332   :  { %14918 = vmatpush3.bf16.xpose.msra.mxu1 %v1009_v46  ;;  %14919 = vmatprep.mubr.msk.bf16.mxu1 %vm17108_vm0, %v17107_v35 }
 0x333   :  { %14929 = vmatprep.subr.bf16.mxu1 %v17107_v35 }
 0x339   :  { %14920 = vmatmul.mubr.msk.bf16.vlgmr.msra.gmra.mxu1 %vm476_vm1, %v1001_v47 }
 0x33a   :  { %14931 = vmatprep.mubr.msk.bf16.mxu1 %vm17108_vm0, %v17107_v35 }
 0x350   :  { %v697_v49 = vpop.xlane.xlu1 %696 }
 0x351   :  { %16592 = vrcp.f32 %v697_v49 }
 0x354   :  { %v949_v53 = vpop.permute.xlu1 %948 }
 0x358   :  { %v1056_v56 = vpop.permute.xlu1 %1055 }
 0x359   :  { %v1061_v57 = vsel %vm476_vm1, %v1056_v56, 0 }
 0x35c   :  { %v1053_v60 = vpop.permute.xlu1 %1052 }
 0x35e   :  { %v16593_v50 = vpop.eup %16592 }
 0x35f   :  { %v705_v51 = vmul.f32 %v16593_v50, %v16585_v18 }
 0x361   :  { %v709_v52 = vpack.c.bf16 %v705_v51, %v705_v51 }
 0x363   :  { %14902 = vmatmul.mubr.msk.bf16.vlgmr.msra.gmra.mxu0 %vm661_vm3, %v709_v52 }
 0x364   :  { %14912 = vmatpush3.bf16.xpose.msra.mxu0 %v957_v54  ;;  %14913 = vmatprep.mubr.msk.bf16.mxu0 %vm17108_vm0, %v17107_v35 }
 0x365   :  { %14923 = vmatprep.subr.bf16.mxu0 %v17107_v35 }
 0x36b   :  { %14914 = vmatmul.mubr.msk.bf16.vlgmr.msra.gmra.mxu0 %vm476_vm1, %v949_v53 }
 0x36c   :  { %14924 = vmatpush3.bf16.xpose.msra.mxu0 %v1061_v57  ;;  %14925 = vmatprep.mubr.msk.bf16.mxu0 %vm17108_vm0, %v17107_v35 }
 0x36d   :  { %14935 = vmatprep.subr.bf16.mxu0 %v17107_v35 }
 0x373   :  { %14926 = vmatmul.mubr.msk.bf16.vlgmr.msra.gmra.mxu0 %vm476_vm1, %v1053_v60 }
 0x374   :  { %14937 = vmatprep.mubr.msk.bf16.mxu0 %vm17108_vm0, %v17107_v35 }
 0x3e1   :  { %v17383_v61 = vpop.f32.mrf.mxu1 }
 0x3e3   :  { %v14885_v62 = vpop.f32.mrf.mxu1 }
 0x3e5   :  { %v754_v63 = vpop.f32.mrf.mxu1 }
 0x3e7   :  { %v14886_v1 = vpop.f32.mrf.mxu1 }
 0x3e9   :  { %v17385_v2 = vpop.f32.mrf.mxu1 }
 0x3ea   :  { %v17387_v6 = vpop.f32.mrf.mxu0 }
 0x3eb   :  { %v14897_v7 = vpop.f32.mrf.mxu1 }
 0x3ec   :  { %v14891_v10 = vpop.f32.mrf.mxu0 }
 0x3ed   :  { %v846_v11 = vpop.f32.mrf.mxu1 }
 0x3ee   :  { %v800_v15 = vpop.f32.mrf.mxu0 }
 0x3ef   :  { %v14898_v16 = vpop.f32.mrf.mxu1 }
 0x3f0   :  { %v14892_v18 = vpop.f32.mrf.mxu0 }
 0x3f1   :  { %v941_v19 = vpop.f32.mrf.mxu1 }
 0x3f2   :  { %v1103_v20 = vsel %vm661_vm3, %v941_v19, -inf }
 0x3f3   :  { %1104 = vmax.xlane.f32.xlu0 %v1103_v20  ;;  %v14909_v23 = vpop.f32.mrf.mxu1 }
 0x3f5   :  { %v944_v24 = vpop.f32.mrf.mxu1 }
 0x3f7   :  { %v14910_v25 = vpop.f32.mrf.mxu1 }
 0x3f9   :  { %v1045_v27 = vpop.f32.mrf.mxu1 }
 0x3fa   :  { %v1109_v28 = vsel %vm661_vm3, %v1045_v27, -inf }
 0x3fb   :  { %1110 = vmax.xlane.f32.xlu0 %v1109_v28  ;;  %v14921_v29 = vpop.f32.mrf.mxu1 }
 0x3fd   :  { %v1048_v32 = vpop.f32.mrf.mxu1 }
 0x3ff   :  { %v14922_v33 = vpop.f32.mrf.mxu1 }
 0x423   :  { %v17391_v34 = vpop.f32.mrf.mxu0 }
 0x425   :  { %v14903_v36 = vpop.f32.mrf.mxu0 }
 0x427   :  { %v892_v37 = vpop.f32.mrf.mxu0 }
 0x429   :  { %v14904_v38 = vpop.f32.mrf.mxu0 }
 0x42b   :  { %v993_v40 = vpop.f32.mrf.mxu0 }
 0x42c   :  { %v1106_v41 = vsel %vm661_vm3, %v993_v40, -inf }
 0x42d   :  { %1107 = vmax.xlane.f32.xlu1 %v1106_v41  ;;  %v14915_v42 = vpop.f32.mrf.mxu0 }
 0x42f   :  { %v996_v44 = vpop.f32.mrf.mxu0 }
 0x431   :  { %v14916_v17 = vpop.f32.mrf.mxu0 }
 0x433   :  { %v1097_v45 = vpop.f32.mrf.mxu0 }
 0x434   :  { %v1112_v46 = vsel %vm661_vm3, %v1097_v45, -inf }
 0x435   :  { %1113 = vmax.xlane.f32.xlu0 %v1112_v46  ;;  %v14927_v47 = vpop.f32.mrf.mxu0 }
 0x437   :  { %v1100_v49 = vpop.f32.mrf.mxu0 }
 0x439   :  { %v14928_v50 = vpop.f32.mrf.mxu0 }
 0x43e   :  { %1201 = vrot.lane.b32.xlu1 %v17305_v22, %s17109_s29 }
 0x442   :  { %1250 = vrot.lane.b32.xlu1 %v17339_v26, %s17109_s29 }
 0x446   :  { %1299 = vrot.lane.b32.xlu1 %v17349_v12, %s17109_s29 }
 0x47c   :  { %v1105_v51 = vpop.xlane.xlu0 %1104 }
 0x47d   :  { %v1115_v52 = vsub.f32 %v941_v19, %v1105_v51 }
 0x47f   :  { %v1119_v53 = vmul.f32 1.442695, %v1115_v52 }
 0x481   :  { %16594 = vpow2.f32 %v1119_v53 }
 0x484   :  { %v1111_v57 = vpop.xlane.xlu0 %1110 }
 0x485   :  { %v1117_v60 = vsub.f32 %v1045_v27, %v1111_v57 }
 0x487   :  { %v1123_v62 = vmul.f32 1.442695, %v1117_v60 }
 0x489   :  { %16596 = vpow2.f32 %v1123_v62 }
 0x48e   :  { %v16595_v54 = vpop.eup %16594 }
 0x48f   :  { %v1127_v56 = vsel %vm661_vm3, %v16595_v54, 0.0 }
 0x490   :  { %1128 = vadd.xlane.f32.xlu0 %v1127_v56 }
 0x496   :  { %v16597_v15 = vpop.eup %16596 }
 0x497   :  { %v1133_v16 = vsel %vm661_vm3, %v16597_v15, 0.0 }
 0x4a6   :  { %1152 = vrot.lane.b32.xlu0 %v17303_v21, %s17109_s29 }
 0x4b6   :  { %v1108_v63 = vpop.xlane.xlu1 %1107 }
 0x4b7   :  { %v1116_v1 = vsub.f32 %v993_v40, %v1108_v63 }
 0x4b9   :  { %v1121_v7 = vmul.f32 1.442695, %v1116_v1 }
 0x4ba   :  { %v1202_v10 = vpop.permute.xlu1 %1201 }
 0x4bb   :  { %16598 = vpow2.f32 %v1121_v7  ;;  %v1207_v11 = vsel %vm713_vm2, %v1202_v10, 0 }
 0x4bc   :  { %14936 = vmatpush3.bf16.msra.mxu0 %v1207_v11 }
 0x4bd   :  { %14947 = vmatprep.subr.bf16.mxu0 %v17107_v35 }
 0x4be   :  { %v1114_v20 = vpop.xlane.xlu0 %1113  ;;  %v1251_v37 = vpop.permute.xlu1 %1250 }
 0x4bf   :  { %v1118_v23 = vsub.f32 %v1097_v45, %v1114_v20  ;;  %v1256_v40 = vsel %vm713_vm2, %v1251_v37, 0 }
 0x4c1   :  { %v1125_v24 = vmul.f32 1.442695, %v1118_v23 }
 0x4c2   :  { %v1300_v42 = vpop.permute.xlu1 %1299 }
 0x4c3   :  { %16600 = vpow2.f32 %v1125_v24 }
 0x4c5   :  { %1134 = vadd.xlane.f32.xlu0 %v1133_v16 }
 0x4c8   :  { %v16599_v18 = vpop.eup %16598 }
 0x4c9   :  { %v1130_v19 = vsel %vm661_vm3, %v16599_v18, 0.0 }
 0x4ca   :  { %1131 = vadd.xlane.f32.xlu1 %v1130_v19 }
 0x4d0   :  { %v16601_v25 = vpop.eup %16600 }
 0x4d1   :  { %v1136_v27 = vsel %vm661_vm3, %v16601_v25, 0.0 }
 0x4db   :  { %1399 = vrot.lane.b32.xlu1 %v17257_v55, %s17110_s30  ;;  %1349 = vrot.lane.b32.xlu0 %v17252_v48, %s17110_s30 }
 0x4df   :  { %1347 = vrot.lane.b32.xlu0 %v17259_v58, %s17110_s30 }
 0x4e3   :  { %1449 = vrot.lane.b32.xlu0 %v17261_v59, %s17110_s30 }
 0x4e7   :  { %1447 = vrot.lane.b32.xlu0 %v17275_v4, %s17110_s30 }
 0x4ff   :  { %1137 = vadd.xlane.f32.xlu1 %v1136_v27 }
 0x510   :  { %1397 = vrot.lane.b32.xlu1 %v17277_v5, %s17110_s30 }
 0x514   :  { %1499 = vrot.lane.b32.xlu1 %v17269_v3, %s17110_s30 }
 0x518   :  { %1497 = vrot.lane.b32.xlu1 %v17290_v8, %s17110_s30 }
 0x519   :  { %v1129_v28 = vpop.xlane.xlu0 %1128 }
 0x51a   :  { %16602 = vrcp.f32 %v1129_v28 }
 0x51d   :  { %v1153_v29 = vpop.permute.xlu0 %1152 }
 0x51e   :  { %v1158_v32 = vsel %vm713_vm2, %v1153_v29, 0 }
 0x51f   :  { %14930 = vmatpush3.bf16.msra.mxu1 %v1158_v32 }
 0x520   :  { %14941 = vmatprep.subr.bf16.mxu1 %v17107_v35 }
 0x527   :  { %v16603_v33 = vpop.eup %16602 }
 0x528   :  { %v1143_v36 = vmul.f32 %v16603_v33, %v16595_v54  ;;  %v1305_v54 = vsel %vm713_vm2, %v1300_v42, 0 }
 0x52a   :  { %v1147_v38 = vpack.c.bf16 %v1143_v36, %v1143_v36 }
 0x52c   :  { %14932 = vmatmul.mubr.msk.bf16.vlgmr.msra.gmra.mxu1 %vm661_vm3, %v1147_v38 }
 0x52d   :  { %14942 = vmatpush3.bf16.msra.mxu1 %v1256_v40  ;;  %14943 = vmatprep.mubr.msk.bf16.mxu1 %vm17108_vm0, %v17107_v35 }
 0x52e   :  { %14953 = vmatprep.subr.bf16.mxu1 %v17107_v35 }
 0x54e   :  { %v1135_v41 = vpop.xlane.xlu0 %1134 }
 0x54f   :  { %16604 = vrcp.f32 %v1135_v41 }
 0x552   :  { %v1350_v17 = vpop.permute.xlu0 %1349 }
 0x553   :  { %v1132_v44 = vpop.xlane.xlu1 %1131  ;;  %v1355_v51 = vsel %vm476_vm1, %v1350_v17, 0 }
 0x554   :  { %16606 = vrcp.f32 %v1132_v44 }
 0x556   :  { %v1348_v49 = vpop.permute.xlu0 %1347 }
 0x557   :  { %v1400_v62 = vpop.permute.xlu1 %1399 }
 0x55a   :  { %v1450_v56 = vpop.permute.xlu0 %1449 }
 0x55b   :  { %v1455_v57 = vsel %vm476_vm1, %v1450_v56, 0 }
 0x55c   :  { %v16605_v45 = vpop.eup %16604 }
 0x55d   :  { %v1145_v46 = vmul.f32 %v16605_v45, %v16597_v15  ;;  %v1405_v15 = vsel %vm476_vm1, %v1400_v62, 0 }
 0x55e   :  { %v1448_v60 = vpop.permute.xlu0 %1447 }
 0x55f   :  { %v1149_v47 = vpack.c.bf16 %v1145_v46, %v1145_v46 }
 0x561   :  { %v16607_v50 = vpop.eup %16606  ;;  %14944 = vmatmul.mubr.msk.bf16.vlgmr.msra.gmra.mxu1 %vm661_vm3, %v1149_v47 }
 0x562   :  { %14954 = vmatpush3.bf16.xpose.msra.mxu1 %v1355_v51  ;;  %v1144_v52 = vmul.f32 %v16607_v50, %v16599_v18  ;;  %14955 = vmatprep.mubr.msk.bf16.mxu1 %vm17108_vm0, %v17107_v35 }
 0x563   :  { %14965 = vmatprep.subr.bf16.mxu1 %v17107_v35 }
 0x564   :  { %v1148_v53 = vpack.c.bf16 %v1144_v52, %v1144_v52 }
 0x566   :  { %14938 = vmatmul.mubr.msk.bf16.vlgmr.msra.gmra.mxu0 %vm661_vm3, %v1148_v53 }
 0x567   :  { %14948 = vmatpush3.bf16.msra.mxu0 %v1305_v54  ;;  %14949 = vmatprep.mubr.msk.bf16.mxu0 %vm17108_vm0, %v17107_v35 }
 0x568   :  { %14959 = vmatprep.subr.bf16.mxu0 %v17107_v35 }
 0x569   :  { %14956 = vmatmul.mubr.msk.bf16.vlgmr.msra.gmra.mxu1 %vm476_vm1, %v1348_v49 }
 0x56a   :  { %14966 = vmatpush3.bf16.xpose.msra.mxu1 %v1455_v57  ;;  %14967 = vmatprep.mubr.msk.bf16.mxu1 %vm17108_vm0, %v17107_v35 }
 0x56b   :  { %14977 = vmatprep.subr.bf16.mxu1 %v17107_v35 }
 0x571   :  { %14968 = vmatmul.mubr.msk.bf16.vlgmr.msra.gmra.mxu1 %vm476_vm1, %v1448_v60 }
 0x572   :  { %14979 = vmatprep.mubr.msk.bf16.mxu1 %vm17108_vm0, %v17107_v35 }
 0x588   :  { %v1138_v63 = vpop.xlane.xlu1 %1137 }
 0x589   :  { %16608 = vrcp.f32 %v1138_v63 }
 0x58c   :  { %v1398_v11 = vpop.permute.xlu1 %1397 }
 0x590   :  { %v1500_v16 = vpop.permute.xlu1 %1499 }
 0x591   :  { %v1505_v18 = vsel %vm476_vm1, %v1500_v16, 0 }
 0x594   :  { %v1498_v19 = vpop.permute.xlu1 %1497 }
 0x596   :  { %v16609_v1 = vpop.eup %16608 }
 0x597   :  { %v1146_v7 = vmul.f32 %v16609_v1, %v16601_v25 }
 0x599   :  { %v1150_v10 = vpack.c.bf16 %v1146_v7, %v1146_v7 }
 0x59b   :  { %14950 = vmatmul.mubr.msk.bf16.vlgmr.msra.gmra.mxu0 %vm661_vm3, %v1150_v10 }
 0x59c   :  { %14960 = vmatpush3.bf16.xpose.msra.mxu0 %v1405_v15  ;;  %14961 = vmatprep.mubr.msk.bf16.mxu0 %vm17108_vm0, %v17107_v35 }
 0x59d   :  { %14971 = vmatprep.subr.bf16.mxu0 %v17107_v35 }
 0x5a3   :  { %14962 = vmatmul.mubr.msk.bf16.vlgmr.msra.gmra.mxu0 %vm476_vm1, %v1398_v11 }
 0x5a4   :  { %14972 = vmatpush3.bf16.xpose.msra.mxu0 %v1505_v18  ;;  %14973 = vmatprep.mubr.msk.bf16.mxu0 %vm17108_vm0, %v17107_v35 }
 0x5a5   :  { %14983 = vmatprep.subr.bf16.mxu0 %v17107_v35 }
 0x5ab   :  { %14974 = vmatmul.mubr.msk.bf16.vlgmr.msra.gmra.mxu0 %vm476_vm1, %v1498_v19 }
 0x5ac   :  { %14985 = vmatprep.mubr.msk.bf16.mxu0 %vm17108_vm0, %v17107_v35 }
 0x5ec   :  { %v17463_v20 = vpop.f32.mrf.mxu1 }
 0x5ee   :  { %v14933_v23 = vpop.f32.mrf.mxu1 }
 0x5f0   :  { %v1197_v24 = vpop.f32.mrf.mxu1 }
 0x5f2   :  { %v14934_v25 = vpop.f32.mrf.mxu1 }
 0x621   :  { %v17465_v27 = vpop.f32.mrf.mxu1 }
 0x623   :  { %v14945_v28 = vpop.f32.mrf.mxu1 }
 0x625   :  { %v1295_v29 = vpop.f32.mrf.mxu1 }
 0x626   :  { %v17467_v32 = vpop.f32.mrf.mxu0 }
 0x627   :  { %v16128_v33 = vpack.i.bf16 %v17467_v32, %v17463_v20  ;;  %v14946_v36 = vpop.f32.mrf.mxu1 }
 0x628   :  { %v14939_v37 = vpop.f32.mrf.mxu0 }
 0x629   :  { %v1391_v38 = vpop.f32.mrf.mxu1 }
 0x62a   :  { %v1246_v40 = vpop.f32.mrf.mxu0  ;;  %v1547_v41 = vsel %vm661_vm3, %v1391_v38, -inf }
 0x62b   :  { %1548 = vmax.xlane.f32.xlu0 %v1547_v41  ;;  %v14957_v42 = vpop.f32.mrf.mxu1 }
 0x62c   :  { %v14940_v44 = vpop.f32.mrf.mxu0 }
 0x62d   :  { %v1394_v17 = vpop.f32.mrf.mxu1 }
 0x62f   :  { %v14958_v45 = vpop.f32.mrf.mxu1 }
 0x631   :  { %v1491_v46 = vpop.f32.mrf.mxu1 }
 0x632   :  { %v1553_v47 = vsel %vm661_vm3, %v1491_v46, -inf }
 0x633   :  { %1554 = vmax.xlane.f32.xlu0 %v1553_v47  ;;  %v14969_v49 = vpop.f32.mrf.mxu1 }
 0x635   :  { %v1494_v50 = vpop.f32.mrf.mxu1 }
 0x637   :  { %v14970_v51 = vpop.f32.mrf.mxu1 }
 0x65b   :  { %v17473_v52 = vpop.f32.mrf.mxu0 }
 0x65d   :  { %v14951_v54 = vpop.f32.mrf.mxu0 }
 0x65f   :  { %v1344_v56 = vpop.f32.mrf.mxu0 }
 0x661   :  { %v14952_v57 = vpop.f32.mrf.mxu0 }
 0x663   :  { %v1441_v60 = vpop.f32.mrf.mxu0 }
 0x664   :  { %v1550_v62 = vsel %vm661_vm3, %v1441_v60, -inf }
 0x665   :  { %1551 = vmax.xlane.f32.xlu1 %v1550_v62  ;;  %v14963_v63 = vpop.f32.mrf.mxu0 }
 0x667   :  { %v1444_v1 = vpop.f32.mrf.mxu0 }
 0x669   :  { %v14964_v7 = vpop.f32.mrf.mxu0 }
 0x66b   :  { %v1541_v10 = vpop.f32.mrf.mxu0 }
 0x66c   :  { %v1556_v11 = vsel %vm661_vm3, %v1541_v10, -inf }
 0x66d   :  { %1557 = vmax.xlane.f32.xlu0 %v1556_v11  ;;  %v14975_v15 = vpop.f32.mrf.mxu0 }
 0x66f   :  { %v1544_v16 = vpop.f32.mrf.mxu0 }
 0x671   :  { %v14976_v18 = vpop.f32.mrf.mxu0 }
 0x676   :  { %1643 = vrot.lane.b32.xlu1 %v17305_v22, %s17110_s30 }
 0x67a   :  { %1691 = vrot.lane.b32.xlu1 %v17339_v26, %s17110_s30 }
 0x67e   :  { %1739 = vrot.lane.b32.xlu1 %v17349_v12, %s17110_s30 }
 0x6b4   :  { %v1549_v19 = vpop.xlane.xlu0 %1548 }
 0x6b5   :  { %v1559_v23 = vsub.f32 %v1391_v38, %v1549_v19 }
 0x6b7   :  { %v1563_v24 = vmul.f32 1.442695, %v1559_v23 }
 0x6b9   :  { %16610 = vpow2.f32 %v1563_v24 }
 0x6bc   :  { %v1555_v29 = vpop.xlane.xlu0 %1554 }
 0x6bd   :  { %v1561_v36 = vsub.f32 %v1491_v46, %v1555_v29 }
 0x6bf   :  { %v1567_v37 = vmul.f32 1.442695, %v1561_v36 }
 0x6c1   :  { %16612 = vpow2.f32 %v1567_v37 }
 0x6c6   :  { %v16611_v25 = vpop.eup %16610 }
 0x6c7   :  { %v1571_v28 = vsel %vm661_vm3, %v16611_v25, 0.0 }
 0x6c8   :  { %1572 = vadd.xlane.f32.xlu0 %v1571_v28 }
 0x6ce   :  { %v16613_v17 = vpop.eup %16612 }
 0x6cf   :  { %v1577_v45 = vsel %vm661_vm3, %v16613_v17, 0.0 }
 0x6de   :  { %1595 = vrot.lane.b32.xlu0 %v17303_v21, %s17110_s30 }
 0x6ee   :  { %v1552_v40 = vpop.xlane.xlu1 %1551 }
 0x6ef   :  { %v1560_v41 = vsub.f32 %v1441_v60, %v1552_v40 }
 0x6f1   :  { %v1565_v42 = vmul.f32 1.442695, %v1560_v41 }
 0x6f2   :  { %v1644_v44 = vpop.permute.xlu1 %1643 }
 0x6f3   :  { %16614 = vpow2.f32 %v1565_v42  ;;  %v1649_v38 = vsel %vm713_vm2, %v1644_v44, 0 }
 0x6f4   :  { %14984 = vmatpush3.bf16.msra.mxu0 %v1649_v38 }
 0x6f5   :  { %14995 = vmatprep.subr.bf16.mxu0 %v17107_v35 }
 0x6f6   :  { %v1558_v46 = vpop.xlane.xlu0 %1557  ;;  %v1692_v7 = vpop.permute.xlu1 %1691 }
 0x6f7   :  { %v1562_v50 = vsub.f32 %v1541_v10, %v1558_v46  ;;  %v1697_v11 = vsel %vm713_vm2, %v1692_v7, 0 }
 0x6f9   :  { %v1569_v51 = vmul.f32 1.442695, %v1562_v50 }
 0x6fa   :  { %v1740_v16 = vpop.permute.xlu1 %1739 }
 0x6fb   :  { %16616 = vpow2.f32 %v1569_v51  ;;  %v1745_v41 = vsel %vm713_vm2, %v1740_v16, 0 }
 0x6fd   :  { %1578 = vadd.xlane.f32.xlu0 %v1577_v45 }
 0x700   :  { %v16615_v47 = vpop.eup %16614 }
 0x701   :  { %v1574_v49 = vsel %vm661_vm3, %v16615_v47, 0.0 }
 0x702   :  { %1575 = vadd.xlane.f32.xlu1 %v1574_v49 }
 0x708   :  { %v16617_v54 = vpop.eup %16616 }
 0x709   :  { %v1580_v56 = vsel %vm661_vm3, %v16617_v54, 0.0 }
 0x713   :  { %1839 = vrot.lane.b32.xlu1 %v17257_v55, %s17111_s15  ;;  %1789 = vrot.lane.b32.xlu0 %v17252_v48, %s17111_s15 }
 0x717   :  { %1787 = vrot.lane.b32.xlu0 %v17259_v58, %s17111_s15 }
 0x71b   :  { %1889 = vrot.lane.b32.xlu0 %v17261_v59, %s17111_s15 }
 0x71f   :  { %1887 = vrot.lane.b32.xlu0 %v17275_v4, %s17111_s15 }
 0x737   :  { %1581 = vadd.xlane.f32.xlu1 %v1580_v56 }
 0x748   :  { %1837 = vrot.lane.b32.xlu1 %v17277_v5, %s17111_s15 }
 0x74c   :  { %1939 = vrot.lane.b32.xlu1 %v17269_v3, %s17111_s15 }
 0x750   :  { %1937 = vrot.lane.b32.xlu1 %v17290_v8, %s17111_s15 }
 0x751   :  { %v1573_v57 = vpop.xlane.xlu0 %1572 }
 0x752   :  { %16618 = vrcp.f32 %v1573_v57 }
 0x755   :  { %v1596_v60 = vpop.permute.xlu0 %1595 }
 0x756   :  { %v1601_v62 = vsel %vm713_vm2, %v1596_v60, 0 }
 0x757   :  { %14978 = vmatpush3.bf16.msra.mxu1 %v1601_v62 }
 0x758   :  { %14989 = vmatprep.subr.bf16.mxu1 %v17107_v35 }
 0x75f   :  { %v16619_v63 = vpop.eup %16618 }
 0x760   :  { %v1587_v1 = vmul.f32 %v16619_v63, %v16611_v25 }
 0x762   :  { %v1591_v10 = vpack.c.bf16 %v1587_v1, %v1587_v1 }
 0x764   :  { %14980 = vmatmul.mubr.msk.bf16.vlgmr.msra.gmra.mxu1 %vm661_vm3, %v1591_v10 }
 0x765   :  { %14990 = vmatpush3.bf16.msra.mxu1 %v1697_v11  ;;  %14991 = vmatprep.mubr.msk.bf16.mxu1 %vm17108_vm0, %v17107_v35 }
 0x766   :  { %15001 = vmatprep.subr.bf16.mxu1 %v17107_v35 }
 0x786   :  { %v1579_v15 = vpop.xlane.xlu0 %1578 }
 0x787   :  { %16620 = vrcp.f32 %v1579_v15 }
 0x78a   :  { %v1790_v19 = vpop.permute.xlu0 %1789 }
 0x78b   :  { %v1576_v18 = vpop.xlane.xlu1 %1575  ;;  %v1795_v36 = vsel %vm476_vm1, %v1790_v19, 0 }
 0x78c   :  { %16622 = vrcp.f32 %v1576_v18 }
 0x78e   :  { %v1788_v28 = vpop.permute.xlu0 %1787 }
 0x792   :  { %v1890_v42 = vpop.permute.xlu0 %1889 }
 0x793   :  { %v1895_v44 = vsel %vm476_vm1, %v1890_v42, 0 }
 0x794   :  { %v16621_v23 = vpop.eup %16620 }
 0x795   :  { %v1589_v24 = vmul.f32 %v16621_v23, %v16613_v17  ;;  %v1840_v17 = vpop.permute.xlu1 %1839 }
 0x796   :  { %v1888_v38 = vpop.permute.xlu0 %1887  ;;  %v1845_v51 = vsel %vm476_vm1, %v1840_v17, 0 }
 0x797   :  { %v1593_v25 = vpack.c.bf16 %v1589_v24, %v1589_v24 }
 0x799   :  { %v16623_v29 = vpop.eup %16622  ;;  %14992 = vmatmul.mubr.msk.bf16.vlgmr.msra.gmra.mxu1 %vm661_vm3, %v1593_v25 }
 0x79a   :  { %15002 = vmatpush3.bf16.xpose.msra.mxu1 %v1795_v36  ;;  %v1588_v37 = vmul.f32 %v16623_v29, %v16615_v47  ;;  %15003 = vmatprep.mubr.msk.bf16.mxu1 %vm17108_vm0, %v17107_v35 }
 0x79b   :  { %15013 = vmatprep.subr.bf16.mxu1 %v17107_v35 }
 0x79c   :  { %v1592_v40 = vpack.c.bf16 %v1588_v37, %v1588_v37 }
 0x79e   :  { %14986 = vmatmul.mubr.msk.bf16.vlgmr.msra.gmra.mxu0 %vm661_vm3, %v1592_v40 }
 0x79f   :  { %14996 = vmatpush3.bf16.msra.mxu0 %v1745_v41  ;;  %14997 = vmatprep.mubr.msk.bf16.mxu0 %vm17108_vm0, %v17107_v35 }
 0x7a0   :  { %15007 = vmatprep.subr.bf16.mxu0 %v17107_v35 }
 0x7a1   :  { %15004 = vmatmul.mubr.msk.bf16.vlgmr.msra.gmra.mxu1 %vm476_vm1, %v1788_v28 }
 0x7a2   :  { %15014 = vmatpush3.bf16.xpose.msra.mxu1 %v1895_v44  ;;  %15015 = vmatprep.mubr.msk.bf16.mxu1 %vm17108_vm0, %v17107_v35 }
 0x7a3   :  { %15025 = vmatprep.subr.bf16.mxu1 %v17107_v35 }
 0x7a9   :  { %15016 = vmatmul.mubr.msk.bf16.vlgmr.msra.gmra.mxu1 %vm476_vm1, %v1888_v38 }
 0x7aa   :  { %15027 = vmatprep.mubr.msk.bf16.mxu1 %vm17108_vm0, %v17107_v35 }
 0x7c0   :  { %v1582_v45 = vpop.xlane.xlu1 %1581 }
 0x7c1   :  { %16624 = vrcp.f32 %v1582_v45 }
 0x7c4   :  { %v1838_v50 = vpop.permute.xlu1 %1837 }
 0x7c8   :  { %v1940_v56 = vpop.permute.xlu1 %1939 }
 0x7c9   :  { %v1945_v57 = vsel %vm476_vm1, %v1940_v56, 0 }
 0x7ce   :  { %v16625_v47 = vpop.eup %16624 }
 0x7cf   :  { %v1590_v49 = vmul.f32 %v16625_v47, %v16617_v54  ;;  %v1938_v54 = vpop.permute.xlu1 %1937 }
 0x7d1   :  { %v1594_v46 = vpack.c.bf16 %v1590_v49, %v1590_v49 }
 0x7d3   :  { %14998 = vmatmul.mubr.msk.bf16.vlgmr.msra.gmra.mxu0 %vm661_vm3, %v1594_v46 }
 0x7d4   :  { %15008 = vmatpush3.bf16.xpose.msra.mxu0 %v1845_v51  ;;  %15009 = vmatprep.mubr.msk.bf16.mxu0 %vm17108_vm0, %v17107_v35 }
 0x7d5   :  { %15019 = vmatprep.subr.bf16.mxu0 %v17107_v35 }
 0x7db   :  { %15010 = vmatmul.mubr.msk.bf16.vlgmr.msra.gmra.mxu0 %vm476_vm1, %v1838_v50 }
 0x7dc   :  { %15020 = vmatpush3.bf16.xpose.msra.mxu0 %v1945_v57  ;;  %15021 = vmatprep.mubr.msk.bf16.mxu0 %vm17108_vm0, %v17107_v35 }
 0x7dd   :  { %15031 = vmatprep.subr.bf16.mxu0 %v17107_v35 }
 0x7e3   :  { %15022 = vmatmul.mubr.msk.bf16.vlgmr.msra.gmra.mxu0 %vm476_vm1, %v1938_v54 }
 0x7e4   :  { %15033 = vmatprep.mubr.msk.bf16.mxu0 %vm17108_vm0, %v17107_v35 }
 0x824   :  { %v17547_v60 = vpop.f32.mrf.mxu1 }
 0x826   :  { %v14981_v62 = vpop.f32.mrf.mxu1 }
 0x828   :  { %v1640_v63 = vpop.f32.mrf.mxu1 }
 0x82a   :  { %v14982_v1 = vpop.f32.mrf.mxu1 }
 0x859   :  { %v17549_v7 = vpop.f32.mrf.mxu1 }
 0x85b   :  { %v14993_v10 = vpop.f32.mrf.mxu1 }
 0x85d   :  { %v1736_v11 = vpop.f32.mrf.mxu1 }
 0x85e   :  { %v17551_v15 = vpop.f32.mrf.mxu0 }
 0x85f   :  { %v16138_v16 = vpack.i.bf16 %v17551_v15, %v17547_v60  ;;  %v14994_v18 = vpop.f32.mrf.mxu1 }
 0x860   :  { %v14987_v19 = vpop.f32.mrf.mxu0 }
 0x861   :  { %v1831_v23 = vpop.f32.mrf.mxu1 }
 0x862   :  { %v1688_v24 = vpop.f32.mrf.mxu0  ;;  %v1987_v25 = vsel %vm661_vm3, %v1831_v23, -inf }
 0x863   :  { %1988 = vmax.xlane.f32.xlu0 %v1987_v25  ;;  %v15005_v28 = vpop.f32.mrf.mxu1 }
 0x864   :  { %v14988_v29 = vpop.f32.mrf.mxu0 }
 0x865   :  { %v1834_v36 = vpop.f32.mrf.mxu1 }
 0x867   :  { %v15006_v37 = vpop.f32.mrf.mxu1 }
 0x869   :  { %v1931_v40 = vpop.f32.mrf.mxu1 }
 0x86a   :  { %v1993_v41 = vsel %vm661_vm3, %v1931_v40, -inf }
 0x86b   :  { %1994 = vmax.xlane.f32.xlu0 %v1993_v41  ;;  %v15017_v42 = vpop.f32.mrf.mxu1 }
 0x86d   :  { %v1934_v44 = vpop.f32.mrf.mxu1 }
 0x86f   :  { %v15018_v38 = vpop.f32.mrf.mxu1 }
 0x893   :  { %v17557_v17 = vpop.f32.mrf.mxu0 }
 0x895   :  { %v14999_v47 = vpop.f32.mrf.mxu0 }
 0x897   :  { %v1784_v49 = vpop.f32.mrf.mxu0 }
 0x899   :  { %v15000_v46 = vpop.f32.mrf.mxu0 }
 0x89b   :  { %v1881_v50 = vpop.f32.mrf.mxu0 }
 0x89c   :  { %v1990_v51 = vsel %vm661_vm3, %v1881_v50, -inf }
 0x89d   :  { %1991 = vmax.xlane.f32.xlu1 %v1990_v51  ;;  %v15011_v56 = vpop.f32.mrf.mxu0 }
 0x89f   :  { %v1884_v57 = vpop.f32.mrf.mxu0 }
 0x8a1   :  { %v15012_v54 = vpop.f32.mrf.mxu0 }
 0x8a3   :  { %v1981_v62 = vpop.f32.mrf.mxu0 }
 0x8a4   :  { %v1996_v63 = vsel %vm661_vm3, %v1981_v62, -inf }
 0x8a5   :  { %1997 = vmax.xlane.f32.xlu0 %v1996_v63  ;;  %v15023_v1 = vpop.f32.mrf.mxu0 }
 0x8a7   :  { %v1984_v10 = vpop.f32.mrf.mxu0 }
 0x8a9   :  { %v15024_v11 = vpop.f32.mrf.mxu0 }
 0x8ae   :  { %2083 = vrot.lane.b32.xlu1 %v17305_v22, %s17111_s15 }
 0x8b2   :  { %2131 = vrot.lane.b32.xlu1 %v17339_v26, %s17111_s15 }
 0x8b6   :  { %2179 = vrot.lane.b32.xlu1 %v17349_v12, %s17111_s15 }
 0x8ec   :  { %v1989_v18 = vpop.xlane.xlu0 %1988 }
 0x8ed   :  { %v1999_v19 = vsub.f32 %v1831_v23, %v1989_v18 }
 0x8ef   :  { %v2003_v24 = vmul.f32 1.442695, %v1999_v19 }
 0x8f1   :  { %16626 = vpow2.f32 %v2003_v24 }
 0x8f4   :  { %v1995_v29 = vpop.xlane.xlu0 %1994 }
 0x8f5   :  { %v2001_v36 = vsub.f32 %v1931_v40, %v1995_v29 }
 0x8f7   :  { %v2007_v37 = vmul.f32 1.442695, %v2001_v36 }
 0x8f9   :  { %16628 = vpow2.f32 %v2007_v37 }
 0x8fe   :  { %v16627_v25 = vpop.eup %16626 }
 0x8ff   :  { %v2011_v28 = vsel %vm661_vm3, %v16627_v25, 0.0 }
 0x900   :  { %2012 = vadd.xlane.f32.xlu0 %v2011_v28 }
 0x906   :  { %v16629_v47 = vpop.eup %16628 }
 0x907   :  { %v2017_v49 = vsel %vm661_vm3, %v16629_v47, 0.0 }
 0x916   :  { %2035 = vrot.lane.b32.xlu0 %v17303_v21, %s17111_s15 }
 0x926   :  { %v1992_v41 = vpop.xlane.xlu1 %1991 }
 0x927   :  { %v2000_v42 = vsub.f32 %v1881_v50, %v1992_v41 }
 0x929   :  { %v2005_v44 = vmul.f32 1.442695, %v2000_v42 }
 0x92a   :  { %v2084_v38 = vpop.permute.xlu1 %2083 }
 0x92b   :  { %16630 = vpow2.f32 %v2005_v44  ;;  %v2089_v23 = vsel %vm713_vm2, %v2084_v38, 0 }
 0x92c   :  { %15032 = vmatpush3.bf16.msra.mxu0 %v2089_v23 }
 0x92d   :  { %15043 = vmatprep.subr.bf16.mxu0 %v17107_v35 }
 0x92e   :  { %v1998_v40 = vpop.xlane.xlu0 %1997  ;;  %v2132_v18 = vpop.permute.xlu1 %2131 }
 0x92f   :  { %v2002_v50 = vsub.f32 %v1981_v62, %v1998_v40  ;;  %v2137_v24 = vsel %vm713_vm2, %v2132_v18, 0 }
 0x931   :  { %v2009_v56 = vmul.f32 1.442695, %v2002_v50 }
 0x932   :  { %v2180_v29 = vpop.permute.xlu1 %2179 }
 0x933   :  { %16632 = vpow2.f32 %v2009_v56  ;;  %v2185_v40 = vsel %vm713_vm2, %v2180_v29, 0 }
 0x935   :  { %2018 = vadd.xlane.f32.xlu0 %v2017_v49 }
 0x938   :  { %v16631_v46 = vpop.eup %16630 }
 0x939   :  { %v2014_v51 = vsel %vm661_vm3, %v16631_v46, 0.0 }
 0x93a   :  { %2015 = vadd.xlane.f32.xlu1 %v2014_v51 }
 0x940   :  { %v16633_v57 = vpop.eup %16632 }
 0x941   :  { %v2020_v54 = vsel %vm661_vm3, %v16633_v57, 0.0 }
 0x94b   :  { %2279 = vrot.lane.b32.xlu1 %v17257_v55, %s17097_s16  ;;  %2229 = vrot.lane.b32.xlu0 %v17252_v48, %s17097_s16 }
 0x94f   :  { %2227 = vrot.lane.b32.xlu0 %v17259_v58, %s17097_s16 }
 0x953   :  { %2329 = vrot.lane.b32.xlu0 %v17261_v59, %s17097_s16 }
 0x957   :  { %2327 = vrot.lane.b32.xlu0 %v17275_v4, %s17097_s16 }
 0x96f   :  { %2021 = vadd.xlane.f32.xlu1 %v2020_v54 }
 0x980   :  { %2277 = vrot.lane.b32.xlu1 %v17277_v5, %s17097_s16 }
 0x984   :  { %2379 = vrot.lane.b32.xlu1 %v17269_v3, %s17097_s16 }
 0x988   :  { %2377 = vrot.lane.b32.xlu1 %v17290_v8, %s17097_s16 }
 0x989   :  { %v2013_v63 = vpop.xlane.xlu0 %2012 }
 0x98a   :  { %16634 = vrcp.f32 %v2013_v63 }
 0x98d   :  { %v2036_v62 = vpop.permute.xlu0 %2035 }
 0x98e   :  { %v2041_v1 = vsel %vm713_vm2, %v2036_v62, 0 }
 0x98f   :  { %15026 = vmatpush3.bf16.msra.mxu1 %v2041_v1 }
 0x990   :  { %15037 = vmatprep.subr.bf16.mxu1 %v17107_v35 }
 0x997   :  { %v16635_v10 = vpop.eup %16634 }
 0x998   :  { %v2027_v11 = vmul.f32 %v16635_v10, %v16627_v25 }
 0x99a   :  { %v2031_v19 = vpack.c.bf16 %v2027_v11, %v2027_v11 }
 0x99c   :  { %15028 = vmatmul.mubr.msk.bf16.vlgmr.msra.gmra.mxu1 %vm661_vm3, %v2031_v19 }
 0x99d   :  { %15038 = vmatpush3.bf16.msra.mxu1 %v2137_v24  ;;  %15039 = vmatprep.mubr.msk.bf16.mxu1 %vm17108_vm0, %v17107_v35 }
 0x99e   :  { %15049 = vmatprep.subr.bf16.mxu1 %v17107_v35 }
 0x9be   :  { %v2019_v28 = vpop.xlane.xlu0 %2018 }
 0x9bf   :  { %16636 = vrcp.f32 %v2019_v28 }
 0x9c2   :  { %v2230_v37 = vpop.permute.xlu0 %2229 }
 0x9c3   :  { %v2016_v36 = vpop.xlane.xlu1 %2015  ;;  %v2235_v23 = vsel %vm476_vm1, %v2230_v37, 0 }
 0x9c4   :  { %16638 = vrcp.f32 %v2016_v36 }
 0x9c6   :  { %v2228_v44 = vpop.permute.xlu0 %2227 }
 0x9c7   :  { %v2280_v56 = vpop.permute.xlu1 %2279 }
 0x9c8   :  { %v2285_v11 = vsel %vm476_vm1, %v2280_v56, 0 }
 0x9ca   :  { %v2330_v50 = vpop.permute.xlu0 %2329 }
 0x9cc   :  { %v16637_v41 = vpop.eup %16636 }
 0x9cd   :  { %v2029_v25 = vmul.f32 %v16637_v41, %v16629_v47  ;;  %v2335_v47 = vsel %vm476_vm1, %v2330_v50, 0 }
 0x9cf   :  { %v2033_v42 = vpack.c.bf16 %v2029_v25, %v2029_v25 }
 0x9d1   :  { %v16639_v38 = vpop.eup %16638  ;;  %15040 = vmatmul.mubr.msk.bf16.vlgmr.msra.gmra.mxu1 %vm661_vm3, %v2033_v42 }
 0x9d2   :  { %15050 = vmatpush3.bf16.xpose.msra.mxu1 %v2235_v23  ;;  %v2028_v49 = vmul.f32 %v16639_v38, %v16631_v46  ;;  %15051 = vmatprep.mubr.msk.bf16.mxu1 %vm17108_vm0, %v17107_v35  ;;  %v2328_v46 = vpop.permute.xlu0 %2327 }
 0x9d3   :  { %15061 = vmatprep.subr.bf16.mxu1 %v17107_v35 }
 0x9d4   :  { %v2032_v51 = vpack.c.bf16 %v2028_v49, %v2028_v49 }
 0x9d6   :  { %15034 = vmatmul.mubr.msk.bf16.vlgmr.msra.gmra.mxu0 %vm661_vm3, %v2032_v51 }
 0x9d7   :  { %15044 = vmatpush3.bf16.msra.mxu0 %v2185_v40  ;;  %15045 = vmatprep.mubr.msk.bf16.mxu0 %vm17108_vm0, %v17107_v35 }
 0x9d8   :  { %15055 = vmatprep.subr.bf16.mxu0 %v17107_v35 }
 0x9d9   :  { %15052 = vmatmul.mubr.msk.bf16.vlgmr.msra.gmra.mxu1 %vm476_vm1, %v2228_v44 }
 0x9da   :  { %15062 = vmatpush3.bf16.xpose.msra.mxu1 %v2335_v47  ;;  %15063 = vmatprep.mubr.msk.bf16.mxu1 %vm17108_vm0, %v17107_v35 }
 0x9db   :  { %15073 = vmatprep.subr.bf16.mxu1 %v17107_v35 }
 0x9e1   :  { %15064 = vmatmul.mubr.msk.bf16.vlgmr.msra.gmra.mxu1 %vm476_vm1, %v2328_v46 }
 0x9e2   :  { %15075 = vmatprep.mubr.msk.bf16.mxu1 %vm17108_vm0, %v17107_v35 }
 0x9f8   :  { %v2022_v54 = vpop.xlane.xlu1 %2021 }
 0x9f9   :  { %16640 = vrcp.f32 %v2022_v54 }
 0x9fc   :  { %v2278_v10 = vpop.permute.xlu1 %2277 }
 0xa00   :  { %v2380_v18 = vpop.permute.xlu1 %2379 }
 0xa01   :  { %v2385_v19 = vsel %vm476_vm1, %v2380_v18, 0 }
 0xa06   :  { %v16641_v63 = vpop.eup %16640 }
 0xa07   :  { %v2030_v62 = vmul.f32 %v16641_v63, %v16633_v57  ;;  %v2378_v57 = vpop.permute.xlu1 %2377 }
 0xa09   :  { %v2034_v1 = vpack.c.bf16 %v2030_v62, %v2030_v62 }
 0xa0b   :  { %15046 = vmatmul.mubr.msk.bf16.vlgmr.msra.gmra.mxu0 %vm661_vm3, %v2034_v1 }
 0xa0c   :  { %15056 = vmatpush3.bf16.xpose.msra.mxu0 %v2285_v11  ;;  %15057 = vmatprep.mubr.msk.bf16.mxu0 %vm17108_vm0, %v17107_v35 }
 0xa0d   :  { %15067 = vmatprep.subr.bf16.mxu0 %v17107_v35 }
 0xa13   :  { %15058 = vmatmul.mubr.msk.bf16.vlgmr.msra.gmra.mxu0 %vm476_vm1, %v2278_v10 }
 0xa14   :  { %15068 = vmatpush3.bf16.xpose.msra.mxu0 %v2385_v19  ;;  %15069 = vmatprep.mubr.msk.bf16.mxu0 %vm17108_vm0, %v17107_v35 }
 0xa15   :  { %15079 = vmatprep.subr.bf16.mxu0 %v17107_v35 }
 0xa1b   :  { %15070 = vmatmul.mubr.msk.bf16.vlgmr.msra.gmra.mxu0 %vm476_vm1, %v2378_v57 }
 0xa1c   :  { %15081 = vmatprep.mubr.msk.bf16.mxu0 %vm17108_vm0, %v17107_v35 }
 0xa5c   :  { %v17631_v24 = vpop.f32.mrf.mxu1 }
 0xa5e   :  { %v15029_v28 = vpop.f32.mrf.mxu1 }
 0xa60   :  { %v2080_v29 = vpop.f32.mrf.mxu1 }
 0xa62   :  { %v15030_v36 = vpop.f32.mrf.mxu1 }
 0xa91   :  { %v17633_v37 = vpop.f32.mrf.mxu1 }
 0xa93   :  { %v15041_v41 = vpop.f32.mrf.mxu1 }
 0xa95   :  { %v2176_v25 = vpop.f32.mrf.mxu1 }
 0xa96   :  { %v17635_v42 = vpop.f32.mrf.mxu0 }
 0xa97   :  { %v16148_v44 = vpack.i.bf16 %v17635_v42, %v17631_v24  ;;  %v15042_v38 = vpop.f32.mrf.mxu1  ;;  %v19842_v42 = vpack.i.bf16 %v17473_v52, %v17465_v27 }
 0xa98   :  { %v15035_v23 = vpop.f32.mrf.mxu0 }
 0xa99   :  { %v2271_v49 = vpop.f32.mrf.mxu1 }
 0xa9a   :  { %v2128_v51 = vpop.f32.mrf.mxu0  ;;  %v2427_v40 = vsel %vm661_vm3, %v2271_v49, -inf }
 0xa9b   :  { %2428 = vmax.xlane.f32.xlu0 %v2427_v40  ;;  %v15053_v50 = vpop.f32.mrf.mxu1 }
 0xa9c   :  { %v15036_v47 = vpop.f32.mrf.mxu0 }
 0xa9d   :  { %v2274_v46 = vpop.f32.mrf.mxu1 }
 0xa9f   :  { %v15054_v56 = vpop.f32.mrf.mxu1 }
 0xaa1   :  { %v2371_v54 = vpop.f32.mrf.mxu1 }
 0xaa2   :  { %v2433_v63 = vsel %vm661_vm3, %v2371_v54, -inf }
 0xaa3   :  { %2434 = vmax.xlane.f32.xlu0 %v2433_v63  ;;  %v15065_v62 = vpop.f32.mrf.mxu1 }
 0xaa5   :  { %v2374_v1 = vpop.f32.mrf.mxu1 }
 0xaa7   :  { %v15066_v10 = vpop.f32.mrf.mxu1 }
 0xacb   :  { %v17641_v11 = vpop.f32.mrf.mxu0 }
 0xacd   :  { %v15047_v19 = vpop.f32.mrf.mxu0 }
 0xacf   :  { %v2224_v57 = vpop.f32.mrf.mxu0 }
 0xad1   :  { %v15048_v28 = vpop.f32.mrf.mxu0 }
 0xad3   :  { %v2321_v29 = vpop.f32.mrf.mxu0 }
 0xad4   :  { %v2430_v36 = vsel %vm661_vm3, %v2321_v29, -inf }
 0xad5   :  { %2431 = vmax.xlane.f32.xlu1 %v2430_v36  ;;  %v15059_v41 = vpop.f32.mrf.mxu0 }
 0xad7   :  { %v2324_v25 = vpop.f32.mrf.mxu0 }
 0xad9   :  { %v15060_v38 = vpop.f32.mrf.mxu0 }
 0xadb   :  { %v2421_v23 = vpop.f32.mrf.mxu0 }
 0xadc   :  { %v2436_v51 = vsel %vm661_vm3, %v2421_v23, -inf }
 0xadd   :  { %2437 = vmax.xlane.f32.xlu0 %v2436_v51  ;;  %v15071_v40 = vpop.f32.mrf.mxu0 }
 0xadf   :  { %v2424_v50 = vpop.f32.mrf.mxu0 }
 0xae1   :  { %v15072_v47 = vpop.f32.mrf.mxu0 }
 0xae6   :  { %2523 = vrot.lane.b32.xlu1 %v17305_v22, %s17097_s16 }
 0xaea   :  { %2571 = vrot.lane.b32.xlu1 %v17339_v26, %s17097_s16 }
 0xaee   :  { %2619 = vrot.lane.b32.xlu1 %v17349_v12, %s17097_s16 }
 0xb24   :  { %v2429_v46 = vpop.xlane.xlu0 %2428 }
 0xb25   :  { %v2439_v56 = vsub.f32 %v2271_v49, %v2429_v46 }
 0xb27   :  { %v2443_v63 = vmul.f32 1.442695, %v2439_v56 }
 0xb29   :  { %16642 = vpow2.f32 %v2443_v63 }
 0xb2c   :  { %v2435_v10 = vpop.xlane.xlu0 %2434 }
 0xb2d   :  { %v2441_v19 = vsub.f32 %v2371_v54, %v2435_v10 }
 0xb2f   :  { %v2447_v57 = vmul.f32 1.442695, %v2441_v19 }
 0xb31   :  { %16644 = vpow2.f32 %v2447_v57 }
 0xb36   :  { %v16643_v62 = vpop.eup %16642 }
 0xb37   :  { %v2451_v1 = vsel %vm661_vm3, %v16643_v62, 0.0 }
 0xb38   :  { %2452 = vadd.xlane.f32.xlu0 %v2451_v1 }
 0xb3e   :  { %v16645_v38 = vpop.eup %16644 }
 0xb3f   :  { %v2457_v51 = vsel %vm661_vm3, %v16645_v38, 0.0 }
 0xb4e   :  { %2475 = vrot.lane.b32.xlu0 %v17303_v21, %s17097_s16 }
 0xb5e   :  { %v2432_v28 = vpop.xlane.xlu1 %2431 }
 0xb5f   :  { %v2440_v36 = vsub.f32 %v2321_v29, %v2432_v28 }
 0xb61   :  { %v2445_v41 = vmul.f32 1.442695, %v2440_v36 }
 0xb62   :  { %v2524_v25 = vpop.permute.xlu1 %2523 }
 0xb63   :  { %16646 = vpow2.f32 %v2445_v41  ;;  %v2529_v49 = vsel %vm713_vm2, %v2524_v25, 0 }
 0xb64   :  { %15080 = vmatpush3.bf16.msra.mxu0 %v2529_v49 }
 0xb65   :  { %15091 = vmatprep.subr.bf16.mxu0 %v17107_v35 }
 0xb66   :  { %v2438_v54 = vpop.xlane.xlu0 %2437  ;;  %v2572_v57 = vpop.permute.xlu1 %2571 }
 0xb67   :  { %v2442_v29 = vsub.f32 %v2421_v23, %v2438_v54  ;;  %v2577_v36 = vsel %vm713_vm2, %v2572_v57, 0 }
 0xb69   :  { %v2449_v47 = vmul.f32 1.442695, %v2442_v29 }
 0xb6a   :  { %v2620_v25 = vpop.permute.xlu1 %2619 }
 0xb6b   :  { %16648 = vpow2.f32 %v2449_v47 }
 0xb6d   :  { %2458 = vadd.xlane.f32.xlu0 %v2457_v51 }
 0xb70   :  { %v16647_v40 = vpop.eup %16646 }
 0xb71   :  { %v2454_v50 = vsel %vm661_vm3, %v16647_v40, 0.0 }
 0xb72   :  { %2455 = vadd.xlane.f32.xlu1 %v2454_v50 }
 0xb78   :  { %v16649_v46 = vpop.eup %16648 }
 0xb79   :  { %v2460_v56 = vsel %vm661_vm3, %v16649_v46, 0.0 }
 0xb83   :  { %2719 = vrot.lane.b32.xlu1 %v17257_v55, %s17112_s18  ;;  %2669 = vrot.lane.b32.xlu0 %v17252_v48, %s17112_s18 }
 0xb87   :  { %2667 = vrot.lane.b32.xlu0 %v17259_v58, %s17112_s18 }
 0xb8b   :  { %2769 = vrot.lane.b32.xlu0 %v17261_v59, %s17112_s18 }
 0xb8f   :  { %2767 = vrot.lane.b32.xlu0 %v17275_v4, %s17112_s18 }
 0xba7   :  { %2461 = vadd.xlane.f32.xlu1 %v2460_v56 }
 0xbb8   :  { %2717 = vrot.lane.b32.xlu1 %v17277_v5, %s17112_s18 }
 0xbbc   :  { %2819 = vrot.lane.b32.xlu1 %v17269_v3, %s17112_s18 }
 0xbc0   :  { %2817 = vrot.lane.b32.xlu1 %v17290_v8, %s17112_s18 }
 0xbc1   :  { %v2453_v63 = vpop.xlane.xlu0 %2452 }
 0xbc2   :  { %16650 = vrcp.f32 %v2453_v63 }
 0xbc5   :  { %v2476_v23 = vpop.permute.xlu0 %2475 }
 0xbc6   :  { %v2481_v1 = vsel %vm713_vm2, %v2476_v23, 0 }
 0xbc7   :  { %15074 = vmatpush3.bf16.msra.mxu1 %v2481_v1  ;;  %v2625_v1 = vsel %vm713_vm2, %v2620_v25, 0 }
 0xbc8   :  { %15085 = vmatprep.subr.bf16.mxu1 %v17107_v35 }
 0xbcf   :  { %v16651_v10 = vpop.eup %16650 }
 0xbd0   :  { %v2467_v19 = vmul.f32 %v16651_v10, %v16643_v62 }
 0xbd2   :  { %v2471_v28 = vpack.c.bf16 %v2467_v19, %v2467_v19 }
 0xbd4   :  { %15076 = vmatmul.mubr.msk.bf16.vlgmr.msra.gmra.mxu1 %vm661_vm3, %v2471_v28 }
 0xbd5   :  { %15086 = vmatpush3.bf16.msra.mxu1 %v2577_v36  ;;  %15087 = vmatprep.mubr.msk.bf16.mxu1 %vm17108_vm0, %v17107_v35 }
 0xbd6   :  { %15097 = vmatprep.subr.bf16.mxu1 %v17107_v35 }
 0xbf6   :  { %v2459_v41 = vpop.xlane.xlu0 %2458 }
 0xbf7   :  { %16652 = vrcp.f32 %v2459_v41 }
 0xbfa   :  { %v2670_v51 = vpop.permute.xlu0 %2669 }
 0xbfb   :  { %v2456_v49 = vpop.xlane.xlu1 %2455  ;;  %v2675_v56 = vsel %vm476_vm1, %v2670_v51, 0 }
 0xbfc   :  { %16654 = vrcp.f32 %v2456_v49 }
 0xbfe   :  { %v2668_v29 = vpop.permute.xlu0 %2667 }
 0xbff   :  { %v2720_v19 = vpop.permute.xlu1 %2719 }
 0xc00   :  { %v2725_v49 = vsel %vm476_vm1, %v2720_v19, 0 }
 0xc02   :  { %v2770_v10 = vpop.permute.xlu0 %2769 }
 0xc04   :  { %v16653_v50 = vpop.eup %16652 }
 0xc05   :  { %v2469_v62 = vmul.f32 %v16653_v50, %v16645_v38  ;;  %v2775_v38 = vsel %vm476_vm1, %v2770_v10, 0 }
 0xc07   :  { %v2473_v54 = vpack.c.bf16 %v2469_v62, %v2469_v62 }
 0xc09   :  { %v16655_v47 = vpop.eup %16654  ;;  %15088 = vmatmul.mubr.msk.bf16.vlgmr.msra.gmra.mxu1 %vm661_vm3, %v2473_v54 }
 0xc0a   :  { %15098 = vmatpush3.bf16.xpose.msra.mxu1 %v2675_v56  ;;  %v2468_v63 = vmul.f32 %v16655_v47, %v16647_v40  ;;  %15099 = vmatprep.mubr.msk.bf16.mxu1 %vm17108_vm0, %v17107_v35  ;;  %v2768_v40 = vpop.permute.xlu0 %2767 }
 0xc0b   :  { %15109 = vmatprep.subr.bf16.mxu1 %v17107_v35 }
 0xc0c   :  { %v2472_v23 = vpack.c.bf16 %v2468_v63, %v2468_v63 }
 0xc0e   :  { %15082 = vmatmul.mubr.msk.bf16.vlgmr.msra.gmra.mxu0 %vm661_vm3, %v2472_v23 }
 0xc0f   :  { %15092 = vmatpush3.bf16.msra.mxu0 %v2625_v1  ;;  %15093 = vmatprep.mubr.msk.bf16.mxu0 %vm17108_vm0, %v17107_v35 }
 0xc10   :  { %15103 = vmatprep.subr.bf16.mxu0 %v17107_v35 }
 0xc11   :  { %15100 = vmatmul.mubr.msk.bf16.vlgmr.msra.gmra.mxu1 %vm476_vm1, %v2668_v29 }
 0xc12   :  { %15110 = vmatpush3.bf16.xpose.msra.mxu1 %v2775_v38  ;;  %15111 = vmatprep.mubr.msk.bf16.mxu1 %vm17108_vm0, %v17107_v35 }
 0xc13   :  { %15121 = vmatprep.subr.bf16.mxu1 %v17107_v35 }
 0xc19   :  { %15112 = vmatmul.mubr.msk.bf16.vlgmr.msra.gmra.mxu1 %vm476_vm1, %v2768_v40 }
 0xc1a   :  { %15123 = vmatprep.mubr.msk.bf16.mxu1 %vm17108_vm0, %v17107_v35 }
 0xc30   :  { %v2462_v57 = vpop.xlane.xlu1 %2461 }
 0xc31   :  { %16656 = vrcp.f32 %v2462_v57 }
 0xc34   :  { %v2718_v25 = vpop.permute.xlu1 %2717 }
 0xc38   :  { %v2820_v51 = vpop.permute.xlu1 %2819 }
 0xc39   :  { %v2825_v50 = vsel %vm476_vm1, %v2820_v51, 0 }
 0xc3e   :  { %v16657_v28 = vpop.eup %16656 }
 0xc3f   :  { %v2470_v36 = vmul.f32 %v16657_v28, %v16649_v46  ;;  %v2818_v46 = vpop.permute.xlu1 %2817 }
 0xc41   :  { %v2474_v41 = vpack.c.bf16 %v2470_v36, %v2470_v36 }
 0xc43   :  { %15094 = vmatmul.mubr.msk.bf16.vlgmr.msra.gmra.mxu0 %vm661_vm3, %v2474_v41 }
 0xc44   :  { %15104 = vmatpush3.bf16.xpose.msra.mxu0 %v2725_v49  ;;  %15105 = vmatprep.mubr.msk.bf16.mxu0 %vm17108_vm0, %v17107_v35 }
 0xc45   :  { %15115 = vmatprep.subr.bf16.mxu0 %v17107_v35 }
 0xc4b   :  { %15106 = vmatmul.mubr.msk.bf16.vlgmr.msra.gmra.mxu0 %vm476_vm1, %v2718_v25 }
 0xc4c   :  { %15116 = vmatpush3.bf16.xpose.msra.mxu0 %v2825_v50  ;;  %15117 = vmatprep.mubr.msk.bf16.mxu0 %vm17108_vm0, %v17107_v35 }
 0xc4d   :  { %15127 = vmatprep.subr.bf16.mxu0 %v17107_v35 }
 0xc53   :  { %15118 = vmatmul.mubr.msk.bf16.vlgmr.msra.gmra.mxu0 %vm476_vm1, %v2818_v46 }
 0xc54   :  { %15129 = vmatprep.mubr.msk.bf16.mxu0 %vm17108_vm0, %v17107_v35 }
 0xc94   :  { %v17715_v62 = vpop.f32.mrf.mxu1 }
 0xc96   :  { %v15077_v54 = vpop.f32.mrf.mxu1 }
 0xc98   :  { %v2520_v29 = vpop.f32.mrf.mxu1 }
 0xc9a   :  { %v15078_v47 = vpop.f32.mrf.mxu1 }
 0xcc9   :  { %v17717_v56 = vpop.f32.mrf.mxu1 }
 0xccb   :  { %v15089_v63 = vpop.f32.mrf.mxu1 }
 0xccd   :  { %v2616_v23 = vpop.f32.mrf.mxu1 }
 0xcce   :  { %v17719_v1 = vpop.f32.mrf.mxu0 }
 0xccf   :  { %v16158_v10 = vpack.i.bf16 %v17719_v1, %v17715_v62  ;;  %v15090_v38 = vpop.f32.mrf.mxu1 }
 0xcd0   :  { %v15083_v40 = vpop.f32.mrf.mxu0 }
 0xcd1   :  { %v2711_v19 = vpop.f32.mrf.mxu1 }
 0xcd2   :  { %v2568_v57 = vpop.f32.mrf.mxu0  ;;  %v2867_v28 = vsel %vm661_vm3, %v2711_v19, -inf }
 0xcd3   :  { %2868 = vmax.xlane.f32.xlu0 %v2867_v28  ;;  %v15101_v36 = vpop.f32.mrf.mxu1 }
 0xcd4   :  { %v15084_v41 = vpop.f32.mrf.mxu0 }
 0xcd5   :  { %v2714_v25 = vpop.f32.mrf.mxu1 }
 0xcd7   :  { %v15102_v49 = vpop.f32.mrf.mxu1 }
 0xcd9   :  { %v2811_v51 = vpop.f32.mrf.mxu1 }
 0xcda   :  { %v2873_v50 = vsel %vm661_vm3, %v2811_v51, -inf }
 0xcdb   :  { %2874 = vmax.xlane.f32.xlu0 %v2873_v50  ;;  %v15113_v46 = vpop.f32.mrf.mxu1 }
 0xcdd   :  { %v2814_v54 = vpop.f32.mrf.mxu1 }
 0xcdf   :  { %v15114_v29 = vpop.f32.mrf.mxu1 }
 0xd03   :  { %v17725_v47 = vpop.f32.mrf.mxu0 }
 0xd05   :  { %v15095_v23 = vpop.f32.mrf.mxu0 }
 0xd07   :  { %v2664_v38 = vpop.f32.mrf.mxu0 }
 0xd09   :  { %v15096_v40 = vpop.f32.mrf.mxu0 }
 0xd0b   :  { %v2761_v57 = vpop.f32.mrf.mxu0 }
 0xd0c   :  { %v2870_v28 = vsel %vm661_vm3, %v2761_v57, -inf }
 0xd0d   :  { %2871 = vmax.xlane.f32.xlu1 %v2870_v28  ;;  %v15107_v36 = vpop.f32.mrf.mxu0 }
 0xd0f   :  { %v2764_v41 = vpop.f32.mrf.mxu0 }
 0xd11   :  { %v15108_v25 = vpop.f32.mrf.mxu0 }
 0xd13   :  { %v2861_v49 = vpop.f32.mrf.mxu0 }
 0xd14   :  { %v2876_v50 = vsel %vm661_vm3, %v2861_v49, -inf }
 0xd15   :  { %2877 = vmax.xlane.f32.xlu0 %v2876_v50  ;;  %v15119_v46 = vpop.f32.mrf.mxu0 }
 0xd17   :  { %v2864_v54 = vpop.f32.mrf.mxu0 }
 0xd19   :  { %v15120_v29 = vpop.f32.mrf.mxu0 }
 0xd1e   :  { %2963 = vrot.lane.b32.xlu1 %v17305_v22, %s17112_s18 }
 0xd22   :  { %3011 = vrot.lane.b32.xlu1 %v17339_v26, %s17112_s18 }
 0xd26   :  { %3059 = vrot.lane.b32.xlu1 %v17349_v12, %s17112_s18 }
 0xd5c   :  { %v2869_v23 = vpop.xlane.xlu0 %2868 }
 0xd5d   :  { %v2879_v38 = vsub.f32 %v2711_v19, %v2869_v23 }
 0xd5f   :  { %v2883_v40 = vmul.f32 1.442695, %v2879_v38 }
 0xd61   :  { %16658 = vpow2.f32 %v2883_v40 }
 0xd64   :  { %v2875_v41 = vpop.xlane.xlu0 %2874 }
 0xd65   :  { %v2881_v25 = vsub.f32 %v2811_v51, %v2875_v41 }
 0xd67   :  { %v2887_v50 = vmul.f32 1.442695, %v2881_v25 }
 0xd69   :  { %16660 = vpow2.f32 %v2887_v50 }
 0xd6e   :  { %v16659_v28 = vpop.eup %16658 }
 0xd6f   :  { %v2891_v36 = vsel %vm661_vm3, %v16659_v28, 0.0 }
 0xd70   :  { %2892 = vadd.xlane.f32.xlu0 %v2891_v36 }
 0xd76   :  { %v16661_v23 = vpop.eup %16660 }
 0xd77   :  { %v2897_v38 = vsel %vm661_vm3, %v16661_v23, 0.0 }
 0xd86   :  { %2915 = vrot.lane.b32.xlu0 %v17303_v21, %s17112_s18 }
 0xd96   :  { %v2872_v46 = vpop.xlane.xlu1 %2871 }
 0xd97   :  { %v2880_v54 = vsub.f32 %v2761_v57, %v2872_v46 }
 0xd99   :  { %v2885_v29 = vmul.f32 1.442695, %v2880_v54 }
 0xd9a   :  { %v2964_v0 = vpop.permute.xlu1 %2963 }
 0xd9b   :  { %16662 = vpow2.f32 %v2885_v29  ;;  %v2969_v19 = vsel %vm713_vm2, %v2964_v0, 0 }
 0xd9c   :  { %15128 = vmatpush3.bf16.msra.mxu0 %v2969_v19 }
 0xd9d   :  { %15139 = vmatprep.subr.bf16.mxu0 %v17107_v35 }
 0xd9e   :  { %v2878_v0 = vpop.xlane.xlu0 %2877  ;;  %v3012_v19 = vpop.permute.xlu1 %3011 }
 0xd9f   :  { %v2882_v51 = vsub.f32 %v2861_v49, %v2878_v0 }
 0xda1   :  { %v2889_v57 = vmul.f32 1.442695, %v2882_v51 }
 0xda2   :  { %v3060_v51 = vpop.permute.xlu1 %3059 }
 0xda3   :  { %16664 = vpow2.f32 %v2889_v57 }
 0xda5   :  { %2898 = vadd.xlane.f32.xlu0 %v2897_v38 }
 0xda8   :  { %v16663_v40 = vpop.eup %16662 }
 0xda9   :  { %v2894_v36 = vsel %vm661_vm3, %v16663_v40, 0.0 }
 0xdaa   :  { %2895 = vadd.xlane.f32.xlu1 %v2894_v36  ;;  %v3017_v36 = vsel %vm713_vm2, %v3012_v19, 0 }
 0xdb0   :  { %v16665_v41 = vpop.eup %16664 }
 0xdb1   :  { %v2900_v25 = vsel %vm661_vm3, %v16665_v41, 0.0 }
 0xdbb   :  { %3159 = vrot.lane.b32.xlu1 %v17257_v55, %s17113_s19  ;;  %3109 = vrot.lane.b32.xlu0 %v17252_v48, %s17113_s19 }
 0xdbf   :  { %3107 = vrot.lane.b32.xlu0 %v17259_v58, %s17113_s19 }
 0xdc3   :  { %3209 = vrot.lane.b32.xlu0 %v17261_v59, %s17113_s19 }
 0xdc7   :  { %3207 = vrot.lane.b32.xlu0 %v17275_v4, %s17113_s19 }
 0xddf   :  { %2901 = vadd.xlane.f32.xlu1 %v2900_v25 }
 0xdf0   :  { %3157 = vrot.lane.b32.xlu1 %v17277_v5, %s17113_s19 }
 0xdf4   :  { %3259 = vrot.lane.b32.xlu1 %v17269_v3, %s17113_s19 }
 0xdf8   :  { %3257 = vrot.lane.b32.xlu1 %v17290_v8, %s17113_s19 }
 0xdf9   :  { %v2893_v50 = vpop.xlane.xlu0 %2892 }
 0xdfa   :  { %16666 = vrcp.f32 %v2893_v50 }
 0xdfd   :  { %v2916_v49 = vpop.permute.xlu0 %2915 }
 0xdfe   :  { %v2921_v46 = vsel %vm713_vm2, %v2916_v49, 0 }
 0xdff   :  { %15122 = vmatpush3.bf16.msra.mxu1 %v2921_v46 }
 0xe00   :  { %15133 = vmatprep.subr.bf16.mxu1 %v17107_v35 }
 0xe07   :  { %v16667_v54 = vpop.eup %16666 }
 0xe08   :  { %v2907_v29 = vmul.f32 %v16667_v54, %v16659_v28 }
 0xe0a   :  { %v2911_v38 = vpack.c.bf16 %v2907_v29, %v2907_v29 }
 0xe0c   :  { %15124 = vmatmul.mubr.msk.bf16.vlgmr.msra.gmra.mxu1 %vm661_vm3, %v2911_v38 }
 0xe0d   :  { %15134 = vmatpush3.bf16.msra.mxu1 %v3017_v36  ;;  %15135 = vmatprep.mubr.msk.bf16.mxu1 %vm17108_vm0, %v17107_v35  ;;  %v3065_v36 = vsel %vm713_vm2, %v3060_v51, 0 }
 0xe0e   :  { %15145 = vmatprep.subr.bf16.mxu1 %v17107_v35 }
 0xe2e   :  { %v2899_v0 = vpop.xlane.xlu0 %2898 }
 0xe2f   :  { %16668 = vrcp.f32 %v2899_v0 }
 0xe32   :  { %v3110_v25 = vpop.permute.xlu0 %3109 }
 0xe33   :  { %v2896_v57 = vpop.xlane.xlu1 %2895  ;;  %v3115_v29 = vsel %vm476_vm1, %v3110_v25, 0 }
 0xe34   :  { %16670 = vrcp.f32 %v2896_v57 }
 0xe36   :  { %v3108_v46 = vpop.permute.xlu0 %3107 }
 0xe37   :  { %v3160_v51 = vpop.permute.xlu1 %3159 }
 0xe3a   :  { %v3210_v0 = vpop.permute.xlu0 %3209 }
 0xe3c   :  { %v16669_v50 = vpop.eup %16668 }
 0xe3d   :  { %v2909_v28 = vmul.f32 %v16669_v50, %v16661_v23  ;;  %v3215_v23 = vsel %vm476_vm1, %v3210_v0, 0 }
 0xe3f   :  { %v2913_v49 = vpack.c.bf16 %v2909_v28, %v2909_v28 }
 0xe41   :  { %v16671_v54 = vpop.eup %16670  ;;  %15136 = vmatmul.mubr.msk.bf16.vlgmr.msra.gmra.mxu1 %vm661_vm3, %v2913_v49 }
 0xe42   :  { %15146 = vmatpush3.bf16.xpose.msra.mxu1 %v3115_v29  ;;  %v2908_v19 = vmul.f32 %v16671_v54, %v16663_v40  ;;  %15147 = vmatprep.mubr.msk.bf16.mxu1 %vm17108_vm0, %v17107_v35  ;;  %v3208_v40 = vpop.permute.xlu0 %3207 }
 0xe43   :  { %15157 = vmatprep.subr.bf16.mxu1 %v17107_v35 }
 0xe44   :  { %v2912_v38 = vpack.c.bf16 %v2908_v19, %v2908_v19 }
 0xe46   :  { %15130 = vmatmul.mubr.msk.bf16.vlgmr.msra.gmra.mxu0 %vm661_vm3, %v2912_v38 }
 0xe47   :  { %15140 = vmatpush3.bf16.msra.mxu0 %v3065_v36  ;;  %15141 = vmatprep.mubr.msk.bf16.mxu0 %vm17108_vm0, %v17107_v35 }
 0xe48   :  { %15151 = vmatprep.subr.bf16.mxu0 %v17107_v35 }
 0xe49   :  { %15148 = vmatmul.mubr.msk.bf16.vlgmr.msra.gmra.mxu1 %vm476_vm1, %v3108_v46  ;;  %v3165_v46 = vsel %vm476_vm1, %v3160_v51, 0 }
 0xe4a   :  { %15158 = vmatpush3.bf16.xpose.msra.mxu1 %v3215_v23  ;;  %15159 = vmatprep.mubr.msk.bf16.mxu1 %vm17108_vm0, %v17107_v35 }
 0xe4b   :  { %15169 = vmatprep.subr.bf16.mxu1 %v17107_v35 }
 0xe51   :  { %15160 = vmatmul.mubr.msk.bf16.vlgmr.msra.gmra.mxu1 %vm476_vm1, %v3208_v40 }
 0xe52   :  { %15171 = vmatprep.mubr.msk.bf16.mxu1 %vm17108_vm0, %v17107_v35 }
 0xe68   :  { %v2902_v57 = vpop.xlane.xlu1 %2901 }
 0xe69   :  { %16672 = vrcp.f32 %v2902_v57 }
 0xe6c   :  { %v3158_v49 = vpop.permute.xlu1 %3157 }
 0xe70   :  { %v3260_v54 = vpop.permute.xlu1 %3259 }
 0xe71   :  { %v3265_v29 = vsel %vm476_vm1, %v3260_v54, 0 }
 0xe76   :  { %v16673_v25 = vpop.eup %16672 }
 0xe77   :  { %v2910_v50 = vmul.f32 %v16673_v25, %v16665_v41  ;;  %v3258_v41 = vpop.permute.xlu1 %3257 }
 0xe79   :  { %v2914_v28 = vpack.c.bf16 %v2910_v50, %v2910_v50 }
 0xe7b   :  { %15142 = vmatmul.mubr.msk.bf16.vlgmr.msra.gmra.mxu0 %vm661_vm3, %v2914_v28 }
 0xe7c   :  { %15152 = vmatpush3.bf16.xpose.msra.mxu0 %v3165_v46  ;;  %15153 = vmatprep.mubr.msk.bf16.mxu0 %vm17108_vm0, %v17107_v35 }
 0xe7d   :  { %15163 = vmatprep.subr.bf16.mxu0 %v17107_v35 }
 0xe83   :  { %15154 = vmatmul.mubr.msk.bf16.vlgmr.msra.gmra.mxu0 %vm476_vm1, %v3158_v49 }
 0xe84   :  { %15164 = vmatpush3.bf16.xpose.msra.mxu0 %v3265_v29  ;;  %15165 = vmatprep.mubr.msk.bf16.mxu0 %vm17108_vm0, %v17107_v35 }
 0xe85   :  { %15175 = vmatprep.subr.bf16.mxu0 %v17107_v35 }
 0xe8b   :  { %15166 = vmatmul.mubr.msk.bf16.vlgmr.msra.gmra.mxu0 %vm476_vm1, %v3258_v41 }
 0xe8c   :  { %15177 = vmatprep.mubr.msk.bf16.mxu0 %vm17108_vm0, %v17107_v35 }
 0xecc   :  { %v17799_v19 = vpop.f32.mrf.mxu1 }
 0xece   :  { %v15125_v38 = vpop.f32.mrf.mxu1 }
 0xed0   :  { %v2960_v36 = vpop.f32.mrf.mxu1 }
 0xed2   :  { %v15126_v0 = vpop.f32.mrf.mxu1 }
 0xf01   :  { %v17801_v23 = vpop.f32.mrf.mxu1 }
 0xf03   :  { %v15137_v40 = vpop.f32.mrf.mxu1 }
 0xf05   :  { %v3056_v51 = vpop.f32.mrf.mxu1 }
 0xf06   :  { %v17803_v57 = vpop.f32.mrf.mxu0 }
 0xf07   :  { %v15138_v50 = vpop.f32.mrf.mxu1 }
 0xf08   :  { %v15131_v28 = vpop.f32.mrf.mxu0 }
 0xf09   :  { %v3151_v49 = vpop.f32.mrf.mxu1 }
 0xf0a   :  { %v3008_v46 = vpop.f32.mrf.mxu0  ;;  %v3307_v54 = vsel %vm661_vm3, %v3151_v49, -inf }
 0xf0b   :  { %3308 = vmax.xlane.f32.xlu0 %v3307_v54  ;;  %v15149_v29 = vpop.f32.mrf.mxu1 }
 0xf0c   :  { %v15132_v41 = vpop.f32.mrf.mxu0 }
 0xf0d   :  { %v3154_v38 = vpop.f32.mrf.mxu1 }
 0xf0f   :  { %v15150_v36 = vpop.f32.mrf.mxu1 }
 0xf11   :  { %v3251_v0 = vpop.f32.mrf.mxu1 }
 0xf12   :  { %v3313_v40 = vsel %vm661_vm3, %v3251_v0, -inf }
 0xf13   :  { %3314 = vmax.xlane.f32.xlu0 %v3313_v40  ;;  %v15161_v51 = vpop.f32.mrf.mxu1 }
 0xf15   :  { %v3254_v63 = vpop.f32.mrf.mxu1 }
 0xf17   :  { %v15162_v18 = vpop.f32.mrf.mxu1 }
 0xf3b   :  { %v17809_v45 = vpop.f32.mrf.mxu0 }
 0xf3d   :  { %v15143_v28 = vpop.f32.mrf.mxu0 }
 0xf3f   :  { %v3104_v46 = vpop.f32.mrf.mxu0 }
 0xf41   :  { %v15144_v53 = vpop.f32.mrf.mxu0 }
 0xf43   :  { %v3201_v54 = vpop.f32.mrf.mxu0 }
 0xf44   :  { %v3310_v29 = vsel %vm661_vm3, %v3201_v54, -inf }
 0xf45   :  { %3311 = vmax.xlane.f32.xlu1 %v3310_v29  ;;  %v15155_v41 = vpop.f32.mrf.mxu0 }
 0xf47   :  { %v3204_v38 = vpop.f32.mrf.mxu0 }
 0xf49   :  { %v15156_v36 = vpop.f32.mrf.mxu0 }
 0xf4b   :  { %v3301_v25 = vpop.f32.mrf.mxu0 }
 0xf4c   :  { %v3316_v40 = vsel %vm661_vm3, %v3301_v25, -inf }
 0xf4d   :  { %3317 = vmax.xlane.f32.xlu0 %v3316_v40  ;;  %v15167_v18 = vpop.f32.mrf.mxu0 }
 0xf4f   :  { %v3304_v63 = vpop.f32.mrf.mxu0 }
 0xf51   :  { %v15168_v51 = vpop.f32.mrf.mxu0 }
 0xf56   :  { %3403 = vrot.lane.b32.xlu1 %v17305_v22, %s17113_s19 }
 0xf5a   :  { %3451 = vrot.lane.b32.xlu1 %v17339_v26, %s17113_s19 }
 0xf5e   :  { %3499 = vrot.lane.b32.xlu1 %v17349_v12, %s17113_s19 }
 0xf94   :  { %v3309_v53 = vpop.xlane.xlu0 %3308 }
 0xf95   :  { %v3319_v28 = vsub.f32 %v3151_v49, %v3309_v53 }
 0xf97   :  { %v3323_v46 = vmul.f32 1.442695, %v3319_v28 }
 0xf99   :  { %16674 = vpow2.f32 %v3323_v46 }
 0xf9c   :  { %v3315_v38 = vpop.xlane.xlu0 %3314 }
 0xf9d   :  { %v3321_v36 = vsub.f32 %v3251_v0, %v3315_v38 }
 0xf9f   :  { %v3327_v40 = vmul.f32 1.442695, %v3321_v36 }
 0xfa1   :  { %16676 = vpow2.f32 %v3327_v40 }
 0xfa6   :  { %v16675_v29 = vpop.eup %16674 }
 0xfa7   :  { %v3331_v41 = vsel %vm661_vm3, %v16675_v29, 0.0 }
 0xfa8   :  { %3332 = vadd.xlane.f32.xlu0 %v3331_v41 }
 0xfae   :  { %v16677_v53 = vpop.eup %16676 }
 0xfaf   :  { %v3337_v28 = vsel %vm661_vm3, %v16677_v53, 0.0 }
 0xfbe   :  { %3355 = vrot.lane.b32.xlu0 %v17303_v21, %s17113_s19 }
 0xfce   :  { %v3312_v18 = vpop.xlane.xlu1 %3311 }
 0xfcf   :  { %v3320_v63 = vsub.f32 %v3201_v54, %v3312_v18 }
 0xfd1   :  { %v3325_v51 = vmul.f32 1.442695, %v3320_v63 }
 0xfd2   :  { %v3404_v50 = vpop.permute.xlu1 %3403 }
 0xfd3   :  { %16678 = vpow2.f32 %v3325_v51  ;;  %v3409_v49 = vsel %vm713_vm2, %v3404_v50, 0 }
 0xfd4   :  { %15176 = vmatpush3.bf16.msra.mxu0 %v3409_v49 }
 0xfd5   :  { %15187 = vmatprep.subr.bf16.mxu0 %v17107_v35 }
 0xfd6   :  { %v3318_v0 = vpop.xlane.xlu0 %3317 }
 0xfd7   :  { %v3322_v50 = vsub.f32 %v3301_v25, %v3318_v0  ;;  %v3452_v25 = vpop.permute.xlu1 %3451 }
 0xfd9   :  { %v3329_v54 = vmul.f32 1.442695, %v3322_v50 }
 0xfdb   :  { %16680 = vpow2.f32 %v3329_v54 }
 0xfdd   :  { %3338 = vadd.xlane.f32.xlu0 %v3337_v28 }
 0xfe0   :  { %v16679_v46 = vpop.eup %16678 }
 0xfe1   :  { %v3334_v41 = vsel %vm661_vm3, %v16679_v46, 0.0 }
 0xfe2   :  { %3335 = vadd.xlane.f32.xlu1 %v3334_v41 }
 0xfe8   :  { %v16681_v38 = vpop.eup %16680 }
 0xfe9   :  { %v3340_v36 = vsel %vm661_vm3, %v16681_v38, 0.0 }
 0xff3   :  { %3599 = vrot.lane.b32.xlu1 %v17257_v55, %s17114_s20  ;;  %3549 = vrot.lane.b32.xlu0 %v17252_v48, %s17114_s20 }
 0xff7   :  { %3547 = vrot.lane.b32.xlu0 %v17259_v58, %s17114_s20 }
 0xffb   :  { %3649 = vrot.lane.b32.xlu0 %v17261_v59, %s17114_s20 }
 0xfff   :  { %3647 = vrot.lane.b32.xlu0 %v17275_v4, %s17114_s20 }
0x1017   :  { %3341 = vadd.xlane.f32.xlu1 %v3340_v36 }
0x1028   :  { %3597 = vrot.lane.b32.xlu1 %v17277_v5, %s17114_s20  ;;  %v3457_v5 = vsel %vm713_vm2, %v3452_v25, 0 }
0x102c   :  { %3699 = vrot.lane.b32.xlu1 %v17269_v3, %s17114_s20 }
0x1030   :  { %3697 = vrot.lane.b32.xlu1 %v17290_v8, %s17114_s20  ;;  %v3500_v8 = vpop.permute.xlu1 %3499 }
0x1031   :  { %v3333_v48 = vpop.xlane.xlu0 %3332  ;;  %v3505_v36 = vsel %vm713_vm2, %v3500_v8, 0 }
0x1032   :  { %16682 = vrcp.f32 %v3333_v48 }
0x1035   :  { %v3356_v55 = vpop.permute.xlu0 %3355 }
0x1036   :  { %v3361_v58 = vsel %vm713_vm2, %v3356_v55, 0 }
0x1037   :  { %15170 = vmatpush3.bf16.msra.mxu1 %v3361_v58 }
0x1038   :  { %15181 = vmatprep.subr.bf16.mxu1 %v17107_v35 }
0x103f   :  { %v16683_v59 = vpop.eup %16682 }
0x1040   :  { %v3347_v4 = vmul.f32 %v16683_v59, %v16675_v29 }
0x1042   :  { %v3351_v40 = vpack.c.bf16 %v3347_v4, %v3347_v4 }
0x1044   :  { %15172 = vmatmul.mubr.msk.bf16.vlgmr.msra.gmra.mxu1 %vm661_vm3, %v3351_v40 }
0x1045   :  { %15182 = vmatpush3.bf16.msra.mxu1 %v3457_v5  ;;  %15183 = vmatprep.mubr.msk.bf16.mxu1 %vm17108_vm0, %v17107_v35 }
0x1046   :  { %15193 = vmatprep.subr.bf16.mxu1 %v17107_v35 }
0x1066   :  { %v3339_v3 = vpop.xlane.xlu0 %3338 }
0x1067   :  { %16684 = vrcp.f32 %v3339_v3 }
0x106a   :  { %v3550_v63 = vpop.permute.xlu0 %3549 }
0x106b   :  { %v3336_v18 = vpop.xlane.xlu1 %3335  ;;  %v3555_v0 = vsel %vm476_vm1, %v3550_v63, 0 }
0x106c   :  { %16686 = vrcp.f32 %v3336_v18 }
0x106e   :  { %v3548_v28 = vpop.permute.xlu0 %3547 }
0x106f   :  { %v3600_v55 = vpop.permute.xlu1 %3599 }
0x1070   :  { %v3605_v5 = vsel %vm476_vm1, %v3600_v55, 0 }
0x1072   :  { %v3650_v48 = vpop.permute.xlu0 %3649 }
0x1074   :  { %v16685_v51 = vpop.eup %16684 }
0x1075   :  { %v3349_v29 = vmul.f32 %v16685_v51, %v16677_v53  ;;  %v3655_v53 = vsel %vm476_vm1, %v3650_v48, 0 }
0x1077   :  { %v3353_v49 = vpack.c.bf16 %v3349_v29, %v3349_v29 }
0x1079   :  { %v16687_v41 = vpop.eup %16686  ;;  %15184 = vmatmul.mubr.msk.bf16.vlgmr.msra.gmra.mxu1 %vm661_vm3, %v3353_v49 }
0x107a   :  { %v3348_v50 = vmul.f32 %v16687_v41, %v16679_v46  ;;  %15194 = vmatpush3.bf16.xpose.msra.mxu1 %v3555_v0  ;;  %15195 = vmatprep.mubr.msk.bf16.mxu1 %vm17108_vm0, %v17107_v35  ;;  %v3648_v46 = vpop.permute.xlu0 %3647 }
0x107b   :  { %15205 = vmatprep.subr.bf16.mxu1 %v17107_v35 }
0x107c   :  { %v3352_v54 = vpack.c.bf16 %v3348_v50, %v3348_v50 }
0x107e   :  { %15178 = vmatmul.mubr.msk.bf16.vlgmr.msra.gmra.mxu0 %vm661_vm3, %v3352_v54 }
0x107f   :  { %15188 = vmatpush3.bf16.msra.mxu0 %v3505_v36  ;;  %15189 = vmatprep.mubr.msk.bf16.mxu0 %vm17108_vm0, %v17107_v35 }
0x1080   :  { %15199 = vmatprep.subr.bf16.mxu0 %v17107_v35 }
0x1081   :  { %15196 = vmatmul.mubr.msk.bf16.vlgmr.msra.gmra.mxu1 %vm476_vm1, %v3548_v28 }
0x1082   :  { %15206 = vmatpush3.bf16.xpose.msra.mxu1 %v3655_v53  ;;  %15207 = vmatprep.mubr.msk.bf16.mxu1 %vm17108_vm0, %v17107_v35 }
0x1083   :  { %15217 = vmatprep.subr.bf16.mxu1 %v17107_v35 }
0x1089   :  { %15208 = vmatmul.mubr.msk.bf16.vlgmr.msra.gmra.mxu1 %vm476_vm1, %v3648_v46 }
0x108a   :  { %15219 = vmatprep.mubr.msk.bf16.mxu1 %vm17108_vm0, %v17107_v35 }
0x10a0   :  { %v3342_v58 = vpop.xlane.xlu1 %3341 }
0x10a1   :  { %16688 = vrcp.f32 %v3342_v58 }
0x10a4   :  { %v3598_v40 = vpop.permute.xlu1 %3597 }
0x10a8   :  { %v3700_v3 = vpop.permute.xlu1 %3699 }
0x10a9   :  { %v3705_v8 = vsel %vm476_vm1, %v3700_v3, 0 }
0x10ae   :  { %v16689_v59 = vpop.eup %16688 }
0x10af   :  { %v3350_v4 = vmul.f32 %v16689_v59, %v16681_v38  ;;  %v3698_v38 = vpop.permute.xlu1 %3697 }
0x10b1   :  { %v3354_v25 = vpack.c.bf16 %v3350_v4, %v3350_v4 }
0x10b3   :  { %15190 = vmatmul.mubr.msk.bf16.vlgmr.msra.gmra.mxu0 %vm661_vm3, %v3354_v25 }
0x10b4   :  { %15200 = vmatpush3.bf16.xpose.msra.mxu0 %v3605_v5  ;;  %15201 = vmatprep.mubr.msk.bf16.mxu0 %vm17108_vm0, %v17107_v35 }
0x10b5   :  { %15211 = vmatprep.subr.bf16.mxu0 %v17107_v35 }
0x10bb   :  { %15202 = vmatmul.mubr.msk.bf16.vlgmr.msra.gmra.mxu0 %vm476_vm1, %v3598_v40 }
0x10bc   :  { %15212 = vmatpush3.bf16.xpose.msra.mxu0 %v3705_v8  ;;  %15213 = vmatprep.mubr.msk.bf16.mxu0 %vm17108_vm0, %v17107_v35 }
0x10bd   :  { %15223 = vmatprep.subr.bf16.mxu0 %v17107_v35 }
0x10c3   :  { %15214 = vmatmul.mubr.msk.bf16.vlgmr.msra.gmra.mxu0 %vm476_vm1, %v3698_v38 }
0x10c4   :  { %15225 = vmatprep.mubr.msk.bf16.mxu0 %vm17108_vm0, %v17107_v35 }
0x1104   :  { %v17883_v18 = vpop.f32.mrf.mxu1 }
0x1106   :  { %v15173_v63 = vpop.f32.mrf.mxu1 }
0x1108   :  { %v3400_v51 = vpop.f32.mrf.mxu1 }
0x110a   :  { %v15174_v29 = vpop.f32.mrf.mxu1 }
0x1139   :  { %v17885_v49 = vpop.f32.mrf.mxu1 }
0x113b   :  { %v15185_v28 = vpop.f32.mrf.mxu1 }
0x113d   :  { %v3496_v41 = vpop.f32.mrf.mxu1 }
0x113e   :  { %v3445_v0 = vpop.f32.mrf.mxu0 }
0x113f   :  { %v16178_v50 = vpack.i.bf16 %v3445_v0, %v17883_v18  ;;  %v15186_v54 = vpop.f32.mrf.mxu1 }
0x1140   :  { %v15179_v36 = vpop.f32.mrf.mxu0 }
0x1141   :  { %v3591_v48 = vpop.f32.mrf.mxu1 }
0x1142   :  { %v3448_v53 = vpop.f32.mrf.mxu0  ;;  %v3747_v46 = vsel %vm661_vm3, %v3591_v48, -inf }
0x1143   :  { %3748 = vmax.xlane.f32.xlu0 %v3747_v46  ;;  %v15197_v55 = vpop.f32.mrf.mxu1 }
0x1144   :  { %v15180_v58 = vpop.f32.mrf.mxu0 }
0x1145   :  { %v3594_v59 = vpop.f32.mrf.mxu1 }
0x1147   :  { %v15198_v4 = vpop.f32.mrf.mxu1 }
0x1149   :  { %v3691_v25 = vpop.f32.mrf.mxu1 }
0x114a   :  { %v3753_v40 = vsel %vm661_vm3, %v3691_v25, -inf }
0x114b   :  { %3754 = vmax.xlane.f32.xlu0 %v3753_v40  ;;  %v15209_v5 = vpop.f32.mrf.mxu1 }
0x114d   :  { %v3694_v3 = vpop.f32.mrf.mxu1 }
0x114f   :  { %v15210_v8 = vpop.f32.mrf.mxu1 }
0x1173   :  { %v17890_v38 = vpop.f32.mrf.mxu0 }
0x1174   :  { %v16183_v18 = vpack.i.bf16 %v17890_v38, %v17885_v49 }
0x1175   :  { %v15191_v63 = vpop.f32.mrf.mxu0 }
0x1177   :  { %v3544_v51 = vpop.f32.mrf.mxu0 }
0x1179   :  { %v15192_v29 = vpop.f32.mrf.mxu0 }
0x117b   :  { %v3641_v28 = vpop.f32.mrf.mxu0 }
0x117c   :  { %v3750_v41 = vsel %vm661_vm3, %v3641_v28, -inf }
0x117d   :  { %3751 = vmax.xlane.f32.xlu1 %v3750_v41  ;;  %v15203_v0 = vpop.f32.mrf.mxu0 }
0x117f   :  { %v3644_v54 = vpop.f32.mrf.mxu0 }
0x1181   :  { %v15204_v36 = vpop.f32.mrf.mxu0 }
0x1183   :  { %v3741_v53 = vpop.f32.mrf.mxu0 }
0x1184   :  { %v3756_v46 = vsel %vm661_vm3, %v3741_v53, -inf }
0x1185   :  { %3757 = vmax.xlane.f32.xlu0 %v3756_v46  ;;  %v15215_v55 = vpop.f32.mrf.mxu0 }
0x1187   :  { %v3744_v58 = vpop.f32.mrf.mxu0 }
0x1188   :  { %v19847_v58 = vmov 0  }
0x1189   :  { %v15216_v59 = vpop.f32.mrf.mxu0 }
0x11cc   :  { %v3749_v4 = vpop.xlane.xlu0 %3748 }
0x11cd   :  { %v3759_v40 = vsub.f32 %v3591_v48, %v3749_v4 }
0x11cf   :  { %v3763_v5 = vmul.f32 1.442695, %v3759_v40 }
0x11d1   :  { %16690 = vpow2.f32 %v3763_v5 }
0x11d4   :  { %v3755_v3 = vpop.xlane.xlu0 %3754 }
0x11d5   :  { %v3761_v8 = vsub.f32 %v3691_v25, %v3755_v3 }
0x11d7   :  { %v3767_v63 = vmul.f32 1.442695, %v3761_v8  ;;  %v16370_v8 = vld [vmem:[#allocation4 + $0x38] sm:$0xff]  }
0x11d9   :  { %16692 = vpow2.f32 %v3767_v63  ;;  %v16371_v63 = vld [vmem:[#allocation4 + $0x30] sm:$0xff]  }
0x11de   :  { %v16691_v51 = vpop.eup %16690 }
0x11df   :  { %v3771_v29 = vsel %vm661_vm3, %v16691_v51, 0.0 }
0x11e0   :  { %3772 = vadd.xlane.f32.xlu0 %v3771_v29 }
0x11e6   :  { %v16693_v41 = vpop.eup %16692 }
0x11e7   :  { %v3777_v0 = vsel %vm661_vm3, %v16693_v41, 0.0 }
0x11e8   :  { %3778 = vadd.xlane.f32.xlu0 %v3777_v0 }
0x11fe   :  { %3795 = vrot.lane.b32.xlu0 %v17303_v21, %s17114_s20  ;;  %v19841_v21 = vpack.i.bf16 %v17803_v57, %v17799_v19 }
0x1202   :  { %16129 = vrot.lane.b32.xlu0 %v16128_v33, %s17114_s20 }
0x1206   :  { %v3752_v48 = vpop.xlane.xlu1 %3751  ;;  %16139 = vrot.lane.b32.xlu0 %v16138_v16, %s17113_s19 }
0x1207   :  { %v3760_v25 = vsub.f32 %v3641_v28, %v3752_v48 }
0x1209   :  { %v3765_v54 = vmul.f32 1.442695, %v3760_v25 }
0x120a   :  { %16149 = vrot.lane.b32.xlu0 %v16148_v44, %s17112_s18  ;;  %v19844_v44 = vpack.i.bf16 %v17641_v11, %v17633_v37 }
0x120b   :  { %16694 = vpow2.f32 %v3765_v54 }
0x120e   :  { %16159 = vrot.lane.b32.xlu0 %v16158_v10, %s17097_s16  ;;  %v3758_v33 = vpop.xlane.xlu0 %3757 }
0x120f   :  { %v3762_v60 = vsub.f32 %v3741_v53, %v3758_v33  ;;  %v16374_v33 = vld [vmem:[#allocation4 + $0x18] sm:$0xff]  }
0x1211   :  { %v3769_v15 = vmul.f32 1.442695, %v3762_v60  ;;  %v16375_v60 = vld [vmem:[#allocation4 + $0x10] sm:$0xff]  }
0x1212   :  { %16169 = vrot.lane.b32.xlu0 %v19841_v21, %s17111_s15  ;;  %v16373_v21 = vld [vmem:[#allocation4 + $0x20] sm:$0xff]  }
0x1213   :  { %16696 = vpow2.f32 %v3769_v15  ;;  %v16376_v15 = vld [vmem:[#allocation4 + $0x8] sm:$0xff]  }
0x1216   :  { %16179 = vrot.lane.b32.xlu0 %v16178_v50, %s17110_s30 }
0x1218   :  { %v16695_v20 = vpop.eup %16694 }
0x1219   :  { %v3774_v32 = vsel %vm661_vm3, %v16695_v20, 0.0 }
0x121a   :  { %3775 = vadd.xlane.f32.xlu1 %v3774_v32 }
0x1220   :  { %v16697_v16 = vpop.eup %16696 }
0x1221   :  { %v3780_v24 = vsel %vm661_vm3, %v16697_v16, 0.0 }
0x122b   :  { %3843 = vrot.lane.b32.xlu1 %v17305_v22, %s17114_s20 }
0x122f   :  { %3891 = vrot.lane.b32.xlu1 %v17339_v26, %s17114_s20  ;;  %v19843_v26 = vpack.i.bf16 %v17557_v17, %v17549_v7  ;;  %v19846_v7 = vpack.i.bf16 %v17809_v45, %v17801_v23 }
0x1253   :  { %3781 = vadd.xlane.f32.xlu1 %v3780_v24 }
0x1264   :  { %3939 = vrot.lane.b32.xlu1 %v17349_v12, %s17114_s20  ;;  %v19845_v12 = vpack.i.bf16 %v17725_v47, %v17717_v56 }
0x1268   :  { %16134 = vrot.lane.b32.xlu1 %v19842_v42, %s17114_s20 }
0x1269   :  { %v3773_v22 = vpop.xlane.xlu0 %3772 }
0x126a   :  { %16698 = vrcp.f32 %v3773_v22 }
0x126c   :  { %16144 = vrot.lane.b32.xlu1 %v19843_v26, %s17113_s19 }
0x1270   :  { %16154 = vrot.lane.b32.xlu1 %v19844_v44, %s17112_s18 }
0x1271   :  { %v3779_v62 = vpop.xlane.xlu0 %3778 }
0x1272   :  { %16700 = vrcp.f32 %v3779_v62 }
0x1274   :  { %16164 = vrot.lane.b32.xlu1 %v19845_v12, %s17097_s16 }
0x1275   :  { %v3796_v27 = vpop.permute.xlu0 %3795 }
0x1276   :  { %v3801_v52 = vsel %vm713_vm2, %v3796_v27, 0 }
0x1277   :  { %v16699_v1 = vpop.eup %16698  ;;  %15218 = vmatpush3.bf16.msra.mxu1 %v3801_v52 }
0x1278   :  { %v3787_v10 = vmul.f32 %v16699_v1, %v16691_v51  ;;  %16174 = vrot.lane.b32.xlu1 %v19846_v7, %s17111_s15  ;;  %15229 = vmatprep.subr.bf16.mxu1 %v17107_v35 }
0x1279   :  { %v16130_v62 = vpop.permute.xlu0 %16129 }
0x127a   :  { %v3791_v17 = vpack.c.bf16 %v3787_v10, %v3787_v10  ;;  %v16132_v10 = vunpack.i.h.bf16 %v16130_v62  ;;  %v16131_v7 = vunpack.i.l.bf16 %v16130_v62 }
0x127c   :  { %16184 = vrot.lane.b32.xlu1 %v16183_v18, %s17110_s30  ;;  %15220 = vmatmul.mubr.msk.bf16.vlgmr.msra.gmra.mxu1 %vm661_vm3, %v3791_v17 }
0x127d   :  { %15231 = vmatprep.mubr.msk.bf16.mxu1 %vm17108_vm0, %v17107_v35  ;;  %v16140_v12 = vpop.permute.xlu0 %16139 }
0x127e   :  { %v16142_v17 = vunpack.i.h.bf16 %v16140_v12 }
0x127f   :  { %v16701_v11 = vpop.eup %16700 }
0x1280   :  { %v3789_v47 = vmul.f32 %v16701_v11, %v16693_v41  ;;  %v16372_v41 = vld [vmem:[#allocation4 + $0x28] sm:$0xff]  }
0x1281   :  { %v16150_v27 = vpop.permute.xlu0 %16149 }
0x1282   :  { %v3793_v57 = vpack.c.bf16 %v3789_v47, %v3789_v47  ;;  %v16152_v11 = vunpack.i.h.bf16 %v16150_v27 }
0x1285   :  { %v16160_v52 = vpop.permute.xlu0 %16159 }
0x1286   :  { %v16162_v47 = vunpack.i.h.bf16 %v16160_v52 }
0x1289   :  { %v16170_v1 = vpop.permute.xlu0 %16169 }
0x12a3   :  { %v3776_v37 = vpop.xlane.xlu1 %3775 }
0x12a4   :  { %16702 = vrcp.f32 %v3776_v37  ;;  %v16141_v37 = vunpack.i.l.bf16 %v16140_v12 }
0x12a7   :  { %v3844_v56 = vpop.permute.xlu1 %3843 }
0x12a8   :  { %v3849_v45 = vsel %vm713_vm2, %v3844_v56, 0  ;;  %v16151_v56 = vunpack.i.l.bf16 %v16150_v27 }
0x12a9   :  { %15224 = vmatpush3.bf16.msra.mxu0 %v3849_v45  ;;  %v16180_v45 = vpop.permute.xlu0 %16179 }
0x12aa   :  { %15235 = vmatprep.subr.bf16.mxu0 %v17107_v35 }
0x12ab   :  { %v3892_v19 = vpop.permute.xlu1 %3891 }
0x12ac   :  { %v3897_v23 = vsel %vm713_vm2, %v3892_v19, 0  ;;  %v16161_v19 = vunpack.i.l.bf16 %v16160_v52 }
0x12ad   :  { %15230 = vmatpush3.bf16.msra.mxu1 %v3897_v23  ;;  %v4100_v23 = vsel %vm476_vm1, %v17387_v6, %v16132_v10 }
0x12ae   :  { %15241 = vmatprep.subr.bf16.mxu1 %v16370_v8 }
0x12b0   :  { %15232 = vmatmul.mubr.msk.bf16.vlgmr.msra.gmra.mxu1 %vm661_vm3, %v3793_v57  ;;  %v4099_v57 = vsel %vm476_vm1, %v17383_v61, %v16131_v7 }
0x12b1   :  { %v16703_v49 = vpop.eup %16702  ;;  %15242 = vmatpush3.bf16.msra.mxu1 %v16370_v8 }
0x12b2   :  { %v3788_v50 = vmul.f32 %v16703_v49, %v16695_v20  ;;  %15243 = vmatprep.subr.bf16.mxu1 %v16371_v63  ;;  %v16172_v49 = vunpack.i.h.bf16 %v16170_v1 }
0x12b4   :  { %v3792_v38 = vpack.c.bf16 %v3788_v50, %v3788_v50  ;;  %v16171_v50 = vunpack.i.l.bf16 %v16170_v1 }
0x12b5   :  { %15244 = vmatpush3.bf16.msra.mxu1 %v16371_v63 }
0x12b6   :  { %15226 = vmatmul.mubr.msk.bf16.vlgmr.msra.gmra.mxu0 %vm661_vm3, %v3792_v38  ;;  %15245 = vmatprep.subr.bf16.mxu1 %v16372_v41  ;;  %v4104_v38 = vsel %vm4103_vm4, %v4099_v57, %v16141_v37 }
0x12b7   :  { %15237 = vmatprep.mubr.msk.bf16.mxu0 %vm17108_vm0, %v17107_v35 }
0x12b9   :  { %15246 = vmatpush3.bf16.msra.mxu1 %v16372_v41 }
0x12ba   :  { %15247 = vmatprep.subr.bf16.mxu1 %v16373_v21 }
0x12bd   :  { %15248 = vmatpush3.bf16.msra.mxu1 %v16373_v21 }
0x12be   :  { %15249 = vmatprep.subr.bf16.mxu1 %v16374_v33 }
0x12c1   :  { %15250 = vmatpush3.bf16.msra.mxu1 %v16374_v33 }
0x12c2   :  { %15251 = vmatprep.subr.bf16.mxu1 %v16375_v60 }
0x12c5   :  { %15252 = vmatpush3.bf16.msra.mxu1 %v16375_v60 }
0x12c6   :  { %15253 = vmatprep.subr.bf16.mxu1 %v16376_v15 }
0x12c9   :  { %15254 = vmatpush3.bf16.msra.mxu1 %v16376_v15 }
0x12dc   :  { %v3782_v18 = vpop.xlane.xlu1 %3781 }
0x12dd   :  { %16704 = vrcp.f32 %v3782_v18  ;;  %v4105_v18 = vsel %vm4103_vm4, %v4100_v23, %v16142_v17 }
0x12e0   :  { %v3940_v28 = vpop.permute.xlu1 %3939 }
0x12e1   :  { %v3945_v36 = vsel %vm713_vm2, %v3940_v28, 0  ;;  %v16182_v28 = vunpack.i.h.bf16 %v16180_v45 }
0x12e2   :  { %15236 = vmatpush3.bf16.msra.mxu0 %v3945_v36  ;;  %v16181_v36 = vunpack.i.l.bf16 %v16180_v45 }
0x12e4   :  { %v16135_v41 = vpop.permute.xlu1 %16134 }
0x12e5   :  { %v16137_v21 = vunpack.i.h.bf16 %v16135_v41 }
0x12ea   :  { %v16705_v53 = vpop.eup %16704 }
0x12eb   :  { %v3790_v46 = vmul.f32 %v16705_v53, %v16697_v16  ;;  %v16377_v16 = vld [vmem:[#allocation4] sm:$0xff]   ;;  %v4109_v53 = vsel %vm4108_vm5, %v4104_v38, %v16151_v56 }
0x12ec   :  { %15255 = vmatprep.subr.bf16.mxu1 %v16377_v16  ;;  %v13979_v38 = vld [vmem:[%s19829_s5] ss:$0 sm:$0xff] }
0x12ed   :  { %v3794_v55 = vpack.c.bf16 %v3790_v46, %v3790_v46  ;;  %15256 = vmatpush3.bf16.msra.mxu1 %v16377_v16  ;;  %v4110_v46 = vsel %vm4108_vm5, %v4105_v18, %v16152_v11 }
0x12ee   :  { %v4115_v6 = vsel %vm4113_vm6, %v4110_v46, %v16162_v47 }
0x12ef   :  { %15238 = vmatmul.mubr.msk.bf16.vlgmr.msra.gmra.mxu0 %vm661_vm3, %v3794_v55  ;;  %v4114_v55 = vsel %vm4113_vm6, %v4109_v53, %v16161_v19 }
0x12f0   :  { %4440 = vmatprep.mubr.bf16.mxu0 %v19847_v58  ;;  %v4119_v61 = vsel %vm4118_vm7, %v4114_v55, %v16171_v50 }
0x133c   :  { %v3837_v59 = vpop.f32.mrf.mxu1 }
0x133e   :  { %v15221_v4 = vpop.f32.mrf.mxu1 }
0x133f   :  { %v4120_v4 = vsel %vm4118_vm7, %v4115_v6, %v16172_v49 }
0x1340   :  { %v3840_v40 = vpop.f32.mrf.mxu1  ;;  %v4125_v8 = vsel %vm4123_vm8, %v4120_v4, %v16182_v28 }
0x1342   :  { %v15222_v5 = vpop.f32.mrf.mxu1 }
0x1370   :  { %v3933_v3 = vpop.f32.mrf.mxu1 }
0x1372   :  { %v15233_v51 = vpop.f32.mrf.mxu1 }
0x1374   :  { %v3936_v29 = vpop.f32.mrf.mxu1 }
0x1376   :  { %v3885_v0 = vpop.f32.mrf.mxu0  ;;  %v15234_v48 = vpop.f32.mrf.mxu1 }
0x1377   :  { %v16188_v25 = vpack.i.bf16 %v3885_v0, %v3837_v59  ;;  %v16145_v0 = vpop.permute.xlu1 %16144 }
0x1378   :  { %v15227_v54 = vpop.f32.mrf.mxu0  ;;  %v16146_v33 = vunpack.i.l.bf16 %v16145_v0 }
0x1379   :  { %16189 = vrot.lane.b32.xlu0 %v16188_v25, %s17109_s29 }
0x137a   :  { %v3888_v20 = vpop.f32.mrf.mxu0 }
0x137b   :  { %v16155_v48 = vpop.permute.xlu1 %16154  ;;  %v16136_v20 = vunpack.i.l.bf16 %v16135_v41  ;;  %v16389_v41 = vld [vmem:[#allocation6 + $0x44] ss:$8 sps:$4 sm:$0xff]  }
0x137c   :  { %v15228_v32 = vpop.f32.mrf.mxu0  ;;  %v16157_v60 = vunpack.i.h.bf16 %v16155_v48  ;;  %v16156_v15 = vunpack.i.l.bf16 %v16155_v48  ;;  %v16392_v48 = vld [vmem:[#allocation6 + $0x34] ss:$8 sps:$4 sm:$0xff]  }
0x137d   :  { %v16147_v32 = vunpack.i.h.bf16 %v16145_v0  ;;  %v16387_v0 = vld [vmem:[#allocation6 + $0x40] ss:$8 sps:$4 sm:$0xff]  }
0x137f   :  { %v16165_v25 = vpop.permute.xlu1 %16164 }
0x1383   :  { %v16175_v54 = vpop.permute.xlu1 %16174 }
0x1384   :  { %v16176_v62 = vunpack.i.l.bf16 %v16175_v54 }
0x1387   :  { %v16185_v16 = vpop.permute.xlu1 %16184 }
0x1388   :  { %v16187_v52 = vunpack.i.h.bf16 %v16185_v16  ;;  %v16186_v1 = vunpack.i.l.bf16 %v16185_v16  ;;  %v16403_v16 = vld [vmem:[#allocation7 + $0x38] sm:$0xff]  }
0x13af   :  { %v3981_v24 = vpop.f32.mrf.mxu0 }
0x13b0   :  { %v16193_v42 = vpack.i.bf16 %v3981_v24, %v3933_v3  ;;  %v4124_v3 = vsel %vm4123_vm8, %v4119_v61, %v16181_v36  ;;  %v16167_v24 = vunpack.i.h.bf16 %v16165_v25 }
0x13b1   :  { %v15239_v22 = vpop.f32.mrf.mxu0 }
0x13b2   :  { %16194 = vrot.lane.b32.xlu1 %v16193_v42, %s17109_s29  ;;  %v16166_v42 = vunpack.i.l.bf16 %v16165_v25  ;;  %v4102_v22 = vsel %vm476_vm1, %v17391_v34, %v16137_v21  ;;  %v16390_v25 = vld [vmem:[#allocation6 + $0x30] ss:$8 sps:$4 sm:$0xff]   ;;  %v16395_v21 = vld [vmem:[#allocation6 + $0x24] ss:$8 sps:$4 sm:$0xff]  }
0x13b3   :  { %v3984_v26 = vpop.f32.mrf.mxu0  ;;  %v4107_v27 = vsel %vm4103_vm4, %v4102_v22, %v16147_v32  ;;  %v16396_v32 = vld [vmem:[#allocation6 + $0x10] ss:$8 sps:$4 sm:$0xff]   ;;  %v16406_v22 = vld [vmem:[#allocation7 + $0x68] sm:$0xff]  }
0x13b4   :  { %v4101_v26 = vsel %vm476_vm1, %v17385_v2, %v16136_v20  ;;  %v4112_v7 = vsel %vm4108_vm5, %v4107_v27, %v16157_v60  ;;  %v16398_v20 = vld [vmem:[#allocation6 + $0x14] ss:$8 sps:$4 sm:$0xff]   ;;  %v16399_v60 = vld [vmem:[#allocation6] ss:$8 sps:$4 sm:$0xff]  }
0x13b5   :  { %v15240_v44 = vpop.f32.mrf.mxu0  ;;  %v4106_v12 = vsel %vm4103_vm4, %v4101_v26, %v16146_v33  ;;  %v4117_v37 = vsel %vm4113_vm6, %v4112_v7, %v16167_v24  ;;  %v16401_v33 = vld [vmem:[#allocation6 + $0x4] ss:$8 sps:$4 sm:$0xff]   ;;  %v16404_v24 = vld [vmem:[#allocation7 + $0x70] sm:$0xff]   ;;  %v16411_v27 = vld [vmem:[#allocation7 + $0x18] sm:$0xff]  }
0x13b6   :  { %v16177_v44 = vunpack.i.h.bf16 %v16175_v54  ;;  %v4111_v10 = vsel %vm4108_vm5, %v4106_v12, %v16156_v15  ;;  %v16393_v54 = vld [vmem:[#allocation6 + $0x20] ss:$8 sps:$4 sm:$0xff]   ;;  %v16402_v15 = vld [vmem:[#allocation7 + $0x78] sm:$0xff]  }
0x13b7   :  { %v4116_v17 = vsel %vm4113_vm6, %v4111_v10, %v16166_v42  ;;  %14457 = vmatprep.subr.bf16.mxu1 %v16402_v15  ;;  %v16405_v42 = vld [vmem:[#allocation7 + $0x30] sm:$0xff]   ;;  %v16407_v26 = vld [vmem:[#allocation7 + $0x28] sm:$0xff]   ;;  %v16410_v12 = vld [vmem:[#allocation7 + $0x58] sm:$0xff]  }
0x13b8   :  { %v4121_v11 = vsel %vm4118_vm7, %v4116_v17, %v16176_v62  ;;  %v4122_v2 = vsel %vm4118_vm7, %v4117_v37, %v16177_v44  ;;  %v16408_v44 = vld [vmem:[#allocation7 + $0x60] sm:$0xff]  }
0x13b9   :  { %v4126_v47 = vsel %vm4123_vm8, %v4121_v11, %v16186_v1  ;;  %v4127_v19 = vsel %vm4123_vm8, %v4122_v2, %v16187_v52  ;;  %v16409_v62 = vld [vmem:[#allocation7 + $0x20] sm:$0xff]  }
0x13eb   :  { %v16190_v59 = vpop.permute.xlu0 %16189 }
0x13ec   :  { %v16192_v40 = vunpack.i.h.bf16 %v16190_v59  ;;  %v16191_v5 = vunpack.i.l.bf16 %v16190_v59 }
0x13ee   :  { %v4129_v63 = vsel %vm4128_vm9, %v4124_v3, %v16191_v5  ;;  %v4130_v51 = vsel %vm4128_vm9, %v4125_v8, %v16192_v40  ;;  %v16380_v3 = vld [vmem:[#allocation6 + $0x74] ss:$8 sps:$4 sm:$0xff]   ;;  %v16378_v8 = vld [vmem:[#allocation6 + $0x70] ss:$8 sps:$4 sm:$0xff]  }
0x13ef   :  { %v4133_v29 = vpack.c.bf16 %v4130_v51, %v4129_v63  ;;  %4408 = vmatprep.subr.bf16.mxu0 %v16380_v3  ;;  %v16383_v63 = vld [vmem:[#allocation6 + $0x64] ss:$8 sps:$4 sm:$0xff]   ;;  %v16381_v51 = vld [vmem:[#allocation6 + $0x60] ss:$8 sps:$4 sm:$0xff]  }
0x13f0   :  { %4409 = vmatpush1.bf16.msra.mxu0 %v16378_v8 }
0x13f1   :  { %15257 = vmatprep.mubr.bf16.mxu1 %v4133_v29  ;;  %4410 = vmatprep.subr.bf16.mxu0 %v16383_v63  ;;  %v16384_v29 = vld [vmem:[#allocation6 + $0x50] ss:$8 sps:$4 sm:$0xff]   ;;  %v13988_v63 = vld [vmem:[%s19830_s6] ss:$0 sm:$0xff] }
0x13f4   :  { %4411 = vmatpush1.bf16.msra.mxu0 %v16381_v51 }
0x1424   :  { %v16195_v34 = vpop.permute.xlu1 %16194 }
0x1425   :  { %v16197_v56 = vunpack.i.h.bf16 %v16195_v34  ;;  %v16196_v45 = vunpack.i.l.bf16 %v16195_v34 }
0x1427   :  { %v4132_v23 = vsel %vm4128_vm9, %v4127_v19, %v16197_v56  ;;  %v4131_v57 = vsel %vm4128_vm9, %v4126_v47, %v16196_v45 }
0x1428   :  { %v4134_v49 = vpack.c.bf16 %v4132_v23, %v4131_v57 }
0x142a   :  { %15258 = vmatmul.mubr.bf16.vlgmr.msra.gmra.mxu1 %v4134_v49 }
0x142b   :  { %14458 = vmatpush3.bf16.msra.mxu1 %v16403_v16 }
0x142c   :  { %14459 = vmatprep.subr.bf16.mxu1 %v16404_v24 }
0x142f   :  { %14460 = vmatpush3.bf16.msra.mxu1 %v16405_v42 }
0x1430   :  { %14461 = vmatprep.subr.bf16.mxu1 %v16406_v22  ;;  %v16413_v22 = vld [vmem:[#allocation7 + $0x10] sm:$0xff]  }
0x1433   :  { %14462 = vmatpush3.bf16.msra.mxu1 %v16407_v26  ;;  %v16414_v26 = vld [vmem:[#allocation7 + $0x48] sm:$0xff]  }
0x1434   :  { %14463 = vmatprep.subr.bf16.mxu1 %v16408_v44  ;;  %v16415_v44 = vld [vmem:[#allocation7 + $0x8] sm:$0xff]  }
0x1437   :  { %14464 = vmatpush3.bf16.msra.mxu1 %v16409_v62  ;;  %v16416_v62 = vld [vmem:[#allocation7 + $0x40] sm:$0xff]  }
0x1438   :  { %14465 = vmatprep.subr.bf16.mxu1 %v16410_v12  ;;  %v16417_v12 = vld [vmem:[#allocation7] sm:$0xff]  }
0x143b   :  { %14466 = vmatpush3.bf16.msra.mxu1 %v16411_v27  ;;  %v180_v27 = vld [vmem:[%s19833_s9] sm:$0x3] }
0x14ea   :  { %v15259_v50 = vpop.f32.mrf.mxu1 }
0x14eb   :  { %v4232_v4 = vadd.f32 %v15259_v50, %v13979_v38 }
0x14ec   :  { %v4223_v18 = vpop.f32.mrf.mxu1 }
0x14ed   :  { %v4224_v28 = vadd.f32 %v13979_v38, %v4223_v18  ;;  %v18022_v5 = vadd.f32 %v4232_v4, %v17230_v30  ;;  %v16386_v30 = vld [vmem:[#allocation6 + $0x54] ss:$8 sps:$4 sm:$0xff]  }
0x14ee   :  { %v15260_v36 = vpop.f32.mrf.mxu1  ;;  %4412 = vmatprep.subr.bf16.mxu0 %v16386_v30 }
0x14ef   :  { %v18006_v53 = vadd.f32 %v4224_v28, %v17218_v13  ;;  %v4235_v6 = vadd.f32 %v15260_v36, %v13979_v38  ;;  %4413 = vmatpush1.bf16.msra.mxu0 %v16384_v29 }
0x14f0   :  { %v4226_v46 = vpop.f32.mrf.mxu1  ;;  %4414 = vmatprep.subr.bf16.mxu0 %v16389_v41 }
0x14f1   :  { %v4227_v55 = vadd.f32 %v13979_v38, %v4226_v46  ;;  %4242 = vadd.xlane.f32.xlu0 %v18006_v53  ;;  %v4255_v61 = vmul.f32 %v18006_v53, %v18006_v53  ;;  %v18016_v40 = vadd.f32 %v4235_v6, %v17232_v31  ;;  %v4257_v31 = vmul.f32 %v18022_v5, %v18022_v5 }
0x14f3   :  { %v18010_v59 = vadd.f32 %v4227_v55, %v17220_v14  ;;  %v4258_v14 = vmul.f32 %v18016_v40, %v18016_v40  ;;  %4415 = vmatpush1.bf16.msra.mxu0 %v16387_v0  ;;  %v13989_v0 = vld [vmem:[%s19831_s7] ss:$0 sm:$0xff] }
0x14f4   :  { %4416 = vmatprep.subr.bf16.mxu0 %v16392_v48 }
0x14f5   :  { %4244 = vadd.xlane.f32.xlu1 %v18010_v59  ;;  %4259 = vadd.xlane.f32.xlu0 %v4255_v61  ;;  %v4256_v13 = vmul.f32 %v18010_v59, %v18010_v59 }
0x14f7   :  { %4417 = vmatpush1.bf16.msra.mxu0 %v16390_v25 }
0x14f8   :  { %4418 = vmatprep.subr.bf16.mxu0 %v16395_v21 }
0x14f9   :  { %4248 = vadd.xlane.f32.xlu1 %v18016_v40  ;;  %4261 = vadd.xlane.f32.xlu0 %v4256_v13 }
0x14fb   :  { %4419 = vmatpush1.bf16.msra.mxu0 %v16393_v54 }
0x14fc   :  { %4420 = vmatprep.subr.bf16.mxu0 %v16398_v20 }
0x14fd   :  { %4265 = vadd.xlane.f32.xlu1 %v4258_v14  ;;  %4246 = vadd.xlane.f32.xlu0 %v18022_v5 }
0x14ff   :  { %4421 = vmatpush1.bf16.msra.mxu0 %v16396_v32 }
0x1500   :  { %4422 = vmatprep.subr.bf16.mxu0 %v16401_v33 }
0x1501   :  { %4263 = vadd.xlane.f32.xlu0 %v4257_v31 }
0x1503   :  { %4423 = vmatpush1.bf16.msra.mxu0 %v16399_v60 }
0x157a   :  { %v4243_v52 = vpop.xlane.xlu0 %4242 }
0x157b   :  { %v4251_v1 = vmul.f32 0.0078125, %v4243_v52 }
0x157d   :  { %v4271_v17 = vmul.f32 %v4251_v1, %v4251_v1  ;;  %v4279_v3 = vsub.f32 %v18006_v53, %v4251_v1  ;;  %v4325_v1 = vrot.slane %v180_v27, %v17243_v39 }
0x157e   :  { %v4245_v10 = vpop.xlane.xlu1 %4244  ;;  %v4260_v7 = vpop.xlane.xlu0 %4259 }
0x157f   :  { %v4252_v37 = vmul.f32 0.0078125, %v4245_v10  ;;  %v4267_v34 = vmul.f32 0.0078125, %v4260_v7  ;;  %v4321_v10 = vrot.slane %v180_v27, %v17249_v43  ;;  %v16418_v27 = vld [vmem:[#allocation2 + $0x168] ss:$12 sps:$4 sm:$0xff]  }
0x1581   :  { %v4275_v11 = vsub.f32 %v4267_v34, %v4271_v17  ;;  %v4272_v45 = vmul.f32 %v4252_v37, %v4252_v37  ;;  %v4280_v51 = vsub.f32 %v18010_v59, %v4252_v37 }
0x1582   :  { %v4249_v2 = vpop.xlane.xlu1 %4248  ;;  %v4262_v56 = vpop.xlane.xlu0 %4261 }
0x1583   :  { %v4283_v47 = vadd.f32 1e-05, %v4275_v11  ;;  %v4254_v19 = vmul.f32 0.0078125, %v4249_v2  ;;  %v4268_v23 = vmul.f32 0.0078125, %v4262_v56 }
0x1585   :  { %16706 = vrsqrt.f32 %v4283_v47  ;;  %v4276_v57 = vsub.f32 %v4268_v23, %v4272_v45  ;;  %v4274_v38 = vmul.f32 %v4254_v19, %v4254_v19  ;;  %v4282_v48 = vsub.f32 %v18016_v40, %v4254_v19 }
0x1586   :  { %v4266_v49 = vpop.xlane.xlu1 %4265  ;;  %v4247_v50 = vpop.xlane.xlu0 %4246 }
0x1587   :  { %v4284_v18 = vadd.f32 1e-05, %v4276_v57  ;;  %v4270_v28 = vmul.f32 0.0078125, %v4266_v49  ;;  %v4253_v36 = vmul.f32 0.0078125, %v4247_v50 }
0x1589   :  { %16708 = vrsqrt.f32 %v4284_v18  ;;  %v4278_v46 = vsub.f32 %v4270_v28, %v4274_v38  ;;  %v4273_v61 = vmul.f32 %v4253_v36, %v4253_v36  ;;  %v4281_v32 = vsub.f32 %v18022_v5, %v4253_v36  ;;  %v16412_v5 = vld [vmem:[#allocation7 + $0x50] sm:$0xff]  }
0x158a   :  { %v4264_v55 = vpop.xlane.xlu0 %4263  ;;  %14467 = vmatprep.subr.bf16.mxu1 %v16412_v5 }
0x158b   :  { %v4286_v6 = vadd.f32 1e-05, %v4278_v46  ;;  %v4269_v4 = vmul.f32 0.0078125, %v4264_v55  ;;  %14468 = vmatpush3.bf16.msra.mxu1 %v16413_v22 }
0x158c   :  { %14469 = vmatprep.subr.bf16.mxu1 %v16414_v26 }
0x158d   :  { %16710 = vrsqrt.f32 %v4286_v6  ;;  %v4277_v13 = vsub.f32 %v4269_v4, %v4273_v61 }
0x158f   :  { %v4285_v14 = vadd.f32 1e-05, %v4277_v13  ;;  %14470 = vmatpush3.bf16.msra.mxu1 %v16415_v44 }
0x1590   :  { %14471 = vmatprep.subr.bf16.mxu1 %v16416_v62  ;;  %v16420_v62 = vld [vmem:[#allocation2 + $0x16c] ss:$12 sps:$4 sm:$0xff]  }
0x1591   :  { %16712 = vrsqrt.f32 %v4285_v14  ;;  %4962 = vmatprep.subr.bf16.mxu0 %v16420_v62 }
0x1592   :  { %v16707_v31 = vpop.eup %16706 }
0x1593   :  { %v4291_v8 = vmul.f32 %v16707_v31, %v4279_v3  ;;  %14472 = vmatpush3.bf16.msra.mxu1 %v16417_v12 }
0x1595   :  { %v4301_v41 = vmul.f32 %v13988_v63, %v4291_v8 }
0x1596   :  { %v16709_v30 = vpop.eup %16708 }
0x1597   :  { %v4292_v29 = vmul.f32 %v16709_v30, %v4280_v51  ;;  %v18038_v54 = vadd.f32 %v13989_v0, %v4301_v41 }
0x1599   :  { %v4302_v25 = vmul.f32 %v13988_v63, %v4292_v29 }
0x159a   :  { %v16711_v53 = vpop.eup %16710 }
0x159b   :  { %v18040_v21 = vadd.f32 %v13989_v0, %v4302_v25  ;;  %v4294_v20 = vmul.f32 %v16711_v53, %v4282_v48 }
0x159d   :  { %v4315_v59 = vpack.c.bf16 %v18040_v21, %v18038_v54  ;;  %v4304_v15 = vmul.f32 %v13988_v63, %v4294_v20 }
0x159e   :  { %v16713_v33 = vpop.eup %16712 }
0x159f   :  { %4441 = vmatmul.mubr.bf16.vlgmr.msra.gmra.mxu0 %v4315_v59  ;;  %v4293_v60 = vmul.f32 %v16713_v33, %v4281_v32  ;;  %v18048_v24 = vadd.f32 %v13989_v0, %v4304_v15 }
0x15a0   :  { %4450 = vmatprep.mubr.bf16.mxu0 %v19847_v58  ;;  %4963 = vmatpush1.bf16.msra.mxu0 %v16418_v27 }
0x15a1   :  { %v4303_v16 = vmul.f32 %v13988_v63, %v4293_v60  ;;  %v14006_v63 = vld [vmem:[%s19835_s11] ss:$0 sm:$0xff] }
0x15a3   :  { %v18046_v40 = vadd.f32 %v13989_v0, %v4303_v16 }
0x15a5   :  { %v4316_v42 = vpack.c.bf16 %v18048_v24, %v18046_v40 }
0x15a7   :  { %4451 = vmatmul.mubr.bf16.gmra.mxu0 %v4316_v42 }
0x15a8   :  { %4994 = vmatprep.mubr.bf16.mxu0 %v19847_v58 }
0x165f   :  { %v4442_v52 = vpop.f32.mrf.mxu0 }
0x1660   :  { %v4443_v11 = vadd.f32 %v4442_v52, %v4321_v10  ;;  %v16421_v52 = vld [vmem:[#allocation2 + $0x150] ss:$12 sps:$4 sm:$0xff]  }
0x1661   :  { %v4444_v7 = vpop.f32.mrf.mxu0 }
0x1662   :  { %v4445_v37 = vadd.f32 %v4444_v7, %v4325_v1  ;;  %v4461_v57 = vmax.f32 %v4443_v11, 0.0  ;;  %v16430_v7 = vld [vmem:[#allocation2 + $0x124] ss:$12 sps:$4 sm:$0xff]   ;;  %v16435_v11 = vld [vmem:[#allocation2 + $0x140] ss:$12 sps:$4 sm:$0xff]  }
0x1663   :  { %v4446_v17 = vpop.f32.mrf.mxu0 }
0x1664   :  { %v4447_v34 = vadd.f32 %v4446_v17, %v4321_v10  ;;  %v4462_v19 = vmax.f32 %v4445_v37, 0.0  ;;  %v16431_v17 = vld [vmem:[#allocation2 + $0x158] ss:$12 sps:$4 sm:$0xff]   ;;  %v16428_v37 = vld [vmem:[#allocation2 + $0x120] ss:$12 sps:$4 sm:$0xff]  }
0x1665   :  { %v4448_v2 = vpop.f32.mrf.mxu0 }
0x1666   :  { %v4449_v56 = vadd.f32 %v4448_v2, %v4325_v1  ;;  %v4463_v45 = vmax.f32 %v4447_v34, 0.0  ;;  %v16434_v34 = vld [vmem:[#allocation2 + $0x10c] ss:$12 sps:$4 sm:$0xff]   ;;  %v16432_v2 = vld [vmem:[#allocation2 + $0x108] ss:$12 sps:$4 sm:$0xff]  }
0x1667   :  { %v4452_v47 = vpop.f32.mrf.mxu0 }
0x1668   :  { %v4464_v23 = vmax.f32 %v4449_v56, 0.0  ;;  %v4469_v38 = vpack.c.bf16 %v4463_v45, %v4461_v57  ;;  %v4453_v46 = vadd.f32 %v4452_v47, %v4321_v10  ;;  %v16438_v56 = vld [vmem:[#allocation2 + $0xf4] ss:$12 sps:$4 sm:$0xff]   ;;  %v16436_v47 = vld [vmem:[#allocation2 + $0xf0] ss:$12 sps:$4 sm:$0xff]  }
0x1669   :  { %v4454_v49 = vpop.f32.mrf.mxu0  ;;  %v16439_v45 = vld [vmem:[#allocation2 + $0x128] ss:$12 sps:$4 sm:$0xff]   ;;  %v16440_v57 = vld [vmem:[#allocation2 + $0xd8] ss:$12 sps:$4 sm:$0xff]  }
0x166a   :  { %v4470_v50 = vpack.c.bf16 %v4464_v23, %v4462_v19  ;;  %v4455_v28 = vadd.f32 %v4454_v49, %v4325_v1  ;;  %v4465_v14 = vmax.f32 %v4453_v46, 0.0  ;;  %v16442_v19 = vld [vmem:[#allocation2 + $0xdc] ss:$12 sps:$4 sm:$0xff]   ;;  %v16444_v49 = vld [vmem:[#allocation2 + $0xc0] ss:$12 sps:$4 sm:$0xff]  }
0x166b   :  { %v4456_v18 = vpop.f32.mrf.mxu0  ;;  %v16443_v23 = vld [vmem:[#allocation2 + $0x110] ss:$12 sps:$4 sm:$0xff]  }
0x166c   :  { %v4457_v36 = vadd.f32 %v4456_v18, %v4321_v10  ;;  %4607 = vmatprep.mubr.bf16.mxu1 %v4470_v50  ;;  %v4466_v4 = vmax.f32 %v4455_v28, 0.0  ;;  %v16424_v10 = vld [vmem:[#allocation2 + $0x138] ss:$12 sps:$4 sm:$0xff]   ;;  %v16448_v18 = vld [vmem:[#allocation2 + $0xe0] ss:$12 sps:$4 sm:$0xff]  }
0x166d   :  { %v4458_v55 = vpop.f32.mrf.mxu0  ;;  %4608 = vmatmul.mubr.bf16.vlgmr.msra.gmra.mxu1 %v4469_v38  ;;  %v16446_v50 = vld [vmem:[#allocation2 + $0xc4] ss:$12 sps:$4 sm:$0xff]   ;;  %v16449_v28 = vld [vmem:[#allocation2 + $0xc8] ss:$12 sps:$4 sm:$0xff]  }
0x166e   :  { %v4459_v6 = vadd.f32 %v4458_v55, %v4325_v1  ;;  %v4467_v61 = vmax.f32 %v4457_v36, 0.0  ;;  %v16427_v1 = vld [vmem:[#allocation2 + $0x170] ss:$12 sps:$4 sm:$0xff]   ;;  %v16447_v38 = vld [vmem:[#allocation2 + $0xf8] ss:$12 sps:$4 sm:$0xff]  }
0x166f   :  { %15261 = vmatprep.subr.bf16.mxu1 %v16427_v1 }
0x1670   :  { %v4468_v13 = vmax.f32 %v4459_v6, 0.0  ;;  %v4471_v31 = vpack.c.bf16 %v4467_v61, %v4465_v14  ;;  %15262 = vmatpush3.bf16.msra.mxu1 %v16427_v1  ;;  %v14024_v1 = vld [vmem:[%s19837_s13] ss:$0 sm:$0xff] }
0x1671   :  { %15263 = vmatprep.subr.bf16.mxu1 %v16431_v17 }
0x1672   :  { %v4472_v3 = vpack.c.bf16 %v4468_v13, %v4466_v4 }
0x1674   :  { %4615 = vmatprep.mubr.bf16.mxu1 %v4472_v3  ;;  %15264 = vmatpush3.bf16.msra.mxu1 %v16431_v17 }
0x1675   :  { %4616 = vmatmul.mubr.bf16.gmra.mxu1 %v4471_v31  ;;  %15265 = vmatprep.subr.bf16.mxu1 %v16435_v11 }
0x1678   :  { %15266 = vmatpush3.bf16.msra.mxu1 %v16435_v11 }
0x1679   :  { %15267 = vmatprep.subr.bf16.mxu1 %v16439_v45 }
0x167c   :  { %15268 = vmatpush3.bf16.msra.mxu1 %v16439_v45 }
0x167d   :  { %15269 = vmatprep.subr.bf16.mxu1 %v16443_v23 }
0x1680   :  { %15270 = vmatpush3.bf16.msra.mxu1 %v16443_v23 }
0x1681   :  { %15271 = vmatprep.subr.bf16.mxu1 %v16447_v38 }
0x1684   :  { %15272 = vmatpush3.bf16.msra.mxu1 %v16447_v38 }
0x1685   :  { %15273 = vmatprep.subr.bf16.mxu1 %v16448_v18 }
0x1688   :  { %15274 = vmatpush3.bf16.msra.mxu1 %v16448_v18 }
0x1689   :  { %15275 = vmatprep.subr.bf16.mxu1 %v16449_v28 }
0x168c   :  { %15276 = vmatpush3.bf16.msra.mxu1 %v16449_v28 }
0x168d   :  { %15299 = vmatprep.subr.bf16.mxu1 %v17107_v35 }
0x172d   :  { %v14473_v8 = vpop.f32.mrf.mxu1 }
0x172f   :  { %v14474_v51 = vpop.f32.mrf.mxu1 }
0x1730   :  { %v14475_v30 = vadd.f32 %v14474_v51, %v14473_v8 }
0x1731   :  { %v14476_v29 = vpop.f32.mrf.mxu1 }
0x1732   :  { %v4610_v41 = vadd.f32 %v14475_v30, %v14006_v63 }
0x1733   :  { %v14477_v0 = vpop.f32.mrf.mxu1 }
0x1734   :  { %v14478_v48 = vadd.f32 %v14477_v0, %v14476_v29  ;;  %v18062_v25 = vadd.f32 %v4610_v41, %v18038_v54 }
0x1735   :  { %v14479_v53 = vpop.f32.mrf.mxu1 }
0x1736   :  { %v4613_v20 = vadd.f32 %v14478_v48, %v14006_v63  ;;  %4628 = vadd.xlane.f32.xlu0 %v18062_v25  ;;  %v4640_v60 = vmul.f32 %v18062_v25, %v18062_v25 }
0x1737   :  { %v14480_v32 = vpop.f32.mrf.mxu1 }
0x1738   :  { %v14481_v59 = vadd.f32 %v14480_v32, %v14479_v53  ;;  %v18066_v33 = vadd.f32 %v4613_v20, %v18040_v21 }
0x1739   :  { %v14482_v15 = vpop.f32.mrf.mxu1 }
0x173a   :  { %v4618_v16 = vadd.f32 %v14481_v59, %v14006_v63  ;;  %4630 = vadd.xlane.f32.xlu1 %v18066_v33  ;;  %4644 = vadd.xlane.f32.xlu0 %v4640_v60  ;;  %v4641_v5 = vmul.f32 %v18066_v33, %v18066_v33 }
0x173b   :  { %v14483_v42 = vpop.f32.mrf.mxu1 }
0x173c   :  { %v14484_v54 = vadd.f32 %v14483_v42, %v14482_v15  ;;  %v18074_v22 = vadd.f32 %v4618_v16, %v18046_v40  ;;  %v16423_v40 = vld [vmem:[#allocation2 + $0x154] ss:$12 sps:$4 sm:$0xff]  }
0x173d   :  { %4964 = vmatprep.subr.bf16.mxu0 %v16423_v40 }
0x173e   :  { %v4621_v26 = vadd.f32 %v14484_v54, %v14006_v63  ;;  %4646 = vadd.xlane.f32.xlu1 %v4641_v5  ;;  %4632 = vadd.xlane.f32.xlu0 %v18074_v22  ;;  %v4642_v44 = vmul.f32 %v18074_v22, %v18074_v22 }
0x173f   :  { %4965 = vmatpush1.bf16.msra.mxu0 %v16421_v52 }
0x1740   :  { %v18078_v21 = vadd.f32 %v4621_v26, %v18048_v24  ;;  %v16426_v24 = vld [vmem:[#allocation2 + $0x13c] ss:$12 sps:$4 sm:$0xff]  }
0x1741   :  { %4966 = vmatprep.subr.bf16.mxu0 %v16426_v24 }
0x1742   :  { %4634 = vadd.xlane.f32.xlu1 %v18078_v21  ;;  %4648 = vadd.xlane.f32.xlu0 %v4642_v44  ;;  %v4643_v12 = vmul.f32 %v18078_v21, %v18078_v21 }
0x1743   :  { %4967 = vmatpush1.bf16.msra.mxu0 %v16424_v10 }
0x1744   :  { %4968 = vmatprep.subr.bf16.mxu0 %v16430_v7 }
0x1746   :  { %4650 = vadd.xlane.f32.xlu1 %v4643_v12  ;;  %v14023_v12 = vld [vmem:[%s19836_s12] ss:$0 sm:$0xff] }
0x1747   :  { %4969 = vmatpush1.bf16.msra.mxu0 %v16428_v37 }
0x1748   :  { %4970 = vmatprep.subr.bf16.mxu0 %v16434_v34 }
0x174b   :  { %4971 = vmatpush1.bf16.msra.mxu0 %v16432_v2 }
0x174c   :  { %4972 = vmatprep.subr.bf16.mxu0 %v16438_v56 }
0x174f   :  { %4973 = vmatpush1.bf16.msra.mxu0 %v16436_v47 }
0x1750   :  { %4974 = vmatprep.subr.bf16.mxu0 %v16442_v19 }
0x1753   :  { %4975 = vmatpush1.bf16.msra.mxu0 %v16440_v57 }
0x1754   :  { %4976 = vmatprep.subr.bf16.mxu0 %v16446_v50 }
0x1757   :  { %4977 = vmatpush1.bf16.msra.mxu0 %v16444_v49 }
0x1758   :  { %15281 = vmatprep.subr.bf16.mxu0 %v17107_v35 }
0x17bf   :  { %v4629_v36 = vpop.xlane.xlu0 %4628 }
0x17c0   :  { %v4636_v46 = vmul.f32 0.0078125, %v4629_v36 }
0x17c2   :  { %v4656_v61 = vmul.f32 %v4636_v46, %v4636_v46  ;;  %v4664_v26 = vsub.f32 %v18062_v25, %v4636_v46 }
0x17c3   :  { %v4631_v55 = vpop.xlane.xlu1 %4630  ;;  %v4645_v6 = vpop.xlane.xlu0 %4644 }
0x17c4   :  { %v4637_v4 = vmul.f32 0.0078125, %v4631_v55  ;;  %v4652_v13 = vmul.f32 0.0078125, %v4645_v6 }
0x17c6   :  { %v4660_v14 = vsub.f32 %v4652_v13, %v4656_v61  ;;  %v4657_v8 = vmul.f32 %v4637_v4, %v4637_v4  ;;  %v4665_v27 = vsub.f32 %v18066_v33, %v4637_v4 }
0x17c7   :  { %v4647_v3 = vpop.xlane.xlu1 %4646  ;;  %v4633_v31 = vpop.xlane.xlu0 %4632 }
0x17c8   :  { %v4668_v63 = vadd.f32 1e-05, %v4660_v14  ;;  %v4653_v51 = vmul.f32 0.0078125, %v4647_v3  ;;  %v4638_v30 = vmul.f32 0.0078125, %v4633_v31 }
0x17ca   :  { %16714 = vrsqrt.f32 %v4668_v63  ;;  %v4661_v29 = vsub.f32 %v4653_v51, %v4657_v8  ;;  %v4658_v53 = vmul.f32 %v4638_v30, %v4638_v30  ;;  %v4666_v7 = vsub.f32 %v18074_v22, %v4638_v30 }
0x17cb   :  { %v4635_v41 = vpop.xlane.xlu1 %4634  ;;  %v4649_v0 = vpop.xlane.xlu0 %4648 }
0x17cc   :  { %v4669_v48 = vadd.f32 1e-05, %v4661_v29  ;;  %v4639_v20 = vmul.f32 0.0078125, %v4635_v41  ;;  %v4654_v32 = vmul.f32 0.0078125, %v4649_v0 }
0x17ce   :  { %16716 = vrsqrt.f32 %v4669_v48  ;;  %v4662_v59 = vsub.f32 %v4654_v32, %v4658_v53  ;;  %v4659_v15 = vmul.f32 %v4639_v20, %v4639_v20  ;;  %v4667_v11 = vsub.f32 %v18078_v21, %v4639_v20  ;;  %v14025_v21 = vld [vmem:[%s19827_s3 + $0x3] sm:$0x7] }
0x17cf   :  { %v4651_v60 = vpop.xlane.xlu1 %4650  ;;  %v4826_v57 = vrot.slane %v14025_v21, %v17243_v39  ;;  %v4822_v28 = vrot.slane %v14025_v21, %v17249_v43  ;;  %v4830_v46 = vrot.slane %v14025_v21, %v17296_v9 }
0x17d0   :  { %v4670_v16 = vadd.f32 1e-05, %v4662_v59  ;;  %v4655_v42 = vmul.f32 0.0078125, %v4651_v60 }
0x17d2   :  { %16718 = vrsqrt.f32 %v4670_v16  ;;  %v4663_v54 = vsub.f32 %v4655_v42, %v4659_v15 }
0x17d4   :  { %v4671_v5 = vadd.f32 1e-05, %v4663_v54 }
0x17d6   :  { %16720 = vrsqrt.f32 %v4671_v5 }
0x17d7   :  { %v16715_v44 = vpop.eup %16714 }
0x17d8   :  { %v4676_v62 = vmul.f32 %v16715_v44, %v4664_v26 }
0x17da   :  { %v4686_v52 = vmul.f32 %v14023_v12, %v4676_v62 }
0x17db   :  { %v16717_v40 = vpop.eup %16716 }
0x17dc   :  { %v4677_v24 = vmul.f32 %v16717_v40, %v4665_v27  ;;  %v18096_v17 = vadd.f32 %v14024_v1, %v4686_v52 }
0x17de   :  { %v4687_v10 = vmul.f32 %v14023_v12, %v4677_v24 }
0x17df   :  { %v16719_v25 = vpop.eup %16718 }
0x17e0   :  { %v18098_v37 = vadd.f32 %v14024_v1, %v4687_v10  ;;  %v4678_v34 = vmul.f32 %v16719_v25, %v4666_v7 }
0x17e2   :  { %v4816_v33 = vpack.c.bf16 %v18098_v37, %v18096_v17  ;;  %v4688_v45 = vmul.f32 %v14023_v12, %v4678_v34 }
0x17e3   :  { %v16721_v2 = vpop.eup %16720 }
0x17e4   :  { %4995 = vmatmul.mubr.bf16.vlgmr.msra.gmra.mxu0 %v4816_v33  ;;  %15277 = vmatprep.mubr.bf16.mxu1 %v4816_v33  ;;  %v4679_v56 = vmul.f32 %v16721_v2, %v4667_v11  ;;  %v18104_v22 = vadd.f32 %v14024_v1, %v4688_v45 }
0x17e5   :  { %5004 = vmatprep.mubr.bf16.mxu0 %v19847_v58 }
0x17e6   :  { %v4689_v47 = vmul.f32 %v14023_v12, %v4679_v56 }
0x17e8   :  { %v18106_v19 = vadd.f32 %v14024_v1, %v4689_v47 }
0x17ea   :  { %v4817_v23 = vpack.c.bf16 %v18106_v19, %v18104_v22 }
0x17ec   :  { %5005 = vmatmul.mubr.bf16.gmra.mxu0 %v4817_v23  ;;  %15278 = vmatmul.mubr.bf16.vlgmr.msra.gmra.mxu1 %v4817_v23 }
0x17ed   :  { %15283 = vmatprep.mubr.msk.bf16.mxu0 %vm17108_vm0, %v17107_v35  ;;  %15301 = vmatprep.mubr.msk.bf16.mxu1 %vm17108_vm0, %v17107_v35 }
0x18a4   :  { %v4996_v49 = vpop.f32.mrf.mxu0 }
0x18a5   :  { %v4997_v14 = vadd.f32 %v4996_v49, %v4822_v28 }
0x18a6   :  { %v4998_v50 = vpop.f32.mrf.mxu0 }
0x18a7   :  { %v4999_v38 = vadd.f32 %v4998_v50, %v4826_v57  ;;  %v18129_v29 = vpack.c.bf16 %v4997_v14, %v4997_v14 }
0x18a8   :  { %v5000_v18 = vpop.f32.mrf.mxu0 }
0x18a9   :  { %v18119_v36 = vpack.c.bf16 %v4999_v38, %v4999_v38  ;;  %v5001_v59 = vadd.f32 %v5000_v18, %v4822_v28 }
0x18aa   :  { %v5002_v55 = vpop.f32.mrf.mxu0 }
0x18ab   :  { %v5003_v6 = vadd.f32 %v5002_v55, %v4826_v57  ;;  %v5080_v61 = vsel %vm476_vm1, %v18119_v36, 0  ;;  %v18146_v54 = vpack.c.bf16 %v5001_v59, %v5001_v59 }
0x18ac   :  { %v5006_v4 = vpop.f32.mrf.mxu0  ;;  %v15279_v13 = vpop.f32.mrf.mxu1  ;;  %15282 = vmatpush3.bf16.xpose.msra.mxu0 %v5080_v61 }
0x18ad   :  { %v18124_v3 = vadd.f32 %v15279_v13, %v4830_v46  ;;  %15287 = vmatprep.subr.bf16.mxu0 %v17107_v35  ;;  %v18127_v63 = vpack.c.bf16 %v5003_v6, %v5003_v6  ;;  %v5007_v12 = vadd.f32 %v5006_v4, %v4822_v28 }
0x18ae   :  { %v5008_v31 = vpop.f32.mrf.mxu0  ;;  %v5049_v8 = vpop.f32.mrf.mxu1 }
0x18af   :  { %v5009_v48 = vadd.f32 %v5008_v31, %v4826_v57  ;;  %v5126_v20 = vsel %vm476_vm1, %v18127_v63, 0  ;;  %v5050_v26 = vadd.f32 %v5049_v8, %v4830_v46  ;;  %v18168_v24 = vpack.c.bf16 %v5007_v12, %v5007_v12 }
0x18b0   :  { %v5010_v51 = vpop.f32.mrf.mxu0  ;;  %v15280_v30 = vpop.f32.mrf.mxu1 }
0x18b1   :  { %v18131_v41 = vadd.f32 %v15280_v30, %v4830_v46  ;;  %v18142_v15 = vpack.c.bf16 %v5009_v48, %v5009_v48  ;;  %v5011_v5 = vadd.f32 %v5010_v51, %v4822_v28  ;;  %v18160_v40 = vpack.c.bf16 %v5050_v26, %v5050_v26 }
0x18b2   :  { %v5012_v0 = vpop.f32.mrf.mxu0  ;;  %v5052_v32 = vpop.f32.mrf.mxu1 }
0x18b3   :  { %v5013_v53 = vadd.f32 %v5012_v0, %v4826_v57  ;;  %15284 = vmatmul.mubr.msk.bf16.vlgmr.msra.gmra.mxu0 %vm476_vm1, %v18129_v29  ;;  %v5053_v16 = vadd.f32 %v5052_v32, %v4830_v46  ;;  %v5172_v62 = vsel %vm476_vm1, %v18142_v15, 0  ;;  %v18157_v27 = vpack.c.bf16 %v5011_v5, %v5011_v5 }
0x18b4   :  { %15288 = vmatpush3.bf16.xpose.msra.mxu0 %v5126_v20  ;;  %15289 = vmatprep.mubr.msk.bf16.mxu0 %vm17108_vm0, %v17107_v35  ;;  %v5312_v1 = vsel %vm713_vm2, %v18160_v40, 0 }
0x18b5   :  { %v18139_v60 = vpack.c.bf16 %v5013_v53, %v5013_v53  ;;  %15293 = vmatprep.subr.bf16.mxu0 %v17107_v35  ;;  %v18149_v44 = vpack.c.bf16 %v5053_v16, %v5053_v16 }
0x18b7   :  { %v5218_v42 = vsel %vm476_vm1, %v18139_v60, 0  ;;  %v5358_v52 = vsel %vm713_vm2, %v18149_v44, 0 }
0x18b8   :  { %15300 = vmatpush3.bf16.xpose.msra.mxu1 %v5218_v42 }
0x18b9   :  { %15311 = vmatprep.subr.bf16.mxu1 %v17107_v35 }
0x18bb   :  { %15290 = vmatmul.mubr.msk.bf16.vlgmr.msra.gmra.mxu0 %vm476_vm1, %v18146_v54 }
0x18bc   :  { %15294 = vmatpush3.bf16.xpose.msra.mxu0 %v5172_v62  ;;  %15295 = vmatprep.mubr.msk.bf16.mxu0 %vm17108_vm0, %v17107_v35 }
0x18bd   :  { %15305 = vmatprep.subr.bf16.mxu0 %v17107_v35 }
0x18bf   :  { %15302 = vmatmul.mubr.msk.bf16.vlgmr.msra.gmra.mxu1 %vm476_vm1, %v18157_v27 }
0x18c0   :  { %15312 = vmatpush3.bf16.msra.mxu1 %v5358_v52  ;;  %15313 = vmatprep.mubr.msk.bf16.mxu1 %vm17108_vm0, %v17107_v35 }
0x18c1   :  { %15323 = vmatprep.subr.bf16.mxu1 %v17107_v35 }
0x18c3   :  { %15296 = vmatmul.mubr.msk.bf16.vlgmr.msra.gmra.mxu0 %vm476_vm1, %v18168_v24 }
0x18c4   :  { %15306 = vmatpush3.bf16.msra.mxu0 %v5312_v1  ;;  %15307 = vmatprep.mubr.msk.bf16.mxu0 %vm17108_vm0, %v17107_v35 }
0x18c5   :  { %15317 = vmatprep.subr.bf16.mxu0 %v17107_v35 }
0x1973   :  { %v5116_v10 = vpop.f32.mrf.mxu0 }
0x1974   :  { %v5260_v7 = vsel %vm661_vm3, %v5116_v10, -inf }
0x1975   :  { %5261 = vmax.xlane.f32.xlu0 %v5260_v7  ;;  %v15285_v25 = vpop.f32.mrf.mxu0  ;;  %v18204_v7 = vpack.c.bf16 %v18124_v3, %v18124_v3  ;;  %v18214_v3 = vpack.c.bf16 %v18131_v41, %v18131_v41 }
0x1977   :  { %v5119_v34 = vpop.f32.mrf.mxu0 }
0x1979   :  { %v15286_v11 = vpop.f32.mrf.mxu0 }
0x197b   :  { %v5162_v33 = vpop.f32.mrf.mxu0 }
0x197c   :  { %v5263_v2 = vsel %vm661_vm3, %v5162_v33, -inf }
0x197d   :  { %5264 = vmax.xlane.f32.xlu1 %v5263_v2  ;;  %v15291_v56 = vpop.f32.mrf.mxu0 }
0x197f   :  { %v5165_v45 = vpop.f32.mrf.mxu0  ;;  %v5254_v47 = vpop.f32.mrf.mxu1 }
0x1980   :  { %v5269_v23 = vsel %vm661_vm3, %v5254_v47, -inf }
0x1981   :  { %v15292_v21 = vpop.f32.mrf.mxu0  ;;  %5270 = vmax.xlane.f32.xlu1 %v5269_v23  ;;  %v15303_v57 = vpop.f32.mrf.mxu1 }
0x1982   :  { %v5450_v21 = vsel %vm713_vm2, %v18214_v3, 0 }
0x1983   :  { %v5208_v49 = vpop.f32.mrf.mxu0  ;;  %v5257_v50 = vpop.f32.mrf.mxu1 }
0x1984   :  { %v5266_v38 = vsel %vm661_vm3, %v5208_v49, -inf }
0x1985   :  { %v15304_v18 = vpop.f32.mrf.mxu1  ;;  %5267 = vmax.xlane.f32.xlu0 %v5266_v38  ;;  %v15297_v28 = vpop.f32.mrf.mxu0 }
0x1987   :  { %v5211_v46 = vpop.f32.mrf.mxu0 }
0x1989   :  { %v15298_v55 = vpop.f32.mrf.mxu0 }
0x19fe   :  { %v5262_v6 = vpop.xlane.xlu0 %5261 }
0x19ff   :  { %v5272_v61 = vsub.f32 %v5116_v10, %v5262_v6 }
0x1a01   :  { %v5276_v4 = vmul.f32 1.442695, %v5272_v61 }
0x1a03   :  { %16722 = vpow2.f32 %v5276_v4 }
0x1a06   :  { %v5265_v13 = vpop.xlane.xlu1 %5264 }
0x1a07   :  { %v5273_v14 = vsub.f32 %v5162_v33, %v5265_v13  ;;  %v5404_v33 = vsel %vm713_vm2, %v18204_v7, 0 }
0x1a09   :  { %v5278_v31 = vmul.f32 1.442695, %v5273_v14 }
0x1a0a   :  { %v5271_v8 = vpop.xlane.xlu1 %5270 }
0x1a0b   :  { %16724 = vpow2.f32 %v5278_v31  ;;  %v5275_v51 = vsub.f32 %v5254_v47, %v5271_v8 }
0x1a0d   :  { %v5282_v30 = vmul.f32 1.442695, %v5275_v51 }
0x1a0e   :  { %v5268_v0 = vpop.xlane.xlu0 %5267 }
0x1a0f   :  { %16726 = vpow2.f32 %v5282_v30  ;;  %v5274_v48 = vsub.f32 %v5208_v49, %v5268_v0 }
0x1a10   :  { %v16723_v53 = vpop.eup %16722 }
0x1a11   :  { %v5280_v20 = vmul.f32 1.442695, %v5274_v48  ;;  %v5284_v32 = vsel %vm661_vm3, %v16723_v53, 0.0 }
0x1a12   :  { %5285 = vadd.xlane.f32.xlu0 %v5284_v32 }
0x1a13   :  { %16728 = vpow2.f32 %v5280_v20 }
0x1a18   :  { %v16725_v59 = vpop.eup %16724 }
0x1a19   :  { %v5287_v16 = vsel %vm661_vm3, %v16725_v59, 0.0 }
0x1a1a   :  { %5288 = vadd.xlane.f32.xlu1 %v5287_v16 }
0x1a1c   :  { %v16727_v42 = vpop.eup %16726 }
0x1a1d   :  { %v5293_v5 = vsel %vm661_vm3, %v16727_v42, 0.0 }
0x1a1e   :  { %5294 = vadd.xlane.f32.xlu1 %v5293_v5 }
0x1a20   :  { %v16729_v26 = vpop.eup %16728 }
0x1a21   :  { %v5290_v62 = vsel %vm661_vm3, %v16729_v26, 0.0 }
0x1a22   :  { %5291 = vadd.xlane.f32.xlu0 %v5290_v62 }
0x1a2f   :  { %5548 = vrot.lane.b32.xlu1 %v18127_v63, %s17109_s29 }
0x1a33   :  { %5493 = vrot.lane.b32.xlu1 %v18129_v29, %s17109_s29 }
0x1a37   :  { %5545 = vrot.lane.b32.xlu1 %v18146_v54, %s17109_s29 }
0x1a38   :  { %5496 = vrot.lane.b32.xlu0 %v18119_v36, %s17109_s29 }
0x1a3b   :  { %5652 = vrot.lane.b32.xlu1 %v18139_v60, %s17109_s29 }
0x1a3c   :  { %5600 = vrot.lane.b32.xlu0 %v18142_v15, %s17109_s29 }
0x1a3f   :  { %5649 = vrot.lane.b32.xlu1 %v18157_v27, %s17109_s29 }
0x1a40   :  { %5597 = vrot.lane.b32.xlu0 %v18168_v24, %s17109_s29 }
0x1a9b   :  { %v5286_v12 = vpop.xlane.xlu0 %5285 }
0x1a9c   :  { %16730 = vrcp.f32 %v5286_v12 }
0x1aa3   :  { %v5289_v52 = vpop.xlane.xlu1 %5288 }
0x1aa4   :  { %16732 = vrcp.f32 %v5289_v52 }
0x1aa7   :  { %v5295_v1 = vpop.xlane.xlu1 %5294 }
0x1aa8   :  { %16734 = vrcp.f32 %v5295_v1 }
0x1aa9   :  { %v16731_v10 = vpop.eup %16730 }
0x1aaa   :  { %v5300_v25 = vmul.f32 %v16731_v10, %v16723_v53 }
0x1aab   :  { %v5292_v34 = vpop.xlane.xlu0 %5291  ;;  %v5549_v56 = vpop.permute.xlu1 %5548 }
0x1aac   :  { %v5304_v11 = vpack.c.bf16 %v5300_v25, %v5300_v25  ;;  %16736 = vrcp.f32 %v5292_v34  ;;  %v5554_v55 = vsel %vm476_vm1, %v5549_v56, 0 }
0x1aae   :  { %15308 = vmatmul.mubr.msk.bf16.vlgmr.msra.gmra.mxu0 %vm661_vm3, %v5304_v11 }
0x1aaf   :  { %15318 = vmatpush3.bf16.msra.mxu0 %v5404_v33  ;;  %15319 = vmatprep.mubr.msk.bf16.mxu0 %vm17108_vm0, %v17107_v35  ;;  %v5494_v57 = vpop.permute.xlu1 %5493  ;;  %v5497_v41 = vpop.permute.xlu0 %5496 }
0x1ab0   :  { %15329 = vmatprep.subr.bf16.mxu0 %v17107_v35  ;;  %v5502_v6 = vsel %vm476_vm1, %v5497_v41, 0 }
0x1ab1   :  { %v16733_v2 = vpop.eup %16732 }
0x1ab2   :  { %v5301_v45 = vmul.f32 %v16733_v2, %v16725_v59 }
0x1ab3   :  { %v5546_v46 = vpop.permute.xlu1 %5545  ;;  %v5601_v61 = vpop.permute.xlu0 %5600 }
0x1ab4   :  { %v5305_v47 = vpack.c.bf16 %v5301_v45, %v5301_v45  ;;  %v5606_v13 = vsel %vm476_vm1, %v5601_v61, 0 }
0x1ab5   :  { %v16735_v23 = vpop.eup %16734 }
0x1ab6   :  { %15314 = vmatmul.mubr.msk.bf16.vlgmr.msra.gmra.mxu1 %vm661_vm3, %v5305_v47  ;;  %v5303_v49 = vmul.f32 %v16735_v23, %v16727_v42 }
0x1ab7   :  { %15324 = vmatpush3.bf16.msra.mxu1 %v5450_v21  ;;  %15325 = vmatprep.mubr.msk.bf16.mxu1 %vm17108_vm0, %v17107_v35  ;;  %v5653_v4 = vpop.permute.xlu1 %5652  ;;  %v5598_v31 = vpop.permute.xlu0 %5597 }
0x1ab8   :  { %15335 = vmatprep.subr.bf16.mxu1 %v17107_v35  ;;  %v5307_v18 = vpack.c.bf16 %v5303_v49, %v5303_v49  ;;  %v5658_v14 = vsel %vm476_vm1, %v5653_v4, 0 }
0x1ab9   :  { %v16737_v50 = vpop.eup %16736 }
0x1aba   :  { %v5302_v38 = vmul.f32 %v16737_v50, %v16729_v26 }
0x1abb   :  { %v5650_v8 = vpop.permute.xlu1 %5649 }
0x1abc   :  { %v5306_v28 = vpack.c.bf16 %v5302_v38, %v5302_v38 }
0x1abe   :  { %15320 = vmatmul.mubr.msk.bf16.vlgmr.msra.gmra.mxu0 %vm661_vm3, %v5306_v28  ;;  %15326 = vmatmul.mubr.msk.bf16.vlgmr.msra.gmra.mxu1 %vm661_vm3, %v5307_v18 }
0x1abf   :  { %15330 = vmatpush3.bf16.xpose.msra.mxu0 %v5502_v6  ;;  %15336 = vmatpush3.bf16.xpose.msra.mxu1 %v5554_v55 }
0x1ac0   :  { %15331 = vmatprep.mubr.msk.bf16.mxu0 %vm17108_vm0, %v17107_v35  ;;  %15337 = vmatprep.mubr.msk.bf16.mxu1 %vm17108_vm0, %v17107_v35 }
0x1ac1   :  { %15341 = vmatprep.subr.bf16.mxu0 %v17107_v35  ;;  %15347 = vmatprep.subr.bf16.mxu1 %v17107_v35 }
0x1ac6   :  { %15332 = vmatmul.mubr.msk.bf16.vlgmr.msra.gmra.mxu0 %vm476_vm1, %v5494_v57  ;;  %15338 = vmatmul.mubr.msk.bf16.vlgmr.msra.gmra.mxu1 %vm476_vm1, %v5546_v46 }
0x1ac7   :  { %15342 = vmatpush3.bf16.xpose.msra.mxu0 %v5606_v13  ;;  %15348 = vmatpush3.bf16.xpose.msra.mxu1 %v5658_v14 }
0x1ac8   :  { %15343 = vmatprep.mubr.msk.bf16.mxu0 %vm17108_vm0, %v17107_v35  ;;  %15349 = vmatprep.mubr.msk.bf16.mxu1 %vm17108_vm0, %v17107_v35 }
0x1ac9   :  { %15359 = vmatprep.subr.bf16.mxu1 %v17107_v35  ;;  %15353 = vmatprep.subr.bf16.mxu0 %v17107_v35 }
0x1ace   :  { %15344 = vmatmul.mubr.msk.bf16.vlgmr.msra.gmra.mxu0 %vm476_vm1, %v5598_v31  ;;  %15350 = vmatmul.mubr.msk.bf16.vlgmr.msra.gmra.mxu1 %vm476_vm1, %v5650_v8 }
0x1acf   :  { %15355 = vmatprep.mubr.msk.bf16.mxu0 %vm17108_vm0, %v17107_v35  ;;  %15361 = vmatprep.mubr.msk.bf16.mxu1 %vm17108_vm0, %v17107_v35 }
0x1b6e   :  { %v18248_v51 = vpop.f32.mrf.mxu0 }
0x1b70   :  { %v15309_v30 = vpop.f32.mrf.mxu0 }
0x1b72   :  { %v5351_v0 = vpop.f32.mrf.mxu0 }
0x1b74   :  { %v15310_v48 = vpop.f32.mrf.mxu0 }
0x1b76   :  { %v18250_v53 = vpop.f32.mrf.mxu1 }
0x1b78   :  { %v15315_v20 = vpop.f32.mrf.mxu1 }
0x1b7a   :  { %v5397_v32 = vpop.f32.mrf.mxu1 }
0x1b7c   :  { %v15316_v59 = vpop.f32.mrf.mxu1 }
0x1b7e   :  { %v18252_v16 = vpop.f32.mrf.mxu0  ;;  %v18254_v42 = vpop.f32.mrf.mxu1 }
0x1b80   :  { %v15321_v5 = vpop.f32.mrf.mxu0  ;;  %v15327_v26 = vpop.f32.mrf.mxu1 }
0x1b82   :  { %v5443_v62 = vpop.f32.mrf.mxu0  ;;  %v5489_v12 = vpop.f32.mrf.mxu1 }
0x1b84   :  { %v15322_v52 = vpop.f32.mrf.mxu0  ;;  %v15328_v1 = vpop.f32.mrf.mxu1 }
0x1b86   :  { %v5538_v10 = vpop.f32.mrf.mxu0  ;;  %v5590_v25 = vpop.f32.mrf.mxu1 }
0x1b87   :  { %v5703_v34 = vsel %vm661_vm3, %v5590_v25, -inf  ;;  %v5700_v11 = vsel %vm661_vm3, %v5538_v10, -inf }
0x1b88   :  { %5704 = vmax.xlane.f32.xlu1 %v5703_v34  ;;  %v15339_v33 = vpop.f32.mrf.mxu1  ;;  %5701 = vmax.xlane.f32.xlu0 %v5700_v11  ;;  %v15333_v2 = vpop.f32.mrf.mxu0 }
0x1b8a   :  { %v5541_v56 = vpop.f32.mrf.mxu0  ;;  %v5593_v45 = vpop.f32.mrf.mxu1 }
0x1b8c   :  { %v15334_v47 = vpop.f32.mrf.mxu0  ;;  %v15340_v23 = vpop.f32.mrf.mxu1 }
0x1b8e   :  { %v5642_v21 = vpop.f32.mrf.mxu0  ;;  %v5694_v57 = vpop.f32.mrf.mxu1 }
0x1b8f   :  { %v5706_v49 = vsel %vm661_vm3, %v5642_v21, -inf  ;;  %v5709_v28 = vsel %vm661_vm3, %v5694_v57, -inf }
0x1b90   :  { %v15351_v50 = vpop.f32.mrf.mxu1  ;;  %5707 = vmax.xlane.f32.xlu0 %v5706_v49  ;;  %v15345_v38 = vpop.f32.mrf.mxu0 }
0x1b92   :  { %v5645_v41 = vpop.f32.mrf.mxu0  ;;  %v5697_v18 = vpop.f32.mrf.mxu1 }
0x1b94   :  { %v15352_v46 = vpop.f32.mrf.mxu1  ;;  %5710 = vmax.xlane.f32.xlu0 %v5709_v28  ;;  %v15346_v55 = vpop.f32.mrf.mxu0 }
0x1b99   :  { %5798 = vrot.lane.b32.xlu1 %v18149_v44, %s17109_s29 }
0x1b9d   :  { %5847 = vrot.lane.b32.xlu1 %v18204_v7, %s17109_s29 }
0x1ba1   :  { %5896 = vrot.lane.b32.xlu1 %v18214_v3, %s17109_s29 }
0x1c11   :  { %v5705_v6 = vpop.xlane.xlu1 %5704  ;;  %v5702_v61 = vpop.xlane.xlu0 %5701 }
0x1c12   :  { %v5713_v4 = vsub.f32 %v5590_v25, %v5705_v6  ;;  %v5712_v13 = vsub.f32 %v5538_v10, %v5702_v61 }
0x1c14   :  { %v5718_v14 = vmul.f32 1.442695, %v5713_v4  ;;  %v5716_v31 = vmul.f32 1.442695, %v5712_v13 }
0x1c15   :  { %v5799_v8 = vpop.permute.xlu1 %5798 }
0x1c16   :  { %16738 = vpow2.f32 %v5718_v14  ;;  %v5804_v30 = vsel %vm713_vm2, %v5799_v8, 0 }
0x1c17   :  { %16740 = vpow2.f32 %v5716_v31  ;;  %15360 = vmatpush3.bf16.msra.mxu1 %v5804_v30 }
0x1c18   :  { %15371 = vmatprep.subr.bf16.mxu1 %v17107_v35 }
0x1c19   :  { %v5708_v59 = vpop.xlane.xlu0 %5707  ;;  %v5848_v11 = vpop.permute.xlu1 %5847 }
0x1c1a   :  { %v5714_v62 = vsub.f32 %v5642_v21, %v5708_v59  ;;  %v5853_v18 = vsel %vm713_vm2, %v5848_v11, 0 }
0x1c1c   :  { %v5720_v52 = vmul.f32 1.442695, %v5714_v62 }
0x1c1d   :  { %v5711_v5 = vpop.xlane.xlu0 %5710  ;;  %v5897_v33 = vpop.permute.xlu1 %5896 }
0x1c1e   :  { %v5715_v26 = vsub.f32 %v5694_v57, %v5711_v5  ;;  %v5902_v41 = vsel %vm713_vm2, %v5897_v33, 0 }
0x1c20   :  { %v5722_v12 = vmul.f32 1.442695, %v5715_v26 }
0x1c22   :  { %16742 = vpow2.f32 %v5722_v12 }
0x1c23   :  { %v16739_v0 = vpop.eup %16738  ;;  %16744 = vpow2.f32 %v5720_v52 }
0x1c24   :  { %v16741_v48 = vpop.eup %16740  ;;  %v5727_v20 = vsel %vm661_vm3, %v16739_v0, 0.0 }
0x1c25   :  { %5728 = vadd.xlane.f32.xlu1 %v5727_v20  ;;  %v5724_v32 = vsel %vm661_vm3, %v16741_v48, 0.0 }
0x1c26   :  { %5725 = vadd.xlane.f32.xlu0 %v5724_v32 }
0x1c2f   :  { %v16743_v1 = vpop.eup %16742 }
0x1c30   :  { %v16745_v10 = vpop.eup %16744  ;;  %v5733_v25 = vsel %vm661_vm3, %v16743_v1, 0.0 }
0x1c31   :  { %v5730_v34 = vsel %vm661_vm3, %v16745_v10, 0.0 }
0x1c36   :  { %5996 = vrot.lane.b32.xlu1 %v18127_v63, %s17110_s30 }
0x1c3c   :  { %5749 = vrot.lane.b32.xlu0 %v18160_v40, %s17109_s29 }
0x1c5a   :  { %5734 = vadd.xlane.f32.xlu1 %v5733_v25 }
0x1c5b   :  { %5731 = vadd.xlane.f32.xlu0 %v5730_v34 }
0x1c6b   :  { %5994 = vrot.lane.b32.xlu1 %v18146_v54, %s17110_s30 }
0x1c6f   :  { %6096 = vrot.lane.b32.xlu1 %v18139_v60, %s17110_s30 }
0x1c71   :  { %5946 = vrot.lane.b32.xlu0 %v18119_v36, %s17110_s30 }
0x1c73   :  { %6094 = vrot.lane.b32.xlu1 %v18157_v27, %s17110_s30 }
0x1c75   :  { %5944 = vrot.lane.b32.xlu0 %v18129_v29, %s17110_s30 }
0x1c79   :  { %6046 = vrot.lane.b32.xlu0 %v18142_v15, %s17110_s30 }
0x1c7d   :  { %6044 = vrot.lane.b32.xlu0 %v18168_v24, %s17110_s30 }
0x1cae   :  { %v5729_v2 = vpop.xlane.xlu1 %5728 }
0x1caf   :  { %16746 = vrcp.f32 %v5729_v2  ;;  %v5726_v56 = vpop.xlane.xlu0 %5725 }
0x1cb0   :  { %16748 = vrcp.f32 %v5726_v56 }
0x1cb2   :  { %v5997_v28 = vpop.permute.xlu1 %5996 }
0x1cb3   :  { %v5750_v45 = vpop.permute.xlu0 %5749 }
0x1cb4   :  { %v5755_v47 = vsel %vm713_vm2, %v5750_v45, 0 }
0x1cb5   :  { %15354 = vmatpush3.bf16.msra.mxu0 %v5755_v47 }
0x1cb6   :  { %15365 = vmatprep.subr.bf16.mxu0 %v17107_v35 }
0x1cbc   :  { %v16747_v23 = vpop.eup %16746 }
0x1cbd   :  { %v16749_v21 = vpop.eup %16748  ;;  %v5741_v57 = vmul.f32 %v16747_v23, %v16739_v0  ;;  %v6002_v0 = vsel %vm476_vm1, %v5997_v28, 0 }
0x1cbe   :  { %v5740_v49 = vmul.f32 %v16749_v21, %v16741_v48 }
0x1cbf   :  { %v5745_v50 = vpack.c.bf16 %v5741_v57, %v5741_v57 }
0x1cc0   :  { %v5744_v38 = vpack.c.bf16 %v5740_v49, %v5740_v49 }
0x1cc1   :  { %15362 = vmatmul.mubr.msk.bf16.vlgmr.msra.gmra.mxu1 %vm661_vm3, %v5745_v50 }
0x1cc2   :  { %15356 = vmatmul.mubr.msk.bf16.vlgmr.msra.gmra.mxu0 %vm661_vm3, %v5744_v38  ;;  %15372 = vmatpush3.bf16.msra.mxu1 %v5902_v41 }
0x1cc3   :  { %15366 = vmatpush3.bf16.msra.mxu0 %v5853_v18  ;;  %15367 = vmatprep.mubr.msk.bf16.mxu0 %vm17108_vm0, %v17107_v35 }
0x1cc4   :  { %15373 = vmatprep.mubr.msk.bf16.mxu1 %vm17108_vm0, %v17107_v35  ;;  %15377 = vmatprep.subr.bf16.mxu0 %v17107_v35 }
0x1cc5   :  { %15383 = vmatprep.subr.bf16.mxu1 %v17107_v35 }
0x1ce3   :  { %v5735_v46 = vpop.xlane.xlu1 %5734 }
0x1ce4   :  { %16750 = vrcp.f32 %v5735_v46  ;;  %v5732_v55 = vpop.xlane.xlu0 %5731 }
0x1ce5   :  { %16752 = vrcp.f32 %v5732_v55 }
0x1ce7   :  { %v5995_v30 = vpop.permute.xlu1 %5994 }
0x1ce8   :  { %v5947_v6 = vpop.permute.xlu0 %5946 }
0x1ce9   :  { %v5952_v20 = vsel %vm476_vm1, %v5947_v6, 0 }
0x1ceb   :  { %v6097_v32 = vpop.permute.xlu1 %6096 }
0x1cec   :  { %v5945_v48 = vpop.permute.xlu0 %5944  ;;  %v6102_v5 = vsel %vm476_vm1, %v6097_v32, 0 }
0x1cef   :  { %v6095_v62 = vpop.permute.xlu1 %6094 }
0x1cf0   :  { %v6047_v59 = vpop.permute.xlu0 %6046 }
0x1cf1   :  { %v16751_v61 = vpop.eup %16750  ;;  %v6052_v26 = vsel %vm476_vm1, %v6047_v59, 0 }
0x1cf2   :  { %v16753_v4 = vpop.eup %16752  ;;  %v5743_v13 = vmul.f32 %v16751_v61, %v16743_v1 }
0x1cf3   :  { %v5742_v14 = vmul.f32 %v16753_v4, %v16745_v10 }
0x1cf4   :  { %v5747_v31 = vpack.c.bf16 %v5743_v13, %v5743_v13  ;;  %v6045_v12 = vpop.permute.xlu0 %6044 }
0x1cf5   :  { %v5746_v8 = vpack.c.bf16 %v5742_v14, %v5742_v14 }
0x1cf6   :  { %15374 = vmatmul.mubr.msk.bf16.vlgmr.msra.gmra.mxu1 %vm661_vm3, %v5747_v31 }
0x1cf7   :  { %15368 = vmatmul.mubr.msk.bf16.vlgmr.msra.gmra.mxu0 %vm661_vm3, %v5746_v8  ;;  %15384 = vmatpush3.bf16.xpose.msra.mxu1 %v6002_v0 }
0x1cf8   :  { %15378 = vmatpush3.bf16.xpose.msra.mxu0 %v5952_v20  ;;  %15379 = vmatprep.mubr.msk.bf16.mxu0 %vm17108_vm0, %v17107_v35 }
0x1cf9   :  { %15385 = vmatprep.mubr.msk.bf16.mxu1 %vm17108_vm0, %v17107_v35  ;;  %15389 = vmatprep.subr.bf16.mxu0 %v17107_v35 }
0x1cfa   :  { %15395 = vmatprep.subr.bf16.mxu1 %v17107_v35 }
0x1cfe   :  { %15386 = vmatmul.mubr.msk.bf16.vlgmr.msra.gmra.mxu1 %vm476_vm1, %v5995_v30 }
0x1cff   :  { %15380 = vmatmul.mubr.msk.bf16.vlgmr.msra.gmra.mxu0 %vm476_vm1, %v5945_v48  ;;  %15396 = vmatpush3.bf16.xpose.msra.mxu1 %v6102_v5 }
0x1d00   :  { %15390 = vmatpush3.bf16.xpose.msra.mxu0 %v6052_v26  ;;  %15391 = vmatprep.mubr.msk.bf16.mxu0 %vm17108_vm0, %v17107_v35 }
0x1d01   :  { %15397 = vmatprep.mubr.msk.bf16.mxu1 %vm17108_vm0, %v17107_v35  ;;  %15407 = vmatprep.subr.bf16.mxu1 %v17107_v35 }
0x1d02   :  { %15401 = vmatprep.subr.bf16.mxu0 %v17107_v35 }
0x1d06   :  { %15398 = vmatmul.mubr.msk.bf16.vlgmr.msra.gmra.mxu1 %vm476_vm1, %v6095_v62 }
0x1d07   :  { %15392 = vmatmul.mubr.msk.bf16.vlgmr.msra.gmra.mxu0 %vm476_vm1, %v6045_v12  ;;  %15409 = vmatprep.mubr.msk.bf16.mxu1 %vm17108_vm0, %v17107_v35 }
0x1d08   :  { %15403 = vmatprep.mubr.msk.bf16.mxu0 %vm17108_vm0, %v17107_v35 }
0x1d81   :  { %v18328_v52 = vpop.f32.mrf.mxu1 }
0x1d82   :  { %v18330_v1 = vpop.f32.mrf.mxu0 }
0x1d83   :  { %v16198_v10 = vpack.i.bf16 %v18328_v52, %v18330_v1  ;;  %v15363_v25 = vpop.f32.mrf.mxu1 }
0x1d84   :  { %v15357_v34 = vpop.f32.mrf.mxu0 }
0x1d85   :  { %v5843_v11 = vpop.f32.mrf.mxu1 }
0x1d86   :  { %v5794_v33 = vpop.f32.mrf.mxu0 }
0x1d87   :  { %v15364_v2 = vpop.f32.mrf.mxu1 }
0x1d88   :  { %v15358_v56 = vpop.f32.mrf.mxu0 }
0x1db6   :  { %v18334_v45 = vpop.f32.mrf.mxu1 }
0x1db7   :  { %v18336_v47 = vpop.f32.mrf.mxu0 }
0x1db8   :  { %v15375_v21 = vpop.f32.mrf.mxu1 }
0x1db9   :  { %v15369_v57 = vpop.f32.mrf.mxu0 }
0x1dba   :  { %v5941_v49 = vpop.f32.mrf.mxu1 }
0x1dbb   :  { %v5892_v50 = vpop.f32.mrf.mxu0 }
0x1dbc   :  { %v15376_v38 = vpop.f32.mrf.mxu1 }
0x1dbd   :  { %v15370_v41 = vpop.f32.mrf.mxu0 }
0x1dbe   :  { %v6038_v18 = vpop.f32.mrf.mxu1 }
0x1dbf   :  { %v5988_v28 = vpop.f32.mrf.mxu0  ;;  %v6147_v46 = vsel %vm661_vm3, %v6038_v18, -inf }
0x1dc0   :  { %6148 = vmax.xlane.f32.xlu1 %v6147_v46  ;;  %v15387_v55 = vpop.f32.mrf.mxu1  ;;  %v6144_v6 = vsel %vm661_vm3, %v5988_v28, -inf }
0x1dc1   :  { %6145 = vmax.xlane.f32.xlu0 %v6144_v6  ;;  %v15381_v61 = vpop.f32.mrf.mxu0 }
0x1dc2   :  { %v6041_v4 = vpop.f32.mrf.mxu1 }
0x1dc3   :  { %v5991_v13 = vpop.f32.mrf.mxu0 }
0x1dc4   :  { %v15388_v14 = vpop.f32.mrf.mxu1 }
0x1dc5   :  { %v15382_v31 = vpop.f32.mrf.mxu0 }
0x1dc6   :  { %v6138_v8 = vpop.f32.mrf.mxu1 }
0x1dc7   :  { %v6088_v30 = vpop.f32.mrf.mxu0  ;;  %v6153_v26 = vsel %vm661_vm3, %v6138_v8, -inf }
0x1dc8   :  { %v15399_v0 = vpop.f32.mrf.mxu1  ;;  %v6150_v48 = vsel %vm661_vm3, %v6088_v30, -inf }
0x1dc9   :  { %6151 = vmax.xlane.f32.xlu0 %v6150_v48  ;;  %v15393_v20 = vpop.f32.mrf.mxu0 }
0x1dca   :  { %v6141_v32 = vpop.f32.mrf.mxu1 }
0x1dcb   :  { %v6091_v59 = vpop.f32.mrf.mxu0 }
0x1dcc   :  { %v15400_v5 = vpop.f32.mrf.mxu1 }
0x1dcd   :  { %6154 = vmax.xlane.f32.xlu0 %v6153_v26  ;;  %v15394_v62 = vpop.f32.mrf.mxu0 }
0x1dd1   :  { %6240 = vrot.lane.b32.xlu1 %v18149_v44, %s17110_s30 }
0x1dd5   :  { %6288 = vrot.lane.b32.xlu1 %v18204_v7, %s17110_s30 }
0x1dd9   :  { %6336 = vrot.lane.b32.xlu1 %v18214_v3, %s17110_s30 }
0x1e49   :  { %v6149_v12 = vpop.xlane.xlu1 %6148 }
0x1e4a   :  { %v6157_v25 = vsub.f32 %v6038_v18, %v6149_v12  ;;  %v6146_v34 = vpop.xlane.xlu0 %6145 }
0x1e4b   :  { %v6156_v11 = vsub.f32 %v5988_v28, %v6146_v34 }
0x1e4c   :  { %v6162_v33 = vmul.f32 1.442695, %v6157_v25 }
0x1e4d   :  { %v6160_v2 = vmul.f32 1.442695, %v6156_v11  ;;  %v6241_v56 = vpop.permute.xlu1 %6240 }
0x1e4e   :  { %16754 = vpow2.f32 %v6162_v33  ;;  %v6246_v21 = vsel %vm713_vm2, %v6241_v56, 0 }
0x1e4f   :  { %16756 = vpow2.f32 %v6160_v2  ;;  %15408 = vmatpush3.bf16.msra.mxu1 %v6246_v21 }
0x1e50   :  { %15419 = vmatprep.subr.bf16.mxu1 %v17107_v35 }
0x1e51   :  { %v6289_v31 = vpop.permute.xlu1 %6288 }
0x1e52   :  { %v6152_v41 = vpop.xlane.xlu0 %6151  ;;  %v6294_v34 = vsel %vm713_vm2, %v6289_v31, 0 }
0x1e53   :  { %v6158_v46 = vsub.f32 %v6088_v30, %v6152_v41 }
0x1e55   :  { %v6164_v6 = vmul.f32 1.442695, %v6158_v46 }
0x1e56   :  { %v6155_v18 = vpop.xlane.xlu0 %6154 }
0x1e57   :  { %v6159_v28 = vsub.f32 %v6138_v8, %v6155_v18  ;;  %v6337_v8 = vpop.permute.xlu1 %6336 }
0x1e58   :  { %v6342_v25 = vsel %vm713_vm2, %v6337_v8, 0 }
0x1e59   :  { %v6166_v55 = vmul.f32 1.442695, %v6159_v28 }
0x1e5b   :  { %v16755_v57 = vpop.eup %16754  ;;  %16758 = vpow2.f32 %v6166_v55 }
0x1e5c   :  { %v16757_v49 = vpop.eup %16756  ;;  %v6171_v50 = vsel %vm661_vm3, %v16755_v57, 0.0  ;;  %16760 = vpow2.f32 %v6164_v6 }
0x1e5d   :  { %6172 = vadd.xlane.f32.xlu1 %v6171_v50  ;;  %v6168_v38 = vsel %vm661_vm3, %v16757_v49, 0.0 }
0x1e5e   :  { %6169 = vadd.xlane.f32.xlu0 %v6168_v38 }
0x1e68   :  { %v16759_v61 = vpop.eup %16758 }
0x1e69   :  { %v16761_v4 = vpop.eup %16760  ;;  %v6177_v13 = vsel %vm661_vm3, %v16759_v61, 0.0 }
0x1e6a   :  { %v6174_v14 = vsel %vm661_vm3, %v16761_v4, 0.0 }
0x1e6e   :  { %6436 = vrot.lane.b32.xlu1 %v18127_v63, %s17111_s15 }
0x1e74   :  { %6192 = vrot.lane.b32.xlu0 %v18160_v40, %s17110_s30 }
0x1e92   :  { %6178 = vadd.xlane.f32.xlu1 %v6177_v13 }
0x1e93   :  { %6175 = vadd.xlane.f32.xlu0 %v6174_v14 }
0x1ea3   :  { %6434 = vrot.lane.b32.xlu1 %v18146_v54, %s17111_s15 }
0x1ea7   :  { %6536 = vrot.lane.b32.xlu1 %v18139_v60, %s17111_s15 }
0x1ea9   :  { %6386 = vrot.lane.b32.xlu0 %v18119_v36, %s17111_s15 }
0x1eab   :  { %6534 = vrot.lane.b32.xlu1 %v18157_v27, %s17111_s15 }
0x1ead   :  { %6384 = vrot.lane.b32.xlu0 %v18129_v29, %s17111_s15 }
0x1eb1   :  { %6486 = vrot.lane.b32.xlu0 %v18142_v15, %s17111_s15 }
0x1eb5   :  { %6484 = vrot.lane.b32.xlu0 %v18168_v24, %s17111_s15 }
0x1ee6   :  { %v6173_v30 = vpop.xlane.xlu1 %6172 }
0x1ee7   :  { %16762 = vrcp.f32 %v6173_v30  ;;  %v6170_v0 = vpop.xlane.xlu0 %6169 }
0x1ee8   :  { %16764 = vrcp.f32 %v6170_v0 }
0x1eea   :  { %v6437_v11 = vpop.permute.xlu1 %6436 }
0x1eeb   :  { %v6193_v48 = vpop.permute.xlu0 %6192  ;;  %v6442_v28 = vsel %vm476_vm1, %v6437_v11, 0 }
0x1eec   :  { %v6198_v20 = vsel %vm713_vm2, %v6193_v48, 0 }
0x1eed   :  { %15402 = vmatpush3.bf16.msra.mxu0 %v6198_v20 }
0x1eee   :  { %15413 = vmatprep.subr.bf16.mxu0 %v17107_v35 }
0x1ef4   :  { %v16763_v32 = vpop.eup %16762 }
0x1ef5   :  { %v16765_v59 = vpop.eup %16764  ;;  %v6185_v5 = vmul.f32 %v16763_v32, %v16755_v57 }
0x1ef6   :  { %v6184_v26 = vmul.f32 %v16765_v59, %v16757_v49 }
0x1ef7   :  { %v6189_v62 = vpack.c.bf16 %v6185_v5, %v6185_v5 }
0x1ef8   :  { %v6188_v12 = vpack.c.bf16 %v6184_v26, %v6184_v26 }
0x1ef9   :  { %15410 = vmatmul.mubr.msk.bf16.vlgmr.msra.gmra.mxu1 %vm661_vm3, %v6189_v62 }
0x1efa   :  { %15404 = vmatmul.mubr.msk.bf16.vlgmr.msra.gmra.mxu0 %vm661_vm3, %v6188_v12  ;;  %15420 = vmatpush3.bf16.msra.mxu1 %v6342_v25 }
0x1efb   :  { %15414 = vmatpush3.bf16.msra.mxu0 %v6294_v34  ;;  %15415 = vmatprep.mubr.msk.bf16.mxu0 %vm17108_vm0, %v17107_v35 }
0x1efc   :  { %15421 = vmatprep.mubr.msk.bf16.mxu1 %vm17108_vm0, %v17107_v35  ;;  %15425 = vmatprep.subr.bf16.mxu0 %v17107_v35 }
0x1efd   :  { %15431 = vmatprep.subr.bf16.mxu1 %v17107_v35 }
0x1f1b   :  { %v6179_v33 = vpop.xlane.xlu1 %6178 }
0x1f1c   :  { %16766 = vrcp.f32 %v6179_v33  ;;  %v6176_v2 = vpop.xlane.xlu0 %6175 }
0x1f1d   :  { %16768 = vrcp.f32 %v6176_v2 }
0x1f1f   :  { %v6435_v18 = vpop.permute.xlu1 %6434 }
0x1f20   :  { %v6387_v56 = vpop.permute.xlu0 %6386 }
0x1f21   :  { %v6392_v55 = vsel %vm476_vm1, %v6387_v56, 0 }
0x1f23   :  { %v6537_v6 = vpop.permute.xlu1 %6536 }
0x1f24   :  { %v6385_v46 = vpop.permute.xlu0 %6384 }
0x1f27   :  { %v6535_v14 = vpop.permute.xlu1 %6534 }
0x1f29   :  { %v16767_v21 = vpop.eup %16766 }
0x1f2a   :  { %v16769_v57 = vpop.eup %16768  ;;  %v6187_v49 = vmul.f32 %v16767_v21, %v16759_v61  ;;  %v6487_v61 = vpop.permute.xlu0 %6486 }
0x1f2b   :  { %v6186_v50 = vmul.f32 %v16769_v57, %v16761_v4  ;;  %v6542_v4 = vsel %vm476_vm1, %v6537_v6, 0  ;;  %v6492_v13 = vsel %vm476_vm1, %v6487_v61, 0 }
0x1f2c   :  { %v6191_v38 = vpack.c.bf16 %v6187_v49, %v6187_v49 }
0x1f2d   :  { %v6190_v41 = vpack.c.bf16 %v6186_v50, %v6186_v50 }
0x1f2e   :  { %15422 = vmatmul.mubr.msk.bf16.vlgmr.msra.gmra.mxu1 %vm661_vm3, %v6191_v38  ;;  %v6485_v31 = vpop.permute.xlu0 %6484 }
0x1f2f   :  { %15416 = vmatmul.mubr.msk.bf16.vlgmr.msra.gmra.mxu0 %vm661_vm3, %v6190_v41  ;;  %15432 = vmatpush3.bf16.xpose.msra.mxu1 %v6442_v28 }
0x1f30   :  { %15426 = vmatpush3.bf16.xpose.msra.mxu0 %v6392_v55  ;;  %15427 = vmatprep.mubr.msk.bf16.mxu0 %vm17108_vm0, %v17107_v35 }
0x1f31   :  { %15433 = vmatprep.mubr.msk.bf16.mxu1 %vm17108_vm0, %v17107_v35  ;;  %15437 = vmatprep.subr.bf16.mxu0 %v17107_v35 }
0x1f32   :  { %15443 = vmatprep.subr.bf16.mxu1 %v17107_v35 }
0x1f36   :  { %15434 = vmatmul.mubr.msk.bf16.vlgmr.msra.gmra.mxu1 %vm476_vm1, %v6435_v18 }
0x1f37   :  { %15428 = vmatmul.mubr.msk.bf16.vlgmr.msra.gmra.mxu0 %vm476_vm1, %v6385_v46  ;;  %15444 = vmatpush3.bf16.xpose.msra.mxu1 %v6542_v4 }
0x1f38   :  { %15438 = vmatpush3.bf16.xpose.msra.mxu0 %v6492_v13  ;;  %15439 = vmatprep.mubr.msk.bf16.mxu0 %vm17108_vm0, %v17107_v35 }
0x1f39   :  { %15445 = vmatprep.mubr.msk.bf16.mxu1 %vm17108_vm0, %v17107_v35  ;;  %15455 = vmatprep.subr.bf16.mxu1 %v17107_v35 }
0x1f3a   :  { %15449 = vmatprep.subr.bf16.mxu0 %v17107_v35 }
0x1f3e   :  { %15446 = vmatmul.mubr.msk.bf16.vlgmr.msra.gmra.mxu1 %vm476_vm1, %v6535_v14 }
0x1f3f   :  { %15440 = vmatmul.mubr.msk.bf16.vlgmr.msra.gmra.mxu0 %vm476_vm1, %v6485_v31  ;;  %15457 = vmatprep.mubr.msk.bf16.mxu1 %vm17108_vm0, %v17107_v35 }
0x1f40   :  { %15451 = vmatprep.mubr.msk.bf16.mxu0 %vm17108_vm0, %v17107_v35 }
0x1fb9   :  { %v18412_v8 = vpop.f32.mrf.mxu1 }
0x1fba   :  { %v18414_v30 = vpop.f32.mrf.mxu0 }
0x1fbb   :  { %v15411_v48 = vpop.f32.mrf.mxu1 }
0x1fbc   :  { %v15405_v20 = vpop.f32.mrf.mxu0 }
0x1fbd   :  { %v6285_v32 = vpop.f32.mrf.mxu1 }
0x1fbe   :  { %v6237_v59 = vpop.f32.mrf.mxu0 }
0x1fbf   :  { %v15412_v5 = vpop.f32.mrf.mxu1 }
0x1fc0   :  { %v15406_v26 = vpop.f32.mrf.mxu0 }
0x1fee   :  { %v18418_v62 = vpop.f32.mrf.mxu1 }
0x1fef   :  { %v18420_v12 = vpop.f32.mrf.mxu0 }
0x1ff0   :  { %v15423_v34 = vpop.f32.mrf.mxu1 }
0x1ff1   :  { %v15417_v11 = vpop.f32.mrf.mxu0 }
0x1ff2   :  { %v6381_v33 = vpop.f32.mrf.mxu1 }
0x1ff3   :  { %v6333_v2 = vpop.f32.mrf.mxu0 }
0x1ff4   :  { %v15424_v56 = vpop.f32.mrf.mxu1 }
0x1ff5   :  { %v15418_v21 = vpop.f32.mrf.mxu0 }
0x1ff6   :  { %v6478_v57 = vpop.f32.mrf.mxu1 }
0x1ff7   :  { %v6428_v49 = vpop.f32.mrf.mxu0  ;;  %v6587_v50 = vsel %vm661_vm3, %v6478_v57, -inf }
0x1ff8   :  { %6588 = vmax.xlane.f32.xlu1 %v6587_v50  ;;  %v15435_v38 = vpop.f32.mrf.mxu1  ;;  %v6584_v41 = vsel %vm661_vm3, %v6428_v49, -inf }
0x1ff9   :  { %6585 = vmax.xlane.f32.xlu0 %v6584_v41  ;;  %v15429_v18 = vpop.f32.mrf.mxu0 }
0x1ffa   :  { %v6481_v28 = vpop.f32.mrf.mxu1 }
0x1ffb   :  { %v6431_v46 = vpop.f32.mrf.mxu0 }
0x1ffc   :  { %v15436_v55 = vpop.f32.mrf.mxu1 }
0x1ffd   :  { %v15430_v6 = vpop.f32.mrf.mxu0 }
0x1ffe   :  { %v6578_v61 = vpop.f32.mrf.mxu1 }
0x1fff   :  { %v6528_v4 = vpop.f32.mrf.mxu0  ;;  %v6593_v59 = vsel %vm661_vm3, %v6578_v61, -inf }
0x2000   :  { %v15447_v13 = vpop.f32.mrf.mxu1  ;;  %v6590_v14 = vsel %vm661_vm3, %v6528_v4, -inf }
0x2001   :  { %6591 = vmax.xlane.f32.xlu0 %v6590_v14  ;;  %v15441_v31 = vpop.f32.mrf.mxu0 }
0x2002   :  { %v6581_v48 = vpop.f32.mrf.mxu1 }
0x2003   :  { %v6531_v20 = vpop.f32.mrf.mxu0 }
0x2004   :  { %v15448_v32 = vpop.f32.mrf.mxu1 }
0x2005   :  { %6594 = vmax.xlane.f32.xlu0 %v6593_v59  ;;  %v15442_v5 = vpop.f32.mrf.mxu0 }
0x2009   :  { %6680 = vrot.lane.b32.xlu1 %v18149_v44, %s17111_s15 }
0x200d   :  { %6728 = vrot.lane.b32.xlu1 %v18204_v7, %s17111_s15 }
0x2011   :  { %6776 = vrot.lane.b32.xlu1 %v18214_v3, %s17111_s15 }
0x2081   :  { %v6589_v26 = vpop.xlane.xlu1 %6588 }
0x2082   :  { %v6597_v34 = vsub.f32 %v6478_v57, %v6589_v26  ;;  %v6586_v11 = vpop.xlane.xlu0 %6585 }
0x2083   :  { %v6596_v33 = vsub.f32 %v6428_v49, %v6586_v11 }
0x2084   :  { %v6602_v2 = vmul.f32 1.442695, %v6597_v34 }
0x2085   :  { %v6600_v56 = vmul.f32 1.442695, %v6596_v33  ;;  %v6681_v21 = vpop.permute.xlu1 %6680 }
0x2086   :  { %16770 = vpow2.f32 %v6602_v2  ;;  %v6686_v50 = vsel %vm713_vm2, %v6681_v21, 0 }
0x2087   :  { %16772 = vpow2.f32 %v6600_v56  ;;  %15456 = vmatpush3.bf16.msra.mxu1 %v6686_v50 }
0x2088   :  { %15467 = vmatprep.subr.bf16.mxu1 %v17107_v35 }
0x208a   :  { %v6592_v57 = vpop.xlane.xlu0 %6591 }
0x208b   :  { %v6598_v55 = vsub.f32 %v6528_v4, %v6592_v57 }
0x208d   :  { %v6604_v13 = vmul.f32 1.442695, %v6598_v55 }
0x208e   :  { %v6595_v49 = vpop.xlane.xlu0 %6594 }
0x208f   :  { %v6599_v46 = vsub.f32 %v6578_v61, %v6595_v49  ;;  %v6729_v61 = vpop.permute.xlu1 %6728 }
0x2091   :  { %v6606_v6 = vmul.f32 1.442695, %v6599_v46 }
0x2093   :  { %v16771_v38 = vpop.eup %16770  ;;  %16774 = vpow2.f32 %v6606_v6  ;;  %v6777_v4 = vpop.permute.xlu1 %6776 }
0x2094   :  { %v16773_v41 = vpop.eup %16772  ;;  %v6611_v18 = vsel %vm661_vm3, %v16771_v38, 0.0  ;;  %16776 = vpow2.f32 %v6604_v13  ;;  %v6782_v50 = vsel %vm713_vm2, %v6777_v4, 0 }
0x2095   :  { %6612 = vadd.xlane.f32.xlu1 %v6611_v18  ;;  %v6608_v28 = vsel %vm661_vm3, %v16773_v41, 0.0  ;;  %v6734_v18 = vsel %vm713_vm2, %v6729_v61, 0 }
0x2096   :  { %6609 = vadd.xlane.f32.xlu0 %v6608_v28 }
0x20a0   :  { %v16775_v14 = vpop.eup %16774 }
0x20a1   :  { %v16777_v31 = vpop.eup %16776  ;;  %v6617_v48 = vsel %vm661_vm3, %v16775_v14, 0.0 }
0x20a2   :  { %v6614_v20 = vsel %vm661_vm3, %v16777_v31, 0.0 }
0x20a6   :  { %6876 = vrot.lane.b32.xlu1 %v18127_v63, %s17097_s16 }
0x20ac   :  { %6632 = vrot.lane.b32.xlu0 %v18160_v40, %s17111_s15 }
0x20ca   :  { %6618 = vadd.xlane.f32.xlu1 %v6617_v48 }
0x20cb   :  { %6615 = vadd.xlane.f32.xlu0 %v6614_v20 }
0x20db   :  { %6874 = vrot.lane.b32.xlu1 %v18146_v54, %s17097_s16 }
0x20df   :  { %6976 = vrot.lane.b32.xlu1 %v18139_v60, %s17097_s16 }
0x20e1   :  { %6826 = vrot.lane.b32.xlu0 %v18119_v36, %s17097_s16 }
0x20e3   :  { %6974 = vrot.lane.b32.xlu1 %v18157_v27, %s17097_s16 }
0x20e5   :  { %6824 = vrot.lane.b32.xlu0 %v18129_v29, %s17097_s16 }
0x20e9   :  { %6926 = vrot.lane.b32.xlu0 %v18142_v15, %s17097_s16 }
0x20ed   :  { %6924 = vrot.lane.b32.xlu0 %v18168_v24, %s17097_s16 }
0x211e   :  { %v6613_v32 = vpop.xlane.xlu1 %6612 }
0x211f   :  { %16778 = vrcp.f32 %v6613_v32  ;;  %v6610_v59 = vpop.xlane.xlu0 %6609 }
0x2120   :  { %16780 = vrcp.f32 %v6610_v59 }
0x2123   :  { %v6633_v5 = vpop.permute.xlu0 %6632 }
0x2124   :  { %v6638_v26 = vsel %vm713_vm2, %v6633_v5, 0 }
0x2125   :  { %15450 = vmatpush3.bf16.msra.mxu0 %v6638_v26 }
0x2126   :  { %15461 = vmatprep.subr.bf16.mxu0 %v17107_v35 }
0x212c   :  { %v16779_v34 = vpop.eup %16778 }
0x212d   :  { %v16781_v11 = vpop.eup %16780  ;;  %v6625_v33 = vmul.f32 %v16779_v34, %v16771_v38  ;;  %v6877_v38 = vpop.permute.xlu1 %6876 }
0x212e   :  { %v6624_v2 = vmul.f32 %v16781_v11, %v16773_v41  ;;  %v6882_v61 = vsel %vm476_vm1, %v6877_v38, 0 }
0x212f   :  { %v6629_v56 = vpack.c.bf16 %v6625_v33, %v6625_v33 }
0x2130   :  { %v6628_v21 = vpack.c.bf16 %v6624_v2, %v6624_v2 }
0x2131   :  { %15458 = vmatmul.mubr.msk.bf16.vlgmr.msra.gmra.mxu1 %vm661_vm3, %v6629_v56 }
0x2132   :  { %15452 = vmatmul.mubr.msk.bf16.vlgmr.msra.gmra.mxu0 %vm661_vm3, %v6628_v21  ;;  %15468 = vmatpush3.bf16.msra.mxu1 %v6782_v50 }
0x2133   :  { %15462 = vmatpush3.bf16.msra.mxu0 %v6734_v18  ;;  %15463 = vmatprep.mubr.msk.bf16.mxu0 %vm17108_vm0, %v17107_v35 }
0x2134   :  { %15469 = vmatprep.mubr.msk.bf16.mxu1 %vm17108_vm0, %v17107_v35  ;;  %15473 = vmatprep.subr.bf16.mxu0 %v17107_v35 }
0x2135   :  { %15479 = vmatprep.subr.bf16.mxu1 %v17107_v35 }
0x2153   :  { %v6619_v41 = vpop.xlane.xlu1 %6618 }
0x2154   :  { %16782 = vrcp.f32 %v6619_v41  ;;  %v6616_v28 = vpop.xlane.xlu0 %6615 }
0x2155   :  { %16784 = vrcp.f32 %v6616_v28 }
0x2157   :  { %v6875_v20 = vpop.permute.xlu1 %6874 }
0x2158   :  { %v6827_v57 = vpop.permute.xlu0 %6826 }
0x2159   :  { %v6832_v32 = vsel %vm476_vm1, %v6827_v57, 0 }
0x215c   :  { %v6825_v4 = vpop.permute.xlu0 %6824 }
0x2161   :  { %v16783_v49 = vpop.eup %16782 }
0x2162   :  { %v16785_v46 = vpop.eup %16784  ;;  %v6627_v55 = vmul.f32 %v16783_v49, %v16775_v14  ;;  %v6977_v14 = vpop.permute.xlu1 %6976 }
0x2163   :  { %v6626_v6 = vmul.f32 %v16785_v46, %v16777_v31  ;;  %v6927_v31 = vpop.permute.xlu0 %6926  ;;  %v6982_v59 = vsel %vm476_vm1, %v6977_v14, 0 }
0x2164   :  { %v6631_v13 = vpack.c.bf16 %v6627_v55, %v6627_v55  ;;  %v6932_v5 = vsel %vm476_vm1, %v6927_v31, 0 }
0x2165   :  { %v6630_v48 = vpack.c.bf16 %v6626_v6, %v6626_v6 }
0x2166   :  { %15470 = vmatmul.mubr.msk.bf16.vlgmr.msra.gmra.mxu1 %vm661_vm3, %v6631_v13  ;;  %v6975_v26 = vpop.permute.xlu1 %6974 }
0x2167   :  { %15464 = vmatmul.mubr.msk.bf16.vlgmr.msra.gmra.mxu0 %vm661_vm3, %v6630_v48  ;;  %15480 = vmatpush3.bf16.xpose.msra.mxu1 %v6882_v61  ;;  %v6925_v34 = vpop.permute.xlu0 %6924 }
0x2168   :  { %15474 = vmatpush3.bf16.xpose.msra.mxu0 %v6832_v32  ;;  %15475 = vmatprep.mubr.msk.bf16.mxu0 %vm17108_vm0, %v17107_v35 }
0x2169   :  { %15481 = vmatprep.mubr.msk.bf16.mxu1 %vm17108_vm0, %v17107_v35  ;;  %15485 = vmatprep.subr.bf16.mxu0 %v17107_v35 }
0x216a   :  { %15491 = vmatprep.subr.bf16.mxu1 %v17107_v35 }
0x216e   :  { %15482 = vmatmul.mubr.msk.bf16.vlgmr.msra.gmra.mxu1 %vm476_vm1, %v6875_v20 }
0x216f   :  { %15476 = vmatmul.mubr.msk.bf16.vlgmr.msra.gmra.mxu0 %vm476_vm1, %v6825_v4  ;;  %15492 = vmatpush3.bf16.xpose.msra.mxu1 %v6982_v59 }
0x2170   :  { %15486 = vmatpush3.bf16.xpose.msra.mxu0 %v6932_v5  ;;  %15487 = vmatprep.mubr.msk.bf16.mxu0 %vm17108_vm0, %v17107_v35 }
0x2171   :  { %15493 = vmatprep.mubr.msk.bf16.mxu1 %vm17108_vm0, %v17107_v35  ;;  %15503 = vmatprep.subr.bf16.mxu1 %v17107_v35 }
0x2172   :  { %15497 = vmatprep.subr.bf16.mxu0 %v17107_v35 }
0x2176   :  { %15494 = vmatmul.mubr.msk.bf16.vlgmr.msra.gmra.mxu1 %vm476_vm1, %v6975_v26 }
0x2177   :  { %15488 = vmatmul.mubr.msk.bf16.vlgmr.msra.gmra.mxu0 %vm476_vm1, %v6925_v34  ;;  %15505 = vmatprep.mubr.msk.bf16.mxu1 %vm17108_vm0, %v17107_v35 }
0x2178   :  { %15499 = vmatprep.mubr.msk.bf16.mxu0 %vm17108_vm0, %v17107_v35 }
0x21f1   :  { %v18496_v11 = vpop.f32.mrf.mxu1 }
0x21f2   :  { %v18498_v33 = vpop.f32.mrf.mxu0 }
0x21f3   :  { %v15459_v56 = vpop.f32.mrf.mxu1 }
0x21f4   :  { %v15453_v21 = vpop.f32.mrf.mxu0 }
0x21f5   :  { %v6725_v50 = vpop.f32.mrf.mxu1 }
0x21f6   :  { %v6677_v18 = vpop.f32.mrf.mxu0 }
0x21f7   :  { %v15460_v38 = vpop.f32.mrf.mxu1 }
0x21f8   :  { %v15454_v41 = vpop.f32.mrf.mxu0 }
0x2226   :  { %v18502_v28 = vpop.f32.mrf.mxu1 }
0x2227   :  { %v18504_v57 = vpop.f32.mrf.mxu0 }
0x2228   :  { %v15471_v46 = vpop.f32.mrf.mxu1 }
0x2229   :  { %v15465_v55 = vpop.f32.mrf.mxu0 }
0x222a   :  { %v6821_v6 = vpop.f32.mrf.mxu1 }
0x222b   :  { %v6773_v13 = vpop.f32.mrf.mxu0 }
0x222c   :  { %v15472_v48 = vpop.f32.mrf.mxu1 }
0x222d   :  { %v15466_v20 = vpop.f32.mrf.mxu0 }
0x222e   :  { %v6918_v61 = vpop.f32.mrf.mxu1 }
0x222f   :  { %v6868_v4 = vpop.f32.mrf.mxu0  ;;  %v7027_v32 = vsel %vm661_vm3, %v6918_v61, -inf }
0x2230   :  { %7028 = vmax.xlane.f32.xlu1 %v7027_v32  ;;  %v15483_v14 = vpop.f32.mrf.mxu1  ;;  %v7024_v31 = vsel %vm661_vm3, %v6868_v4, -inf }
0x2231   :  { %7025 = vmax.xlane.f32.xlu0 %v7024_v31  ;;  %v15477_v59 = vpop.f32.mrf.mxu0 }
0x2232   :  { %v6921_v5 = vpop.f32.mrf.mxu1 }
0x2233   :  { %v6871_v26 = vpop.f32.mrf.mxu0 }
0x2234   :  { %v15484_v34 = vpop.f32.mrf.mxu1 }
0x2235   :  { %v15478_v56 = vpop.f32.mrf.mxu0 }
0x2236   :  { %v7018_v21 = vpop.f32.mrf.mxu1 }
0x2237   :  { %v6968_v50 = vpop.f32.mrf.mxu0  ;;  %v7033_v13 = vsel %vm661_vm3, %v7018_v21, -inf }
0x2238   :  { %v15495_v18 = vpop.f32.mrf.mxu1  ;;  %v7030_v38 = vsel %vm661_vm3, %v6968_v50, -inf }
0x2239   :  { %7031 = vmax.xlane.f32.xlu0 %v7030_v38  ;;  %v15489_v41 = vpop.f32.mrf.mxu0 }
0x223a   :  { %v7021_v46 = vpop.f32.mrf.mxu1 }
0x223b   :  { %v6971_v55 = vpop.f32.mrf.mxu0 }
0x223c   :  { %v15496_v6 = vpop.f32.mrf.mxu1 }
0x223d   :  { %7034 = vmax.xlane.f32.xlu0 %v7033_v13  ;;  %v15490_v48 = vpop.f32.mrf.mxu0 }
0x2241   :  { %7120 = vrot.lane.b32.xlu1 %v18149_v44, %s17097_s16 }
0x2245   :  { %7168 = vrot.lane.b32.xlu1 %v18204_v7, %s17097_s16 }
0x2249   :  { %7216 = vrot.lane.b32.xlu1 %v18214_v3, %s17097_s16 }
0x22b9   :  { %v7029_v20 = vpop.xlane.xlu1 %7028 }
0x22ba   :  { %v7037_v32 = vsub.f32 %v6918_v61, %v7029_v20  ;;  %v7026_v14 = vpop.xlane.xlu0 %7025 }
0x22bb   :  { %v7036_v31 = vsub.f32 %v6868_v4, %v7026_v14 }
0x22bc   :  { %v7042_v59 = vmul.f32 1.442695, %v7037_v32 }
0x22bd   :  { %v7040_v5 = vmul.f32 1.442695, %v7036_v31  ;;  %v7121_v26 = vpop.permute.xlu1 %7120 }
0x22be   :  { %16786 = vpow2.f32 %v7042_v59  ;;  %v7126_v34 = vsel %vm713_vm2, %v7121_v26, 0 }
0x22bf   :  { %16788 = vpow2.f32 %v7040_v5  ;;  %15504 = vmatpush3.bf16.msra.mxu1 %v7126_v34 }
0x22c0   :  { %15515 = vmatprep.subr.bf16.mxu1 %v17107_v35 }
0x22c2   :  { %v7032_v61 = vpop.xlane.xlu0 %7031 }
0x22c3   :  { %v7038_v55 = vsub.f32 %v6968_v50, %v7032_v61 }
0x22c5   :  { %v7044_v13 = vmul.f32 1.442695, %v7038_v55 }
0x22c6   :  { %v7035_v4 = vpop.xlane.xlu0 %7034 }
0x22c7   :  { %v7039_v46 = vsub.f32 %v7018_v21, %v7035_v4  ;;  %v7169_v21 = vpop.permute.xlu1 %7168 }
0x22c9   :  { %v7046_v6 = vmul.f32 1.442695, %v7039_v46 }
0x22cb   :  { %v16787_v56 = vpop.eup %16786  ;;  %16790 = vpow2.f32 %v7046_v6  ;;  %v7217_v50 = vpop.permute.xlu1 %7216  ;;  %v7174_v6 = vsel %vm713_vm2, %v7169_v21, 0 }
0x22cc   :  { %v16789_v18 = vpop.eup %16788  ;;  %v7051_v38 = vsel %vm661_vm3, %v16787_v56, 0.0  ;;  %16792 = vpow2.f32 %v7044_v13  ;;  %v7222_v55 = vsel %vm713_vm2, %v7217_v50, 0 }
0x22cd   :  { %7052 = vadd.xlane.f32.xlu1 %v7051_v38  ;;  %v7048_v41 = vsel %vm661_vm3, %v16789_v18, 0.0 }
0x22ce   :  { %7049 = vadd.xlane.f32.xlu0 %v7048_v41 }
0x22d8   :  { %v16791_v48 = vpop.eup %16790 }
0x22d9   :  { %v16793_v20 = vpop.eup %16792  ;;  %v7057_v32 = vsel %vm661_vm3, %v16791_v48, 0.0 }
0x22da   :  { %v7054_v14 = vsel %vm661_vm3, %v16793_v20, 0.0 }
0x22de   :  { %7316 = vrot.lane.b32.xlu1 %v18127_v63, %s17112_s18 }
0x22e4   :  { %7072 = vrot.lane.b32.xlu0 %v18160_v40, %s17097_s16 }
0x2302   :  { %7058 = vadd.xlane.f32.xlu1 %v7057_v32 }
0x2303   :  { %7055 = vadd.xlane.f32.xlu0 %v7054_v14 }
0x2313   :  { %7314 = vrot.lane.b32.xlu1 %v18146_v54, %s17112_s18 }
0x2317   :  { %7416 = vrot.lane.b32.xlu1 %v18139_v60, %s17112_s18 }
0x2319   :  { %7266 = vrot.lane.b32.xlu0 %v18119_v36, %s17112_s18 }
0x231b   :  { %7414 = vrot.lane.b32.xlu1 %v18157_v27, %s17112_s18 }
0x231d   :  { %7264 = vrot.lane.b32.xlu0 %v18129_v29, %s17112_s18 }
0x2321   :  { %7366 = vrot.lane.b32.xlu0 %v18142_v15, %s17112_s18 }
0x2325   :  { %7364 = vrot.lane.b32.xlu0 %v18168_v24, %s17112_s18 }
0x2356   :  { %v7053_v31 = vpop.xlane.xlu1 %7052 }
0x2357   :  { %16794 = vrcp.f32 %v7053_v31  ;;  %v7050_v59 = vpop.xlane.xlu0 %7049 }
0x2358   :  { %16796 = vrcp.f32 %v7050_v59 }
0x235b   :  { %v7073_v5 = vpop.permute.xlu0 %7072 }
0x235c   :  { %v7078_v26 = vsel %vm713_vm2, %v7073_v5, 0 }
0x235d   :  { %15498 = vmatpush3.bf16.msra.mxu0 %v7078_v26 }
0x235e   :  { %15509 = vmatprep.subr.bf16.mxu0 %v17107_v35 }
0x2364   :  { %v16795_v34 = vpop.eup %16794 }
0x2365   :  { %v16797_v38 = vpop.eup %16796  ;;  %v7065_v41 = vmul.f32 %v16795_v34, %v16787_v56  ;;  %v7317_v56 = vpop.permute.xlu1 %7316 }
0x2366   :  { %v7064_v61 = vmul.f32 %v16797_v38, %v16789_v18  ;;  %v7322_v34 = vsel %vm476_vm1, %v7317_v56, 0 }
0x2367   :  { %v7069_v4 = vpack.c.bf16 %v7065_v41, %v7065_v41 }
0x2368   :  { %v7068_v46 = vpack.c.bf16 %v7064_v61, %v7064_v61 }
0x2369   :  { %15506 = vmatmul.mubr.msk.bf16.vlgmr.msra.gmra.mxu1 %vm661_vm3, %v7069_v4 }
0x236a   :  { %15500 = vmatmul.mubr.msk.bf16.vlgmr.msra.gmra.mxu0 %vm661_vm3, %v7068_v46  ;;  %15516 = vmatpush3.bf16.msra.mxu1 %v7222_v55 }
0x236b   :  { %15510 = vmatpush3.bf16.msra.mxu0 %v7174_v6  ;;  %15511 = vmatprep.mubr.msk.bf16.mxu0 %vm17108_vm0, %v17107_v35 }
0x236c   :  { %15517 = vmatprep.mubr.msk.bf16.mxu1 %vm17108_vm0, %v17107_v35  ;;  %15521 = vmatprep.subr.bf16.mxu0 %v17107_v35 }
0x236d   :  { %15527 = vmatprep.subr.bf16.mxu1 %v17107_v35 }
0x238b   :  { %v7059_v18 = vpop.xlane.xlu1 %7058 }
0x238c   :  { %16798 = vrcp.f32 %v7059_v18  ;;  %v7056_v13 = vpop.xlane.xlu0 %7055 }
0x238d   :  { %16800 = vrcp.f32 %v7056_v13 }
0x238f   :  { %v7315_v26 = vpop.permute.xlu1 %7314 }
0x2390   :  { %v7267_v32 = vpop.permute.xlu0 %7266 }
0x2391   :  { %v7272_v41 = vsel %vm476_vm1, %v7267_v32, 0 }
0x2394   :  { %v7265_v38 = vpop.permute.xlu0 %7264 }
0x2399   :  { %v16799_v14 = vpop.eup %16798 }
0x239a   :  { %v16801_v21 = vpop.eup %16800  ;;  %v7067_v50 = vmul.f32 %v16799_v14, %v16791_v48  ;;  %v7417_v48 = vpop.permute.xlu1 %7416 }
0x239b   :  { %v7066_v31 = vmul.f32 %v16801_v21, %v16793_v20  ;;  %v7367_v20 = vpop.permute.xlu0 %7366  ;;  %v7422_v61 = vsel %vm476_vm1, %v7417_v48, 0 }
0x239c   :  { %v7071_v59 = vpack.c.bf16 %v7067_v50, %v7067_v50  ;;  %v7372_v4 = vsel %vm476_vm1, %v7367_v20, 0 }
0x239d   :  { %v7070_v5 = vpack.c.bf16 %v7066_v31, %v7066_v31 }
0x239e   :  { %15518 = vmatmul.mubr.msk.bf16.vlgmr.msra.gmra.mxu1 %vm661_vm3, %v7071_v59  ;;  %v7415_v46 = vpop.permute.xlu1 %7414 }
0x239f   :  { %15512 = vmatmul.mubr.msk.bf16.vlgmr.msra.gmra.mxu0 %vm661_vm3, %v7070_v5  ;;  %15528 = vmatpush3.bf16.xpose.msra.mxu1 %v7322_v34  ;;  %v7365_v55 = vpop.permute.xlu0 %7364 }
0x23a0   :  { %15522 = vmatpush3.bf16.xpose.msra.mxu0 %v7272_v41  ;;  %15523 = vmatprep.mubr.msk.bf16.mxu0 %vm17108_vm0, %v17107_v35 }
0x23a1   :  { %15529 = vmatprep.mubr.msk.bf16.mxu1 %vm17108_vm0, %v17107_v35  ;;  %15533 = vmatprep.subr.bf16.mxu0 %v17107_v35 }
0x23a2   :  { %15539 = vmatprep.subr.bf16.mxu1 %v17107_v35 }
0x23a6   :  { %15530 = vmatmul.mubr.msk.bf16.vlgmr.msra.gmra.mxu1 %vm476_vm1, %v7315_v26 }
0x23a7   :  { %15524 = vmatmul.mubr.msk.bf16.vlgmr.msra.gmra.mxu0 %vm476_vm1, %v7265_v38  ;;  %15540 = vmatpush3.bf16.xpose.msra.mxu1 %v7422_v61 }
0x23a8   :  { %15534 = vmatpush3.bf16.xpose.msra.mxu0 %v7372_v4  ;;  %15535 = vmatprep.mubr.msk.bf16.mxu0 %vm17108_vm0, %v17107_v35 }
0x23a9   :  { %15541 = vmatprep.mubr.msk.bf16.mxu1 %vm17108_vm0, %v17107_v35  ;;  %15551 = vmatprep.subr.bf16.mxu1 %v17107_v35 }
0x23aa   :  { %15545 = vmatprep.subr.bf16.mxu0 %v17107_v35 }
0x23ae   :  { %15542 = vmatmul.mubr.msk.bf16.vlgmr.msra.gmra.mxu1 %vm476_vm1, %v7415_v46 }
0x23af   :  { %15536 = vmatmul.mubr.msk.bf16.vlgmr.msra.gmra.mxu0 %vm476_vm1, %v7365_v55  ;;  %15553 = vmatprep.mubr.msk.bf16.mxu1 %vm17108_vm0, %v17107_v35 }
0x23b0   :  { %15547 = vmatprep.mubr.msk.bf16.mxu0 %vm17108_vm0, %v17107_v35 }
0x2429   :  { %v18580_v6 = vpop.f32.mrf.mxu1 }
0x242a   :  { %v18582_v56 = vpop.f32.mrf.mxu0 }
0x242b   :  { %v15507_v13 = vpop.f32.mrf.mxu1 }
0x242c   :  { %v15501_v32 = vpop.f32.mrf.mxu0 }
0x242d   :  { %v7165_v14 = vpop.f32.mrf.mxu1 }
0x242e   :  { %v7117_v21 = vpop.f32.mrf.mxu0 }
0x242f   :  { %v15508_v50 = vpop.f32.mrf.mxu1 }
0x2430   :  { %v15502_v31 = vpop.f32.mrf.mxu0 }
0x245e   :  { %v18586_v59 = vpop.f32.mrf.mxu1 }
0x245f   :  { %v18588_v5 = vpop.f32.mrf.mxu0 }
0x2460   :  { %v15519_v34 = vpop.f32.mrf.mxu1 }
0x2461   :  { %v15513_v38 = vpop.f32.mrf.mxu0 }
0x2462   :  { %v7261_v41 = vpop.f32.mrf.mxu1 }
0x2463   :  { %v7213_v48 = vpop.f32.mrf.mxu0 }
0x2464   :  { %v15520_v20 = vpop.f32.mrf.mxu1 }
0x2465   :  { %v15514_v61 = vpop.f32.mrf.mxu0 }
0x2466   :  { %v7358_v4 = vpop.f32.mrf.mxu1 }
0x2467   :  { %v7308_v46 = vpop.f32.mrf.mxu0  ;;  %v7467_v55 = vsel %vm661_vm3, %v7358_v4, -inf }
0x2468   :  { %7468 = vmax.xlane.f32.xlu1 %v7467_v55  ;;  %v15531_v13 = vpop.f32.mrf.mxu1  ;;  %v7464_v32 = vsel %vm661_vm3, %v7308_v46, -inf }
0x2469   :  { %7465 = vmax.xlane.f32.xlu0 %v7464_v32  ;;  %v15525_v14 = vpop.f32.mrf.mxu0 }
0x246a   :  { %v7361_v21 = vpop.f32.mrf.mxu1 }
0x246b   :  { %v7311_v50 = vpop.f32.mrf.mxu0 }
0x246c   :  { %v15532_v31 = vpop.f32.mrf.mxu1 }
0x246d   :  { %v15526_v26 = vpop.f32.mrf.mxu0 }
0x246e   :  { %v7458_v34 = vpop.f32.mrf.mxu1 }
0x246f   :  { %v7408_v38 = vpop.f32.mrf.mxu0  ;;  %v7473_v55 = vsel %vm661_vm3, %v7458_v34, -inf }
0x2470   :  { %v15543_v41 = vpop.f32.mrf.mxu1  ;;  %v7470_v48 = vsel %vm661_vm3, %v7408_v38, -inf }
0x2471   :  { %7471 = vmax.xlane.f32.xlu0 %v7470_v48  ;;  %v15537_v20 = vpop.f32.mrf.mxu0 }
0x2472   :  { %v7461_v61 = vpop.f32.mrf.mxu1 }
0x2473   :  { %v7411_v49 = vpop.f32.mrf.mxu0 }
0x2474   :  { %v15544_v25 = vpop.f32.mrf.mxu1 }
0x2475   :  { %7474 = vmax.xlane.f32.xlu0 %v7473_v55  ;;  %v15538_v13 = vpop.f32.mrf.mxu0 }
0x2479   :  { %7560 = vrot.lane.b32.xlu1 %v18149_v44, %s17112_s18 }
0x247d   :  { %7608 = vrot.lane.b32.xlu1 %v18204_v7, %s17112_s18 }
0x2481   :  { %7656 = vrot.lane.b32.xlu1 %v18214_v3, %s17112_s18 }
0x24f1   :  { %v7469_v26 = vpop.xlane.xlu1 %7468 }
0x24f2   :  { %v7477_v32 = vsub.f32 %v7358_v4, %v7469_v26  ;;  %v7466_v14 = vpop.xlane.xlu0 %7465 }
0x24f3   :  { %v7476_v21 = vsub.f32 %v7308_v46, %v7466_v14 }
0x24f4   :  { %v7482_v50 = vmul.f32 1.442695, %v7477_v32 }
0x24f5   :  { %v7480_v49 = vmul.f32 1.442695, %v7476_v21  ;;  %v7561_v25 = vpop.permute.xlu1 %7560 }
0x24f6   :  { %16802 = vpow2.f32 %v7482_v50  ;;  %v7566_v31 = vsel %vm713_vm2, %v7561_v25, 0 }
0x24f7   :  { %16804 = vpow2.f32 %v7480_v49  ;;  %15552 = vmatpush3.bf16.msra.mxu1 %v7566_v31 }
0x24f8   :  { %15563 = vmatprep.subr.bf16.mxu1 %v17107_v35 }
0x24fa   :  { %v7472_v4 = vpop.xlane.xlu0 %7471 }
0x24fb   :  { %v7478_v13 = vsub.f32 %v7408_v38, %v7472_v4 }
0x24fd   :  { %v7484_v32 = vmul.f32 1.442695, %v7478_v13 }
0x24fe   :  { %v7475_v46 = vpop.xlane.xlu0 %7474 }
0x24ff   :  { %v7479_v55 = vsub.f32 %v7458_v34, %v7475_v46  ;;  %v7609_v34 = vpop.permute.xlu1 %7608 }
0x2501   :  { %v7486_v26 = vmul.f32 1.442695, %v7479_v55 }
0x2503   :  { %v16803_v41 = vpop.eup %16802  ;;  %16806 = vpow2.f32 %v7486_v26  ;;  %v7657_v38 = vpop.permute.xlu1 %7656 }
0x2504   :  { %v16805_v48 = vpop.eup %16804  ;;  %v7491_v20 = vsel %vm661_vm3, %v16803_v41, 0.0  ;;  %16808 = vpow2.f32 %v7484_v32 }
0x2505   :  { %7492 = vadd.xlane.f32.xlu1 %v7491_v20  ;;  %v7488_v61 = vsel %vm661_vm3, %v16805_v48, 0.0 }
0x2506   :  { %7489 = vadd.xlane.f32.xlu0 %v7488_v61 }
0x2510   :  { %v16807_v14 = vpop.eup %16806 }
0x2511   :  { %v16809_v21 = vpop.eup %16808  ;;  %v7497_v50 = vsel %vm661_vm3, %v16807_v14, 0.0 }
0x2512   :  { %v7494_v49 = vsel %vm661_vm3, %v16809_v21, 0.0 }
0x2516   :  { %7756 = vrot.lane.b32.xlu1 %v18127_v63, %s17113_s19 }
0x251c   :  { %7512 = vrot.lane.b32.xlu0 %v18160_v40, %s17112_s18 }
0x253a   :  { %7498 = vadd.xlane.f32.xlu1 %v7497_v50  ;;  %v7662_v50 = vsel %vm713_vm2, %v7657_v38, 0 }
0x253b   :  { %7495 = vadd.xlane.f32.xlu0 %v7494_v49  ;;  %v7614_v49 = vsel %vm713_vm2, %v7609_v34, 0 }
0x254b   :  { %7754 = vrot.lane.b32.xlu1 %v18146_v54, %s17113_s19 }
0x254f   :  { %7856 = vrot.lane.b32.xlu1 %v18139_v60, %s17113_s19 }
0x2551   :  { %7706 = vrot.lane.b32.xlu0 %v18119_v36, %s17113_s19 }
0x2553   :  { %7854 = vrot.lane.b32.xlu1 %v18157_v27, %s17113_s19 }
0x2555   :  { %7704 = vrot.lane.b32.xlu0 %v18129_v29, %s17113_s19 }
0x2559   :  { %7806 = vrot.lane.b32.xlu0 %v18142_v15, %s17113_s19 }
0x255d   :  { %7804 = vrot.lane.b32.xlu0 %v18168_v24, %s17113_s19 }
0x258e   :  { %v7493_v25 = vpop.xlane.xlu1 %7492 }
0x258f   :  { %16810 = vrcp.f32 %v7493_v25  ;;  %v7490_v31 = vpop.xlane.xlu0 %7489 }
0x2590   :  { %16812 = vrcp.f32 %v7490_v31 }
0x2593   :  { %v7513_v20 = vpop.permute.xlu0 %7512 }
0x2594   :  { %v7518_v61 = vsel %vm713_vm2, %v7513_v20, 0 }
0x2595   :  { %15546 = vmatpush3.bf16.msra.mxu0 %v7518_v61 }
0x2596   :  { %15557 = vmatprep.subr.bf16.mxu0 %v17107_v35 }
0x259c   :  { %v16811_v4 = vpop.eup %16810 }
0x259d   :  { %v16813_v46 = vpop.eup %16812  ;;  %v7505_v55 = vmul.f32 %v16811_v4, %v16803_v41  ;;  %v7757_v41 = vpop.permute.xlu1 %7756 }
0x259e   :  { %v7504_v13 = vmul.f32 %v16813_v46, %v16805_v48 }
0x259f   :  { %v7509_v26 = vpack.c.bf16 %v7505_v55, %v7505_v55 }
0x25a0   :  { %v7508_v32 = vpack.c.bf16 %v7504_v13, %v7504_v13  ;;  %v7762_v13 = vsel %vm476_vm1, %v7757_v41, 0 }
0x25a1   :  { %15554 = vmatmul.mubr.msk.bf16.vlgmr.msra.gmra.mxu1 %vm661_vm3, %v7509_v26 }
0x25a2   :  { %15548 = vmatmul.mubr.msk.bf16.vlgmr.msra.gmra.mxu0 %vm661_vm3, %v7508_v32  ;;  %15564 = vmatpush3.bf16.msra.mxu1 %v7662_v50 }
0x25a3   :  { %15558 = vmatpush3.bf16.msra.mxu0 %v7614_v49  ;;  %15559 = vmatprep.mubr.msk.bf16.mxu0 %vm17108_vm0, %v17107_v35 }
0x25a4   :  { %15565 = vmatprep.mubr.msk.bf16.mxu1 %vm17108_vm0, %v17107_v35  ;;  %15569 = vmatprep.subr.bf16.mxu0 %v17107_v35 }
0x25a5   :  { %15575 = vmatprep.subr.bf16.mxu1 %v17107_v35 }
0x25c3   :  { %v7499_v48 = vpop.xlane.xlu1 %7498 }
0x25c4   :  { %16814 = vrcp.f32 %v7499_v48  ;;  %v7496_v38 = vpop.xlane.xlu0 %7495 }
0x25c5   :  { %16816 = vrcp.f32 %v7496_v38 }
0x25c7   :  { %v7755_v55 = vpop.permute.xlu1 %7754 }
0x25c8   :  { %v7707_v34 = vpop.permute.xlu0 %7706 }
0x25c9   :  { %v7712_v32 = vsel %vm476_vm1, %v7707_v34, 0 }
0x25cc   :  { %v7705_v26 = vpop.permute.xlu0 %7704 }
0x25d1   :  { %v16815_v25 = vpop.eup %16814 }
0x25d2   :  { %v16817_v31 = vpop.eup %16816  ;;  %v7507_v20 = vmul.f32 %v16815_v25, %v16807_v14  ;;  %v7857_v14 = vpop.permute.xlu1 %7856 }
0x25d3   :  { %v7506_v61 = vmul.f32 %v16817_v31, %v16809_v21  ;;  %v7807_v21 = vpop.permute.xlu0 %7806  ;;  %v7862_v50 = vsel %vm476_vm1, %v7857_v14, 0 }
0x25d4   :  { %v7511_v4 = vpack.c.bf16 %v7507_v20, %v7507_v20  ;;  %v7812_v49 = vsel %vm476_vm1, %v7807_v21, 0 }
0x25d5   :  { %v7510_v46 = vpack.c.bf16 %v7506_v61, %v7506_v61 }
0x25d6   :  { %15566 = vmatmul.mubr.msk.bf16.vlgmr.msra.gmra.mxu1 %vm661_vm3, %v7511_v4  ;;  %v7855_v41 = vpop.permute.xlu1 %7854 }
0x25d7   :  { %15560 = vmatmul.mubr.msk.bf16.vlgmr.msra.gmra.mxu0 %vm661_vm3, %v7510_v46  ;;  %15576 = vmatpush3.bf16.xpose.msra.mxu1 %v7762_v13  ;;  %v7805_v48 = vpop.permute.xlu0 %7804 }
0x25d8   :  { %15570 = vmatpush3.bf16.xpose.msra.mxu0 %v7712_v32  ;;  %15571 = vmatprep.mubr.msk.bf16.mxu0 %vm17108_vm0, %v17107_v35 }
0x25d9   :  { %15577 = vmatprep.mubr.msk.bf16.mxu1 %vm17108_vm0, %v17107_v35  ;;  %15581 = vmatprep.subr.bf16.mxu0 %v17107_v35 }
0x25da   :  { %15587 = vmatprep.subr.bf16.mxu1 %v17107_v35 }
0x25de   :  { %15578 = vmatmul.mubr.msk.bf16.vlgmr.msra.gmra.mxu1 %vm476_vm1, %v7755_v55 }
0x25df   :  { %15572 = vmatmul.mubr.msk.bf16.vlgmr.msra.gmra.mxu0 %vm476_vm1, %v7705_v26  ;;  %15588 = vmatpush3.bf16.xpose.msra.mxu1 %v7862_v50 }
0x25e0   :  { %15582 = vmatpush3.bf16.xpose.msra.mxu0 %v7812_v49  ;;  %15583 = vmatprep.mubr.msk.bf16.mxu0 %vm17108_vm0, %v17107_v35 }
0x25e1   :  { %15589 = vmatprep.mubr.msk.bf16.mxu1 %vm17108_vm0, %v17107_v35  ;;  %15599 = vmatprep.subr.bf16.mxu1 %v17107_v35 }
0x25e2   :  { %15593 = vmatprep.subr.bf16.mxu0 %v17107_v35 }
0x25e6   :  { %15590 = vmatmul.mubr.msk.bf16.vlgmr.msra.gmra.mxu1 %vm476_vm1, %v7855_v41 }
0x25e7   :  { %15584 = vmatmul.mubr.msk.bf16.vlgmr.msra.gmra.mxu0 %vm476_vm1, %v7805_v48  ;;  %15601 = vmatprep.mubr.msk.bf16.mxu1 %vm17108_vm0, %v17107_v35 }
0x25e8   :  { %15595 = vmatprep.mubr.msk.bf16.mxu0 %vm17108_vm0, %v17107_v35 }
0x2661   :  { %v18664_v38 = vpop.f32.mrf.mxu1 }
0x2662   :  { %v18666_v34 = vpop.f32.mrf.mxu0 }
0x2663   :  { %v15555_v31 = vpop.f32.mrf.mxu1 }
0x2664   :  { %v15549_v20 = vpop.f32.mrf.mxu0 }
0x2665   :  { %v7605_v61 = vpop.f32.mrf.mxu1 }
0x2666   :  { %v7557_v4 = vpop.f32.mrf.mxu0 }
0x2667   :  { %v15556_v46 = vpop.f32.mrf.mxu1 }
0x2668   :  { %v15550_v55 = vpop.f32.mrf.mxu0 }
0x2696   :  { %v18670_v13 = vpop.f32.mrf.mxu1 }
0x2697   :  { %v18672_v26 = vpop.f32.mrf.mxu0 }
0x2698   :  { %v15567_v14 = vpop.f32.mrf.mxu1 }
0x2699   :  { %v15561_v21 = vpop.f32.mrf.mxu0 }
0x269a   :  { %v7701_v50 = vpop.f32.mrf.mxu1 }
0x269b   :  { %v7653_v49 = vpop.f32.mrf.mxu0 }
0x269c   :  { %v15568_v41 = vpop.f32.mrf.mxu1 }
0x269d   :  { %v15562_v48 = vpop.f32.mrf.mxu0 }
0x269e   :  { %v7798_v23 = vpop.f32.mrf.mxu1 }
0x269f   :  { %v7748_v31 = vpop.f32.mrf.mxu0  ;;  %v7907_v20 = vsel %vm661_vm3, %v7798_v23, -inf }
0x26a0   :  { %7908 = vmax.xlane.f32.xlu1 %v7907_v20  ;;  %v15579_v61 = vpop.f32.mrf.mxu1  ;;  %v7904_v4 = vsel %vm661_vm3, %v7748_v31, -inf }
0x26a1   :  { %7905 = vmax.xlane.f32.xlu0 %v7904_v4  ;;  %v15573_v46 = vpop.f32.mrf.mxu0 }
0x26a2   :  { %v7801_v55 = vpop.f32.mrf.mxu1 }
0x26a3   :  { %v7751_v25 = vpop.f32.mrf.mxu0 }
0x26a4   :  { %v15580_v18 = vpop.f32.mrf.mxu1 }
0x26a5   :  { %v15574_v32 = vpop.f32.mrf.mxu0 }
0x26a6   :  { %v7898_v14 = vpop.f32.mrf.mxu1 }
0x26a7   :  { %v7848_v21 = vpop.f32.mrf.mxu0  ;;  %v7913_v20 = vsel %vm661_vm3, %v7898_v14, -inf }
0x26a8   :  { %v15591_v50 = vpop.f32.mrf.mxu1  ;;  %v7910_v49 = vsel %vm661_vm3, %v7848_v21, -inf }
0x26a9   :  { %7911 = vmax.xlane.f32.xlu0 %v7910_v49  ;;  %v15585_v41 = vpop.f32.mrf.mxu0 }
0x26aa   :  { %v7901_v48 = vpop.f32.mrf.mxu1 }
0x26ab   :  { %v7851_v2 = vpop.f32.mrf.mxu0 }
0x26ac   :  { %v15592_v0 = vpop.f32.mrf.mxu1 }
0x26ad   :  { %7914 = vmax.xlane.f32.xlu0 %v7913_v20  ;;  %v15586_v61 = vpop.f32.mrf.mxu0 }
0x26b1   :  { %8000 = vrot.lane.b32.xlu1 %v18149_v44, %s17113_s19 }
0x26b5   :  { %8048 = vrot.lane.b32.xlu1 %v18204_v7, %s17113_s19 }
0x26b9   :  { %8096 = vrot.lane.b32.xlu1 %v18214_v3, %s17113_s19 }
0x2729   :  { %v7909_v18 = vpop.xlane.xlu1 %7908 }
0x272a   :  { %v7917_v25 = vsub.f32 %v7798_v23, %v7909_v18  ;;  %v7906_v32 = vpop.xlane.xlu0 %7905 }
0x272b   :  { %v7916_v4 = vsub.f32 %v7748_v31, %v7906_v32 }
0x272c   :  { %v7922_v46 = vmul.f32 1.442695, %v7917_v25 }
0x272d   :  { %v7920_v2 = vmul.f32 1.442695, %v7916_v4  ;;  %v8001_v0 = vpop.permute.xlu1 %8000 }
0x272e   :  { %16818 = vpow2.f32 %v7922_v46  ;;  %v8006_v55 = vsel %vm713_vm2, %v8001_v0, 0 }
0x272f   :  { %16820 = vpow2.f32 %v7920_v2  ;;  %15600 = vmatpush3.bf16.msra.mxu1 %v8006_v55 }
0x2730   :  { %15611 = vmatprep.subr.bf16.mxu1 %v17107_v35 }
0x2732   :  { %v7912_v23 = vpop.xlane.xlu0 %7911 }
0x2733   :  { %v7918_v61 = vsub.f32 %v7848_v21, %v7912_v23 }
0x2735   :  { %v7924_v25 = vmul.f32 1.442695, %v7918_v61 }
0x2736   :  { %v7915_v31 = vpop.xlane.xlu0 %7914 }
0x2737   :  { %v7919_v20 = vsub.f32 %v7898_v14, %v7915_v31 }
0x2739   :  { %v7926_v18 = vmul.f32 1.442695, %v7919_v20 }
0x273b   :  { %v16819_v50 = vpop.eup %16818  ;;  %16822 = vpow2.f32 %v7926_v18 }
0x273c   :  { %v16821_v49 = vpop.eup %16820  ;;  %v7931_v41 = vsel %vm661_vm3, %v16819_v50, 0.0  ;;  %16824 = vpow2.f32 %v7924_v25 }
0x273d   :  { %7932 = vadd.xlane.f32.xlu1 %v7931_v41  ;;  %v7928_v48 = vsel %vm661_vm3, %v16821_v49, 0.0 }
0x273e   :  { %7929 = vadd.xlane.f32.xlu0 %v7928_v48 }
0x2748   :  { %v16823_v32 = vpop.eup %16822 }
0x2749   :  { %v16825_v4 = vpop.eup %16824  ;;  %v7937_v46 = vsel %vm661_vm3, %v16823_v32, 0.0 }
0x274a   :  { %v7934_v2 = vsel %vm661_vm3, %v16825_v4, 0.0 }
0x274e   :  { %8196 = vrot.lane.b32.xlu1 %v18127_v63, %s17114_s20  ;;  %v8049_v63 = vpop.permute.xlu1 %8048 }
0x274f   :  { %v8054_v48 = vsel %vm713_vm2, %v8049_v63, 0 }
0x2754   :  { %7952 = vrot.lane.b32.xlu0 %v18160_v40, %s17113_s19 }
0x2772   :  { %7938 = vadd.xlane.f32.xlu1 %v7937_v46 }
0x2773   :  { %7935 = vadd.xlane.f32.xlu0 %v7934_v2 }
0x2783   :  { %8194 = vrot.lane.b32.xlu1 %v18146_v54, %s17114_s20  ;;  %v8097_v54 = vpop.permute.xlu1 %8096 }
0x2787   :  { %8296 = vrot.lane.b32.xlu1 %v18139_v60, %s17114_s20 }
0x2789   :  { %8146 = vrot.lane.b32.xlu0 %v18119_v36, %s17114_s20 }
0x278b   :  { %8294 = vrot.lane.b32.xlu1 %v18157_v27, %s17114_s20 }
0x278d   :  { %8144 = vrot.lane.b32.xlu0 %v18129_v29, %s17114_s20 }
0x2791   :  { %8246 = vrot.lane.b32.xlu0 %v18142_v15, %s17114_s20 }
0x2795   :  { %8244 = vrot.lane.b32.xlu0 %v18168_v24, %s17114_s20  ;;  %v8102_v24 = vsel %vm713_vm2, %v8097_v54, 0 }
0x27c6   :  { %v7933_v14 = vpop.xlane.xlu1 %7932 }
0x27c7   :  { %16826 = vrcp.f32 %v7933_v14  ;;  %v7930_v60 = vpop.xlane.xlu0 %7929 }
0x27c8   :  { %16828 = vrcp.f32 %v7930_v60 }
0x27cb   :  { %v7953_v21 = vpop.permute.xlu0 %7952 }
0x27cc   :  { %v7958_v36 = vsel %vm713_vm2, %v7953_v21, 0 }
0x27cd   :  { %15594 = vmatpush3.bf16.msra.mxu0 %v7958_v36 }
0x27ce   :  { %15605 = vmatprep.subr.bf16.mxu0 %v17107_v35 }
0x27d4   :  { %v16827_v27 = vpop.eup %16826 }
0x27d5   :  { %v16829_v29 = vpop.eup %16828  ;;  %v7945_v0 = vmul.f32 %v16827_v27, %v16819_v50  ;;  %v8197_v50 = vpop.permute.xlu1 %8196 }
0x27d6   :  { %v7944_v55 = vmul.f32 %v16829_v29, %v16821_v49  ;;  %v8202_v54 = vsel %vm476_vm1, %v8197_v50, 0 }
0x27d7   :  { %v7949_v15 = vpack.c.bf16 %v7945_v0, %v7945_v0 }
0x27d8   :  { %v7948_v41 = vpack.c.bf16 %v7944_v55, %v7944_v55 }
0x27d9   :  { %15602 = vmatmul.mubr.msk.bf16.vlgmr.msra.gmra.mxu1 %vm661_vm3, %v7949_v15 }
0x27da   :  { %15596 = vmatmul.mubr.msk.bf16.vlgmr.msra.gmra.mxu0 %vm661_vm3, %v7948_v41  ;;  %15612 = vmatpush3.bf16.msra.mxu1 %v8102_v24 }
0x27db   :  { %15606 = vmatpush3.bf16.msra.mxu0 %v8054_v48  ;;  %15607 = vmatprep.mubr.msk.bf16.mxu0 %vm17108_vm0, %v17107_v35 }
0x27dc   :  { %15613 = vmatprep.mubr.msk.bf16.mxu1 %vm17108_vm0, %v17107_v35  ;;  %15617 = vmatprep.subr.bf16.mxu0 %v17107_v35 }
0x27dd   :  { %15623 = vmatprep.subr.bf16.mxu1 %v17107_v35 }
0x27fb   :  { %v7939_v49 = vpop.xlane.xlu1 %7938 }
0x27fc   :  { %16830 = vrcp.f32 %v7939_v49  ;;  %v7936_v23 = vpop.xlane.xlu0 %7935 }
0x27fd   :  { %16832 = vrcp.f32 %v7936_v23 }
0x27ff   :  { %v8195_v63 = vpop.permute.xlu1 %8194 }
0x2800   :  { %v8147_v31 = vpop.permute.xlu0 %8146 }
0x2801   :  { %v8152_v60 = vsel %vm476_vm1, %v8147_v31, 0 }
0x2804   :  { %v8145_v14 = vpop.permute.xlu0 %8144 }
0x2809   :  { %v16831_v20 = vpop.eup %16830 }
0x280a   :  { %v16833_v61 = vpop.eup %16832  ;;  %v7947_v18 = vmul.f32 %v16831_v20, %v16823_v32  ;;  %v8297_v32 = vpop.permute.xlu1 %8296 }
0x280b   :  { %v7946_v25 = vmul.f32 %v16833_v61, %v16825_v4  ;;  %v8247_v4 = vpop.permute.xlu0 %8246  ;;  %v8302_v21 = vsel %vm476_vm1, %v8297_v32, 0 }
0x280c   :  { %v7951_v46 = vpack.c.bf16 %v7947_v18, %v7947_v18  ;;  %v8252_v36 = vsel %vm476_vm1, %v8247_v4, 0 }
0x280d   :  { %v7950_v2 = vpack.c.bf16 %v7946_v25, %v7946_v25 }
0x280e   :  { %15614 = vmatmul.mubr.msk.bf16.vlgmr.msra.gmra.mxu1 %vm661_vm3, %v7951_v46  ;;  %v8295_v27 = vpop.permute.xlu1 %8294 }
0x280f   :  { %15608 = vmatmul.mubr.msk.bf16.vlgmr.msra.gmra.mxu0 %vm661_vm3, %v7950_v2  ;;  %15624 = vmatpush3.bf16.xpose.msra.mxu1 %v8202_v54  ;;  %v8245_v29 = vpop.permute.xlu0 %8244 }
0x2810   :  { %15618 = vmatpush3.bf16.xpose.msra.mxu0 %v8152_v60  ;;  %15619 = vmatprep.mubr.msk.bf16.mxu0 %vm17108_vm0, %v17107_v35 }
0x2811   :  { %15625 = vmatprep.mubr.msk.bf16.mxu1 %vm17108_vm0, %v17107_v35  ;;  %15629 = vmatprep.subr.bf16.mxu0 %v17107_v35 }
0x2812   :  { %15635 = vmatprep.subr.bf16.mxu1 %v17107_v35 }
0x2816   :  { %15626 = vmatmul.mubr.msk.bf16.vlgmr.msra.gmra.mxu1 %vm476_vm1, %v8195_v63 }
0x2817   :  { %15620 = vmatmul.mubr.msk.bf16.vlgmr.msra.gmra.mxu0 %vm476_vm1, %v8145_v14  ;;  %15636 = vmatpush3.bf16.xpose.msra.mxu1 %v8302_v21 }
0x2818   :  { %15630 = vmatpush3.bf16.xpose.msra.mxu0 %v8252_v36  ;;  %15631 = vmatprep.mubr.msk.bf16.mxu0 %vm17108_vm0, %v17107_v35 }
0x2819   :  { %15637 = vmatprep.mubr.msk.bf16.mxu1 %vm17108_vm0, %v17107_v35  ;;  %15647 = vmatprep.subr.bf16.mxu1 %v17107_v35 }
0x281a   :  { %15641 = vmatprep.subr.bf16.mxu0 %v17107_v35 }
0x281e   :  { %15638 = vmatmul.mubr.msk.bf16.vlgmr.msra.gmra.mxu1 %vm476_vm1, %v8295_v27 }
0x281f   :  { %15632 = vmatmul.mubr.msk.bf16.vlgmr.msra.gmra.mxu0 %vm476_vm1, %v8245_v29  ;;  %15649 = vmatprep.mubr.msk.bf16.mxu1 %vm17108_vm0, %v17107_v35 }
0x2820   :  { %15643 = vmatprep.mubr.msk.bf16.mxu0 %vm17108_vm0, %v17107_v35 }
0x2899   :  { %v18748_v0 = vpop.f32.mrf.mxu1 }
0x289a   :  { %v18750_v55 = vpop.f32.mrf.mxu0 }
0x289b   :  { %v16248_v15 = vpack.i.bf16 %v18748_v0, %v18750_v55  ;;  %v15603_v41 = vpop.f32.mrf.mxu1 }
0x289c   :  { %v15597_v24 = vpop.f32.mrf.mxu0 }
0x289d   :  { %v8045_v48 = vpop.f32.mrf.mxu1 }
0x289e   :  { %v7997_v50 = vpop.f32.mrf.mxu0 }
0x289f   :  { %v15604_v49 = vpop.f32.mrf.mxu1 }
0x28a0   :  { %v15598_v23 = vpop.f32.mrf.mxu0 }
0x28ce   :  { %v18754_v31 = vpop.f32.mrf.mxu1 }
0x28cf   :  { %v18756_v20 = vpop.f32.mrf.mxu0 }
0x28d0   :  { %v16253_v61 = vpack.i.bf16 %v18754_v31, %v18756_v20  ;;  %v15615_v18 = vpop.f32.mrf.mxu1 }
0x28d1   :  { %v15609_v25 = vpop.f32.mrf.mxu0 }
0x28d2   :  { %v8141_v46 = vpop.f32.mrf.mxu1 }
0x28d3   :  { %v8093_v2 = vpop.f32.mrf.mxu0 }
0x28d4   :  { %v15616_v63 = vpop.f32.mrf.mxu1 }
0x28d5   :  { %v15610_v54 = vpop.f32.mrf.mxu0 }
0x28d6   :  { %v8238_v14 = vpop.f32.mrf.mxu1 }
0x28d7   :  { %v8188_v60 = vpop.f32.mrf.mxu0  ;;  %v8347_v32 = vsel %vm661_vm3, %v8238_v14, -inf }
0x28d8   :  { %8348 = vmax.xlane.f32.xlu1 %v8347_v32  ;;  %v15627_v4 = vpop.f32.mrf.mxu1  ;;  %v8344_v21 = vsel %vm661_vm3, %v8188_v60, -inf }
0x28d9   :  { %8345 = vmax.xlane.f32.xlu0 %v8344_v21  ;;  %v15621_v36 = vpop.f32.mrf.mxu0 }
0x28da   :  { %v8241_v27 = vpop.f32.mrf.mxu1 }
0x28db   :  { %v8191_v29 = vpop.f32.mrf.mxu0 }
0x28dc   :  { %v15628_v41 = vpop.f32.mrf.mxu1 }
0x28dd   :  { %v15622_v24 = vpop.f32.mrf.mxu0 }
0x28de   :  { %v8338_v48 = vpop.f32.mrf.mxu1 }
0x28df   :  { %v8288_v50 = vpop.f32.mrf.mxu0  ;;  %v8353_v63 = vsel %vm661_vm3, %v8338_v48, -inf }
0x28e0   :  { %v15639_v49 = vpop.f32.mrf.mxu1  ;;  %v8350_v23 = vsel %vm661_vm3, %v8288_v50, -inf }
0x28e1   :  { %8351 = vmax.xlane.f32.xlu0 %v8350_v23  ;;  %v15633_v18 = vpop.f32.mrf.mxu0 }
0x28e2   :  { %v8341_v25 = vpop.f32.mrf.mxu1 }
0x28e3   :  { %v8291_v46 = vpop.f32.mrf.mxu0 }
0x28e4   :  { %v15640_v2 = vpop.f32.mrf.mxu1 }
0x28e5   :  { %8354 = vmax.xlane.f32.xlu0 %v8353_v63  ;;  %v15634_v54 = vpop.f32.mrf.mxu0 }
0x28e6   :  { %v19848_v54 = vpack.i.bf16 %v18412_v8, %v18414_v30  ;;  %v19853_v8 = vpack.i.bf16 %v18418_v62, %v18420_v12  ;;  %v19854_v30 = vpack.i.bf16 %v18502_v28, %v18504_v57 }
0x2961   :  { %v8349_v32 = vpop.xlane.xlu1 %8348 }
0x2962   :  { %v8357_v4 = vsub.f32 %v8238_v14, %v8349_v32  ;;  %v8346_v21 = vpop.xlane.xlu0 %8345 }
0x2963   :  { %v8356_v36 = vsub.f32 %v8188_v60, %v8346_v21  ;;  %v16450_v21 = vld [vmem:[#allocation4 + $0x78] sm:$0xff]  }
0x2964   :  { %v8362_v27 = vmul.f32 1.442695, %v8357_v4 }
0x2965   :  { %v8360_v29 = vmul.f32 1.442695, %v8356_v36  ;;  %v16451_v36 = vld [vmem:[#allocation4 + $0x70] sm:$0xff]  }
0x2966   :  { %16834 = vpow2.f32 %v8362_v27 }
0x2967   :  { %16836 = vpow2.f32 %v8360_v29  ;;  %v16452_v29 = vld [vmem:[#allocation4 + $0x68] sm:$0xff]  }
0x296a   :  { %v8352_v41 = vpop.xlane.xlu0 %8351 }
0x296b   :  { %v8358_v24 = vsub.f32 %v8288_v50, %v8352_v41 }
0x296d   :  { %v8364_v49 = vmul.f32 1.442695, %v8358_v24 }
0x296e   :  { %v8355_v60 = vpop.xlane.xlu0 %8354 }
0x296f   :  { %16838 = vpow2.f32 %v8364_v49  ;;  %v8359_v50 = vsub.f32 %v8338_v48, %v8355_v60  ;;  %v16454_v60 = vld [vmem:[#allocation4 + $0x58] sm:$0xff]  }
0x2971   :  { %v8366_v63 = vmul.f32 1.442695, %v8359_v50 }
0x2973   :  { %v16835_v23 = vpop.eup %16834  ;;  %16840 = vpow2.f32 %v8366_v63 }
0x2974   :  { %v16837_v18 = vpop.eup %16836  ;;  %v8371_v25 = vsel %vm661_vm3, %v16835_v23, 0.0 }
0x2975   :  { %8372 = vadd.xlane.f32.xlu1 %v8371_v25  ;;  %v8368_v46 = vsel %vm661_vm3, %v16837_v18, 0.0  ;;  %v16453_v25 = vld [vmem:[#allocation4 + $0x60] sm:$0xff]  }
0x2976   :  { %8369 = vadd.xlane.f32.xlu0 %v8368_v46 }
0x297c   :  { %v16839_v2 = vpop.eup %16838 }
0x297d   :  { %v8374_v14 = vsel %vm661_vm3, %v16839_v2, 0.0 }
0x297e   :  { %8375 = vadd.xlane.f32.xlu0 %v8374_v14 }
0x2980   :  { %v16841_v52 = vpop.eup %16840 }
0x2981   :  { %v8377_v1 = vsel %vm661_vm3, %v16841_v52, 0.0 }
0x2986   :  { %8440 = vrot.lane.b32.xlu1 %v18149_v44, %s17114_s20  ;;  %v19849_v44 = vpack.i.bf16 %v18496_v11, %v18498_v33  ;;  %v19855_v11 = vpack.i.bf16 %v18586_v59, %v18588_v5 }
0x298a   :  { %8488 = vrot.lane.b32.xlu1 %v18204_v7, %s17114_s20  ;;  %v19851_v7 = vpack.i.bf16 %v18664_v38, %v18666_v34 }
0x2994   :  { %8392 = vrot.lane.b32.xlu0 %v18160_v40, %s17114_s20  ;;  %v19850_v40 = vpack.i.bf16 %v18580_v6, %v18582_v56 }
0x2998   :  { %16199 = vrot.lane.b32.xlu0 %v16198_v10, %s17114_s20  ;;  %v19852_v10 = vpack.i.bf16 %v18334_v45, %v18336_v47 }
0x299c   :  { %16209 = vrot.lane.b32.xlu0 %v19848_v54, %s17113_s19  ;;  %v16455_v54 = vld [vmem:[#allocation4 + $0x50] sm:$0xff]  }
0x29a0   :  { %16219 = vrot.lane.b32.xlu0 %v19849_v44, %s17112_s18 }
0x29a4   :  { %16229 = vrot.lane.b32.xlu0 %v19850_v40, %s17097_s16 }
0x29a8   :  { %16239 = vrot.lane.b32.xlu0 %v19851_v7, %s17111_s15  ;;  %v16456_v7 = vld [vmem:[#allocation4 + $0x48] sm:$0xff]  }
0x29ac   :  { %16249 = vrot.lane.b32.xlu0 %v16248_v15, %s17110_s30 }
0x29ae   :  { %8378 = vadd.xlane.f32.xlu1 %v8377_v1 }
0x29bf   :  { %8536 = vrot.lane.b32.xlu1 %v18214_v3, %s17114_s20  ;;  %v19856_v3 = vpack.i.bf16 %v18670_v13, %v18672_v26 }
0x29c3   :  { %16204 = vrot.lane.b32.xlu1 %v19852_v10, %s17114_s20 }
0x29c7   :  { %16214 = vrot.lane.b32.xlu1 %v19853_v8, %s17113_s19 }
0x29cb   :  { %16224 = vrot.lane.b32.xlu1 %v19854_v30, %s17112_s18 }
0x29cf   :  { %16234 = vrot.lane.b32.xlu1 %v19855_v11, %s17097_s16 }
0x29d3   :  { %16244 = vrot.lane.b32.xlu1 %v19856_v3, %s17111_s15 }
0x29d7   :  { %16254 = vrot.lane.b32.xlu1 %v16253_v61, %s17110_s30 }
0x29fe   :  { %v8373_v45 = vpop.xlane.xlu1 %8372 }
0x29ff   :  { %16842 = vrcp.f32 %v8373_v45  ;;  %v8370_v47 = vpop.xlane.xlu0 %8369 }
0x2a00   :  { %16844 = vrcp.f32 %v8370_v47 }
0x2a02   :  { %v8441_v62 = vpop.permute.xlu1 %8440 }
0x2a03   :  { %v8446_v12 = vsel %vm713_vm2, %v8441_v62, 0 }
0x2a04   :  { %15648 = vmatpush3.bf16.msra.mxu1 %v8446_v12 }
0x2a05   :  { %15659 = vmatprep.subr.bf16.mxu1 %v17107_v35 }
0x2a06   :  { %v8489_v34 = vpop.permute.xlu1 %8488 }
0x2a07   :  { %v8376_v33 = vpop.xlane.xlu0 %8375  ;;  %v8494_v26 = vsel %vm713_vm2, %v8489_v34, 0 }
0x2a08   :  { %16846 = vrcp.f32 %v8376_v33 }
0x2a0b   :  { %v8393_v28 = vpop.permute.xlu0 %8392 }
0x2a0c   :  { %v16843_v57 = vpop.eup %16842  ;;  %v8398_v6 = vsel %vm713_vm2, %v8393_v28, 0 }
0x2a0d   :  { %v16845_v56 = vpop.eup %16844  ;;  %v8385_v59 = vmul.f32 %v16843_v57, %v16835_v23  ;;  %15642 = vmatpush3.bf16.msra.mxu0 %v8398_v6 }
0x2a0e   :  { %v8384_v5 = vmul.f32 %v16845_v56, %v16837_v18  ;;  %15653 = vmatprep.subr.bf16.mxu0 %v17107_v35 }
0x2a0f   :  { %v8389_v38 = vpack.c.bf16 %v8385_v59, %v8385_v59  ;;  %v16200_v3 = vpop.permute.xlu0 %16199 }
0x2a10   :  { %v8388_v13 = vpack.c.bf16 %v8384_v5, %v8384_v5  ;;  %v16202_v33 = vunpack.i.h.bf16 %v16200_v3  ;;  %v16201_v28 = vunpack.i.l.bf16 %v16200_v3 }
0x2a11   :  { %15650 = vmatmul.mubr.msk.bf16.vlgmr.msra.gmra.mxu1 %vm661_vm3, %v8389_v38 }
0x2a12   :  { %15644 = vmatmul.mubr.msk.bf16.vlgmr.msra.gmra.mxu0 %vm661_vm3, %v8388_v13  ;;  %15661 = vmatprep.mubr.msk.bf16.mxu1 %vm17108_vm0, %v17107_v35  ;;  %v8697_v13 = vsel %vm476_vm1, %v18250_v53, %v16202_v33 }
0x2a13   :  { %15654 = vmatpush3.bf16.msra.mxu0 %v8494_v26  ;;  %15655 = vmatprep.mubr.msk.bf16.mxu0 %vm17108_vm0, %v17107_v35  ;;  %v16210_v45 = vpop.permute.xlu0 %16209  ;;  %v8696_v26 = vsel %vm476_vm1, %v18248_v51, %v16201_v28 }
0x2a14   :  { %15665 = vmatprep.subr.bf16.mxu0 %v16450_v21  ;;  %v16212_v57 = vunpack.i.h.bf16 %v16210_v45  ;;  %v16211_v6 = vunpack.i.l.bf16 %v16210_v45 }
0x2a15   :  { %v16847_v0 = vpop.eup %16846 }
0x2a16   :  { %v8386_v55 = vmul.f32 %v16847_v0, %v16839_v2 }
0x2a17   :  { %v16220_v47 = vpop.permute.xlu0 %16219 }
0x2a18   :  { %v8390_v15 = vpack.c.bf16 %v8386_v55, %v8386_v55  ;;  %v16222_v56 = vunpack.i.h.bf16 %v16220_v47  ;;  %v16221_v59 = vunpack.i.l.bf16 %v16220_v47 }
0x2a1a   :  { %15656 = vmatmul.mubr.msk.bf16.vlgmr.msra.gmra.mxu0 %vm661_vm3, %v8390_v15  ;;  %v8700_v15 = vsel %vm4103_vm4, %v8696_v26, %v16211_v6 }
0x2a1b   :  { %15666 = vmatpush3.bf16.msra.mxu0 %v16450_v21  ;;  %v16230_v62 = vpop.permute.xlu0 %16229 }
0x2a1c   :  { %15667 = vmatprep.subr.bf16.mxu0 %v16451_v36  ;;  %v16232_v38 = vunpack.i.h.bf16 %v16230_v62  ;;  %v16231_v34 = vunpack.i.l.bf16 %v16230_v62 }
0x2a1f   :  { %15668 = vmatpush3.bf16.msra.mxu0 %v16451_v36  ;;  %v16240_v12 = vpop.permute.xlu0 %16239 }
0x2a20   :  { %15669 = vmatprep.subr.bf16.mxu0 %v16452_v29  ;;  %v16242_v0 = vunpack.i.h.bf16 %v16240_v12  ;;  %v16241_v55 = vunpack.i.l.bf16 %v16240_v12 }
0x2a23   :  { %15670 = vmatpush3.bf16.msra.mxu0 %v16452_v29  ;;  %v16250_v5 = vpop.permute.xlu0 %16249 }
0x2a24   :  { %15671 = vmatprep.subr.bf16.mxu0 %v16453_v25 }
0x2a27   :  { %15672 = vmatpush3.bf16.msra.mxu0 %v16453_v25 }
0x2a28   :  { %15673 = vmatprep.subr.bf16.mxu0 %v16454_v60 }
0x2a2b   :  { %15674 = vmatpush3.bf16.msra.mxu0 %v16454_v60 }
0x2a2c   :  { %15675 = vmatprep.subr.bf16.mxu0 %v16455_v54 }
0x2a2f   :  { %15676 = vmatpush3.bf16.msra.mxu0 %v16455_v54 }
0x2a30   :  { %15677 = vmatprep.subr.bf16.mxu0 %v16456_v7 }
0x2a33   :  { %15678 = vmatpush3.bf16.msra.mxu0 %v16456_v7 }
0x2a37   :  { %v8379_v31 = vpop.xlane.xlu1 %8378 }
0x2a38   :  { %16848 = vrcp.f32 %v8379_v31  ;;  %v8701_v31 = vsel %vm4103_vm4, %v8697_v13, %v16212_v57 }
0x2a3b   :  { %v8537_v20 = vpop.permute.xlu1 %8536 }
0x2a3c   :  { %v8542_v61 = vsel %vm713_vm2, %v8537_v20, 0  ;;  %v16252_v20 = vunpack.i.h.bf16 %v16250_v5 }
0x2a3d   :  { %15660 = vmatpush3.bf16.msra.mxu1 %v8542_v61  ;;  %v16251_v61 = vunpack.i.l.bf16 %v16250_v5 }
0x2a3f   :  { %v16205_v25 = vpop.permute.xlu1 %16204 }
0x2a45   :  { %v16849_v48 = vpop.eup %16848 }
0x2a46   :  { %v8387_v32 = vmul.f32 %v16849_v48, %v16841_v52  ;;  %v16457_v52 = vld [vmem:[#allocation4 + $0x40] sm:$0xff]   ;;  %v8704_v48 = vsel %vm4108_vm5, %v8700_v15, %v16221_v59 }
0x2a47   :  { %15679 = vmatprep.subr.bf16.mxu0 %v16457_v52  ;;  %v14121_v15 = vld [vmem:[%s19829_s5 + $0x1] ss:$0 sm:$0xff] }
0x2a48   :  { %v8391_v4 = vpack.c.bf16 %v8387_v32, %v8387_v32  ;;  %15680 = vmatpush3.bf16.msra.mxu0 %v16457_v52  ;;  %v8705_v32 = vsel %vm4108_vm5, %v8701_v31, %v16222_v56 }
0x2a49   :  { %v8709_v21 = vsel %vm4113_vm6, %v8705_v32, %v16232_v38 }
0x2a4a   :  { %15662 = vmatmul.mubr.msk.bf16.vlgmr.msra.gmra.mxu1 %vm661_vm3, %v8391_v4  ;;  %v8708_v4 = vsel %vm4113_vm6, %v8704_v48, %v16231_v34  ;;  %v8713_v51 = vsel %vm4118_vm7, %v8709_v21, %v16242_v0 }
0x2a4b   :  { %9030 = vmatprep.mubr.bf16.mxu1 %v19847_v58  ;;  %v8712_v36 = vsel %vm4118_vm7, %v8708_v4, %v16241_v55 }
0x2ad1   :  { %v8482_v27 = vpop.f32.mrf.mxu1 }
0x2ad2   :  { %v8434_v41 = vpop.f32.mrf.mxu0 }
0x2ad3   :  { %v16258_v24 = vpack.i.bf16 %v8482_v27, %v8434_v41  ;;  %v15651_v49 = vpop.f32.mrf.mxu1  ;;  %v8716_v41 = vsel %vm4123_vm8, %v8712_v36, %v16251_v61 }
0x2ad4   :  { %v15645_v23 = vpop.f32.mrf.mxu0 }
0x2ad5   :  { %16259 = vrot.lane.b32.xlu0 %v16258_v24, %s17109_s29  ;;  %v8485_v18 = vpop.f32.mrf.mxu1  ;;  %v8717_v24 = vsel %vm4123_vm8, %v8713_v51, %v16252_v20 }
0x2ad6   :  { %v8437_v46 = vpop.f32.mrf.mxu0 }
0x2ad7   :  { %v15652_v2 = vpop.f32.mrf.mxu1  ;;  %v16215_v46 = vpop.permute.xlu1 %16214 }
0x2ad8   :  { %v15646_v14 = vpop.f32.mrf.mxu0  ;;  %v16217_v54 = vunpack.i.h.bf16 %v16215_v46 }
0x2ada   :  { %v8530_v50 = vpop.f32.mrf.mxu0 }
0x2adb   :  { %v16225_v2 = vpop.permute.xlu1 %16224 }
0x2adc   :  { %v15657_v63 = vpop.f32.mrf.mxu0  ;;  %v16226_v7 = vunpack.i.l.bf16 %v16225_v2 }
0x2add   :  { %v16206_v63 = vunpack.i.l.bf16 %v16205_v25 }
0x2ade   :  { %v8533_v44 = vpop.f32.mrf.mxu0 }
0x2adf   :  { %v16235_v14 = vpop.permute.xlu1 %16234  ;;  %v16216_v44 = vunpack.i.l.bf16 %v16215_v46  ;;  %v16467_v46 = vld [vmem:[#allocation6 + $0xc0] ss:$8 sps:$4 sm:$0xff]  }
0x2ae0   :  { %v15658_v40 = vpop.f32.mrf.mxu0 }
0x2ae1   :  { %v16227_v40 = vunpack.i.h.bf16 %v16225_v2  ;;  %v16472_v2 = vld [vmem:[#allocation6 + $0xb4] ss:$8 sps:$4 sm:$0xff]  }
0x2ae3   :  { %v16245_v60 = vpop.permute.xlu1 %16244 }
0x2ae4   :  { %v16246_v3 = vunpack.i.l.bf16 %v16245_v60 }
0x2ae7   :  { %v16255_v52 = vpop.permute.xlu1 %16254 }
0x2ae8   :  { %v16257_v62 = vunpack.i.h.bf16 %v16255_v52  ;;  %v16256_v12 = vunpack.i.l.bf16 %v16255_v52  ;;  %v16483_v52 = vld [vmem:[#allocation7 + $0xb8] sm:$0xff]  }
0x2b0a   :  { %v8578_v1 = vpop.f32.mrf.mxu1 }
0x2b0b   :  { %v16263_v10 = vpack.i.bf16 %v8578_v1, %v8530_v50  ;;  %v16207_v50 = vunpack.i.h.bf16 %v16205_v25  ;;  %v16237_v1 = vunpack.i.h.bf16 %v16235_v14  ;;  %v16469_v25 = vld [vmem:[#allocation6 + $0xc4] ss:$8 sps:$4 sm:$0xff]  }
0x2b0c   :  { %v15663_v8 = vpop.f32.mrf.mxu1 }
0x2b0d   :  { %16264 = vrot.lane.b32.xlu1 %v16263_v10, %s17109_s29  ;;  %v16236_v10 = vunpack.i.l.bf16 %v16235_v14  ;;  %v8699_v8 = vsel %vm476_vm1, %v18254_v42, %v16207_v50  ;;  %v16470_v14 = vld [vmem:[#allocation6 + $0xb0] ss:$8 sps:$4 sm:$0xff]   ;;  %v16473_v50 = vld [vmem:[#allocation6 + $0xa0] ss:$8 sps:$4 sm:$0xff]  }
0x2b0e   :  { %v8581_v30 = vpop.f32.mrf.mxu1  ;;  %v8703_v47 = vsel %vm4103_vm4, %v8699_v8, %v16217_v54  ;;  %v16476_v54 = vld [vmem:[#allocation6 + $0x90] ss:$8 sps:$4 sm:$0xff]   ;;  %v16486_v8 = vld [vmem:[#allocation7 + $0xe8] sm:$0xff]  }
0x2b0f   :  { %v8698_v30 = vsel %vm476_vm1, %v18252_v16, %v16206_v63  ;;  %v8707_v28 = vsel %vm4108_vm5, %v8703_v47, %v16227_v40  ;;  %v16478_v63 = vld [vmem:[#allocation6 + $0x94] ss:$8 sps:$4 sm:$0xff]   ;;  %v16479_v40 = vld [vmem:[#allocation6 + $0x80] ss:$8 sps:$4 sm:$0xff]  }
0x2b10   :  { %v15664_v11 = vpop.f32.mrf.mxu1  ;;  %v8702_v45 = vsel %vm4103_vm4, %v8698_v30, %v16216_v44  ;;  %v8711_v6 = vsel %vm4113_vm6, %v8707_v28, %v16237_v1  ;;  %v16481_v44 = vld [vmem:[#allocation6 + $0x84] ss:$8 sps:$4 sm:$0xff]   ;;  %v16484_v1 = vld [vmem:[#allocation7 + $0xf0] sm:$0xff]   ;;  %v16491_v47 = vld [vmem:[#allocation7 + $0x98] sm:$0xff]  }
0x2b11   :  { %v16247_v11 = vunpack.i.h.bf16 %v16245_v60  ;;  %v8706_v33 = vsel %vm4108_vm5, %v8702_v45, %v16226_v7  ;;  %v16475_v60 = vld [vmem:[#allocation6 + $0xa4] ss:$8 sps:$4 sm:$0xff]   ;;  %v16482_v7 = vld [vmem:[#allocation7 + $0xf8] sm:$0xff]  }
0x2b12   :  { %v8710_v57 = vsel %vm4113_vm6, %v8706_v33, %v16236_v10  ;;  %14633 = vmatprep.subr.bf16.mxu0 %v16482_v7  ;;  %v16485_v10 = vld [vmem:[#allocation7 + $0xb0] sm:$0xff]   ;;  %v16487_v30 = vld [vmem:[#allocation7 + $0xa8] sm:$0xff]   ;;  %v16490_v45 = vld [vmem:[#allocation7 + $0xd8] sm:$0xff]  }
0x2b13   :  { %v8714_v56 = vsel %vm4118_vm7, %v8710_v57, %v16246_v3  ;;  %v8715_v16 = vsel %vm4118_vm7, %v8711_v6, %v16247_v11  ;;  %v16488_v11 = vld [vmem:[#allocation7 + $0xe0] sm:$0xff]  }
0x2b14   :  { %v8718_v38 = vsel %vm4123_vm8, %v8714_v56, %v16256_v12  ;;  %v8719_v34 = vsel %vm4123_vm8, %v8715_v16, %v16257_v62  ;;  %v16489_v3 = vld [vmem:[#allocation7 + $0xa0] sm:$0xff]  }
0x2b47   :  { %v16260_v53 = vpop.permute.xlu0 %16259 }
0x2b48   :  { %v16262_v27 = vunpack.i.h.bf16 %v16260_v53  ;;  %v16261_v29 = vunpack.i.l.bf16 %v16260_v53 }
0x2b4a   :  { %v8720_v49 = vsel %vm4128_vm9, %v8716_v41, %v16261_v29  ;;  %v8721_v23 = vsel %vm4128_vm9, %v8717_v24, %v16262_v27  ;;  %v16458_v24 = vld [vmem:[#allocation6 + $0xf0] ss:$8 sps:$4 sm:$0xff]  }
0x2b4b   :  { %v8724_v18 = vpack.c.bf16 %v8721_v23, %v8720_v49  ;;  %v16463_v49 = vld [vmem:[#allocation6 + $0xe4] ss:$8 sps:$4 sm:$0xff]   ;;  %v16461_v23 = vld [vmem:[#allocation6 + $0xe0] ss:$8 sps:$4 sm:$0xff]  }
0x2b4d   :  { %15681 = vmatprep.mubr.bf16.mxu0 %v8724_v18  ;;  %v16464_v18 = vld [vmem:[#allocation6 + $0xd0] ss:$8 sps:$4 sm:$0xff]  }
0x2b7f   :  { %v16265_v42 = vpop.permute.xlu1 %16264 }
0x2b80   :  { %v16267_v59 = vunpack.i.h.bf16 %v16265_v42  ;;  %v16266_v5 = vunpack.i.l.bf16 %v16265_v42 }
0x2b82   :  { %v8723_v13 = vsel %vm4128_vm9, %v8719_v34, %v16267_v59  ;;  %v8722_v26 = vsel %vm4128_vm9, %v8718_v38, %v16266_v5 }
0x2b83   :  { %v8725_v0 = vpack.c.bf16 %v8723_v13, %v8722_v26 }
0x2b85   :  { %15682 = vmatmul.mubr.bf16.vlgmr.msra.gmra.mxu0 %v8725_v0 }
0x2b86   :  { %14634 = vmatpush3.bf16.msra.mxu0 %v16483_v52 }
0x2b87   :  { %14635 = vmatprep.subr.bf16.mxu0 %v16484_v1 }
0x2b8a   :  { %14636 = vmatpush3.bf16.msra.mxu0 %v16485_v10 }
0x2b8b   :  { %14637 = vmatprep.subr.bf16.mxu0 %v16486_v8  ;;  %v16493_v8 = vld [vmem:[#allocation7 + $0x90] sm:$0xff]  }
0x2b8e   :  { %14638 = vmatpush3.bf16.msra.mxu0 %v16487_v30  ;;  %v16494_v30 = vld [vmem:[#allocation7 + $0xc8] sm:$0xff]  }
0x2b8f   :  { %14639 = vmatprep.subr.bf16.mxu0 %v16488_v11  ;;  %v16495_v11 = vld [vmem:[#allocation7 + $0x88] sm:$0xff]  }
0x2b92   :  { %14640 = vmatpush3.bf16.msra.mxu0 %v16489_v3  ;;  %v16496_v3 = vld [vmem:[#allocation7 + $0xc0] sm:$0xff]  }
0x2b93   :  { %14641 = vmatprep.subr.bf16.mxu0 %v16490_v45  ;;  %v16497_v45 = vld [vmem:[#allocation7 + $0x80] sm:$0xff]  }
0x2b96   :  { %14642 = vmatpush3.bf16.msra.mxu0 %v16491_v47  ;;  %v14029_v47 = vld [vmem:[%s19833_s9 + $0x2] sm:$0x3] }
0x2c45   :  { %v15683_v55 = vpop.f32.mrf.mxu0 }
0x2c46   :  { %v8823_v51 = vadd.f32 %v15683_v55, %v14121_v15 }
0x2c47   :  { %v8814_v31 = vpop.f32.mrf.mxu0 }
0x2c48   :  { %v8815_v20 = vadd.f32 %v14121_v15, %v8814_v31  ;;  %v18893_v29 = vadd.f32 %v8823_v51, %v18104_v22  ;;  %v16466_v22 = vld [vmem:[#allocation6 + $0xd4] ss:$8 sps:$4 sm:$0xff]  }
0x2c49   :  { %v15684_v61 = vpop.f32.mrf.mxu0 }
0x2c4a   :  { %v18877_v48 = vadd.f32 %v8815_v20, %v18096_v17  ;;  %v8826_v21 = vadd.f32 %v15684_v61, %v14121_v15  ;;  %v8847_v41 = vmul.f32 %v18893_v29, %v18893_v29 }
0x2c4b   :  { %v8817_v32 = vpop.f32.mrf.mxu0 }
0x2c4c   :  { %v8818_v4 = vadd.f32 %v14121_v15, %v8817_v32  ;;  %8833 = vadd.xlane.f32.xlu0 %v18877_v48  ;;  %v8845_v36 = vmul.f32 %v18877_v48, %v18877_v48  ;;  %v18887_v27 = vadd.f32 %v8826_v21, %v18106_v19  ;;  %v16460_v19 = vld [vmem:[#allocation6 + $0xf4] ss:$8 sps:$4 sm:$0xff]  }
0x2c4d   :  { %8998 = vmatprep.subr.bf16.mxu1 %v16460_v19 }
0x2c4e   :  { %v18881_v53 = vadd.f32 %v8818_v4, %v18098_v37  ;;  %v8848_v37 = vmul.f32 %v18887_v27, %v18887_v27  ;;  %8999 = vmatpush1.bf16.msra.mxu1 %v16458_v24 }
0x2c4f   :  { %9000 = vmatprep.subr.bf16.mxu1 %v16463_v49  ;;  %v14130_v49 = vld [vmem:[%s19830_s6 + $0x1] ss:$0 sm:$0xff] }
0x2c50   :  { %8835 = vadd.xlane.f32.xlu1 %v18881_v53  ;;  %8849 = vadd.xlane.f32.xlu0 %v8845_v36  ;;  %v8846_v17 = vmul.f32 %v18881_v53, %v18881_v53 }
0x2c52   :  { %9001 = vmatpush1.bf16.msra.mxu1 %v16461_v23 }
0x2c53   :  { %9002 = vmatprep.subr.bf16.mxu1 %v16466_v22 }
0x2c54   :  { %8839 = vadd.xlane.f32.xlu1 %v18887_v27  ;;  %8851 = vadd.xlane.f32.xlu0 %v8846_v17 }
0x2c56   :  { %9003 = vmatpush1.bf16.msra.mxu1 %v16464_v18 }
0x2c57   :  { %9004 = vmatprep.subr.bf16.mxu1 %v16469_v25 }
0x2c58   :  { %8855 = vadd.xlane.f32.xlu1 %v8848_v37  ;;  %8837 = vadd.xlane.f32.xlu0 %v18893_v29 }
0x2c5a   :  { %9005 = vmatpush1.bf16.msra.mxu1 %v16467_v46  ;;  %v14131_v46 = vld [vmem:[%s19831_s7 + $0x1] ss:$0 sm:$0xff] }
0x2c5b   :  { %9006 = vmatprep.subr.bf16.mxu1 %v16472_v2 }
0x2c5c   :  { %8853 = vadd.xlane.f32.xlu0 %v8847_v41 }
0x2c5e   :  { %9007 = vmatpush1.bf16.msra.mxu1 %v16470_v14 }
0x2c5f   :  { %9008 = vmatprep.subr.bf16.mxu1 %v16475_v60 }
0x2c62   :  { %9009 = vmatpush1.bf16.msra.mxu1 %v16473_v50 }
0x2c63   :  { %9010 = vmatprep.subr.bf16.mxu1 %v16478_v63 }
0x2c66   :  { %9011 = vmatpush1.bf16.msra.mxu1 %v16476_v54 }
0x2c67   :  { %9012 = vmatprep.subr.bf16.mxu1 %v16481_v44 }
0x2c6a   :  { %9013 = vmatpush1.bf16.msra.mxu1 %v16479_v40 }
0x2cd5   :  { %v8834_v62 = vpop.xlane.xlu0 %8833 }
0x2cd6   :  { %v8841_v12 = vmul.f32 0.0078125, %v8834_v62 }
0x2cd8   :  { %v8861_v57 = vmul.f32 %v8841_v12, %v8841_v12  ;;  %v8869_v41 = vsub.f32 %v18877_v48, %v8841_v12  ;;  %v8915_v12 = vrot.slane %v14029_v47, %v17243_v39 }
0x2cd9   :  { %v8836_v33 = vpop.xlane.xlu1 %8835  ;;  %v8850_v28 = vpop.xlane.xlu0 %8849 }
0x2cda   :  { %v8842_v6 = vmul.f32 0.0078125, %v8836_v33  ;;  %v8857_v42 = vmul.f32 0.0078125, %v8850_v28  ;;  %v8911_v33 = vrot.slane %v14029_v47, %v17249_v43  ;;  %v16498_v47 = vld [vmem:[#allocation2 + $0x228] ss:$12 sps:$4 sm:$0xff]  }
0x2cdc   :  { %v8865_v56 = vsub.f32 %v8857_v42, %v8861_v57  ;;  %v8862_v5 = vmul.f32 %v8842_v6, %v8842_v6  ;;  %v8870_v23 = vsub.f32 %v18881_v53, %v8842_v6 }
0x2cdd   :  { %v8840_v16 = vpop.xlane.xlu1 %8839  ;;  %v8852_v59 = vpop.xlane.xlu0 %8851 }
0x2cde   :  { %v8873_v38 = vadd.f32 1e-05, %v8865_v56  ;;  %v8844_v34 = vmul.f32 0.0078125, %v8840_v16  ;;  %v8858_v13 = vmul.f32 0.0078125, %v8852_v59 }
0x2ce0   :  { %16850 = vrsqrt.f32 %v8873_v38  ;;  %v8866_v26 = vsub.f32 %v8858_v13, %v8862_v5  ;;  %v8864_v15 = vmul.f32 %v8844_v34, %v8844_v34  ;;  %v8872_v2 = vsub.f32 %v18887_v27, %v8844_v34 }
0x2ce1   :  { %v8856_v0 = vpop.xlane.xlu1 %8855  ;;  %v8838_v55 = vpop.xlane.xlu0 %8837 }
0x2ce2   :  { %v8874_v31 = vadd.f32 1e-05, %v8866_v26  ;;  %v8860_v20 = vmul.f32 0.0078125, %v8856_v0  ;;  %v8843_v61 = vmul.f32 0.0078125, %v8838_v55 }
0x2ce4   :  { %16852 = vrsqrt.f32 %v8874_v31  ;;  %v8868_v32 = vsub.f32 %v8860_v20, %v8864_v15  ;;  %v8863_v36 = vmul.f32 %v8843_v61, %v8843_v61  ;;  %v8871_v54 = vsub.f32 %v18893_v29, %v8843_v61  ;;  %v16492_v29 = vld [vmem:[#allocation7 + $0xd0] sm:$0xff]  }
0x2ce5   :  { %v8854_v4 = vpop.xlane.xlu0 %8853  ;;  %14643 = vmatprep.subr.bf16.mxu0 %v16492_v29 }
0x2ce6   :  { %v8876_v21 = vadd.f32 1e-05, %v8868_v32  ;;  %v8859_v51 = vmul.f32 0.0078125, %v8854_v4  ;;  %14644 = vmatpush3.bf16.msra.mxu0 %v16493_v8 }
0x2ce7   :  { %14645 = vmatprep.subr.bf16.mxu0 %v16494_v30 }
0x2ce8   :  { %16854 = vrsqrt.f32 %v8876_v21  ;;  %v8867_v17 = vsub.f32 %v8859_v51, %v8863_v36 }
0x2cea   :  { %v8875_v37 = vadd.f32 1e-05, %v8867_v17  ;;  %14646 = vmatpush3.bf16.msra.mxu0 %v16495_v11 }
0x2ceb   :  { %14647 = vmatprep.subr.bf16.mxu0 %v16496_v3 }
0x2cec   :  { %16856 = vrsqrt.f32 %v8875_v37 }
0x2ced   :  { %v16851_v19 = vpop.eup %16850 }
0x2cee   :  { %v8881_v24 = vmul.f32 %v16851_v19, %v8869_v41  ;;  %14648 = vmatpush3.bf16.msra.mxu0 %v16497_v45  ;;  %v16500_v45 = vld [vmem:[#allocation2 + $0x22c] ss:$12 sps:$4 sm:$0xff]  }
0x2cef   :  { %9552 = vmatprep.subr.bf16.mxu1 %v16500_v45  ;;  %v14165_v45 = vld [vmem:[%s19836_s12 + $0x1] ss:$0 sm:$0xff] }
0x2cf0   :  { %v8891_v25 = vmul.f32 %v14130_v49, %v8881_v24 }
0x2cf1   :  { %v16853_v22 = vpop.eup %16852 }
0x2cf2   :  { %v8882_v18 = vmul.f32 %v16853_v22, %v8870_v23  ;;  %v18909_v60 = vadd.f32 %v14131_v46, %v8891_v25 }
0x2cf4   :  { %v8892_v14 = vmul.f32 %v14130_v49, %v8882_v18 }
0x2cf5   :  { %v16855_v48 = vpop.eup %16854 }
0x2cf6   :  { %v18911_v50 = vadd.f32 %v14131_v46, %v8892_v14  ;;  %v8884_v63 = vmul.f32 %v16855_v48, %v8872_v2 }
0x2cf8   :  { %v8905_v53 = vpack.c.bf16 %v18911_v50, %v18909_v60  ;;  %v8894_v7 = vmul.f32 %v14130_v49, %v8884_v63 }
0x2cf9   :  { %v16857_v44 = vpop.eup %16856 }
0x2cfa   :  { %9031 = vmatmul.mubr.bf16.vlgmr.msra.gmra.mxu1 %v8905_v53  ;;  %v8883_v40 = vmul.f32 %v16857_v44, %v8871_v54  ;;  %v18919_v1 = vadd.f32 %v14131_v46, %v8894_v7 }
0x2cfb   :  { %9040 = vmatprep.mubr.bf16.mxu1 %v19847_v58  ;;  %9553 = vmatpush1.bf16.msra.mxu1 %v16498_v47 }
0x2cfc   :  { %v8893_v52 = vmul.f32 %v14130_v49, %v8883_v40  ;;  %v14148_v49 = vld [vmem:[%s19835_s11 + $0x1] ss:$0 sm:$0xff] }
0x2cfe   :  { %v18917_v27 = vadd.f32 %v14131_v46, %v8893_v52 }
0x2d00   :  { %v8906_v10 = vpack.c.bf16 %v18919_v1, %v18917_v27 }
0x2d02   :  { %9041 = vmatmul.mubr.bf16.gmra.mxu1 %v8906_v10 }
0x2d03   :  { %9584 = vmatprep.mubr.bf16.mxu1 %v19847_v58 }
0x2dba   :  { %v9032_v62 = vpop.f32.mrf.mxu1 }
0x2dbb   :  { %v9033_v56 = vadd.f32 %v9032_v62, %v8911_v33  ;;  %v16501_v62 = vld [vmem:[#allocation2 + $0x210] ss:$12 sps:$4 sm:$0xff]  }
0x2dbc   :  { %v9034_v28 = vpop.f32.mrf.mxu1 }
0x2dbd   :  { %v9035_v6 = vadd.f32 %v9034_v28, %v8915_v12  ;;  %v9051_v26 = vmax.f32 %v9033_v56, 0.0  ;;  %v16510_v28 = vld [vmem:[#allocation2 + $0x1e4] ss:$12 sps:$4 sm:$0xff]   ;;  %v16515_v56 = vld [vmem:[#allocation2 + $0x200] ss:$12 sps:$4 sm:$0xff]  }
0x2dbe   :  { %v9036_v57 = vpop.f32.mrf.mxu1 }
0x2dbf   :  { %v9037_v42 = vadd.f32 %v9036_v57, %v8911_v33  ;;  %v9052_v34 = vmax.f32 %v9035_v6, 0.0  ;;  %v16511_v57 = vld [vmem:[#allocation2 + $0x218] ss:$12 sps:$4 sm:$0xff]   ;;  %v16508_v6 = vld [vmem:[#allocation2 + $0x1e0] ss:$12 sps:$4 sm:$0xff]  }
0x2dc0   :  { %v9038_v16 = vpop.f32.mrf.mxu1 }
0x2dc1   :  { %v9039_v59 = vadd.f32 %v9038_v16, %v8915_v12  ;;  %v9053_v5 = vmax.f32 %v9037_v42, 0.0  ;;  %v16514_v42 = vld [vmem:[#allocation2 + $0x1cc] ss:$12 sps:$4 sm:$0xff]   ;;  %v16512_v16 = vld [vmem:[#allocation2 + $0x1c8] ss:$12 sps:$4 sm:$0xff]  }
0x2dc2   :  { %v9042_v38 = vpop.f32.mrf.mxu1 }
0x2dc3   :  { %v9054_v13 = vmax.f32 %v9039_v59, 0.0  ;;  %v9059_v15 = vpack.c.bf16 %v9053_v5, %v9051_v26  ;;  %v9043_v32 = vadd.f32 %v9042_v38, %v8911_v33  ;;  %v16518_v59 = vld [vmem:[#allocation2 + $0x1b4] ss:$12 sps:$4 sm:$0xff]   ;;  %v16516_v38 = vld [vmem:[#allocation2 + $0x1b0] ss:$12 sps:$4 sm:$0xff]  }
0x2dc4   :  { %v9044_v0 = vpop.f32.mrf.mxu1  ;;  %v16519_v5 = vld [vmem:[#allocation2 + $0x1e8] ss:$12 sps:$4 sm:$0xff]   ;;  %v16520_v26 = vld [vmem:[#allocation2 + $0x198] ss:$12 sps:$4 sm:$0xff]  }
0x2dc5   :  { %v9060_v55 = vpack.c.bf16 %v9054_v13, %v9052_v34  ;;  %v9045_v20 = vadd.f32 %v9044_v0, %v8915_v12  ;;  %v9055_v37 = vmax.f32 %v9043_v32, 0.0  ;;  %v16522_v34 = vld [vmem:[#allocation2 + $0x19c] ss:$12 sps:$4 sm:$0xff]   ;;  %v16526_v0 = vld [vmem:[#allocation2 + $0x184] ss:$12 sps:$4 sm:$0xff]  }
0x2dc6   :  { %v9046_v31 = vpop.f32.mrf.mxu1  ;;  %v16523_v13 = vld [vmem:[#allocation2 + $0x1d0] ss:$12 sps:$4 sm:$0xff]  }
0x2dc7   :  { %v9047_v61 = vadd.f32 %v9046_v31, %v8911_v33  ;;  %9197 = vmatprep.mubr.bf16.mxu0 %v9060_v55  ;;  %v9056_v51 = vmax.f32 %v9045_v20, 0.0  ;;  %v16504_v33 = vld [vmem:[#allocation2 + $0x1f8] ss:$12 sps:$4 sm:$0xff]   ;;  %v16528_v31 = vld [vmem:[#allocation2 + $0x1a0] ss:$12 sps:$4 sm:$0xff]  }
0x2dc8   :  { %v9048_v4 = vpop.f32.mrf.mxu1  ;;  %9198 = vmatmul.mubr.bf16.vlgmr.msra.gmra.mxu0 %v9059_v15  ;;  %v16527_v55 = vld [vmem:[#allocation2 + $0x1b8] ss:$12 sps:$4 sm:$0xff]   ;;  %v16524_v15 = vld [vmem:[#allocation2 + $0x180] ss:$12 sps:$4 sm:$0xff]   ;;  %v16529_v20 = vld [vmem:[#allocation2 + $0x188] ss:$12 sps:$4 sm:$0xff]  }
0x2dc9   :  { %v9049_v21 = vadd.f32 %v9048_v4, %v8915_v12  ;;  %v9057_v36 = vmax.f32 %v9047_v61, 0.0  ;;  %v16507_v12 = vld [vmem:[#allocation2 + $0x230] ss:$12 sps:$4 sm:$0xff]  }
0x2dca   :  { %15685 = vmatprep.subr.bf16.mxu0 %v16507_v12 }
0x2dcb   :  { %v9058_v17 = vmax.f32 %v9049_v21, 0.0  ;;  %v9061_v19 = vpack.c.bf16 %v9057_v36, %v9055_v37  ;;  %15686 = vmatpush3.bf16.msra.mxu0 %v16507_v12  ;;  %v14166_v12 = vld [vmem:[%s19837_s13 + $0x1] ss:$0 sm:$0xff] }
0x2dcc   :  { %15687 = vmatprep.subr.bf16.mxu0 %v16511_v57 }
0x2dcd   :  { %v9062_v41 = vpack.c.bf16 %v9058_v17, %v9056_v51 }
0x2dcf   :  { %9205 = vmatprep.mubr.bf16.mxu0 %v9062_v41  ;;  %15688 = vmatpush3.bf16.msra.mxu0 %v16511_v57 }
0x2dd0   :  { %9206 = vmatmul.mubr.bf16.gmra.mxu0 %v9061_v19  ;;  %15689 = vmatprep.subr.bf16.mxu0 %v16515_v56 }
0x2dd3   :  { %15690 = vmatpush3.bf16.msra.mxu0 %v16515_v56 }
0x2dd4   :  { %15691 = vmatprep.subr.bf16.mxu0 %v16519_v5 }
0x2dd7   :  { %15692 = vmatpush3.bf16.msra.mxu0 %v16519_v5 }
0x2dd8   :  { %15693 = vmatprep.subr.bf16.mxu0 %v16523_v13 }
0x2ddb   :  { %15694 = vmatpush3.bf16.msra.mxu0 %v16523_v13 }
0x2ddc   :  { %15695 = vmatprep.subr.bf16.mxu0 %v16527_v55 }
0x2ddf   :  { %15696 = vmatpush3.bf16.msra.mxu0 %v16527_v55 }
0x2de0   :  { %15697 = vmatprep.subr.bf16.mxu0 %v16528_v31 }
0x2de3   :  { %15698 = vmatpush3.bf16.msra.mxu0 %v16528_v31 }
0x2de4   :  { %15699 = vmatprep.subr.bf16.mxu0 %v16529_v20 }
0x2de7   :  { %15700 = vmatpush3.bf16.msra.mxu0 %v16529_v20 }
0x2de8   :  { %15723 = vmatprep.subr.bf16.mxu0 %v17107_v35 }
0x2e88   :  { %v14649_v24 = vpop.f32.mrf.mxu0 }
0x2e8a   :  { %v14650_v23 = vpop.f32.mrf.mxu0 }
0x2e8b   :  { %v14651_v22 = vadd.f32 %v14650_v23, %v14649_v24 }
0x2e8c   :  { %v14652_v18 = vpop.f32.mrf.mxu0 }
0x2e8d   :  { %v9200_v25 = vadd.f32 %v14651_v22, %v14148_v49 }
0x2e8e   :  { %v14653_v46 = vpop.f32.mrf.mxu0 }
0x2e8f   :  { %v14654_v2 = vadd.f32 %v14653_v46, %v14652_v18  ;;  %v18933_v14 = vadd.f32 %v9200_v25, %v18909_v60 }
0x2e90   :  { %v14655_v48 = vpop.f32.mrf.mxu0 }
0x2e91   :  { %v9203_v63 = vadd.f32 %v14654_v2, %v14148_v49  ;;  %9218 = vadd.xlane.f32.xlu0 %v18933_v14  ;;  %v9230_v40 = vmul.f32 %v18933_v14, %v18933_v14 }
0x2e92   :  { %v14656_v54 = vpop.f32.mrf.mxu0 }
0x2e93   :  { %v14657_v53 = vadd.f32 %v14656_v54, %v14655_v48  ;;  %v18937_v44 = vadd.f32 %v9203_v63, %v18911_v50 }
0x2e94   :  { %v14658_v7 = vpop.f32.mrf.mxu0 }
0x2e95   :  { %v9208_v52 = vadd.f32 %v14657_v53, %v14148_v49  ;;  %9220 = vadd.xlane.f32.xlu1 %v18937_v44  ;;  %9234 = vadd.xlane.f32.xlu0 %v9230_v40  ;;  %v9231_v29 = vmul.f32 %v18937_v44, %v18937_v44 }
0x2e96   :  { %v14659_v10 = vpop.f32.mrf.mxu0 }
0x2e97   :  { %v14660_v60 = vadd.f32 %v14659_v10, %v14658_v7  ;;  %v18945_v8 = vadd.f32 %v9208_v52, %v18917_v27  ;;  %v16503_v27 = vld [vmem:[#allocation2 + $0x214] ss:$12 sps:$4 sm:$0xff]  }
0x2e98   :  { %9554 = vmatprep.subr.bf16.mxu1 %v16503_v27 }
0x2e99   :  { %v9211_v30 = vadd.f32 %v14660_v60, %v14148_v49  ;;  %9236 = vadd.xlane.f32.xlu1 %v9231_v29  ;;  %9222 = vadd.xlane.f32.xlu0 %v18945_v8  ;;  %v9232_v11 = vmul.f32 %v18945_v8, %v18945_v8 }
0x2e9a   :  { %9555 = vmatpush1.bf16.msra.mxu1 %v16501_v62 }
0x2e9b   :  { %v18949_v50 = vadd.f32 %v9211_v30, %v18919_v1  ;;  %v16506_v1 = vld [vmem:[#allocation2 + $0x1fc] ss:$12 sps:$4 sm:$0xff]  }
0x2e9c   :  { %9556 = vmatprep.subr.bf16.mxu1 %v16506_v1 }
0x2e9d   :  { %9224 = vadd.xlane.f32.xlu1 %v18949_v50  ;;  %9238 = vadd.xlane.f32.xlu0 %v9232_v11  ;;  %v9233_v3 = vmul.f32 %v18949_v50, %v18949_v50 }
0x2e9e   :  { %9557 = vmatpush1.bf16.msra.mxu1 %v16504_v33 }
0x2e9f   :  { %9558 = vmatprep.subr.bf16.mxu1 %v16510_v28 }
0x2ea1   :  { %9240 = vadd.xlane.f32.xlu1 %v9233_v3 }
0x2ea2   :  { %9559 = vmatpush1.bf16.msra.mxu1 %v16508_v6 }
0x2ea3   :  { %9560 = vmatprep.subr.bf16.mxu1 %v16514_v42 }
0x2ea6   :  { %9561 = vmatpush1.bf16.msra.mxu1 %v16512_v16 }
0x2ea7   :  { %9562 = vmatprep.subr.bf16.mxu1 %v16518_v59 }
0x2eaa   :  { %9563 = vmatpush1.bf16.msra.mxu1 %v16516_v38 }
0x2eab   :  { %9564 = vmatprep.subr.bf16.mxu1 %v16522_v34 }
0x2eae   :  { %9565 = vmatpush1.bf16.msra.mxu1 %v16520_v26 }
0x2eaf   :  { %9566 = vmatprep.subr.bf16.mxu1 %v16526_v0 }
0x2eb2   :  { %9567 = vmatpush1.bf16.msra.mxu1 %v16524_v15 }
0x2eb3   :  { %15705 = vmatprep.subr.bf16.mxu1 %v17107_v35 }
0x2f1a   :  { %v9219_v61 = vpop.xlane.xlu0 %9218 }
0x2f1b   :  { %v9226_v32 = vmul.f32 0.0078125, %v9219_v61 }
0x2f1d   :  { %v9246_v36 = vmul.f32 %v9226_v32, %v9226_v32  ;;  %v9254_v30 = vsub.f32 %v18933_v14, %v9226_v32 }
0x2f1e   :  { %v9221_v4 = vpop.xlane.xlu1 %9220  ;;  %v9235_v21 = vpop.xlane.xlu0 %9234 }
0x2f1f   :  { %v9227_v51 = vmul.f32 0.0078125, %v9221_v4  ;;  %v9242_v17 = vmul.f32 0.0078125, %v9235_v21 }
0x2f21   :  { %v9250_v37 = vsub.f32 %v9242_v17, %v9246_v36  ;;  %v9247_v24 = vmul.f32 %v9227_v51, %v9227_v51  ;;  %v9255_v47 = vsub.f32 %v18937_v44, %v9227_v51 }
0x2f22   :  { %v9237_v41 = vpop.xlane.xlu1 %9236  ;;  %v9223_v19 = vpop.xlane.xlu0 %9222 }
0x2f23   :  { %v9258_v49 = vadd.f32 1e-05, %v9250_v37  ;;  %v9243_v23 = vmul.f32 0.0078125, %v9237_v41  ;;  %v9228_v22 = vmul.f32 0.0078125, %v9223_v19 }
0x2f25   :  { %16858 = vrsqrt.f32 %v9258_v49  ;;  %v9251_v18 = vsub.f32 %v9243_v23, %v9247_v24  ;;  %v9248_v48 = vmul.f32 %v9228_v22, %v9228_v22  ;;  %v9256_v28 = vsub.f32 %v18945_v8, %v9228_v22 }
0x2f26   :  { %v9225_v25 = vpop.xlane.xlu1 %9224  ;;  %v9239_v46 = vpop.xlane.xlu0 %9238 }
0x2f27   :  { %v9259_v2 = vadd.f32 1e-05, %v9251_v18  ;;  %v9229_v63 = vmul.f32 0.0078125, %v9225_v25  ;;  %v9244_v54 = vmul.f32 0.0078125, %v9239_v46 }
0x2f29   :  { %16860 = vrsqrt.f32 %v9259_v2  ;;  %v9252_v53 = vsub.f32 %v9244_v54, %v9248_v48  ;;  %v9249_v7 = vmul.f32 %v9229_v63, %v9229_v63  ;;  %v9257_v56 = vsub.f32 %v18949_v50, %v9229_v63  ;;  %v14167_v50 = vld [vmem:[%s19827_s3 + $0x6] sm:$0x7] }
0x2f2a   :  { %v9241_v40 = vpop.xlane.xlu1 %9240  ;;  %v9416_v26 = vrot.slane %v14167_v50, %v17243_v39  ;;  %v9412_v20 = vrot.slane %v14167_v50, %v17249_v43  ;;  %v9420_v32 = vrot.slane %v14167_v50, %v17296_v9 }
0x2f2b   :  { %v9260_v52 = vadd.f32 1e-05, %v9252_v53  ;;  %v9245_v10 = vmul.f32 0.0078125, %v9241_v40 }
0x2f2d   :  { %16862 = vrsqrt.f32 %v9260_v52  ;;  %v9253_v60 = vsub.f32 %v9245_v10, %v9249_v7 }
0x2f2f   :  { %v9261_v29 = vadd.f32 1e-05, %v9253_v60 }
0x2f31   :  { %16864 = vrsqrt.f32 %v9261_v29 }
0x2f32   :  { %v16859_v11 = vpop.eup %16858 }
0x2f33   :  { %v9266_v3 = vmul.f32 %v16859_v11, %v9254_v30 }
0x2f35   :  { %v9276_v62 = vmul.f32 %v14165_v45, %v9266_v3 }
0x2f36   :  { %v16861_v27 = vpop.eup %16860 }
0x2f37   :  { %v9267_v1 = vmul.f32 %v16861_v27, %v9255_v47  ;;  %v18967_v57 = vadd.f32 %v14166_v12, %v9276_v62 }
0x2f39   :  { %v9277_v33 = vmul.f32 %v14165_v45, %v9267_v1 }
0x2f3a   :  { %v16863_v14 = vpop.eup %16862 }
0x2f3b   :  { %v18969_v6 = vadd.f32 %v14166_v12, %v9277_v33  ;;  %v9268_v42 = vmul.f32 %v16863_v14, %v9256_v28 }
0x2f3d   :  { %v9406_v44 = vpack.c.bf16 %v18969_v6, %v18967_v57  ;;  %v9278_v5 = vmul.f32 %v14165_v45, %v9268_v42 }
0x2f3e   :  { %v16865_v16 = vpop.eup %16864 }
0x2f3f   :  { %9585 = vmatmul.mubr.bf16.vlgmr.msra.gmra.mxu1 %v9406_v44  ;;  %15701 = vmatprep.mubr.bf16.mxu0 %v9406_v44  ;;  %v9269_v59 = vmul.f32 %v16865_v16, %v9257_v56  ;;  %v18975_v8 = vadd.f32 %v14166_v12, %v9278_v5 }
0x2f40   :  { %9594 = vmatprep.mubr.bf16.mxu1 %v19847_v58 }
0x2f41   :  { %v9279_v38 = vmul.f32 %v14165_v45, %v9269_v59 }
0x2f43   :  { %v18977_v34 = vadd.f32 %v14166_v12, %v9279_v38 }
0x2f45   :  { %v9407_v13 = vpack.c.bf16 %v18977_v34, %v18975_v8 }
0x2f47   :  { %9595 = vmatmul.mubr.bf16.gmra.mxu1 %v9407_v13  ;;  %15702 = vmatmul.mubr.bf16.vlgmr.msra.gmra.mxu0 %v9407_v13 }
0x2f48   :  { %15707 = vmatprep.mubr.msk.bf16.mxu1 %vm17108_vm0, %v17107_v35  ;;  %15725 = vmatprep.mubr.msk.bf16.mxu0 %vm17108_vm0, %v17107_v35 }
0x2fff   :  { %v9586_v0 = vpop.f32.mrf.mxu1 }
0x3000   :  { %v9587_v37 = vadd.f32 %v9586_v0, %v9412_v20 }
0x3001   :  { %v9588_v55 = vpop.f32.mrf.mxu1 }
0x3002   :  { %v9589_v15 = vadd.f32 %v9588_v55, %v9416_v26  ;;  %v19000_v9 = vpack.c.bf16 %v9587_v37, %v9587_v37 }
0x3003   :  { %v9590_v31 = vpop.f32.mrf.mxu1 }
0x3004   :  { %v18990_v61 = vpack.c.bf16 %v9589_v15, %v9589_v15  ;;  %v9591_v54 = vadd.f32 %v9590_v31, %v9412_v20 }
0x3005   :  { %v9592_v4 = vpop.f32.mrf.mxu1 }
0x3006   :  { %v9593_v21 = vadd.f32 %v9592_v4, %v9416_v26  ;;  %v9670_v36 = vsel %vm476_vm1, %v18990_v61, 0  ;;  %v19017_v10 = vpack.c.bf16 %v9591_v54, %v9591_v54 }
0x3007   :  { %v9596_v51 = vpop.f32.mrf.mxu1  ;;  %v15703_v17 = vpop.f32.mrf.mxu0  ;;  %15706 = vmatpush3.bf16.xpose.msra.mxu1 %v9670_v36 }
0x3008   :  { %v18995_v41 = vadd.f32 %v15703_v17, %v9420_v32  ;;  %15711 = vmatprep.subr.bf16.mxu1 %v17107_v35  ;;  %v18998_v49 = vpack.c.bf16 %v9593_v21, %v9593_v21  ;;  %v9597_v3 = vadd.f32 %v9596_v51, %v9412_v20 }
0x3009   :  { %v9598_v19 = vpop.f32.mrf.mxu1  ;;  %v9639_v24 = vpop.f32.mrf.mxu0 }
0x300a   :  { %v9599_v46 = vadd.f32 %v9598_v19, %v9416_v26  ;;  %v9716_v48 = vsel %vm476_vm1, %v18998_v49, 0  ;;  %v9640_v29 = vadd.f32 %v9639_v24, %v9420_v32  ;;  %v19039_v62 = vpack.c.bf16 %v9597_v3, %v9597_v3 }
0x300b   :  { %v9600_v23 = vpop.f32.mrf.mxu1  ;;  %v15704_v22 = vpop.f32.mrf.mxu0 }
0x300c   :  { %v19002_v18 = vadd.f32 %v15704_v22, %v9420_v32  ;;  %v19013_v40 = vpack.c.bf16 %v9599_v46, %v9599_v46  ;;  %v9601_v60 = vadd.f32 %v9600_v23, %v9412_v20  ;;  %v19031_v47 = vpack.c.bf16 %v9640_v29, %v9640_v29 }
0x300d   :  { %v9602_v25 = vpop.f32.mrf.mxu1  ;;  %v9642_v63 = vpop.f32.mrf.mxu0 }
0x300e   :  { %v9603_v2 = vadd.f32 %v9602_v25, %v9416_v26  ;;  %15708 = vmatmul.mubr.msk.bf16.vlgmr.msra.gmra.mxu1 %vm476_vm1, %v19000_v9  ;;  %v9643_v7 = vadd.f32 %v9642_v63, %v9420_v32  ;;  %v9762_v11 = vsel %vm476_vm1, %v19013_v40, 0  ;;  %v19028_v45 = vpack.c.bf16 %v9601_v60, %v9601_v60 }
0x300f   :  { %15712 = vmatpush3.bf16.xpose.msra.mxu1 %v9716_v48  ;;  %15713 = vmatprep.mubr.msk.bf16.mxu1 %vm17108_vm0, %v17107_v35  ;;  %v9902_v1 = vsel %vm713_vm2, %v19031_v47, 0 }
0x3010   :  { %v19010_v53 = vpack.c.bf16 %v9603_v2, %v9603_v2  ;;  %15717 = vmatprep.subr.bf16.mxu1 %v17107_v35  ;;  %v19020_v30 = vpack.c.bf16 %v9643_v7, %v9643_v7 }
0x3012   :  { %v9808_v52 = vsel %vm476_vm1, %v19010_v53, 0  ;;  %v9948_v27 = vsel %vm713_vm2, %v19020_v30, 0 }
0x3013   :  { %15724 = vmatpush3.bf16.xpose.msra.mxu0 %v9808_v52 }
0x3014   :  { %15735 = vmatprep.subr.bf16.mxu0 %v17107_v35 }
0x3016   :  { %15714 = vmatmul.mubr.msk.bf16.vlgmr.msra.gmra.mxu1 %vm476_vm1, %v19017_v10 }
0x3017   :  { %15718 = vmatpush3.bf16.xpose.msra.mxu1 %v9762_v11  ;;  %15719 = vmatprep.mubr.msk.bf16.mxu1 %vm17108_vm0, %v17107_v35 }
0x3018   :  { %15729 = vmatprep.subr.bf16.mxu1 %v17107_v35 }
0x301a   :  { %15726 = vmatmul.mubr.msk.bf16.vlgmr.msra.gmra.mxu0 %vm476_vm1, %v19028_v45 }
0x301b   :  { %15736 = vmatpush3.bf16.msra.mxu0 %v9948_v27  ;;  %15737 = vmatprep.mubr.msk.bf16.mxu0 %vm17108_vm0, %v17107_v35 }
0x301c   :  { %15747 = vmatprep.subr.bf16.mxu0 %v17107_v35 }
0x301e   :  { %15720 = vmatmul.mubr.msk.bf16.vlgmr.msra.gmra.mxu1 %vm476_vm1, %v19039_v62 }
0x301f   :  { %15730 = vmatpush3.bf16.msra.mxu1 %v9902_v1  ;;  %15731 = vmatprep.mubr.msk.bf16.mxu1 %vm17108_vm0, %v17107_v35 }
0x3020   :  { %15741 = vmatprep.subr.bf16.mxu1 %v17107_v35 }
0x30ce   :  { %v9706_v12 = vpop.f32.mrf.mxu1 }
0x30cf   :  { %v9850_v33 = vsel %vm661_vm3, %v9706_v12, -inf }
0x30d0   :  { %9851 = vmax.xlane.f32.xlu0 %v9850_v33  ;;  %v15709_v28 = vpop.f32.mrf.mxu1 }
0x30d2   :  { %v9709_v14 = vpop.f32.mrf.mxu1 }
0x30d4   :  { %v15710_v42 = vpop.f32.mrf.mxu1 }
0x30d6   :  { %v9752_v56 = vpop.f32.mrf.mxu1 }
0x30d7   :  { %v9853_v44 = vsel %vm661_vm3, %v9752_v56, -inf }
0x30d8   :  { %9854 = vmax.xlane.f32.xlu1 %v9853_v44  ;;  %v15715_v16 = vpop.f32.mrf.mxu1 }
0x30da   :  { %v9755_v59 = vpop.f32.mrf.mxu1  ;;  %v9844_v5 = vpop.f32.mrf.mxu0 }
0x30db   :  { %v9859_v38 = vsel %vm661_vm3, %v9844_v5, -inf }
0x30dc   :  { %v15716_v13 = vpop.f32.mrf.mxu1  ;;  %9860 = vmax.xlane.f32.xlu1 %v9859_v38  ;;  %v15727_v50 = vpop.f32.mrf.mxu0 }
0x30de   :  { %v9798_v26 = vpop.f32.mrf.mxu1  ;;  %v9847_v0 = vpop.f32.mrf.mxu0 }
0x30df   :  { %v9856_v55 = vsel %vm661_vm3, %v9798_v26, -inf }
0x30e0   :  { %v15728_v15 = vpop.f32.mrf.mxu0  ;;  %9857 = vmax.xlane.f32.xlu0 %v9856_v55  ;;  %v15721_v31 = vpop.f32.mrf.mxu1 }
0x30e2   :  { %v9801_v20 = vpop.f32.mrf.mxu1 }
0x30e4   :  { %v15722_v32 = vpop.f32.mrf.mxu1 }
0x3159   :  { %v9852_v4 = vpop.xlane.xlu0 %9851 }
0x315a   :  { %v9862_v21 = vsub.f32 %v9706_v12, %v9852_v4  ;;  %v19075_v12 = vpack.c.bf16 %v18995_v41, %v18995_v41  ;;  %v19085_v41 = vpack.c.bf16 %v19002_v18, %v19002_v18 }
0x315c   :  { %v9866_v36 = vmul.f32 1.442695, %v9862_v21  ;;  %v9994_v42 = vsel %vm713_vm2, %v19075_v12, 0  ;;  %v10040_v38 = vsel %vm713_vm2, %v19085_v41, 0 }
0x315e   :  { %16866 = vpow2.f32 %v9866_v36 }
0x3161   :  { %v9855_v51 = vpop.xlane.xlu1 %9854 }
0x3162   :  { %v9863_v17 = vsub.f32 %v9752_v56, %v9855_v51 }
0x3164   :  { %v9868_v37 = vmul.f32 1.442695, %v9863_v17 }
0x3165   :  { %v9861_v19 = vpop.xlane.xlu1 %9860 }
0x3166   :  { %16868 = vpow2.f32 %v9868_v37  ;;  %v9865_v24 = vsub.f32 %v9844_v5, %v9861_v19 }
0x3168   :  { %v9872_v23 = vmul.f32 1.442695, %v9865_v24 }
0x3169   :  { %v9858_v22 = vpop.xlane.xlu0 %9857 }
0x316a   :  { %16870 = vpow2.f32 %v9872_v23  ;;  %v9864_v25 = vsub.f32 %v9798_v26, %v9858_v22 }
0x316b   :  { %v16867_v46 = vpop.eup %16866 }
0x316c   :  { %v9870_v2 = vmul.f32 1.442695, %v9864_v25  ;;  %v9874_v48 = vsel %vm661_vm3, %v16867_v46, 0.0 }
0x316d   :  { %9875 = vadd.xlane.f32.xlu0 %v9874_v48 }
0x316e   :  { %16872 = vpow2.f32 %v9870_v2 }
0x3173   :  { %v16869_v63 = vpop.eup %16868 }
0x3174   :  { %v9877_v54 = vsel %vm661_vm3, %v16869_v63, 0.0 }
0x3175   :  { %9878 = vadd.xlane.f32.xlu1 %v9877_v54 }
0x3177   :  { %v16871_v7 = vpop.eup %16870 }
0x3178   :  { %v9883_v52 = vsel %vm661_vm3, %v16871_v7, 0.0 }
0x3179   :  { %9884 = vadd.xlane.f32.xlu1 %v9883_v52 }
0x317b   :  { %v16873_v60 = vpop.eup %16872 }
0x317c   :  { %v9880_v29 = vsel %vm661_vm3, %v16873_v60, 0.0 }
0x317d   :  { %9881 = vadd.xlane.f32.xlu0 %v9880_v29 }
0x318a   :  { %10138 = vrot.lane.b32.xlu1 %v18998_v49, %s17109_s29 }
0x318e   :  { %10083 = vrot.lane.b32.xlu1 %v19000_v9, %s17109_s29 }
0x3192   :  { %10135 = vrot.lane.b32.xlu1 %v19017_v10, %s17109_s29 }
0x3193   :  { %10086 = vrot.lane.b32.xlu0 %v18990_v61, %s17109_s29 }
0x3196   :  { %10242 = vrot.lane.b32.xlu1 %v19010_v53, %s17109_s29 }
0x3197   :  { %10190 = vrot.lane.b32.xlu0 %v19013_v40, %s17109_s29 }
0x319a   :  { %10239 = vrot.lane.b32.xlu1 %v19028_v45, %s17109_s29 }
0x319b   :  { %10187 = vrot.lane.b32.xlu0 %v19039_v62, %s17109_s29 }
0x31f6   :  { %v9876_v11 = vpop.xlane.xlu0 %9875 }
0x31f7   :  { %16874 = vrcp.f32 %v9876_v11 }
0x31fe   :  { %v9879_v3 = vpop.xlane.xlu1 %9878 }
0x31ff   :  { %16876 = vrcp.f32 %v9879_v3 }
0x3202   :  { %v9885_v27 = vpop.xlane.xlu1 %9884 }
0x3203   :  { %16878 = vrcp.f32 %v9885_v27 }
0x3204   :  { %v16875_v1 = vpop.eup %16874 }
0x3205   :  { %v9890_v33 = vmul.f32 %v16875_v1, %v16867_v46 }
0x3206   :  { %v9882_v28 = vpop.xlane.xlu0 %9881  ;;  %v10139_v44 = vpop.permute.xlu1 %10138 }
0x3207   :  { %v9894_v14 = vpack.c.bf16 %v9890_v33, %v9890_v33  ;;  %16880 = vrcp.f32 %v9882_v28  ;;  %v10144_v20 = vsel %vm476_vm1, %v10139_v44, 0 }
0x3209   :  { %15732 = vmatmul.mubr.msk.bf16.vlgmr.msra.gmra.mxu1 %vm661_vm3, %v9894_v14 }
0x320a   :  { %15742 = vmatpush3.bf16.msra.mxu1 %v9994_v42  ;;  %15743 = vmatprep.mubr.msk.bf16.mxu1 %vm17108_vm0, %v17107_v35  ;;  %v10084_v13 = vpop.permute.xlu1 %10083  ;;  %v10087_v18 = vpop.permute.xlu0 %10086 }
0x320b   :  { %15753 = vmatprep.subr.bf16.mxu1 %v17107_v35  ;;  %v10092_v32 = vsel %vm476_vm1, %v10087_v18, 0 }
0x320c   :  { %v16877_v56 = vpop.eup %16876 }
0x320d   :  { %v9891_v16 = vmul.f32 %v16877_v56, %v16869_v63 }
0x320e   :  { %v10136_v31 = vpop.permute.xlu1 %10135  ;;  %v10191_v4 = vpop.permute.xlu0 %10190 }
0x320f   :  { %v9895_v59 = vpack.c.bf16 %v9891_v16, %v9891_v16  ;;  %v10196_v36 = vsel %vm476_vm1, %v10191_v4, 0 }
0x3210   :  { %v16879_v5 = vpop.eup %16878 }
0x3211   :  { %15738 = vmatmul.mubr.msk.bf16.vlgmr.msra.gmra.mxu0 %vm661_vm3, %v9895_v59  ;;  %v9893_v50 = vmul.f32 %v16879_v5, %v16871_v7 }
0x3212   :  { %15748 = vmatpush3.bf16.msra.mxu0 %v10040_v38  ;;  %15749 = vmatprep.mubr.msk.bf16.mxu0 %vm17108_vm0, %v17107_v35  ;;  %v10243_v21 = vpop.permute.xlu1 %10242  ;;  %v10188_v17 = vpop.permute.xlu0 %10187 }
0x3213   :  { %15759 = vmatprep.subr.bf16.mxu0 %v17107_v35  ;;  %v9897_v55 = vpack.c.bf16 %v9893_v50, %v9893_v50  ;;  %v10248_v51 = vsel %vm476_vm1, %v10243_v21, 0 }
0x3214   :  { %v16881_v26 = vpop.eup %16880 }
0x3215   :  { %v9892_v0 = vmul.f32 %v16881_v26, %v16873_v60 }
0x3216   :  { %v10240_v37 = vpop.permute.xlu1 %10239 }
0x3217   :  { %v9896_v15 = vpack.c.bf16 %v9892_v0, %v9892_v0 }
0x3219   :  { %15744 = vmatmul.mubr.msk.bf16.vlgmr.msra.gmra.mxu1 %vm661_vm3, %v9896_v15  ;;  %15750 = vmatmul.mubr.msk.bf16.vlgmr.msra.gmra.mxu0 %vm661_vm3, %v9897_v55 }
0x321a   :  { %15754 = vmatpush3.bf16.xpose.msra.mxu1 %v10092_v32  ;;  %15760 = vmatpush3.bf16.xpose.msra.mxu0 %v10144_v20 }
0x321b   :  { %15755 = vmatprep.mubr.msk.bf16.mxu1 %vm17108_vm0, %v17107_v35  ;;  %15761 = vmatprep.mubr.msk.bf16.mxu0 %vm17108_vm0, %v17107_v35 }
0x321c   :  { %15765 = vmatprep.subr.bf16.mxu1 %v17107_v35  ;;  %15771 = vmatprep.subr.bf16.mxu0 %v17107_v35 }
0x3221   :  { %15756 = vmatmul.mubr.msk.bf16.vlgmr.msra.gmra.mxu1 %vm476_vm1, %v10084_v13  ;;  %15762 = vmatmul.mubr.msk.bf16.vlgmr.msra.gmra.mxu0 %vm476_vm1, %v10136_v31 }
0x3222   :  { %15766 = vmatpush3.bf16.xpose.msra.mxu1 %v10196_v36  ;;  %15772 = vmatpush3.bf16.xpose.msra.mxu0 %v10248_v51 }
0x3223   :  { %15767 = vmatprep.mubr.msk.bf16.mxu1 %vm17108_vm0, %v17107_v35  ;;  %15773 = vmatprep.mubr.msk.bf16.mxu0 %vm17108_vm0, %v17107_v35 }
0x3224   :  { %15783 = vmatprep.subr.bf16.mxu0 %v17107_v35  ;;  %15777 = vmatprep.subr.bf16.mxu1 %v17107_v35 }
0x3229   :  { %15768 = vmatmul.mubr.msk.bf16.vlgmr.msra.gmra.mxu1 %vm476_vm1, %v10188_v17  ;;  %15774 = vmatmul.mubr.msk.bf16.vlgmr.msra.gmra.mxu0 %vm476_vm1, %v10240_v37 }
0x322a   :  { %15779 = vmatprep.mubr.msk.bf16.mxu1 %vm17108_vm0, %v17107_v35  ;;  %15785 = vmatprep.mubr.msk.bf16.mxu0 %vm17108_vm0, %v17107_v35 }
0x32c9   :  { %v19119_v19 = vpop.f32.mrf.mxu1 }
0x32cb   :  { %v15733_v24 = vpop.f32.mrf.mxu1 }
0x32cd   :  { %v9941_v23 = vpop.f32.mrf.mxu1 }
0x32cf   :  { %v15734_v22 = vpop.f32.mrf.mxu1 }
0x32d1   :  { %v19121_v25 = vpop.f32.mrf.mxu0 }
0x32d3   :  { %v15739_v46 = vpop.f32.mrf.mxu0 }
0x32d5   :  { %v9987_v2 = vpop.f32.mrf.mxu0 }
0x32d7   :  { %v15740_v48 = vpop.f32.mrf.mxu0 }
0x32d9   :  { %v19123_v63 = vpop.f32.mrf.mxu1  ;;  %v19125_v54 = vpop.f32.mrf.mxu0 }
0x32db   :  { %v15745_v7 = vpop.f32.mrf.mxu1  ;;  %v15751_v52 = vpop.f32.mrf.mxu0 }
0x32dd   :  { %v10033_v60 = vpop.f32.mrf.mxu1  ;;  %v10079_v29 = vpop.f32.mrf.mxu0 }
0x32df   :  { %v15746_v11 = vpop.f32.mrf.mxu1  ;;  %v15752_v3 = vpop.f32.mrf.mxu0 }
0x32e1   :  { %v10128_v27 = vpop.f32.mrf.mxu1  ;;  %v10180_v1 = vpop.f32.mrf.mxu0 }
0x32e2   :  { %v10293_v33 = vsel %vm661_vm3, %v10180_v1, -inf  ;;  %v10290_v28 = vsel %vm661_vm3, %v10128_v27, -inf }
0x32e3   :  { %10294 = vmax.xlane.f32.xlu1 %v10293_v33  ;;  %v15763_v14 = vpop.f32.mrf.mxu0  ;;  %10291 = vmax.xlane.f32.xlu0 %v10290_v28  ;;  %v15757_v42 = vpop.f32.mrf.mxu1 }
0x32e5   :  { %v10131_v56 = vpop.f32.mrf.mxu1  ;;  %v10183_v44 = vpop.f32.mrf.mxu0 }
0x32e7   :  { %v15758_v16 = vpop.f32.mrf.mxu1  ;;  %v15764_v59 = vpop.f32.mrf.mxu0 }
0x32e9   :  { %v10232_v5 = vpop.f32.mrf.mxu1  ;;  %v10284_v38 = vpop.f32.mrf.mxu0 }
0x32ea   :  { %v10296_v13 = vsel %vm661_vm3, %v10232_v5, -inf  ;;  %v10299_v55 = vsel %vm661_vm3, %v10284_v38, -inf }
0x32eb   :  { %v15775_v50 = vpop.f32.mrf.mxu0  ;;  %10297 = vmax.xlane.f32.xlu0 %v10296_v13  ;;  %v15769_v26 = vpop.f32.mrf.mxu1 }
0x32ed   :  { %v10235_v0 = vpop.f32.mrf.mxu1  ;;  %v10287_v18 = vpop.f32.mrf.mxu0 }
0x32ef   :  { %v15776_v15 = vpop.f32.mrf.mxu0  ;;  %10300 = vmax.xlane.f32.xlu0 %v10299_v55  ;;  %v15770_v31 = vpop.f32.mrf.mxu1 }
0x32f4   :  { %10388 = vrot.lane.b32.xlu1 %v19020_v30, %s17109_s29 }
0x32f8   :  { %10437 = vrot.lane.b32.xlu1 %v19075_v12, %s17109_s29 }
0x32fc   :  { %10486 = vrot.lane.b32.xlu1 %v19085_v41, %s17109_s29 }
0x336c   :  { %v10295_v20 = vpop.xlane.xlu1 %10294  ;;  %v10292_v32 = vpop.xlane.xlu0 %10291 }
0x336d   :  { %v10303_v4 = vsub.f32 %v10180_v1, %v10295_v20  ;;  %v10302_v21 = vsub.f32 %v10128_v27, %v10292_v32 }
0x336f   :  { %v10308_v36 = vmul.f32 1.442695, %v10303_v4  ;;  %v10306_v51 = vmul.f32 1.442695, %v10302_v21 }
0x3370   :  { %v10389_v17 = vpop.permute.xlu1 %10388 }
0x3371   :  { %16882 = vpow2.f32 %v10308_v36  ;;  %v10394_v37 = vsel %vm713_vm2, %v10389_v17, 0 }
0x3372   :  { %16884 = vpow2.f32 %v10306_v51  ;;  %15784 = vmatpush3.bf16.msra.mxu0 %v10394_v37 }
0x3373   :  { %15795 = vmatprep.subr.bf16.mxu0 %v17107_v35 }
0x3374   :  { %v10298_v2 = vpop.xlane.xlu0 %10297  ;;  %v10438_v33 = vpop.permute.xlu1 %10437 }
0x3375   :  { %v10304_v52 = vsub.f32 %v10232_v5, %v10298_v2  ;;  %v10443_v0 = vsel %vm713_vm2, %v10438_v33, 0 }
0x3377   :  { %v10310_v29 = vmul.f32 1.442695, %v10304_v52 }
0x3378   :  { %v10301_v48 = vpop.xlane.xlu0 %10300  ;;  %v10487_v28 = vpop.permute.xlu1 %10486 }
0x3379   :  { %v10305_v7 = vsub.f32 %v10284_v38, %v10301_v48  ;;  %v10492_v26 = vsel %vm713_vm2, %v10487_v28, 0 }
0x337b   :  { %v10312_v60 = vmul.f32 1.442695, %v10305_v7 }
0x337d   :  { %16886 = vpow2.f32 %v10312_v60 }
0x337e   :  { %v16883_v24 = vpop.eup %16882  ;;  %16888 = vpow2.f32 %v10310_v29 }
0x337f   :  { %v16885_v23 = vpop.eup %16884  ;;  %v10317_v22 = vsel %vm661_vm3, %v16883_v24, 0.0 }
0x3380   :  { %10318 = vadd.xlane.f32.xlu1 %v10317_v22  ;;  %v10314_v46 = vsel %vm661_vm3, %v16885_v23, 0.0 }
0x3381   :  { %10315 = vadd.xlane.f32.xlu0 %v10314_v46 }
0x338a   :  { %v16887_v11 = vpop.eup %16886 }
0x338b   :  { %v16889_v3 = vpop.eup %16888  ;;  %v10323_v27 = vsel %vm661_vm3, %v16887_v11, 0.0 }
0x338c   :  { %v10320_v1 = vsel %vm661_vm3, %v16889_v3, 0.0 }
0x3391   :  { %10586 = vrot.lane.b32.xlu1 %v18998_v49, %s17110_s30 }
0x3397   :  { %10339 = vrot.lane.b32.xlu0 %v19031_v47, %s17109_s29 }
0x33b5   :  { %10324 = vadd.xlane.f32.xlu1 %v10323_v27 }
0x33b6   :  { %10321 = vadd.xlane.f32.xlu0 %v10320_v1 }
0x33c6   :  { %10584 = vrot.lane.b32.xlu1 %v19017_v10, %s17110_s30 }
0x33ca   :  { %10686 = vrot.lane.b32.xlu1 %v19010_v53, %s17110_s30 }
0x33cc   :  { %10536 = vrot.lane.b32.xlu0 %v18990_v61, %s17110_s30 }
0x33ce   :  { %10684 = vrot.lane.b32.xlu1 %v19028_v45, %s17110_s30 }
0x33d0   :  { %10534 = vrot.lane.b32.xlu0 %v19000_v9, %s17110_s30 }
0x33d4   :  { %10636 = vrot.lane.b32.xlu0 %v19013_v40, %s17110_s30 }
0x33d8   :  { %10634 = vrot.lane.b32.xlu0 %v19039_v62, %s17110_s30 }
0x3409   :  { %v10319_v14 = vpop.xlane.xlu1 %10318 }
0x340a   :  { %16890 = vrcp.f32 %v10319_v14  ;;  %v10316_v42 = vpop.xlane.xlu0 %10315 }
0x340b   :  { %16892 = vrcp.f32 %v10316_v42 }
0x340d   :  { %v10587_v18 = vpop.permute.xlu1 %10586 }
0x340e   :  { %v10340_v56 = vpop.permute.xlu0 %10339  ;;  %v10592_v37 = vsel %vm476_vm1, %v10587_v18, 0 }
0x340f   :  { %v10345_v44 = vsel %vm713_vm2, %v10340_v56, 0 }
0x3410   :  { %15778 = vmatpush3.bf16.msra.mxu1 %v10345_v44 }
0x3411   :  { %15789 = vmatprep.subr.bf16.mxu1 %v17107_v35 }
0x3417   :  { %v16891_v16 = vpop.eup %16890 }
0x3418   :  { %v16893_v59 = vpop.eup %16892  ;;  %v10331_v5 = vmul.f32 %v16891_v16, %v16883_v24 }
0x3419   :  { %v10330_v38 = vmul.f32 %v16893_v59, %v16885_v23 }
0x341a   :  { %v10335_v13 = vpack.c.bf16 %v10331_v5, %v10331_v5 }
0x341b   :  { %v10334_v50 = vpack.c.bf16 %v10330_v38, %v10330_v38 }
0x341c   :  { %15786 = vmatmul.mubr.msk.bf16.vlgmr.msra.gmra.mxu0 %vm661_vm3, %v10335_v13 }
0x341d   :  { %15780 = vmatmul.mubr.msk.bf16.vlgmr.msra.gmra.mxu1 %vm661_vm3, %v10334_v50  ;;  %15796 = vmatpush3.bf16.msra.mxu0 %v10492_v26 }
0x341e   :  { %15790 = vmatpush3.bf16.msra.mxu1 %v10443_v0  ;;  %15791 = vmatprep.mubr.msk.bf16.mxu1 %vm17108_vm0, %v17107_v35 }
0x341f   :  { %15797 = vmatprep.mubr.msk.bf16.mxu0 %vm17108_vm0, %v17107_v35  ;;  %15801 = vmatprep.subr.bf16.mxu1 %v17107_v35 }
0x3420   :  { %15807 = vmatprep.subr.bf16.mxu0 %v17107_v35 }
0x343e   :  { %v10325_v55 = vpop.xlane.xlu1 %10324 }
0x343f   :  { %16894 = vrcp.f32 %v10325_v55  ;;  %v10322_v15 = vpop.xlane.xlu0 %10321 }
0x3440   :  { %16896 = vrcp.f32 %v10322_v15 }
0x3442   :  { %v10585_v17 = vpop.permute.xlu1 %10584 }
0x3443   :  { %v10537_v31 = vpop.permute.xlu0 %10536 }
0x3444   :  { %v10542_v23 = vsel %vm476_vm1, %v10537_v31, 0 }
0x3446   :  { %v10687_v22 = vpop.permute.xlu1 %10686 }
0x3447   :  { %v10535_v24 = vpop.permute.xlu0 %10534  ;;  %v10692_v2 = vsel %vm476_vm1, %v10687_v22, 0 }
0x344a   :  { %v10685_v7 = vpop.permute.xlu1 %10684 }
0x344b   :  { %v10637_v46 = vpop.permute.xlu0 %10636 }
0x344c   :  { %v16895_v20 = vpop.eup %16894  ;;  %v10642_v48 = vsel %vm476_vm1, %v10637_v46, 0 }
0x344d   :  { %v16897_v32 = vpop.eup %16896  ;;  %v10333_v4 = vmul.f32 %v16895_v20, %v16887_v11 }
0x344e   :  { %v10332_v21 = vmul.f32 %v16897_v32, %v16889_v3 }
0x344f   :  { %v10337_v36 = vpack.c.bf16 %v10333_v4, %v10333_v4  ;;  %v10635_v52 = vpop.permute.xlu0 %10634 }
0x3450   :  { %v10336_v51 = vpack.c.bf16 %v10332_v21, %v10332_v21 }
0x3451   :  { %15798 = vmatmul.mubr.msk.bf16.vlgmr.msra.gmra.mxu0 %vm661_vm3, %v10337_v36 }
0x3452   :  { %15792 = vmatmul.mubr.msk.bf16.vlgmr.msra.gmra.mxu1 %vm661_vm3, %v10336_v51  ;;  %15808 = vmatpush3.bf16.xpose.msra.mxu0 %v10592_v37 }
0x3453   :  { %15802 = vmatpush3.bf16.xpose.msra.mxu1 %v10542_v23  ;;  %15803 = vmatprep.mubr.msk.bf16.mxu1 %vm17108_vm0, %v17107_v35 }
0x3454   :  { %15809 = vmatprep.mubr.msk.bf16.mxu0 %vm17108_vm0, %v17107_v35  ;;  %15813 = vmatprep.subr.bf16.mxu1 %v17107_v35 }
0x3455   :  { %15819 = vmatprep.subr.bf16.mxu0 %v17107_v35 }
0x3459   :  { %15810 = vmatmul.mubr.msk.bf16.vlgmr.msra.gmra.mxu0 %vm476_vm1, %v10585_v17 }
0x345a   :  { %15804 = vmatmul.mubr.msk.bf16.vlgmr.msra.gmra.mxu1 %vm476_vm1, %v10535_v24  ;;  %15820 = vmatpush3.bf16.xpose.msra.mxu0 %v10692_v2 }
0x345b   :  { %15814 = vmatpush3.bf16.xpose.msra.mxu1 %v10642_v48  ;;  %15815 = vmatprep.mubr.msk.bf16.mxu1 %vm17108_vm0, %v17107_v35 }
0x345c   :  { %15821 = vmatprep.mubr.msk.bf16.mxu0 %vm17108_vm0, %v17107_v35  ;;  %15831 = vmatprep.subr.bf16.mxu0 %v17107_v35 }
0x345d   :  { %15825 = vmatprep.subr.bf16.mxu1 %v17107_v35 }
0x3461   :  { %15822 = vmatmul.mubr.msk.bf16.vlgmr.msra.gmra.mxu0 %vm476_vm1, %v10685_v7 }
0x3462   :  { %15816 = vmatmul.mubr.msk.bf16.vlgmr.msra.gmra.mxu1 %vm476_vm1, %v10635_v52  ;;  %15833 = vmatprep.mubr.msk.bf16.mxu0 %vm17108_vm0, %v17107_v35 }
0x3463   :  { %15827 = vmatprep.mubr.msk.bf16.mxu1 %vm17108_vm0, %v17107_v35 }
0x34dc   :  { %v19199_v60 = vpop.f32.mrf.mxu0 }
0x34dd   :  { %v19201_v29 = vpop.f32.mrf.mxu1 }
0x34de   :  { %v16268_v11 = vpack.i.bf16 %v19199_v60, %v19201_v29  ;;  %v15787_v3 = vpop.f32.mrf.mxu0 }
0x34df   :  { %v15781_v27 = vpop.f32.mrf.mxu1 }
0x34e0   :  { %v10433_v1 = vpop.f32.mrf.mxu0 }
0x34e1   :  { %v10384_v33 = vpop.f32.mrf.mxu1 }
0x34e2   :  { %v15788_v28 = vpop.f32.mrf.mxu0 }
0x34e3   :  { %v15782_v14 = vpop.f32.mrf.mxu1 }
0x3511   :  { %v19205_v42 = vpop.f32.mrf.mxu0 }
0x3512   :  { %v19207_v56 = vpop.f32.mrf.mxu1 }
0x3513   :  { %v15799_v16 = vpop.f32.mrf.mxu0 }
0x3514   :  { %v15793_v59 = vpop.f32.mrf.mxu1 }
0x3515   :  { %v10531_v5 = vpop.f32.mrf.mxu0 }
0x3516   :  { %v10482_v38 = vpop.f32.mrf.mxu1 }
0x3517   :  { %v15800_v13 = vpop.f32.mrf.mxu0 }
0x3518   :  { %v15794_v50 = vpop.f32.mrf.mxu1 }
0x3519   :  { %v10628_v26 = vpop.f32.mrf.mxu0 }
0x351a   :  { %v10578_v0 = vpop.f32.mrf.mxu1  ;;  %v10737_v18 = vsel %vm661_vm3, %v10628_v26, -inf }
0x351b   :  { %10738 = vmax.xlane.f32.xlu1 %v10737_v18  ;;  %v15811_v55 = vpop.f32.mrf.mxu0  ;;  %v10734_v15 = vsel %vm661_vm3, %v10578_v0, -inf }
0x351c   :  { %10735 = vmax.xlane.f32.xlu0 %v10734_v15  ;;  %v15805_v31 = vpop.f32.mrf.mxu1 }
0x351d   :  { %v10631_v20 = vpop.f32.mrf.mxu0 }
0x351e   :  { %v10581_v32 = vpop.f32.mrf.mxu1 }
0x351f   :  { %v15812_v4 = vpop.f32.mrf.mxu0 }
0x3520   :  { %v15806_v21 = vpop.f32.mrf.mxu1 }
0x3521   :  { %v10728_v36 = vpop.f32.mrf.mxu0 }
0x3522   :  { %v10678_v51 = vpop.f32.mrf.mxu1  ;;  %v10743_v2 = vsel %vm661_vm3, %v10728_v36, -inf }
0x3523   :  { %v15823_v17 = vpop.f32.mrf.mxu0  ;;  %v10740_v37 = vsel %vm661_vm3, %v10678_v51, -inf }
0x3524   :  { %10741 = vmax.xlane.f32.xlu0 %v10740_v37  ;;  %v15817_v24 = vpop.f32.mrf.mxu1 }
0x3525   :  { %v10731_v23 = vpop.f32.mrf.mxu0 }
0x3526   :  { %v10681_v22 = vpop.f32.mrf.mxu1 }
0x3527   :  { %v15824_v46 = vpop.f32.mrf.mxu0 }
0x3528   :  { %10744 = vmax.xlane.f32.xlu0 %v10743_v2  ;;  %v15818_v48 = vpop.f32.mrf.mxu1 }
0x352c   :  { %10830 = vrot.lane.b32.xlu1 %v19020_v30, %s17110_s30 }
0x3530   :  { %10878 = vrot.lane.b32.xlu1 %v19075_v12, %s17110_s30 }
0x3534   :  { %10926 = vrot.lane.b32.xlu1 %v19085_v41, %s17110_s30 }
0x35a4   :  { %v10739_v7 = vpop.xlane.xlu1 %10738 }
0x35a5   :  { %v10747_v52 = vsub.f32 %v10628_v26, %v10739_v7  ;;  %v10736_v3 = vpop.xlane.xlu0 %10735 }
0x35a6   :  { %v10746_v27 = vsub.f32 %v10578_v0, %v10736_v3 }
0x35a7   :  { %v10752_v1 = vmul.f32 1.442695, %v10747_v52 }
0x35a8   :  { %v10750_v33 = vmul.f32 1.442695, %v10746_v27  ;;  %v10831_v28 = vpop.permute.xlu1 %10830 }
0x35a9   :  { %16898 = vpow2.f32 %v10752_v1  ;;  %v10836_v14 = vsel %vm713_vm2, %v10831_v28, 0 }
0x35aa   :  { %16900 = vpow2.f32 %v10750_v33  ;;  %15832 = vmatpush3.bf16.msra.mxu0 %v10836_v14 }
0x35ab   :  { %15843 = vmatprep.subr.bf16.mxu0 %v17107_v35 }
0x35ac   :  { %v10879_v4 = vpop.permute.xlu1 %10878 }
0x35ad   :  { %v10742_v13 = vpop.xlane.xlu0 %10741  ;;  %v10884_v52 = vsel %vm713_vm2, %v10879_v4, 0 }
0x35ae   :  { %v10748_v0 = vsub.f32 %v10678_v51, %v10742_v13 }
0x35b0   :  { %v10754_v55 = vmul.f32 1.442695, %v10748_v0  ;;  %v10927_v21 = vpop.permute.xlu1 %10926 }
0x35b1   :  { %v10745_v50 = vpop.xlane.xlu0 %10744  ;;  %v10932_v7 = vsel %vm713_vm2, %v10927_v21, 0 }
0x35b2   :  { %v10749_v26 = vsub.f32 %v10728_v36, %v10745_v50 }
0x35b4   :  { %v10756_v18 = vmul.f32 1.442695, %v10749_v26 }
0x35b6   :  { %v16899_v16 = vpop.eup %16898  ;;  %16902 = vpow2.f32 %v10756_v18 }
0x35b7   :  { %v16901_v59 = vpop.eup %16900  ;;  %v10761_v5 = vsel %vm661_vm3, %v16899_v16, 0.0  ;;  %16904 = vpow2.f32 %v10754_v55 }
0x35b8   :  { %10762 = vadd.xlane.f32.xlu1 %v10761_v5  ;;  %v10758_v38 = vsel %vm661_vm3, %v16901_v59, 0.0 }
0x35b9   :  { %10759 = vadd.xlane.f32.xlu0 %v10758_v38 }
0x35c3   :  { %v16903_v15 = vpop.eup %16902 }
0x35c4   :  { %v16905_v31 = vpop.eup %16904  ;;  %v10767_v20 = vsel %vm661_vm3, %v16903_v15, 0.0 }
0x35c5   :  { %v10764_v32 = vsel %vm661_vm3, %v16905_v31, 0.0 }
0x35c9   :  { %11026 = vrot.lane.b32.xlu1 %v18998_v49, %s17111_s15 }
0x35cf   :  { %10782 = vrot.lane.b32.xlu0 %v19031_v47, %s17110_s30 }
0x35ed   :  { %10768 = vadd.xlane.f32.xlu1 %v10767_v20 }
0x35ee   :  { %10765 = vadd.xlane.f32.xlu0 %v10764_v32 }
0x35fe   :  { %11024 = vrot.lane.b32.xlu1 %v19017_v10, %s17111_s15 }
0x3602   :  { %11126 = vrot.lane.b32.xlu1 %v19010_v53, %s17111_s15 }
0x3604   :  { %10976 = vrot.lane.b32.xlu0 %v18990_v61, %s17111_s15 }
0x3606   :  { %11124 = vrot.lane.b32.xlu1 %v19028_v45, %s17111_s15 }
0x3608   :  { %10974 = vrot.lane.b32.xlu0 %v19000_v9, %s17111_s15 }
0x360c   :  { %11076 = vrot.lane.b32.xlu0 %v19013_v40, %s17111_s15 }
0x3610   :  { %11074 = vrot.lane.b32.xlu0 %v19039_v62, %s17111_s15 }
0x3641   :  { %v10763_v36 = vpop.xlane.xlu1 %10762 }
0x3642   :  { %16906 = vrcp.f32 %v10763_v36  ;;  %v10760_v51 = vpop.xlane.xlu0 %10759 }
0x3643   :  { %16908 = vrcp.f32 %v10760_v51 }
0x3645   :  { %v11027_v3 = vpop.permute.xlu1 %11026 }
0x3646   :  { %v10783_v17 = vpop.permute.xlu0 %10782  ;;  %v11032_v50 = vsel %vm476_vm1, %v11027_v3, 0 }
0x3647   :  { %v10788_v37 = vsel %vm713_vm2, %v10783_v17, 0 }
0x3648   :  { %15826 = vmatpush3.bf16.msra.mxu1 %v10788_v37 }
0x3649   :  { %15837 = vmatprep.subr.bf16.mxu1 %v17107_v35 }
0x364f   :  { %v16907_v24 = vpop.eup %16906 }
0x3650   :  { %v16909_v23 = vpop.eup %16908  ;;  %v10775_v22 = vmul.f32 %v16907_v24, %v16899_v16 }
0x3651   :  { %v10774_v46 = vmul.f32 %v16909_v23, %v16901_v59 }
0x3652   :  { %v10779_v2 = vpack.c.bf16 %v10775_v22, %v10775_v22 }
0x3653   :  { %v10778_v48 = vpack.c.bf16 %v10774_v46, %v10774_v46 }
0x3654   :  { %15834 = vmatmul.mubr.msk.bf16.vlgmr.msra.gmra.mxu0 %vm661_vm3, %v10779_v2 }
0x3655   :  { %15828 = vmatmul.mubr.msk.bf16.vlgmr.msra.gmra.mxu1 %vm661_vm3, %v10778_v48  ;;  %15844 = vmatpush3.bf16.msra.mxu0 %v10932_v7 }
0x3656   :  { %15838 = vmatpush3.bf16.msra.mxu1 %v10884_v52  ;;  %15839 = vmatprep.mubr.msk.bf16.mxu1 %vm17108_vm0, %v17107_v35 }
0x3657   :  { %15845 = vmatprep.mubr.msk.bf16.mxu0 %vm17108_vm0, %v17107_v35  ;;  %15849 = vmatprep.subr.bf16.mxu1 %v17107_v35 }
0x3658   :  { %15855 = vmatprep.subr.bf16.mxu0 %v17107_v35 }
0x3676   :  { %v10769_v27 = vpop.xlane.xlu1 %10768 }
0x3677   :  { %16910 = vrcp.f32 %v10769_v27  ;;  %v10766_v1 = vpop.xlane.xlu0 %10765 }
0x3678   :  { %16912 = vrcp.f32 %v10766_v1 }
0x367a   :  { %v11025_v13 = vpop.permute.xlu1 %11024 }
0x367b   :  { %v10977_v33 = vpop.permute.xlu0 %10976 }
0x367c   :  { %v10982_v0 = vsel %vm476_vm1, %v10977_v33, 0 }
0x367e   :  { %v11127_v18 = vpop.permute.xlu1 %11126 }
0x367f   :  { %v10975_v26 = vpop.permute.xlu0 %10974 }
0x3682   :  { %v11125_v20 = vpop.permute.xlu1 %11124 }
0x3683   :  { %v11077_v55 = vpop.permute.xlu0 %11076 }
0x3684   :  { %v16911_v28 = vpop.eup %16910 }
0x3685   :  { %v16913_v14 = vpop.eup %16912  ;;  %v10777_v16 = vmul.f32 %v16911_v28, %v16903_v15  ;;  %v11132_v15 = vsel %vm476_vm1, %v11127_v18, 0 }
0x3686   :  { %v10776_v59 = vmul.f32 %v16913_v14, %v16905_v31  ;;  %v11082_v31 = vsel %vm476_vm1, %v11077_v55, 0 }
0x3687   :  { %v10781_v5 = vpack.c.bf16 %v10777_v16, %v10777_v16  ;;  %v11075_v32 = vpop.permute.xlu0 %11074 }
0x3688   :  { %v10780_v38 = vpack.c.bf16 %v10776_v59, %v10776_v59 }
0x3689   :  { %15846 = vmatmul.mubr.msk.bf16.vlgmr.msra.gmra.mxu0 %vm661_vm3, %v10781_v5 }
0x368a   :  { %15840 = vmatmul.mubr.msk.bf16.vlgmr.msra.gmra.mxu1 %vm661_vm3, %v10780_v38  ;;  %15856 = vmatpush3.bf16.xpose.msra.mxu0 %v11032_v50 }
0x368b   :  { %15850 = vmatpush3.bf16.xpose.msra.mxu1 %v10982_v0  ;;  %15851 = vmatprep.mubr.msk.bf16.mxu1 %vm17108_vm0, %v17107_v35 }
0x368c   :  { %15857 = vmatprep.mubr.msk.bf16.mxu0 %vm17108_vm0, %v17107_v35  ;;  %15861 = vmatprep.subr.bf16.mxu1 %v17107_v35 }
0x368d   :  { %15867 = vmatprep.subr.bf16.mxu0 %v17107_v35 }
0x3691   :  { %15858 = vmatmul.mubr.msk.bf16.vlgmr.msra.gmra.mxu0 %vm476_vm1, %v11025_v13 }
0x3692   :  { %15852 = vmatmul.mubr.msk.bf16.vlgmr.msra.gmra.mxu1 %vm476_vm1, %v10975_v26  ;;  %15868 = vmatpush3.bf16.xpose.msra.mxu0 %v11132_v15 }
0x3693   :  { %15862 = vmatpush3.bf16.xpose.msra.mxu1 %v11082_v31  ;;  %15863 = vmatprep.mubr.msk.bf16.mxu1 %vm17108_vm0, %v17107_v35 }
0x3694   :  { %15869 = vmatprep.mubr.msk.bf16.mxu0 %vm17108_vm0, %v17107_v35  ;;  %15879 = vmatprep.subr.bf16.mxu0 %v17107_v35 }
0x3695   :  { %15873 = vmatprep.subr.bf16.mxu1 %v17107_v35 }
0x3699   :  { %15870 = vmatmul.mubr.msk.bf16.vlgmr.msra.gmra.mxu0 %vm476_vm1, %v11125_v20 }
0x369a   :  { %15864 = vmatmul.mubr.msk.bf16.vlgmr.msra.gmra.mxu1 %vm476_vm1, %v11075_v32  ;;  %15881 = vmatprep.mubr.msk.bf16.mxu0 %vm17108_vm0, %v17107_v35 }
0x369b   :  { %15875 = vmatprep.mubr.msk.bf16.mxu1 %vm17108_vm0, %v17107_v35 }
0x3714   :  { %v19283_v4 = vpop.f32.mrf.mxu0 }
0x3715   :  { %v19285_v21 = vpop.f32.mrf.mxu1 }
0x3716   :  { %v16278_v36 = vpack.i.bf16 %v19283_v4, %v19285_v21  ;;  %v15835_v51 = vpop.f32.mrf.mxu0 }
0x3717   :  { %v15829_v17 = vpop.f32.mrf.mxu1 }
0x3718   :  { %v10875_v37 = vpop.f32.mrf.mxu0 }
0x3719   :  { %v10827_v24 = vpop.f32.mrf.mxu1 }
0x371a   :  { %v15836_v23 = vpop.f32.mrf.mxu0 }
0x371b   :  { %v15830_v22 = vpop.f32.mrf.mxu1 }
0x3749   :  { %v19289_v46 = vpop.f32.mrf.mxu0 }
0x374a   :  { %v19291_v2 = vpop.f32.mrf.mxu1 }
0x374b   :  { %v15847_v7 = vpop.f32.mrf.mxu0  ;;  %v19861_v4 = vpack.i.bf16 %v19289_v46, %v19291_v2 }
0x374c   :  { %v15841_v52 = vpop.f32.mrf.mxu1 }
0x374d   :  { %v10971_v3 = vpop.f32.mrf.mxu0 }
0x374e   :  { %v10923_v27 = vpop.f32.mrf.mxu1 }
0x374f   :  { %v15848_v1 = vpop.f32.mrf.mxu0 }
0x3750   :  { %v15842_v33 = vpop.f32.mrf.mxu1 }
0x3751   :  { %v11068_v28 = vpop.f32.mrf.mxu0 }
0x3752   :  { %v11018_v14 = vpop.f32.mrf.mxu1  ;;  %v11177_v16 = vsel %vm661_vm3, %v11068_v28, -inf }
0x3753   :  { %11178 = vmax.xlane.f32.xlu1 %v11177_v16  ;;  %v15859_v59 = vpop.f32.mrf.mxu0  ;;  %v11174_v5 = vsel %vm661_vm3, %v11018_v14, -inf }
0x3754   :  { %11175 = vmax.xlane.f32.xlu0 %v11174_v5  ;;  %v15853_v38 = vpop.f32.mrf.mxu1 }
0x3755   :  { %v11071_v13 = vpop.f32.mrf.mxu0 }
0x3756   :  { %v11021_v50 = vpop.f32.mrf.mxu1 }
0x3757   :  { %v15860_v26 = vpop.f32.mrf.mxu0 }
0x3758   :  { %v15854_v0 = vpop.f32.mrf.mxu1 }
0x3759   :  { %v11168_v18 = vpop.f32.mrf.mxu0 }
0x375a   :  { %v11118_v55 = vpop.f32.mrf.mxu1  ;;  %v11183_v37 = vsel %vm661_vm3, %v11168_v18, -inf }
0x375b   :  { %v15871_v15 = vpop.f32.mrf.mxu0  ;;  %v11180_v31 = vsel %vm661_vm3, %v11118_v55, -inf }
0x375c   :  { %11181 = vmax.xlane.f32.xlu0 %v11180_v31  ;;  %v15865_v20 = vpop.f32.mrf.mxu1 }
0x375d   :  { %v11171_v32 = vpop.f32.mrf.mxu0 }
0x375e   :  { %v11121_v51 = vpop.f32.mrf.mxu1 }
0x375f   :  { %v15872_v17 = vpop.f32.mrf.mxu0 }
0x3760   :  { %11184 = vmax.xlane.f32.xlu0 %v11183_v37  ;;  %v15866_v24 = vpop.f32.mrf.mxu1 }
0x3764   :  { %11270 = vrot.lane.b32.xlu1 %v19020_v30, %s17111_s15 }
0x3768   :  { %11318 = vrot.lane.b32.xlu1 %v19075_v12, %s17111_s15 }
0x376c   :  { %11366 = vrot.lane.b32.xlu1 %v19085_v41, %s17111_s15 }
0x37dc   :  { %v11179_v23 = vpop.xlane.xlu1 %11178 }
0x37dd   :  { %v11187_v22 = vsub.f32 %v11068_v28, %v11179_v23  ;;  %v11176_v7 = vpop.xlane.xlu0 %11175 }
0x37de   :  { %v11186_v52 = vsub.f32 %v11018_v14, %v11176_v7 }
0x37df   :  { %v11192_v3 = vmul.f32 1.442695, %v11187_v22 }
0x37e0   :  { %v11190_v27 = vmul.f32 1.442695, %v11186_v52  ;;  %v11271_v1 = vpop.permute.xlu1 %11270 }
0x37e1   :  { %16914 = vpow2.f32 %v11192_v3  ;;  %v11276_v33 = vsel %vm713_vm2, %v11271_v1, 0 }
0x37e2   :  { %16916 = vpow2.f32 %v11190_v27  ;;  %15880 = vmatpush3.bf16.msra.mxu0 %v11276_v33 }
0x37e3   :  { %15891 = vmatprep.subr.bf16.mxu0 %v17107_v35 }
0x37e5   :  { %v11182_v28 = vpop.xlane.xlu0 %11181 }
0x37e6   :  { %v11188_v50 = vsub.f32 %v11118_v55, %v11182_v28 }
0x37e8   :  { %v11194_v0 = vmul.f32 1.442695, %v11188_v50 }
0x37e9   :  { %v11185_v14 = vpop.xlane.xlu0 %11184 }
0x37ea   :  { %v11189_v13 = vsub.f32 %v11168_v18, %v11185_v14  ;;  %v11319_v18 = vpop.permute.xlu1 %11318 }
0x37eb   :  { %v11324_v33 = vsel %vm713_vm2, %v11319_v18, 0 }
0x37ec   :  { %v11196_v26 = vmul.f32 1.442695, %v11189_v13 }
0x37ee   :  { %v16915_v16 = vpop.eup %16914  ;;  %16918 = vpow2.f32 %v11196_v26  ;;  %v11367_v55 = vpop.permute.xlu1 %11366 }
0x37ef   :  { %v16917_v59 = vpop.eup %16916  ;;  %v11201_v5 = vsel %vm661_vm3, %v16915_v16, 0.0  ;;  %16920 = vpow2.f32 %v11194_v0  ;;  %v11372_v1 = vsel %vm713_vm2, %v11367_v55, 0 }
0x37f0   :  { %11202 = vadd.xlane.f32.xlu1 %v11201_v5  ;;  %v11198_v38 = vsel %vm661_vm3, %v16917_v59, 0.0 }
0x37f1   :  { %11199 = vadd.xlane.f32.xlu0 %v11198_v38 }
0x37fb   :  { %v16919_v15 = vpop.eup %16918 }
0x37fc   :  { %v16921_v31 = vpop.eup %16920  ;;  %v11207_v20 = vsel %vm661_vm3, %v16919_v15, 0.0 }
0x37fd   :  { %v11204_v32 = vsel %vm661_vm3, %v16921_v31, 0.0 }
0x3801   :  { %11466 = vrot.lane.b32.xlu1 %v18998_v49, %s17097_s16 }
0x3807   :  { %11222 = vrot.lane.b32.xlu0 %v19031_v47, %s17111_s15 }
0x3825   :  { %11208 = vadd.xlane.f32.xlu1 %v11207_v20 }
0x3826   :  { %11205 = vadd.xlane.f32.xlu0 %v11204_v32 }
0x3836   :  { %11464 = vrot.lane.b32.xlu1 %v19017_v10, %s17097_s16 }
0x383a   :  { %11566 = vrot.lane.b32.xlu1 %v19010_v53, %s17097_s16 }
0x383c   :  { %11416 = vrot.lane.b32.xlu0 %v18990_v61, %s17097_s16 }
0x383e   :  { %11564 = vrot.lane.b32.xlu1 %v19028_v45, %s17097_s16 }
0x3840   :  { %11414 = vrot.lane.b32.xlu0 %v19000_v9, %s17097_s16 }
0x3844   :  { %11516 = vrot.lane.b32.xlu0 %v19013_v40, %s17097_s16 }
0x3848   :  { %11514 = vrot.lane.b32.xlu0 %v19039_v62, %s17097_s16 }
0x3879   :  { %v11203_v51 = vpop.xlane.xlu1 %11202 }
0x387a   :  { %16922 = vrcp.f32 %v11203_v51  ;;  %v11200_v17 = vpop.xlane.xlu0 %11199 }
0x387b   :  { %16924 = vrcp.f32 %v11200_v17 }
0x387e   :  { %v11223_v37 = vpop.permute.xlu0 %11222 }
0x387f   :  { %v11228_v24 = vsel %vm713_vm2, %v11223_v37, 0 }
0x3880   :  { %15874 = vmatpush3.bf16.msra.mxu1 %v11228_v24 }
0x3881   :  { %15885 = vmatprep.subr.bf16.mxu1 %v17107_v35 }
0x3887   :  { %v16923_v23 = vpop.eup %16922 }
0x3888   :  { %v16925_v22 = vpop.eup %16924  ;;  %v11215_v7 = vmul.f32 %v16923_v23, %v16915_v16  ;;  %v11467_v16 = vpop.permute.xlu1 %11466 }
0x3889   :  { %v11214_v52 = vmul.f32 %v16925_v22, %v16917_v59  ;;  %v11472_v32 = vsel %vm476_vm1, %v11467_v16, 0 }
0x388a   :  { %v11219_v3 = vpack.c.bf16 %v11215_v7, %v11215_v7 }
0x388b   :  { %v11218_v27 = vpack.c.bf16 %v11214_v52, %v11214_v52 }
0x388c   :  { %15882 = vmatmul.mubr.msk.bf16.vlgmr.msra.gmra.mxu0 %vm661_vm3, %v11219_v3 }
0x388d   :  { %15876 = vmatmul.mubr.msk.bf16.vlgmr.msra.gmra.mxu1 %vm661_vm3, %v11218_v27  ;;  %15892 = vmatpush3.bf16.msra.mxu0 %v11372_v1 }
0x388e   :  { %15886 = vmatpush3.bf16.msra.mxu1 %v11324_v33  ;;  %15887 = vmatprep.mubr.msk.bf16.mxu1 %vm17108_vm0, %v17107_v35 }
0x388f   :  { %15893 = vmatprep.mubr.msk.bf16.mxu0 %vm17108_vm0, %v17107_v35  ;;  %15897 = vmatprep.subr.bf16.mxu1 %v17107_v35 }
0x3890   :  { %15903 = vmatprep.subr.bf16.mxu0 %v17107_v35 }
0x38ae   :  { %v11209_v59 = vpop.xlane.xlu1 %11208 }
0x38af   :  { %16926 = vrcp.f32 %v11209_v59  ;;  %v11206_v5 = vpop.xlane.xlu0 %11205 }
0x38b0   :  { %16928 = vrcp.f32 %v11206_v5 }
0x38b2   :  { %v11465_v20 = vpop.permute.xlu1 %11464 }
0x38b3   :  { %v11417_v38 = vpop.permute.xlu0 %11416 }
0x38b4   :  { %v11422_v55 = vsel %vm476_vm1, %v11417_v38, 0 }
0x38b7   :  { %v11415_v18 = vpop.permute.xlu0 %11414 }
0x38bc   :  { %v16927_v28 = vpop.eup %16926 }
0x38bd   :  { %v16929_v14 = vpop.eup %16928  ;;  %v11217_v13 = vmul.f32 %v16927_v28, %v16919_v15  ;;  %v11567_v15 = vpop.permute.xlu1 %11566 }
0x38be   :  { %v11216_v50 = vmul.f32 %v16929_v14, %v16921_v31  ;;  %v11517_v31 = vpop.permute.xlu0 %11516  ;;  %v11572_v51 = vsel %vm476_vm1, %v11567_v15, 0 }
0x38bf   :  { %v11221_v26 = vpack.c.bf16 %v11217_v13, %v11217_v13  ;;  %v11522_v17 = vsel %vm476_vm1, %v11517_v31, 0 }
0x38c0   :  { %v11220_v0 = vpack.c.bf16 %v11216_v50, %v11216_v50 }
0x38c1   :  { %15894 = vmatmul.mubr.msk.bf16.vlgmr.msra.gmra.mxu0 %vm661_vm3, %v11221_v26  ;;  %v11565_v37 = vpop.permute.xlu1 %11564 }
0x38c2   :  { %15888 = vmatmul.mubr.msk.bf16.vlgmr.msra.gmra.mxu1 %vm661_vm3, %v11220_v0  ;;  %15904 = vmatpush3.bf16.xpose.msra.mxu0 %v11472_v32  ;;  %v11515_v24 = vpop.permute.xlu0 %11514 }
0x38c3   :  { %15898 = vmatpush3.bf16.xpose.msra.mxu1 %v11422_v55  ;;  %15899 = vmatprep.mubr.msk.bf16.mxu1 %vm17108_vm0, %v17107_v35 }
0x38c4   :  { %15905 = vmatprep.mubr.msk.bf16.mxu0 %vm17108_vm0, %v17107_v35  ;;  %15909 = vmatprep.subr.bf16.mxu1 %v17107_v35 }
0x38c5   :  { %15915 = vmatprep.subr.bf16.mxu0 %v17107_v35 }
0x38c9   :  { %15906 = vmatmul.mubr.msk.bf16.vlgmr.msra.gmra.mxu0 %vm476_vm1, %v11465_v20 }
0x38ca   :  { %15900 = vmatmul.mubr.msk.bf16.vlgmr.msra.gmra.mxu1 %vm476_vm1, %v11415_v18  ;;  %15916 = vmatpush3.bf16.xpose.msra.mxu0 %v11572_v51 }
0x38cb   :  { %15910 = vmatpush3.bf16.xpose.msra.mxu1 %v11522_v17  ;;  %15911 = vmatprep.mubr.msk.bf16.mxu1 %vm17108_vm0, %v17107_v35 }
0x38cc   :  { %15917 = vmatprep.mubr.msk.bf16.mxu0 %vm17108_vm0, %v17107_v35  ;;  %15927 = vmatprep.subr.bf16.mxu0 %v17107_v35 }
0x38cd   :  { %15921 = vmatprep.subr.bf16.mxu1 %v17107_v35 }
0x38d1   :  { %15918 = vmatmul.mubr.msk.bf16.vlgmr.msra.gmra.mxu0 %vm476_vm1, %v11565_v37 }
0x38d2   :  { %15912 = vmatmul.mubr.msk.bf16.vlgmr.msra.gmra.mxu1 %vm476_vm1, %v11515_v24  ;;  %15929 = vmatprep.mubr.msk.bf16.mxu0 %vm17108_vm0, %v17107_v35 }
0x38d3   :  { %15923 = vmatprep.mubr.msk.bf16.mxu1 %vm17108_vm0, %v17107_v35 }
0x394c   :  { %v19367_v23 = vpop.f32.mrf.mxu0 }
0x394d   :  { %v19369_v22 = vpop.f32.mrf.mxu1 }
0x394e   :  { %v15883_v52 = vpop.f32.mrf.mxu0 }
0x394f   :  { %v15877_v3 = vpop.f32.mrf.mxu1 }
0x3950   :  { %v11315_v27 = vpop.f32.mrf.mxu0 }
0x3951   :  { %v11267_v1 = vpop.f32.mrf.mxu1 }
0x3952   :  { %v15884_v33 = vpop.f32.mrf.mxu0 }
0x3953   :  { %v15878_v16 = vpop.f32.mrf.mxu1 }
0x3981   :  { %v19373_v59 = vpop.f32.mrf.mxu0 }
0x3982   :  { %v19375_v5 = vpop.f32.mrf.mxu1 }
0x3983   :  { %v15895_v28 = vpop.f32.mrf.mxu0  ;;  %v19862_v21 = vpack.i.bf16 %v19373_v59, %v19375_v5 }
0x3984   :  { %v15889_v14 = vpop.f32.mrf.mxu1 }
0x3985   :  { %v11411_v13 = vpop.f32.mrf.mxu0 }
0x3986   :  { %v11363_v50 = vpop.f32.mrf.mxu1 }
0x3987   :  { %v15896_v26 = vpop.f32.mrf.mxu0 }
0x3988   :  { %v15890_v0 = vpop.f32.mrf.mxu1 }
0x3989   :  { %v11508_v20 = vpop.f32.mrf.mxu0 }
0x398a   :  { %v11458_v32 = vpop.f32.mrf.mxu1  ;;  %v11617_v18 = vsel %vm661_vm3, %v11508_v20, -inf }
0x398b   :  { %11618 = vmax.xlane.f32.xlu1 %v11617_v18  ;;  %v15907_v55 = vpop.f32.mrf.mxu0  ;;  %v11614_v15 = vsel %vm661_vm3, %v11458_v32, -inf }
0x398c   :  { %11615 = vmax.xlane.f32.xlu0 %v11614_v15  ;;  %v15901_v31 = vpop.f32.mrf.mxu1 }
0x398d   :  { %v11511_v51 = vpop.f32.mrf.mxu0 }
0x398e   :  { %v11461_v17 = vpop.f32.mrf.mxu1 }
0x398f   :  { %v15908_v37 = vpop.f32.mrf.mxu0 }
0x3990   :  { %v15902_v24 = vpop.f32.mrf.mxu1 }
0x3991   :  { %v11608_v52 = vpop.f32.mrf.mxu0 }
0x3992   :  { %v11558_v3 = vpop.f32.mrf.mxu1  ;;  %v11623_v13 = vsel %vm661_vm3, %v11608_v52, -inf }
0x3993   :  { %v15919_v27 = vpop.f32.mrf.mxu0  ;;  %v11620_v1 = vsel %vm661_vm3, %v11558_v3, -inf }
0x3994   :  { %11621 = vmax.xlane.f32.xlu0 %v11620_v1  ;;  %v15913_v33 = vpop.f32.mrf.mxu1 }
0x3995   :  { %v11611_v16 = vpop.f32.mrf.mxu0 }
0x3996   :  { %v11561_v28 = vpop.f32.mrf.mxu1 }
0x3997   :  { %v15920_v14 = vpop.f32.mrf.mxu0 }
0x3998   :  { %11624 = vmax.xlane.f32.xlu0 %v11623_v13  ;;  %v15914_v50 = vpop.f32.mrf.mxu1 }
0x399c   :  { %11710 = vrot.lane.b32.xlu1 %v19020_v30, %s17097_s16 }
0x39a0   :  { %11758 = vrot.lane.b32.xlu1 %v19075_v12, %s17097_s16 }
0x39a4   :  { %11806 = vrot.lane.b32.xlu1 %v19085_v41, %s17097_s16 }
0x3a14   :  { %v11619_v26 = vpop.xlane.xlu1 %11618 }
0x3a15   :  { %v11627_v0 = vsub.f32 %v11508_v20, %v11619_v26  ;;  %v11616_v18 = vpop.xlane.xlu0 %11615 }
0x3a16   :  { %v11626_v55 = vsub.f32 %v11458_v32, %v11616_v18 }
0x3a17   :  { %v11632_v15 = vmul.f32 1.442695, %v11627_v0 }
0x3a18   :  { %v11630_v31 = vmul.f32 1.442695, %v11626_v55  ;;  %v11711_v51 = vpop.permute.xlu1 %11710 }
0x3a19   :  { %16930 = vpow2.f32 %v11632_v15  ;;  %v11716_v17 = vsel %vm713_vm2, %v11711_v51, 0 }
0x3a1a   :  { %16932 = vpow2.f32 %v11630_v31  ;;  %15928 = vmatpush3.bf16.msra.mxu0 %v11716_v17 }
0x3a1b   :  { %15939 = vmatprep.subr.bf16.mxu0 %v17107_v35 }
0x3a1d   :  { %v11622_v20 = vpop.xlane.xlu0 %11621 }
0x3a1e   :  { %v11628_v16 = vsub.f32 %v11558_v3, %v11622_v20 }
0x3a20   :  { %v11634_v14 = vmul.f32 1.442695, %v11628_v16 }
0x3a21   :  { %v11625_v32 = vpop.xlane.xlu0 %11624 }
0x3a22   :  { %v11629_v33 = vsub.f32 %v11608_v52, %v11625_v32  ;;  %v11759_v52 = vpop.permute.xlu1 %11758 }
0x3a23   :  { %v11764_v16 = vsel %vm713_vm2, %v11759_v52, 0 }
0x3a24   :  { %v11636_v28 = vmul.f32 1.442695, %v11629_v33 }
0x3a26   :  { %v16931_v37 = vpop.eup %16930  ;;  %16934 = vpow2.f32 %v11636_v28  ;;  %v11807_v3 = vpop.permute.xlu1 %11806 }
0x3a27   :  { %v16933_v24 = vpop.eup %16932  ;;  %v11641_v27 = vsel %vm661_vm3, %v16931_v37, 0.0  ;;  %16936 = vpow2.f32 %v11634_v14  ;;  %v11812_v33 = vsel %vm713_vm2, %v11807_v3, 0 }
0x3a28   :  { %11642 = vadd.xlane.f32.xlu1 %v11641_v27  ;;  %v11638_v1 = vsel %vm661_vm3, %v16933_v24, 0.0 }
0x3a29   :  { %11639 = vadd.xlane.f32.xlu0 %v11638_v1 }
0x3a33   :  { %v16935_v13 = vpop.eup %16934 }
0x3a34   :  { %v16937_v50 = vpop.eup %16936  ;;  %v11647_v26 = vsel %vm661_vm3, %v16935_v13, 0.0 }
0x3a35   :  { %v11644_v0 = vsel %vm661_vm3, %v16937_v50, 0.0 }
0x3a39   :  { %11906 = vrot.lane.b32.xlu1 %v18998_v49, %s17112_s18 }
0x3a3f   :  { %11662 = vrot.lane.b32.xlu0 %v19031_v47, %s17097_s16 }
0x3a5d   :  { %11648 = vadd.xlane.f32.xlu1 %v11647_v26 }
0x3a5e   :  { %11645 = vadd.xlane.f32.xlu0 %v11644_v0 }
0x3a6e   :  { %11904 = vrot.lane.b32.xlu1 %v19017_v10, %s17112_s18 }
0x3a72   :  { %12006 = vrot.lane.b32.xlu1 %v19010_v53, %s17112_s18 }
0x3a74   :  { %11856 = vrot.lane.b32.xlu0 %v18990_v61, %s17112_s18 }
0x3a76   :  { %12004 = vrot.lane.b32.xlu1 %v19028_v45, %s17112_s18 }
0x3a78   :  { %11854 = vrot.lane.b32.xlu0 %v19000_v9, %s17112_s18 }
0x3a7c   :  { %11956 = vrot.lane.b32.xlu0 %v19013_v40, %s17112_s18 }
0x3a80   :  { %11954 = vrot.lane.b32.xlu0 %v19039_v62, %s17112_s18 }
0x3ab1   :  { %v11643_v18 = vpop.xlane.xlu1 %11642 }
0x3ab2   :  { %16938 = vrcp.f32 %v11643_v18  ;;  %v11640_v55 = vpop.xlane.xlu0 %11639 }
0x3ab3   :  { %16940 = vrcp.f32 %v11640_v55 }
0x3ab6   :  { %v11663_v15 = vpop.permute.xlu0 %11662 }
0x3ab7   :  { %v11668_v31 = vsel %vm713_vm2, %v11663_v15, 0 }
0x3ab8   :  { %15922 = vmatpush3.bf16.msra.mxu1 %v11668_v31 }
0x3ab9   :  { %15933 = vmatprep.subr.bf16.mxu1 %v17107_v35 }
0x3abf   :  { %v16939_v51 = vpop.eup %16938 }
0x3ac0   :  { %v16941_v17 = vpop.eup %16940  ;;  %v11655_v27 = vmul.f32 %v16939_v51, %v16931_v37  ;;  %v11907_v37 = vpop.permute.xlu1 %11906 }
0x3ac1   :  { %v11654_v1 = vmul.f32 %v16941_v17, %v16933_v24  ;;  %v11912_v31 = vsel %vm476_vm1, %v11907_v37, 0 }
0x3ac2   :  { %v11659_v20 = vpack.c.bf16 %v11655_v27, %v11655_v27 }
0x3ac3   :  { %v11658_v32 = vpack.c.bf16 %v11654_v1, %v11654_v1 }
0x3ac4   :  { %15930 = vmatmul.mubr.msk.bf16.vlgmr.msra.gmra.mxu0 %vm661_vm3, %v11659_v20 }
0x3ac5   :  { %15924 = vmatmul.mubr.msk.bf16.vlgmr.msra.gmra.mxu1 %vm661_vm3, %v11658_v32  ;;  %15940 = vmatpush3.bf16.msra.mxu0 %v11812_v33 }
0x3ac6   :  { %15934 = vmatpush3.bf16.msra.mxu1 %v11764_v16  ;;  %15935 = vmatprep.mubr.msk.bf16.mxu1 %vm17108_vm0, %v17107_v35 }
0x3ac7   :  { %15941 = vmatprep.mubr.msk.bf16.mxu0 %vm17108_vm0, %v17107_v35  ;;  %15945 = vmatprep.subr.bf16.mxu1 %v17107_v35 }
0x3ac8   :  { %15951 = vmatprep.subr.bf16.mxu0 %v17107_v35 }
0x3ae6   :  { %v11649_v24 = vpop.xlane.xlu1 %11648 }
0x3ae7   :  { %16942 = vrcp.f32 %v11649_v24  ;;  %v11646_v28 = vpop.xlane.xlu0 %11645 }
0x3ae8   :  { %16944 = vrcp.f32 %v11646_v28 }
0x3aea   :  { %v11905_v15 = vpop.permute.xlu1 %11904 }
0x3aeb   :  { %v11857_v14 = vpop.permute.xlu0 %11856 }
0x3aec   :  { %v11862_v17 = vsel %vm476_vm1, %v11857_v14, 0 }
0x3aef   :  { %v11855_v51 = vpop.permute.xlu0 %11854 }
0x3af4   :  { %v16943_v26 = vpop.eup %16942 }
0x3af5   :  { %v16945_v0 = vpop.eup %16944  ;;  %v11657_v52 = vmul.f32 %v16943_v26, %v16935_v13  ;;  %v12007_v13 = vpop.permute.xlu1 %12006 }
0x3af6   :  { %v11656_v3 = vmul.f32 %v16945_v0, %v16937_v50  ;;  %v11957_v50 = vpop.permute.xlu0 %11956  ;;  %v12012_v27 = vsel %vm476_vm1, %v12007_v13, 0 }
0x3af7   :  { %v11661_v18 = vpack.c.bf16 %v11657_v52, %v11657_v52  ;;  %v11962_v1 = vsel %vm476_vm1, %v11957_v50, 0 }
0x3af8   :  { %v11660_v55 = vpack.c.bf16 %v11656_v3, %v11656_v3 }
0x3af9   :  { %15942 = vmatmul.mubr.msk.bf16.vlgmr.msra.gmra.mxu0 %vm661_vm3, %v11661_v18  ;;  %v12005_v20 = vpop.permute.xlu1 %12004 }
0x3afa   :  { %15936 = vmatmul.mubr.msk.bf16.vlgmr.msra.gmra.mxu1 %vm661_vm3, %v11660_v55  ;;  %15952 = vmatpush3.bf16.xpose.msra.mxu0 %v11912_v31  ;;  %v11955_v32 = vpop.permute.xlu0 %11954 }
0x3afb   :  { %15946 = vmatpush3.bf16.xpose.msra.mxu1 %v11862_v17  ;;  %15947 = vmatprep.mubr.msk.bf16.mxu1 %vm17108_vm0, %v17107_v35 }
0x3afc   :  { %15953 = vmatprep.mubr.msk.bf16.mxu0 %vm17108_vm0, %v17107_v35  ;;  %15957 = vmatprep.subr.bf16.mxu1 %v17107_v35 }
0x3afd   :  { %15963 = vmatprep.subr.bf16.mxu0 %v17107_v35 }
0x3b01   :  { %15954 = vmatmul.mubr.msk.bf16.vlgmr.msra.gmra.mxu0 %vm476_vm1, %v11905_v15 }
0x3b02   :  { %15948 = vmatmul.mubr.msk.bf16.vlgmr.msra.gmra.mxu1 %vm476_vm1, %v11855_v51  ;;  %15964 = vmatpush3.bf16.xpose.msra.mxu0 %v12012_v27 }
0x3b03   :  { %15958 = vmatpush3.bf16.xpose.msra.mxu1 %v11962_v1  ;;  %15959 = vmatprep.mubr.msk.bf16.mxu1 %vm17108_vm0, %v17107_v35 }
0x3b04   :  { %15965 = vmatprep.mubr.msk.bf16.mxu0 %vm17108_vm0, %v17107_v35  ;;  %15975 = vmatprep.subr.bf16.mxu0 %v17107_v35 }
0x3b05   :  { %15969 = vmatprep.subr.bf16.mxu1 %v17107_v35 }
0x3b09   :  { %15966 = vmatmul.mubr.msk.bf16.vlgmr.msra.gmra.mxu0 %vm476_vm1, %v12005_v20 }
0x3b0a   :  { %15960 = vmatmul.mubr.msk.bf16.vlgmr.msra.gmra.mxu1 %vm476_vm1, %v11955_v32  ;;  %15977 = vmatprep.mubr.msk.bf16.mxu0 %vm17108_vm0, %v17107_v35 }
0x3b0b   :  { %15971 = vmatprep.mubr.msk.bf16.mxu1 %vm17108_vm0, %v17107_v35 }
0x3b84   :  { %v19451_v33 = vpop.f32.mrf.mxu0 }
0x3b85   :  { %v19453_v16 = vpop.f32.mrf.mxu1 }
0x3b86   :  { %v15931_v24 = vpop.f32.mrf.mxu0 }
0x3b87   :  { %v15925_v28 = vpop.f32.mrf.mxu1 }
0x3b88   :  { %v11755_v14 = vpop.f32.mrf.mxu0 }
0x3b89   :  { %v11707_v26 = vpop.f32.mrf.mxu1 }
0x3b8a   :  { %v15932_v0 = vpop.f32.mrf.mxu0 }
0x3b8b   :  { %v15926_v52 = vpop.f32.mrf.mxu1 }
0x3bb9   :  { %v19457_v3 = vpop.f32.mrf.mxu0 }
0x3bba   :  { %v19459_v18 = vpop.f32.mrf.mxu1 }
0x3bbb   :  { %v15943_v15 = vpop.f32.mrf.mxu0 }
0x3bbc   :  { %v15937_v31 = vpop.f32.mrf.mxu1 }
0x3bbd   :  { %v11851_v51 = vpop.f32.mrf.mxu0 }
0x3bbe   :  { %v11803_v17 = vpop.f32.mrf.mxu1 }
0x3bbf   :  { %v15944_v13 = vpop.f32.mrf.mxu0 }
0x3bc0   :  { %v15938_v50 = vpop.f32.mrf.mxu1 }
0x3bc1   :  { %v11948_v27 = vpop.f32.mrf.mxu0 }
0x3bc2   :  { %v11898_v1 = vpop.f32.mrf.mxu1  ;;  %v12057_v20 = vsel %vm661_vm3, %v11948_v27, -inf }
0x3bc3   :  { %12058 = vmax.xlane.f32.xlu1 %v12057_v20  ;;  %v15955_v32 = vpop.f32.mrf.mxu0  ;;  %v12054_v24 = vsel %vm661_vm3, %v11898_v1, -inf }
0x3bc4   :  { %12055 = vmax.xlane.f32.xlu0 %v12054_v24  ;;  %v15949_v28 = vpop.f32.mrf.mxu1 }
0x3bc5   :  { %v11951_v14 = vpop.f32.mrf.mxu0 }
0x3bc6   :  { %v11901_v26 = vpop.f32.mrf.mxu1 }
0x3bc7   :  { %v15956_v0 = vpop.f32.mrf.mxu0 }
0x3bc8   :  { %v15950_v52 = vpop.f32.mrf.mxu1 }
0x3bc9   :  { %v12048_v15 = vpop.f32.mrf.mxu0 }
0x3bca   :  { %v11998_v31 = vpop.f32.mrf.mxu1  ;;  %v12063_v20 = vsel %vm661_vm3, %v12048_v15, -inf }
0x3bcb   :  { %v15967_v51 = vpop.f32.mrf.mxu0  ;;  %v12060_v17 = vsel %vm661_vm3, %v11998_v31, -inf }
0x3bcc   :  { %12061 = vmax.xlane.f32.xlu0 %v12060_v17  ;;  %v15961_v13 = vpop.f32.mrf.mxu1 }
0x3bcd   :  { %v12051_v50 = vpop.f32.mrf.mxu0 }
0x3bce   :  { %v12001_v55 = vpop.f32.mrf.mxu1 }
0x3bcf   :  { %v15968_v38 = vpop.f32.mrf.mxu0 }
0x3bd0   :  { %12064 = vmax.xlane.f32.xlu0 %v12063_v20  ;;  %v15962_v32 = vpop.f32.mrf.mxu1 }
0x3bd4   :  { %12150 = vrot.lane.b32.xlu1 %v19020_v30, %s17112_s18 }
0x3bd8   :  { %12198 = vrot.lane.b32.xlu1 %v19075_v12, %s17112_s18 }
0x3bdc   :  { %12246 = vrot.lane.b32.xlu1 %v19085_v41, %s17112_s18 }
0x3c4c   :  { %v12059_v24 = vpop.xlane.xlu1 %12058 }
0x3c4d   :  { %v12067_v28 = vsub.f32 %v11948_v27, %v12059_v24  ;;  %v12056_v14 = vpop.xlane.xlu0 %12055 }
0x3c4e   :  { %v12066_v26 = vsub.f32 %v11898_v1, %v12056_v14 }
0x3c4f   :  { %v12072_v0 = vmul.f32 1.442695, %v12067_v28 }
0x3c50   :  { %v12070_v55 = vmul.f32 1.442695, %v12066_v26  ;;  %v12151_v38 = vpop.permute.xlu1 %12150 }
0x3c51   :  { %16946 = vpow2.f32 %v12072_v0  ;;  %v12156_v52 = vsel %vm713_vm2, %v12151_v38, 0 }
0x3c52   :  { %16948 = vpow2.f32 %v12070_v55  ;;  %15976 = vmatpush3.bf16.msra.mxu0 %v12156_v52 }
0x3c53   :  { %15987 = vmatprep.subr.bf16.mxu0 %v17107_v35 }
0x3c55   :  { %v12062_v27 = vpop.xlane.xlu0 %12061 }
0x3c56   :  { %v12068_v32 = vsub.f32 %v11998_v31, %v12062_v27 }
0x3c58   :  { %v12074_v28 = vmul.f32 1.442695, %v12068_v32 }
0x3c59   :  { %v12065_v1 = vpop.xlane.xlu0 %12064 }
0x3c5a   :  { %v12069_v20 = vsub.f32 %v12048_v15, %v12065_v1  ;;  %v12199_v15 = vpop.permute.xlu1 %12198 }
0x3c5c   :  { %v12076_v24 = vmul.f32 1.442695, %v12069_v20 }
0x3c5e   :  { %v16947_v51 = vpop.eup %16946  ;;  %16950 = vpow2.f32 %v12076_v24  ;;  %v12247_v31 = vpop.permute.xlu1 %12246 }
0x3c5f   :  { %v16949_v17 = vpop.eup %16948  ;;  %v12081_v13 = vsel %vm661_vm3, %v16947_v51, 0.0  ;;  %16952 = vpow2.f32 %v12074_v28 }
0x3c60   :  { %12082 = vadd.xlane.f32.xlu1 %v12081_v13  ;;  %v12078_v50 = vsel %vm661_vm3, %v16949_v17, 0.0 }
0x3c61   :  { %12079 = vadd.xlane.f32.xlu0 %v12078_v50 }
0x3c6b   :  { %v16951_v14 = vpop.eup %16950 }
0x3c6c   :  { %v16953_v26 = vpop.eup %16952  ;;  %v12087_v0 = vsel %vm661_vm3, %v16951_v14, 0.0 }
0x3c6d   :  { %v12084_v55 = vsel %vm661_vm3, %v16953_v26, 0.0 }
0x3c71   :  { %12346 = vrot.lane.b32.xlu1 %v18998_v49, %s17113_s19 }
0x3c77   :  { %12102 = vrot.lane.b32.xlu0 %v19031_v47, %s17112_s18 }
0x3c95   :  { %12088 = vadd.xlane.f32.xlu1 %v12087_v0  ;;  %v12252_v0 = vsel %vm713_vm2, %v12247_v31, 0 }
0x3c96   :  { %12085 = vadd.xlane.f32.xlu0 %v12084_v55  ;;  %v12204_v55 = vsel %vm713_vm2, %v12199_v15, 0 }
0x3ca6   :  { %12344 = vrot.lane.b32.xlu1 %v19017_v10, %s17113_s19 }
0x3caa   :  { %12446 = vrot.lane.b32.xlu1 %v19010_v53, %s17113_s19 }
0x3cac   :  { %12296 = vrot.lane.b32.xlu0 %v18990_v61, %s17113_s19 }
0x3cae   :  { %12444 = vrot.lane.b32.xlu1 %v19028_v45, %s17113_s19 }
0x3cb0   :  { %12294 = vrot.lane.b32.xlu0 %v19000_v9, %s17113_s19 }
0x3cb4   :  { %12396 = vrot.lane.b32.xlu0 %v19013_v40, %s17113_s19 }
0x3cb8   :  { %12394 = vrot.lane.b32.xlu0 %v19039_v62, %s17113_s19 }
0x3ce9   :  { %v12083_v38 = vpop.xlane.xlu1 %12082 }
0x3cea   :  { %16954 = vrcp.f32 %v12083_v38  ;;  %v12080_v52 = vpop.xlane.xlu0 %12079 }
0x3ceb   :  { %16956 = vrcp.f32 %v12080_v52 }
0x3cee   :  { %v12103_v13 = vpop.permute.xlu0 %12102 }
0x3cef   :  { %v12108_v50 = vsel %vm713_vm2, %v12103_v13, 0 }
0x3cf0   :  { %15970 = vmatpush3.bf16.msra.mxu1 %v12108_v50 }
0x3cf1   :  { %15981 = vmatprep.subr.bf16.mxu1 %v17107_v35 }
0x3cf7   :  { %v16955_v27 = vpop.eup %16954 }
0x3cf8   :  { %v16957_v1 = vpop.eup %16956  ;;  %v12095_v20 = vmul.f32 %v16955_v27, %v16947_v51  ;;  %v12347_v51 = vpop.permute.xlu1 %12346 }
0x3cf9   :  { %v12094_v32 = vmul.f32 %v16957_v1, %v16949_v17 }
0x3cfa   :  { %v12099_v24 = vpack.c.bf16 %v12095_v20, %v12095_v20 }
0x3cfb   :  { %v12098_v28 = vpack.c.bf16 %v12094_v32, %v12094_v32  ;;  %v12352_v32 = vsel %vm476_vm1, %v12347_v51, 0 }
0x3cfc   :  { %15978 = vmatmul.mubr.msk.bf16.vlgmr.msra.gmra.mxu0 %vm661_vm3, %v12099_v24 }
0x3cfd   :  { %15972 = vmatmul.mubr.msk.bf16.vlgmr.msra.gmra.mxu1 %vm661_vm3, %v12098_v28  ;;  %15988 = vmatpush3.bf16.msra.mxu0 %v12252_v0 }
0x3cfe   :  { %15982 = vmatpush3.bf16.msra.mxu1 %v12204_v55  ;;  %15983 = vmatprep.mubr.msk.bf16.mxu1 %vm17108_vm0, %v17107_v35 }
0x3cff   :  { %15989 = vmatprep.mubr.msk.bf16.mxu0 %vm17108_vm0, %v17107_v35  ;;  %15993 = vmatprep.subr.bf16.mxu1 %v17107_v35 }
0x3d00   :  { %15999 = vmatprep.subr.bf16.mxu0 %v17107_v35 }
0x3d1e   :  { %v12089_v17 = vpop.xlane.xlu1 %12088 }
0x3d1f   :  { %16958 = vrcp.f32 %v12089_v17  ;;  %v12086_v31 = vpop.xlane.xlu0 %12085 }
0x3d20   :  { %16960 = vrcp.f32 %v12086_v31 }
0x3d22   :  { %v12345_v20 = vpop.permute.xlu1 %12344 }
0x3d23   :  { %v12297_v15 = vpop.permute.xlu0 %12296 }
0x3d24   :  { %v12302_v28 = vsel %vm476_vm1, %v12297_v15, 0 }
0x3d27   :  { %v12295_v24 = vpop.permute.xlu0 %12294 }
0x3d2c   :  { %v16959_v38 = vpop.eup %16958 }
0x3d2d   :  { %v16961_v52 = vpop.eup %16960  ;;  %v12097_v13 = vmul.f32 %v16959_v38, %v16951_v14  ;;  %v12447_v14 = vpop.permute.xlu1 %12446 }
0x3d2e   :  { %v12096_v50 = vmul.f32 %v16961_v52, %v16953_v26  ;;  %v12397_v26 = vpop.permute.xlu0 %12396  ;;  %v12452_v0 = vsel %vm476_vm1, %v12447_v14, 0 }
0x3d2f   :  { %v12101_v27 = vpack.c.bf16 %v12097_v13, %v12097_v13  ;;  %v12402_v55 = vsel %vm476_vm1, %v12397_v26, 0 }
0x3d30   :  { %v12100_v1 = vpack.c.bf16 %v12096_v50, %v12096_v50 }
0x3d31   :  { %15990 = vmatmul.mubr.msk.bf16.vlgmr.msra.gmra.mxu0 %vm661_vm3, %v12101_v27  ;;  %v12445_v51 = vpop.permute.xlu1 %12444 }
0x3d32   :  { %15984 = vmatmul.mubr.msk.bf16.vlgmr.msra.gmra.mxu1 %vm661_vm3, %v12100_v1  ;;  %16000 = vmatpush3.bf16.xpose.msra.mxu0 %v12352_v32  ;;  %v12395_v17 = vpop.permute.xlu0 %12394 }
0x3d33   :  { %15994 = vmatpush3.bf16.xpose.msra.mxu1 %v12302_v28  ;;  %15995 = vmatprep.mubr.msk.bf16.mxu1 %vm17108_vm0, %v17107_v35 }
0x3d34   :  { %16001 = vmatprep.mubr.msk.bf16.mxu0 %vm17108_vm0, %v17107_v35  ;;  %16005 = vmatprep.subr.bf16.mxu1 %v17107_v35 }
0x3d35   :  { %16011 = vmatprep.subr.bf16.mxu0 %v17107_v35 }
0x3d39   :  { %16002 = vmatmul.mubr.msk.bf16.vlgmr.msra.gmra.mxu0 %vm476_vm1, %v12345_v20 }
0x3d3a   :  { %15996 = vmatmul.mubr.msk.bf16.vlgmr.msra.gmra.mxu1 %vm476_vm1, %v12295_v24  ;;  %16012 = vmatpush3.bf16.xpose.msra.mxu0 %v12452_v0 }
0x3d3b   :  { %16006 = vmatpush3.bf16.xpose.msra.mxu1 %v12402_v55  ;;  %16007 = vmatprep.mubr.msk.bf16.mxu1 %vm17108_vm0, %v17107_v35 }
0x3d3c   :  { %16013 = vmatprep.mubr.msk.bf16.mxu0 %vm17108_vm0, %v17107_v35  ;;  %16023 = vmatprep.subr.bf16.mxu0 %v17107_v35 }
0x3d3d   :  { %16017 = vmatprep.subr.bf16.mxu1 %v17107_v35 }
0x3d41   :  { %16014 = vmatmul.mubr.msk.bf16.vlgmr.msra.gmra.mxu0 %vm476_vm1, %v12445_v51 }
0x3d42   :  { %16008 = vmatmul.mubr.msk.bf16.vlgmr.msra.gmra.mxu1 %vm476_vm1, %v12395_v17  ;;  %16025 = vmatprep.mubr.msk.bf16.mxu0 %vm17108_vm0, %v17107_v35 }
0x3d43   :  { %16019 = vmatprep.mubr.msk.bf16.mxu1 %vm17108_vm0, %v17107_v35 }
0x3dbc   :  { %v19535_v31 = vpop.f32.mrf.mxu0 }
0x3dbd   :  { %v19537_v15 = vpop.f32.mrf.mxu1 }
0x3dbe   :  { %v15979_v52 = vpop.f32.mrf.mxu0 }
0x3dbf   :  { %v15973_v13 = vpop.f32.mrf.mxu1 }
0x3dc0   :  { %v12195_v50 = vpop.f32.mrf.mxu0 }
0x3dc1   :  { %v12147_v27 = vpop.f32.mrf.mxu1 }
0x3dc2   :  { %v15980_v1 = vpop.f32.mrf.mxu0 }
0x3dc3   :  { %v15974_v20 = vpop.f32.mrf.mxu1 }
0x3df1   :  { %v19541_v32 = vpop.f32.mrf.mxu0 }
0x3df2   :  { %v19543_v24 = vpop.f32.mrf.mxu1 }
0x3df3   :  { %v15991_v14 = vpop.f32.mrf.mxu0 }
0x3df4   :  { %v15985_v26 = vpop.f32.mrf.mxu1 }
0x3df5   :  { %v12291_v0 = vpop.f32.mrf.mxu0 }
0x3df6   :  { %v12243_v55 = vpop.f32.mrf.mxu1 }
0x3df7   :  { %v15992_v51 = vpop.f32.mrf.mxu0 }
0x3df8   :  { %v15986_v17 = vpop.f32.mrf.mxu1 }
0x3df9   :  { %v12388_v48 = vpop.f32.mrf.mxu0 }
0x3dfa   :  { %v12338_v52 = vpop.f32.mrf.mxu1  ;;  %v12497_v13 = vsel %vm661_vm3, %v12388_v48, -inf }
0x3dfb   :  { %12498 = vmax.xlane.f32.xlu1 %v12497_v13  ;;  %v16003_v50 = vpop.f32.mrf.mxu0  ;;  %v12494_v27 = vsel %vm661_vm3, %v12338_v52, -inf }
0x3dfc   :  { %12495 = vmax.xlane.f32.xlu0 %v12494_v27  ;;  %v15997_v1 = vpop.f32.mrf.mxu1 }
0x3dfd   :  { %v12391_v20 = vpop.f32.mrf.mxu0 }
0x3dfe   :  { %v12341_v44 = vpop.f32.mrf.mxu1 }
0x3dff   :  { %v16004_v38 = vpop.f32.mrf.mxu0 }
0x3e00   :  { %v15998_v28 = vpop.f32.mrf.mxu1 }
0x3e01   :  { %v12488_v14 = vpop.f32.mrf.mxu0 }
0x3e02   :  { %v12438_v26 = vpop.f32.mrf.mxu1  ;;  %v12503_v13 = vsel %vm661_vm3, %v12488_v14, -inf }
0x3e03   :  { %v16015_v0 = vpop.f32.mrf.mxu0  ;;  %v12500_v55 = vsel %vm661_vm3, %v12438_v26, -inf }
0x3e04   :  { %12501 = vmax.xlane.f32.xlu0 %v12500_v55  ;;  %v16009_v51 = vpop.f32.mrf.mxu1 }
0x3e05   :  { %v12491_v17 = vpop.f32.mrf.mxu0 }
0x3e06   :  { %v12441_v37 = vpop.f32.mrf.mxu1 }
0x3e07   :  { %v16016_v7 = vpop.f32.mrf.mxu0 }
0x3e08   :  { %12504 = vmax.xlane.f32.xlu0 %v12503_v13  ;;  %v16010_v50 = vpop.f32.mrf.mxu1 }
0x3e0c   :  { %12590 = vrot.lane.b32.xlu1 %v19020_v30, %s17113_s19 }
0x3e10   :  { %12638 = vrot.lane.b32.xlu1 %v19075_v12, %s17113_s19 }
0x3e14   :  { %12686 = vrot.lane.b32.xlu1 %v19085_v41, %s17113_s19 }
0x3e84   :  { %v12499_v44 = vpop.xlane.xlu1 %12498 }
0x3e85   :  { %v12507_v38 = vsub.f32 %v12388_v48, %v12499_v44  ;;  %v12496_v28 = vpop.xlane.xlu0 %12495 }
0x3e86   :  { %v12506_v27 = vsub.f32 %v12338_v52, %v12496_v28 }
0x3e87   :  { %v12512_v1 = vmul.f32 1.442695, %v12507_v38 }
0x3e88   :  { %v12510_v37 = vmul.f32 1.442695, %v12506_v27  ;;  %v12591_v7 = vpop.permute.xlu1 %12590 }
0x3e89   :  { %16962 = vpow2.f32 %v12512_v1  ;;  %v12596_v20 = vsel %vm713_vm2, %v12591_v7, 0 }
0x3e8a   :  { %16964 = vpow2.f32 %v12510_v37  ;;  %16024 = vmatpush3.bf16.msra.mxu0 %v12596_v20 }
0x3e8b   :  { %16035 = vmatprep.subr.bf16.mxu0 %v17107_v35 }
0x3e8d   :  { %v12502_v48 = vpop.xlane.xlu0 %12501 }
0x3e8e   :  { %v12508_v50 = vsub.f32 %v12438_v26, %v12502_v48 }
0x3e90   :  { %v12514_v38 = vmul.f32 1.442695, %v12508_v50 }
0x3e91   :  { %v12505_v52 = vpop.xlane.xlu0 %12504 }
0x3e92   :  { %v12509_v13 = vsub.f32 %v12488_v14, %v12505_v52 }
0x3e94   :  { %v12516_v44 = vmul.f32 1.442695, %v12509_v13 }
0x3e96   :  { %v16963_v0 = vpop.eup %16962  ;;  %16966 = vpow2.f32 %v12516_v44 }
0x3e97   :  { %v16965_v55 = vpop.eup %16964  ;;  %v12521_v51 = vsel %vm661_vm3, %v16963_v0, 0.0  ;;  %16968 = vpow2.f32 %v12514_v38 }
0x3e98   :  { %12522 = vadd.xlane.f32.xlu1 %v12521_v51  ;;  %v12518_v17 = vsel %vm661_vm3, %v16965_v55, 0.0 }
0x3e99   :  { %12519 = vadd.xlane.f32.xlu0 %v12518_v17 }
0x3ea3   :  { %v16967_v28 = vpop.eup %16966 }
0x3ea4   :  { %v16969_v27 = vpop.eup %16968  ;;  %v12527_v1 = vsel %vm661_vm3, %v16967_v28, 0.0 }
0x3ea5   :  { %v12524_v37 = vsel %vm661_vm3, %v16969_v27, 0.0 }
0x3ea9   :  { %12786 = vrot.lane.b32.xlu1 %v18998_v49, %s17114_s20  ;;  %v12639_v49 = vpop.permute.xlu1 %12638 }
0x3eaa   :  { %v12644_v17 = vsel %vm713_vm2, %v12639_v49, 0 }
0x3eaf   :  { %12542 = vrot.lane.b32.xlu0 %v19031_v47, %s17113_s19 }
0x3ecd   :  { %12528 = vadd.xlane.f32.xlu1 %v12527_v1 }
0x3ece   :  { %12525 = vadd.xlane.f32.xlu0 %v12524_v37 }
0x3ede   :  { %12784 = vrot.lane.b32.xlu1 %v19017_v10, %s17114_s20  ;;  %v12687_v10 = vpop.permute.xlu1 %12686 }
0x3ee2   :  { %12886 = vrot.lane.b32.xlu1 %v19010_v53, %s17114_s20 }
0x3ee4   :  { %12736 = vrot.lane.b32.xlu0 %v18990_v61, %s17114_s20 }
0x3ee6   :  { %12884 = vrot.lane.b32.xlu1 %v19028_v45, %s17114_s20 }
0x3ee8   :  { %12734 = vrot.lane.b32.xlu0 %v19000_v9, %s17114_s20 }
0x3eec   :  { %12836 = vrot.lane.b32.xlu0 %v19013_v40, %s17114_s20 }
0x3ef0   :  { %12834 = vrot.lane.b32.xlu0 %v19039_v62, %s17114_s20  ;;  %v12692_v62 = vsel %vm713_vm2, %v12687_v10, 0 }
0x3f21   :  { %v12523_v14 = vpop.xlane.xlu1 %12522 }
0x3f22   :  { %16970 = vrcp.f32 %v12523_v14  ;;  %v12520_v53 = vpop.xlane.xlu0 %12519 }
0x3f23   :  { %16972 = vrcp.f32 %v12520_v53 }
0x3f26   :  { %v12543_v26 = vpop.permute.xlu0 %12542 }
0x3f27   :  { %v12548_v61 = vsel %vm713_vm2, %v12543_v26, 0 }
0x3f28   :  { %16018 = vmatpush3.bf16.msra.mxu1 %v12548_v61 }
0x3f29   :  { %16029 = vmatprep.subr.bf16.mxu1 %v17107_v35 }
0x3f2f   :  { %v16971_v45 = vpop.eup %16970 }
0x3f30   :  { %v16973_v9 = vpop.eup %16972  ;;  %v12535_v7 = vmul.f32 %v16971_v45, %v16963_v0  ;;  %v12787_v0 = vpop.permute.xlu1 %12786 }
0x3f31   :  { %v12534_v20 = vmul.f32 %v16973_v9, %v16965_v55  ;;  %v12792_v10 = vsel %vm476_vm1, %v12787_v0, 0 }
0x3f32   :  { %v12539_v40 = vpack.c.bf16 %v12535_v7, %v12535_v7 }
0x3f33   :  { %v12538_v51 = vpack.c.bf16 %v12534_v20, %v12534_v20 }
0x3f34   :  { %16026 = vmatmul.mubr.msk.bf16.vlgmr.msra.gmra.mxu0 %vm661_vm3, %v12539_v40 }
0x3f35   :  { %16020 = vmatmul.mubr.msk.bf16.vlgmr.msra.gmra.mxu1 %vm661_vm3, %v12538_v51  ;;  %16036 = vmatpush3.bf16.msra.mxu0 %v12692_v62 }
0x3f36   :  { %16030 = vmatpush3.bf16.msra.mxu1 %v12644_v17  ;;  %16031 = vmatprep.mubr.msk.bf16.mxu1 %vm17108_vm0, %v17107_v35 }
0x3f37   :  { %16037 = vmatprep.mubr.msk.bf16.mxu0 %vm17108_vm0, %v17107_v35  ;;  %16041 = vmatprep.subr.bf16.mxu1 %v17107_v35 }
0x3f38   :  { %16047 = vmatprep.subr.bf16.mxu0 %v17107_v35 }
0x3f56   :  { %v12529_v55 = vpop.xlane.xlu1 %12528 }
0x3f57   :  { %16974 = vrcp.f32 %v12529_v55  ;;  %v12526_v48 = vpop.xlane.xlu0 %12525 }
0x3f58   :  { %16976 = vrcp.f32 %v12526_v48 }
0x3f5a   :  { %v12785_v49 = vpop.permute.xlu1 %12784 }
0x3f5b   :  { %v12737_v52 = vpop.permute.xlu0 %12736 }
0x3f5c   :  { %v12742_v53 = vsel %vm476_vm1, %v12737_v52, 0 }
0x3f5f   :  { %v12735_v14 = vpop.permute.xlu0 %12734 }
0x3f64   :  { %v16975_v13 = vpop.eup %16974 }
0x3f65   :  { %v16977_v50 = vpop.eup %16976  ;;  %v12537_v44 = vmul.f32 %v16975_v13, %v16967_v28  ;;  %v12887_v28 = vpop.permute.xlu1 %12886 }
0x3f66   :  { %v12536_v38 = vmul.f32 %v16977_v50, %v16969_v27  ;;  %v12837_v27 = vpop.permute.xlu0 %12836  ;;  %v12892_v26 = vsel %vm476_vm1, %v12887_v28, 0 }
0x3f67   :  { %v12541_v1 = vpack.c.bf16 %v12537_v44, %v12537_v44  ;;  %v12842_v61 = vsel %vm476_vm1, %v12837_v27, 0 }
0x3f68   :  { %v12540_v37 = vpack.c.bf16 %v12536_v38, %v12536_v38 }
0x3f69   :  { %16038 = vmatmul.mubr.msk.bf16.vlgmr.msra.gmra.mxu0 %vm661_vm3, %v12541_v1  ;;  %v12885_v45 = vpop.permute.xlu1 %12884 }
0x3f6a   :  { %16032 = vmatmul.mubr.msk.bf16.vlgmr.msra.gmra.mxu1 %vm661_vm3, %v12540_v37  ;;  %16048 = vmatpush3.bf16.xpose.msra.mxu0 %v12792_v10  ;;  %v12835_v9 = vpop.permute.xlu0 %12834 }
0x3f6b   :  { %16042 = vmatpush3.bf16.xpose.msra.mxu1 %v12742_v53  ;;  %16043 = vmatprep.mubr.msk.bf16.mxu1 %vm17108_vm0, %v17107_v35 }
0x3f6c   :  { %16049 = vmatprep.mubr.msk.bf16.mxu0 %vm17108_vm0, %v17107_v35  ;;  %16053 = vmatprep.subr.bf16.mxu1 %v17107_v35 }
0x3f6d   :  { %16059 = vmatprep.subr.bf16.mxu0 %v17107_v35 }
0x3f71   :  { %16050 = vmatmul.mubr.msk.bf16.vlgmr.msra.gmra.mxu0 %vm476_vm1, %v12785_v49 }
0x3f72   :  { %16044 = vmatmul.mubr.msk.bf16.vlgmr.msra.gmra.mxu1 %vm476_vm1, %v12735_v14  ;;  %16060 = vmatpush3.bf16.xpose.msra.mxu0 %v12892_v26 }
0x3f73   :  { %16054 = vmatpush3.bf16.xpose.msra.mxu1 %v12842_v61  ;;  %16055 = vmatprep.mubr.msk.bf16.mxu1 %vm17108_vm0, %v17107_v35 }
0x3f74   :  { %16061 = vmatprep.mubr.msk.bf16.mxu0 %vm17108_vm0, %v17107_v35  ;;  %16071 = vmatprep.subr.bf16.mxu0 %v17107_v35 }
0x3f75   :  { %16065 = vmatprep.subr.bf16.mxu1 %v17107_v35 }
0x3f79   :  { %16062 = vmatmul.mubr.msk.bf16.vlgmr.msra.gmra.mxu0 %vm476_vm1, %v12885_v45 }
0x3f7a   :  { %16056 = vmatmul.mubr.msk.bf16.vlgmr.msra.gmra.mxu1 %vm476_vm1, %v12835_v9  ;;  %16073 = vmatprep.mubr.msk.bf16.mxu0 %vm17108_vm0, %v17107_v35 }
0x3f7b   :  { %16067 = vmatprep.mubr.msk.bf16.mxu1 %vm17108_vm0, %v17107_v35 }
0x3ff4   :  { %v19619_v7 = vpop.f32.mrf.mxu0 }
0x3ff5   :  { %v19621_v20 = vpop.f32.mrf.mxu1 }
0x3ff6   :  { %v16318_v40 = vpack.i.bf16 %v19619_v7, %v19621_v20  ;;  %v16027_v51 = vpop.f32.mrf.mxu0 }
0x3ff7   :  { %v16021_v62 = vpop.f32.mrf.mxu1 }
0x3ff8   :  { %v12635_v17 = vpop.f32.mrf.mxu0 }
0x3ff9   :  { %v12587_v0 = vpop.f32.mrf.mxu1 }
0x3ffa   :  { %v16028_v55 = vpop.f32.mrf.mxu0 }
0x3ffb   :  { %v16022_v48 = vpop.f32.mrf.mxu1 }
0x4029   :  { %v19625_v52 = vpop.f32.mrf.mxu0 }
0x402a   :  { %v19627_v13 = vpop.f32.mrf.mxu1 }
0x402b   :  { %v16323_v50 = vpack.i.bf16 %v19625_v52, %v19627_v13  ;;  %v16039_v44 = vpop.f32.mrf.mxu0 }
0x402c   :  { %v16033_v38 = vpop.f32.mrf.mxu1 }
0x402d   :  { %v12731_v1 = vpop.f32.mrf.mxu0 }
0x402e   :  { %v12683_v37 = vpop.f32.mrf.mxu1 }
0x402f   :  { %v16040_v49 = vpop.f32.mrf.mxu0 }
0x4030   :  { %v16034_v10 = vpop.f32.mrf.mxu1 }
0x4031   :  { %v12828_v14 = vpop.f32.mrf.mxu0 }
0x4032   :  { %v12778_v53 = vpop.f32.mrf.mxu1  ;;  %v12937_v28 = vsel %vm661_vm3, %v12828_v14, -inf }
0x4033   :  { %12938 = vmax.xlane.f32.xlu1 %v12937_v28  ;;  %v16051_v27 = vpop.f32.mrf.mxu0  ;;  %v12934_v26 = vsel %vm661_vm3, %v12778_v53, -inf }
0x4034   :  { %12935 = vmax.xlane.f32.xlu0 %v12934_v26  ;;  %v16045_v61 = vpop.f32.mrf.mxu1 }
0x4035   :  { %v12831_v45 = vpop.f32.mrf.mxu0 }
0x4036   :  { %v12781_v9 = vpop.f32.mrf.mxu1 }
0x4037   :  { %v16052_v51 = vpop.f32.mrf.mxu0 }
0x4038   :  { %v16046_v62 = vpop.f32.mrf.mxu1 }
0x4039   :  { %v12928_v17 = vpop.f32.mrf.mxu0 }
0x403a   :  { %v12878_v0 = vpop.f32.mrf.mxu1  ;;  %v12943_v49 = vsel %vm661_vm3, %v12928_v17, -inf }
0x403b   :  { %v16063_v55 = vpop.f32.mrf.mxu0  ;;  %v12940_v48 = vsel %vm661_vm3, %v12878_v0, -inf }
0x403c   :  { %12941 = vmax.xlane.f32.xlu0 %v12940_v48  ;;  %v16057_v44 = vpop.f32.mrf.mxu1 }
0x403d   :  { %v12931_v38 = vpop.f32.mrf.mxu0 }
0x403e   :  { %v12881_v1 = vpop.f32.mrf.mxu1 }
0x403f   :  { %v16064_v37 = vpop.f32.mrf.mxu0 }
0x4040   :  { %12944 = vmax.xlane.f32.xlu0 %v12943_v49  ;;  %v16058_v10 = vpop.f32.mrf.mxu1 }
0x40bc   :  { %v12939_v28 = vpop.xlane.xlu1 %12938 }
0x40bd   :  { %v12947_v27 = vsub.f32 %v12828_v14, %v12939_v28  ;;  %v12936_v26 = vpop.xlane.xlu0 %12935  ;;  %v16530_v28 = vld [vmem:[#allocation4 + $0xb8] sm:$0xff]  }
0x40be   :  { %v12946_v61 = vsub.f32 %v12778_v53, %v12936_v26  ;;  %v16532_v26 = vld [vmem:[#allocation4 + $0xa8] sm:$0xff]  }
0x40bf   :  { %v12952_v45 = vmul.f32 1.442695, %v12947_v27 }
0x40c0   :  { %v12950_v9 = vmul.f32 1.442695, %v12946_v61 }
0x40c1   :  { %16978 = vpow2.f32 %v12952_v45 }
0x40c2   :  { %16980 = vpow2.f32 %v12950_v9 }
0x40c5   :  { %v12942_v51 = vpop.xlane.xlu0 %12941 }
0x40c6   :  { %v12948_v62 = vsub.f32 %v12878_v0, %v12942_v51 }
0x40c8   :  { %v12954_v55 = vmul.f32 1.442695, %v12948_v62 }
0x40c9   :  { %v12945_v53 = vpop.xlane.xlu0 %12944 }
0x40ca   :  { %16982 = vpow2.f32 %v12954_v55  ;;  %v12949_v0 = vsub.f32 %v12928_v17, %v12945_v53  ;;  %v16533_v55 = vld [vmem:[#allocation4 + $0xa0] sm:$0xff]   ;;  %v16535_v53 = vld [vmem:[#allocation4 + $0x90] sm:$0xff]  }
0x40cc   :  { %v12956_v49 = vmul.f32 1.442695, %v12949_v0 }
0x40ce   :  { %v16979_v48 = vpop.eup %16978  ;;  %16984 = vpow2.f32 %v12956_v49 }
0x40cf   :  { %v16981_v44 = vpop.eup %16980  ;;  %v12961_v38 = vsel %vm661_vm3, %v16979_v48, 0.0 }
0x40d0   :  { %12962 = vadd.xlane.f32.xlu1 %v12961_v38  ;;  %v12958_v1 = vsel %vm661_vm3, %v16981_v44, 0.0 }
0x40d1   :  { %12959 = vadd.xlane.f32.xlu0 %v12958_v1  ;;  %v16534_v1 = vld [vmem:[#allocation4 + $0x98] sm:$0xff]  }
0x40d7   :  { %v16983_v37 = vpop.eup %16982 }
0x40d8   :  { %v12964_v14 = vsel %vm661_vm3, %v16983_v37, 0.0 }
0x40d9   :  { %12965 = vadd.xlane.f32.xlu0 %v12964_v14 }
0x40db   :  { %v16985_v60 = vpop.eup %16984 }
0x40dc   :  { %v12967_v29 = vsel %vm661_vm3, %v16985_v60, 0.0 }
0x40e1   :  { %13030 = vrot.lane.b32.xlu1 %v19020_v30, %s17114_s20  ;;  %v19857_v30 = vpack.i.bf16 %v19367_v23, %v19369_v22 }
0x40e5   :  { %13078 = vrot.lane.b32.xlu1 %v19075_v12, %s17114_s20  ;;  %v19859_v12 = vpack.i.bf16 %v19535_v31, %v19537_v15 }
0x40ef   :  { %12982 = vrot.lane.b32.xlu0 %v19031_v47, %s17114_s20  ;;  %v19858_v47 = vpack.i.bf16 %v19451_v33, %v19453_v16 }
0x40f3   :  { %16269 = vrot.lane.b32.xlu0 %v16268_v11, %s17114_s20  ;;  %v19860_v11 = vpack.i.bf16 %v19205_v42, %v19207_v56 }
0x40f7   :  { %16279 = vrot.lane.b32.xlu0 %v16278_v36, %s17113_s19  ;;  %v19863_v36 = vpack.i.bf16 %v19457_v3, %v19459_v18 }
0x40fb   :  { %16289 = vrot.lane.b32.xlu0 %v19857_v30, %s17112_s18  ;;  %v16536_v30 = vld [vmem:[#allocation4 + $0x88] sm:$0xff]  }
0x40ff   :  { %16299 = vrot.lane.b32.xlu0 %v19858_v47, %s17097_s16  ;;  %v16537_v47 = vld [vmem:[#allocation4 + $0x80] sm:$0xff]  }
0x4103   :  { %16309 = vrot.lane.b32.xlu0 %v19859_v12, %s17111_s15 }
0x4107   :  { %16319 = vrot.lane.b32.xlu0 %v16318_v40, %s17110_s30 }
0x4109   :  { %12968 = vadd.xlane.f32.xlu1 %v12967_v29 }
0x411a   :  { %13126 = vrot.lane.b32.xlu1 %v19085_v41, %s17114_s20  ;;  %v19864_v41 = vpack.i.bf16 %v19541_v32, %v19543_v24 }
0x411e   :  { %16274 = vrot.lane.b32.xlu1 %v19860_v11, %s17114_s20 }
0x4122   :  { %16284 = vrot.lane.b32.xlu1 %v19861_v4, %s17113_s19 }
0x4126   :  { %16294 = vrot.lane.b32.xlu1 %v19862_v21, %s17112_s18 }
0x412a   :  { %16304 = vrot.lane.b32.xlu1 %v19863_v36, %s17097_s16 }
0x412e   :  { %16314 = vrot.lane.b32.xlu1 %v19864_v41, %s17111_s15 }
0x4132   :  { %16324 = vrot.lane.b32.xlu1 %v16323_v50, %s17110_s30 }
0x4159   :  { %v12963_v42 = vpop.xlane.xlu1 %12962 }
0x415a   :  { %16986 = vrcp.f32 %v12963_v42  ;;  %v12960_v56 = vpop.xlane.xlu0 %12959 }
0x415b   :  { %16988 = vrcp.f32 %v12960_v56 }
0x415d   :  { %v13031_v46 = vpop.permute.xlu1 %13030 }
0x415e   :  { %v13036_v2 = vsel %vm713_vm2, %v13031_v46, 0 }
0x415f   :  { %16072 = vmatpush3.bf16.msra.mxu0 %v13036_v2 }
0x4160   :  { %16083 = vmatprep.subr.bf16.mxu0 %v17107_v35 }
0x4161   :  { %v13079_v31 = vpop.permute.xlu1 %13078 }
0x4162   :  { %v12966_v23 = vpop.xlane.xlu0 %12965  ;;  %v13084_v32 = vsel %vm713_vm2, %v13079_v31, 0 }
0x4163   :  { %16990 = vrcp.f32 %v12966_v23 }
0x4166   :  { %v12983_v22 = vpop.permute.xlu0 %12982 }
0x4167   :  { %v16987_v59 = vpop.eup %16986  ;;  %v12988_v5 = vsel %vm713_vm2, %v12983_v22, 0 }
0x4168   :  { %v16989_v33 = vpop.eup %16988  ;;  %v12975_v16 = vmul.f32 %v16987_v59, %v16979_v48  ;;  %16066 = vmatpush3.bf16.msra.mxu1 %v12988_v5 }
0x4169   :  { %v12974_v3 = vmul.f32 %v16989_v33, %v16981_v44  ;;  %16077 = vmatprep.subr.bf16.mxu1 %v17107_v35 }
0x416a   :  { %v12979_v18 = vpack.c.bf16 %v12975_v16, %v12975_v16  ;;  %v16270_v21 = vpop.permute.xlu0 %16269 }
0x416b   :  { %v12978_v15 = vpack.c.bf16 %v12974_v3, %v12974_v3  ;;  %v16272_v46 = vunpack.i.h.bf16 %v16270_v21  ;;  %v16271_v2 = vunpack.i.l.bf16 %v16270_v21 }
0x416c   :  { %16074 = vmatmul.mubr.msk.bf16.vlgmr.msra.gmra.mxu0 %vm661_vm3, %v12979_v18 }
0x416d   :  { %16068 = vmatmul.mubr.msk.bf16.vlgmr.msra.gmra.mxu1 %vm661_vm3, %v12978_v15  ;;  %16085 = vmatprep.mubr.msk.bf16.mxu0 %vm17108_vm0, %v17107_v35  ;;  %v13287_v18 = vsel %vm476_vm1, %v19121_v25, %v16272_v46  ;;  %v13286_v31 = vsel %vm476_vm1, %v19119_v19, %v16271_v2 }
0x416e   :  { %16078 = vmatpush3.bf16.msra.mxu1 %v13084_v32  ;;  %16079 = vmatprep.mubr.msk.bf16.mxu1 %vm17108_vm0, %v17107_v35  ;;  %v16531_v35 = vld [vmem:[#allocation4 + $0xb0] sm:$0xff]   ;;  %v16280_v36 = vpop.permute.xlu0 %16279 }
0x416f   :  { %16089 = vmatprep.subr.bf16.mxu1 %v16530_v28  ;;  %v16282_v23 = vunpack.i.h.bf16 %v16280_v36  ;;  %v16281_v22 = vunpack.i.l.bf16 %v16280_v36 }
0x4170   :  { %v16991_v24 = vpop.eup %16990 }
0x4171   :  { %v12976_v7 = vmul.f32 %v16991_v24, %v16983_v37  ;;  %v13290_v24 = vsel %vm4103_vm4, %v13286_v31, %v16281_v22 }
0x4172   :  { %v16290_v41 = vpop.permute.xlu0 %16289 }
0x4173   :  { %v12980_v20 = vpack.c.bf16 %v12976_v7, %v12976_v7  ;;  %v16292_v59 = vunpack.i.h.bf16 %v16290_v41  ;;  %v16291_v5 = vunpack.i.l.bf16 %v16290_v41  ;;  %v13291_v7 = vsel %vm4103_vm4, %v13287_v18, %v16282_v23 }
0x4175   :  { %16080 = vmatmul.mubr.msk.bf16.vlgmr.msra.gmra.mxu1 %vm661_vm3, %v12980_v20 }
0x4176   :  { %16090 = vmatpush3.bf16.msra.mxu1 %v16530_v28  ;;  %v16300_v42 = vpop.permute.xlu0 %16299 }
0x4177   :  { %16091 = vmatprep.subr.bf16.mxu1 %v16531_v35  ;;  %v16302_v16 = vunpack.i.h.bf16 %v16300_v42  ;;  %v16301_v3 = vunpack.i.l.bf16 %v16300_v42 }
0x417a   :  { %16092 = vmatpush3.bf16.msra.mxu1 %v16531_v35  ;;  %v16310_v56 = vpop.permute.xlu0 %16309 }
0x417b   :  { %16093 = vmatprep.subr.bf16.mxu1 %v16532_v26  ;;  %v16312_v15 = vunpack.i.h.bf16 %v16310_v56  ;;  %v16311_v32 = vunpack.i.l.bf16 %v16310_v56 }
0x417e   :  { %16094 = vmatpush3.bf16.msra.mxu1 %v16532_v26  ;;  %v16320_v33 = vpop.permute.xlu0 %16319 }
0x417f   :  { %16095 = vmatprep.subr.bf16.mxu1 %v16533_v55  ;;  %v16322_v20 = vunpack.i.h.bf16 %v16320_v33 }
0x4182   :  { %16096 = vmatpush3.bf16.msra.mxu1 %v16533_v55 }
0x4183   :  { %16097 = vmatprep.subr.bf16.mxu1 %v16534_v1 }
0x4186   :  { %16098 = vmatpush3.bf16.msra.mxu1 %v16534_v1 }
0x4187   :  { %16099 = vmatprep.subr.bf16.mxu1 %v16535_v53 }
0x418a   :  { %16100 = vmatpush3.bf16.msra.mxu1 %v16535_v53 }
0x418b   :  { %16101 = vmatprep.subr.bf16.mxu1 %v16536_v30 }
0x418e   :  { %16102 = vmatpush3.bf16.msra.mxu1 %v16536_v30 }
0x418f   :  { %16103 = vmatprep.subr.bf16.mxu1 %v16537_v47 }
0x4192   :  { %v12969_v40 = vpop.xlane.xlu1 %12968  ;;  %16104 = vmatpush3.bf16.msra.mxu1 %v16537_v47 }
0x4193   :  { %16992 = vrcp.f32 %v12969_v40  ;;  %v16321_v40 = vunpack.i.l.bf16 %v16320_v33 }
0x4196   :  { %v13127_v52 = vpop.permute.xlu1 %13126 }
0x4197   :  { %v13132_v13 = vsel %vm713_vm2, %v13127_v52, 0  ;;  %v13294_v52 = vsel %vm4108_vm5, %v13290_v24, %v16291_v5 }
0x4198   :  { %16084 = vmatpush3.bf16.msra.mxu0 %v13132_v13  ;;  %v13295_v13 = vsel %vm4108_vm5, %v13291_v7, %v16292_v59 }
0x41a0   :  { %v16993_v50 = vpop.eup %16992 }
0x41a1   :  { %v12977_v17 = vmul.f32 %v16993_v50, %v16985_v60  ;;  %v13298_v50 = vsel %vm4113_vm6, %v13294_v52, %v16301_v3 }
0x41a3   :  { %v12981_v10 = vpack.c.bf16 %v12977_v17, %v12977_v17  ;;  %v13299_v17 = vsel %vm4113_vm6, %v13295_v13, %v16302_v16 }
0x41a4   :  { %v13303_v19 = vsel %vm4118_vm7, %v13299_v17, %v16312_v15  ;;  %v14263_v15 = vld [vmem:[%s19829_s5 + $0x2] ss:$0 sm:$0xff] }
0x41a5   :  { %16086 = vmatmul.mubr.msk.bf16.vlgmr.msra.gmra.mxu0 %vm661_vm3, %v12981_v10  ;;  %v13302_v10 = vsel %vm4118_vm7, %v13298_v50, %v16311_v32  ;;  %v13307_v26 = vsel %vm4123_vm8, %v13303_v19, %v16322_v20 }
0x41a6   :  { %13620 = vmatprep.mubr.bf16.mxu0 %v19847_v58 }
0x422c   :  { %v13072_v27 = vpop.f32.mrf.mxu0 }
0x422d   :  { %v13024_v61 = vpop.f32.mrf.mxu1 }
0x422e   :  { %v16328_v45 = vpack.i.bf16 %v13072_v27, %v13024_v61  ;;  %v16075_v9 = vpop.f32.mrf.mxu0  ;;  %v13306_v27 = vsel %vm4123_vm8, %v13302_v10, %v16321_v40 }
0x422f   :  { %v16069_v51 = vpop.f32.mrf.mxu1 }
0x4230   :  { %16329 = vrot.lane.b32.xlu0 %v16328_v45, %s17109_s29  ;;  %v13075_v62 = vpop.f32.mrf.mxu0  ;;  %v16275_v51 = vpop.permute.xlu1 %16274 }
0x4231   :  { %v13027_v48 = vpop.f32.mrf.mxu1  ;;  %v16276_v1 = vunpack.i.l.bf16 %v16275_v51 }
0x4232   :  { %v16076_v44 = vpop.f32.mrf.mxu0 }
0x4233   :  { %v16070_v38 = vpop.f32.mrf.mxu1 }
0x4234   :  { %v16285_v62 = vpop.permute.xlu1 %16284  ;;  %v16277_v38 = vunpack.i.h.bf16 %v16275_v51  ;;  %v16552_v51 = vld [vmem:[#allocation6 + $0x134] ss:$8 sps:$4 sm:$0xff]  }
0x4235   :  { %v13120_v37 = vpop.f32.mrf.mxu1 }
0x4237   :  { %v16081_v14 = vpop.f32.mrf.mxu1 }
0x4238   :  { %v16295_v55 = vpop.permute.xlu1 %16294  ;;  %v16286_v14 = vunpack.i.l.bf16 %v16285_v62 }
0x4239   :  { %v13123_v0 = vpop.f32.mrf.mxu1  ;;  %v16297_v53 = vunpack.i.h.bf16 %v16295_v55 }
0x423a   :  { %v16296_v0 = vunpack.i.l.bf16 %v16295_v55  ;;  %v16555_v55 = vld [vmem:[#allocation6 + $0x124] ss:$8 sps:$4 sm:$0xff]  }
0x423b   :  { %v16082_v49 = vpop.f32.mrf.mxu1 }
0x423c   :  { %v16305_v48 = vpop.permute.xlu1 %16304 }
0x423d   :  { %v16307_v30 = vunpack.i.h.bf16 %v16305_v48  ;;  %v16306_v47 = vunpack.i.l.bf16 %v16305_v48  ;;  %v16553_v48 = vld [vmem:[#allocation6 + $0x120] ss:$8 sps:$4 sm:$0xff]  }
0x4240   :  { %v16315_v44 = vpop.permute.xlu1 %16314 }
0x4244   :  { %v16325_v49 = vpop.permute.xlu1 %16324 }
0x4245   :  { %v16327_v36 = vunpack.i.h.bf16 %v16325_v49  ;;  %v16326_v41 = vunpack.i.l.bf16 %v16325_v49  ;;  %v16565_v49 = vld [vmem:[#allocation7 + $0x130] sm:$0xff]  }
0x4265   :  { %v13168_v12 = vpop.f32.mrf.mxu0 }
0x4266   :  { %v16333_v60 = vpack.i.bf16 %v13168_v12, %v13120_v37  ;;  %v16287_v37 = vunpack.i.h.bf16 %v16285_v62  ;;  %v13289_v12 = vsel %vm476_vm1, %v19125_v54, %v16277_v38  ;;  %v16550_v62 = vld [vmem:[#allocation6 + $0x130] ss:$8 sps:$4 sm:$0xff]   ;;  %v16558_v38 = vld [vmem:[#allocation6 + $0x114] ss:$8 sps:$4 sm:$0xff]  }
0x4267   :  { %v16087_v29 = vpop.f32.mrf.mxu0 }
0x4268   :  { %16334 = vrot.lane.b32.xlu1 %v16333_v60, %s17109_s29  ;;  %v13288_v60 = vsel %vm476_vm1, %v19123_v63, %v16276_v1  ;;  %v16317_v29 = vunpack.i.h.bf16 %v16315_v44  ;;  %v13293_v21 = vsel %vm4103_vm4, %v13289_v12, %v16287_v37  ;;  %v16561_v1 = vld [vmem:[#allocation6 + $0x104] ss:$8 sps:$4 sm:$0xff]   ;;  %v16559_v37 = vld [vmem:[#allocation6 + $0x100] ss:$8 sps:$4 sm:$0xff]  }
0x4269   :  { %v13171_v11 = vpop.f32.mrf.mxu0  ;;  %v13297_v56 = vsel %vm4108_vm5, %v13293_v21, %v16297_v53  ;;  %v16563_v53 = vld [vmem:[#allocation7 + $0x138] sm:$0xff]   ;;  %v16568_v12 = vld [vmem:[#allocation7 + $0x160] sm:$0xff]  }
0x426a   :  { %v16316_v11 = vunpack.i.l.bf16 %v16315_v44  ;;  %v13301_v2 = vsel %vm4113_vm6, %v13297_v56, %v16307_v30  ;;  %v16556_v44 = vld [vmem:[#allocation6 + $0x110] ss:$8 sps:$4 sm:$0xff]   ;;  %v16566_v30 = vld [vmem:[#allocation7 + $0x168] sm:$0xff]  }
0x426b   :  { %v16088_v4 = vpop.f32.mrf.mxu0  ;;  %v13305_v63 = vsel %vm4118_vm7, %v13301_v2, %v16317_v29  ;;  %v16570_v29 = vld [vmem:[#allocation7 + $0x158] sm:$0xff]  }
0x426c   :  { %v13292_v4 = vsel %vm4103_vm4, %v13288_v60, %v16286_v14  ;;  %v13309_v33 = vsel %vm4123_vm8, %v13305_v63, %v16327_v36  ;;  %v16562_v14 = vld [vmem:[#allocation7 + $0x178] sm:$0xff]   ;;  %v16569_v60 = vld [vmem:[#allocation7 + $0x120] sm:$0xff]  }
0x426d   :  { %v13296_v42 = vsel %vm4108_vm5, %v13292_v4, %v16296_v0  ;;  %v16564_v0 = vld [vmem:[#allocation7 + $0x170] sm:$0xff]   ;;  %14809 = vmatprep.subr.bf16.mxu1 %v16562_v14 }
0x426e   :  { %v13300_v46 = vsel %vm4113_vm6, %v13296_v42, %v16306_v47  ;;  %v16567_v47 = vld [vmem:[#allocation7 + $0x128] sm:$0xff]  }
0x426f   :  { %v13304_v23 = vsel %vm4118_vm7, %v13300_v46, %v16316_v11  ;;  %v16571_v11 = vld [vmem:[#allocation7 + $0x118] sm:$0xff]  }
0x4270   :  { %v13308_v5 = vsel %vm4123_vm8, %v13304_v23, %v16326_v41 }
0x42a2   :  { %v16330_v25 = vpop.permute.xlu0 %16329 }
0x42a3   :  { %v16332_v28 = vunpack.i.h.bf16 %v16330_v25  ;;  %v16331_v35 = vunpack.i.l.bf16 %v16330_v25 }
0x42a5   :  { %v13310_v61 = vsel %vm4128_vm9, %v13306_v27, %v16331_v35  ;;  %v13311_v45 = vsel %vm4128_vm9, %v13307_v26, %v16332_v28  ;;  %v16538_v35 = vld [vmem:[#allocation6 + $0x170] ss:$8 sps:$4 sm:$0xff]   ;;  %v16543_v27 = vld [vmem:[#allocation6 + $0x164] ss:$8 sps:$4 sm:$0xff]   ;;  %v16541_v26 = vld [vmem:[#allocation6 + $0x160] ss:$8 sps:$4 sm:$0xff]  }
0x42a6   :  { %v13314_v9 = vpack.c.bf16 %v13311_v45, %v13310_v61  ;;  %v16544_v61 = vld [vmem:[#allocation6 + $0x150] ss:$8 sps:$4 sm:$0xff]   ;;  %v16549_v45 = vld [vmem:[#allocation6 + $0x144] ss:$8 sps:$4 sm:$0xff]  }
0x42a8   :  { %16105 = vmatprep.mubr.bf16.mxu1 %v13314_v9  ;;  %v16547_v9 = vld [vmem:[#allocation6 + $0x140] ss:$8 sps:$4 sm:$0xff]  }
0x42da   :  { %v16335_v54 = vpop.permute.xlu1 %16334 }
0x42db   :  { %v16337_v22 = vunpack.i.h.bf16 %v16335_v54  ;;  %v16336_v59 = vunpack.i.l.bf16 %v16335_v54 }
0x42dd   :  { %v13313_v16 = vsel %vm4128_vm9, %v13309_v33, %v16337_v22  ;;  %v13312_v3 = vsel %vm4128_vm9, %v13308_v5, %v16336_v59 }
0x42de   :  { %v13315_v18 = vpack.c.bf16 %v13313_v16, %v13312_v3 }
0x42e0   :  { %16106 = vmatmul.mubr.bf16.vlgmr.msra.gmra.mxu1 %v13315_v18 }
0x42e1   :  { %14810 = vmatpush3.bf16.msra.mxu1 %v16563_v53 }
0x42e2   :  { %14811 = vmatprep.subr.bf16.mxu1 %v16564_v0  ;;  %v16572_v0 = vld [vmem:[#allocation7 + $0x150] sm:$0xff]  }
0x42e5   :  { %14812 = vmatpush3.bf16.msra.mxu1 %v16565_v49  ;;  %v16574_v49 = vld [vmem:[#allocation7 + $0x148] sm:$0xff]  }
0x42e6   :  { %14813 = vmatprep.subr.bf16.mxu1 %v16566_v30  ;;  %v16575_v30 = vld [vmem:[#allocation7 + $0x108] sm:$0xff]  }
0x42e9   :  { %14814 = vmatpush3.bf16.msra.mxu1 %v16567_v47  ;;  %v16576_v47 = vld [vmem:[#allocation7 + $0x140] sm:$0xff]  }
0x42ea   :  { %14815 = vmatprep.subr.bf16.mxu1 %v16568_v12  ;;  %v16577_v12 = vld [vmem:[#allocation7 + $0x100] sm:$0xff]  }
0x42ed   :  { %14816 = vmatpush3.bf16.msra.mxu1 %v16569_v60 }
0x42ee   :  { %14817 = vmatprep.subr.bf16.mxu1 %v16570_v29 }
0x42f1   :  { %14818 = vmatpush3.bf16.msra.mxu1 %v16571_v11 }
0x42f2   :  { %14819 = vmatprep.subr.bf16.mxu1 %v16572_v0 }
0x43a0   :  { %v16107_v31 = vpop.f32.mrf.mxu1 }
0x43a1   :  { %v13413_v25 = vadd.f32 %v16107_v31, %v14263_v15 }
0x43a2   :  { %v13404_v32 = vpop.f32.mrf.mxu1 }
0x43a3   :  { %v13405_v24 = vadd.f32 %v14263_v15, %v13404_v32  ;;  %v19764_v19 = vadd.f32 %v13413_v25, %v18975_v8  ;;  %v16546_v8 = vld [vmem:[#allocation6 + $0x154] ss:$8 sps:$4 sm:$0xff]  }
0x43a4   :  { %v16108_v7 = vpop.f32.mrf.mxu1 }
0x43a5   :  { %v19748_v20 = vadd.f32 %v13405_v24, %v18967_v57  ;;  %v13416_v13 = vadd.f32 %v16108_v7, %v14263_v15  ;;  %v13437_v28 = vmul.f32 %v19764_v19, %v19764_v19 }
0x43a6   :  { %v13407_v40 = vpop.f32.mrf.mxu1 }
0x43a7   :  { %v13408_v52 = vadd.f32 %v14263_v15, %v13407_v40  ;;  %13423 = vadd.xlane.f32.xlu0 %v19748_v20  ;;  %v13435_v17 = vmul.f32 %v19748_v20, %v19748_v20  ;;  %v19758_v10 = vadd.f32 %v13416_v13, %v18977_v34  ;;  %v16540_v34 = vld [vmem:[#allocation6 + $0x174] ss:$8 sps:$4 sm:$0xff]  }
0x43a8   :  { %13588 = vmatprep.subr.bf16.mxu0 %v16540_v34  ;;  %v14272_v34 = vld [vmem:[%s19830_s6 + $0x2] ss:$0 sm:$0xff] }
0x43a9   :  { %v19752_v50 = vadd.f32 %v13408_v52, %v18969_v6  ;;  %v13438_v6 = vmul.f32 %v19758_v10, %v19758_v10  ;;  %13589 = vmatpush1.bf16.msra.mxu0 %v16538_v35 }
0x43aa   :  { %13590 = vmatprep.subr.bf16.mxu0 %v16543_v27 }
0x43ab   :  { %13425 = vadd.xlane.f32.xlu1 %v19752_v50  ;;  %13439 = vadd.xlane.f32.xlu0 %v13435_v17  ;;  %v13436_v57 = vmul.f32 %v19752_v50, %v19752_v50 }
0x43ad   :  { %13591 = vmatpush1.bf16.msra.mxu0 %v16541_v26 }
0x43ae   :  { %13592 = vmatprep.subr.bf16.mxu0 %v16546_v8 }
0x43af   :  { %13429 = vadd.xlane.f32.xlu1 %v19758_v10  ;;  %13441 = vadd.xlane.f32.xlu0 %v13436_v57 }
0x43b1   :  { %13593 = vmatpush1.bf16.msra.mxu0 %v16544_v61  ;;  %v14273_v61 = vld [vmem:[%s19831_s7 + $0x2] ss:$0 sm:$0xff] }
0x43b2   :  { %13594 = vmatprep.subr.bf16.mxu0 %v16549_v45 }
0x43b3   :  { %13445 = vadd.xlane.f32.xlu1 %v13438_v6  ;;  %13427 = vadd.xlane.f32.xlu0 %v19764_v19 }
0x43b5   :  { %13595 = vmatpush1.bf16.msra.mxu0 %v16547_v9 }
0x43b6   :  { %13596 = vmatprep.subr.bf16.mxu0 %v16552_v51 }
0x43b7   :  { %13443 = vadd.xlane.f32.xlu0 %v13437_v28 }
0x43b9   :  { %13597 = vmatpush1.bf16.msra.mxu0 %v16550_v62 }
0x43ba   :  { %13598 = vmatprep.subr.bf16.mxu0 %v16555_v55 }
0x43bd   :  { %13599 = vmatpush1.bf16.msra.mxu0 %v16553_v48 }
0x43be   :  { %13600 = vmatprep.subr.bf16.mxu0 %v16558_v38 }
0x43c1   :  { %13601 = vmatpush1.bf16.msra.mxu0 %v16556_v44 }
0x43c2   :  { %13602 = vmatprep.subr.bf16.mxu0 %v16561_v1 }
0x43c5   :  { %13603 = vmatpush1.bf16.msra.mxu0 %v16559_v37 }
0x4430   :  { %v13424_v4 = vpop.xlane.xlu0 %13423 }
0x4431   :  { %v13431_v21 = vmul.f32 0.0078125, %v13424_v4 }
0x4433   :  { %v13451_v42 = vmul.f32 %v13431_v21, %v13431_v21  ;;  %v13459_v57 = vsub.f32 %v19748_v20, %v13431_v21 }
0x4434   :  { %v13426_v36 = vpop.xlane.xlu1 %13425  ;;  %v13440_v41 = vpop.xlane.xlu0 %13439 }
0x4435   :  { %v13432_v56 = vmul.f32 0.0078125, %v13426_v36  ;;  %v13447_v46 = vmul.f32 0.0078125, %v13440_v41 }
0x4437   :  { %v13455_v2 = vsub.f32 %v13447_v46, %v13451_v42  ;;  %v13452_v63 = vmul.f32 %v13432_v56, %v13432_v56  ;;  %v13460_v35 = vsub.f32 %v19752_v50, %v13432_v56 }
0x4438   :  { %v13430_v54 = vpop.xlane.xlu1 %13429  ;;  %v13442_v23 = vpop.xlane.xlu0 %13441 }
0x4439   :  { %v13463_v22 = vadd.f32 1e-05, %v13455_v2  ;;  %v13434_v59 = vmul.f32 0.0078125, %v13430_v54  ;;  %v13448_v5 = vmul.f32 0.0078125, %v13442_v23 }
0x443b   :  { %16994 = vrsqrt.f32 %v13463_v22  ;;  %v13456_v33 = vsub.f32 %v13448_v5, %v13452_v63  ;;  %v13454_v18 = vmul.f32 %v13434_v59, %v13434_v59  ;;  %v13462_v45 = vsub.f32 %v19758_v10, %v13434_v59 }
0x443c   :  { %v13446_v16 = vpop.xlane.xlu1 %13445  ;;  %v13428_v3 = vpop.xlane.xlu0 %13427 }
0x443d   :  { %v13464_v31 = vadd.f32 1e-05, %v13456_v33  ;;  %v13450_v15 = vmul.f32 0.0078125, %v13446_v16  ;;  %v13433_v32 = vmul.f32 0.0078125, %v13428_v3 }
0x443f   :  { %16996 = vrsqrt.f32 %v13464_v31  ;;  %v13458_v24 = vsub.f32 %v13450_v15, %v13454_v18  ;;  %v13453_v52 = vmul.f32 %v13433_v32, %v13433_v32  ;;  %v13461_v48 = vsub.f32 %v19764_v19, %v13433_v32  ;;  %v16573_v19 = vld [vmem:[#allocation7 + $0x110] sm:$0xff]  }
0x4440   :  { %v13444_v7 = vpop.xlane.xlu0 %13443  ;;  %14820 = vmatpush3.bf16.msra.mxu1 %v16573_v19 }
0x4441   :  { %v13466_v40 = vadd.f32 1e-05, %v13458_v24  ;;  %v13449_v13 = vmul.f32 0.0078125, %v13444_v7  ;;  %14821 = vmatprep.subr.bf16.mxu1 %v16574_v49 }
0x4443   :  { %16998 = vrsqrt.f32 %v13466_v40  ;;  %v13457_v17 = vsub.f32 %v13449_v13, %v13453_v52 }
0x4444   :  { %14822 = vmatpush3.bf16.msra.mxu1 %v16575_v30 }
0x4445   :  { %v13465_v25 = vadd.f32 1e-05, %v13457_v17  ;;  %14823 = vmatprep.subr.bf16.mxu1 %v16576_v47  ;;  %v14290_v17 = vld [vmem:[%s19835_s11 + $0x2] ss:$0 sm:$0xff] }
0x4447   :  { %17000 = vrsqrt.f32 %v13465_v25 }
0x4448   :  { %v16995_v6 = vpop.eup %16994  ;;  %14824 = vmatpush3.bf16.msra.mxu1 %v16577_v12 }
0x4449   :  { %v13471_v28 = vmul.f32 %v16995_v6, %v13459_v57 }
0x444b   :  { %v13481_v8 = vmul.f32 %v14272_v34, %v13471_v28 }
0x444c   :  { %v16997_v27 = vpop.eup %16996 }
0x444d   :  { %v13472_v26 = vmul.f32 %v16997_v27, %v13460_v35  ;;  %v19780_v51 = vadd.f32 %v14273_v61, %v13481_v8 }
0x444f   :  { %v13482_v9 = vmul.f32 %v14272_v34, %v13472_v26 }
0x4450   :  { %v16999_v20 = vpop.eup %16998 }
0x4451   :  { %v19782_v62 = vadd.f32 %v14273_v61, %v13482_v9  ;;  %v13474_v55 = vmul.f32 %v16999_v20, %v13462_v45 }
0x4453   :  { %v13495_v50 = vpack.c.bf16 %v19782_v62, %v19780_v51  ;;  %v13484_v1 = vmul.f32 %v14272_v34, %v13474_v55 }
0x4454   :  { %v17001_v44 = vpop.eup %17000 }
0x4455   :  { %13621 = vmatmul.mubr.bf16.vlgmr.msra.gmra.mxu0 %v13495_v50  ;;  %v13473_v38 = vmul.f32 %v17001_v44, %v13461_v48  ;;  %v19790_v14 = vadd.f32 %v14273_v61, %v13484_v1 }
0x4456   :  { %13630 = vmatprep.mubr.bf16.mxu0 %v19847_v58  ;;  %v14171_v58 = vld [vmem:[%s19833_s9 + $0x4] sm:$0x3] }
0x4457   :  { %v13483_v37 = vmul.f32 %v14272_v34, %v13473_v38  ;;  %v13505_v29 = vrot.slane %v14171_v58, %v17243_v39  ;;  %v13501_v11 = vrot.slane %v14171_v58, %v17249_v43 }
0x4459   :  { %v19788_v10 = vadd.f32 %v14273_v61, %v13483_v37 }
0x445b   :  { %v13496_v53 = vpack.c.bf16 %v19790_v14, %v19788_v10 }
0x445d   :  { %13631 = vmatmul.mubr.bf16.gmra.mxu0 %v13496_v53 }
0x4515   :  { %v13622_v60 = vpop.f32.mrf.mxu0 }
0x4516   :  { %v13623_v42 = vadd.f32 %v13622_v60, %v13501_v11 }
0x4517   :  { %v13624_v4 = vpop.f32.mrf.mxu0 }
0x4518   :  { %v13625_v36 = vadd.f32 %v13624_v4, %v13505_v29  ;;  %v13641_v22 = vmax.f32 %v13623_v42, 0.0 }
0x4519   :  { %v13626_v21 = vpop.f32.mrf.mxu0 }
0x451a   :  { %v13627_v41 = vadd.f32 %v13626_v21, %v13501_v11  ;;  %v13642_v23 = vmax.f32 %v13625_v36, 0.0 }
0x451b   :  { %v13628_v56 = vpop.f32.mrf.mxu0 }
0x451c   :  { %v13629_v46 = vadd.f32 %v13628_v56, %v13505_v29  ;;  %v13643_v2 = vmax.f32 %v13627_v41, 0.0 }
0x451d   :  { %v13632_v54 = vpop.f32.mrf.mxu0 }
0x451e   :  { %v13644_v63 = vmax.f32 %v13629_v46, 0.0  ;;  %v13649_v33 = vpack.c.bf16 %v13643_v2, %v13641_v22  ;;  %v13633_v43 = vadd.f32 %v13632_v54, %v13501_v11 }
0x451f   :  { %v13634_v59 = vpop.f32.mrf.mxu0 }
0x4520   :  { %v13650_v5 = vpack.c.bf16 %v13644_v63, %v13642_v23  ;;  %v13635_v3 = vadd.f32 %v13634_v59, %v13505_v29  ;;  %v13645_v7 = vmax.f32 %v13633_v43, 0.0  ;;  %v14307_v43 = vld [vmem:[%s19836_s12 + $0x2] ss:$0 sm:$0xff] }
0x4521   :  { %v13636_v16 = vpop.f32.mrf.mxu0 }
0x4522   :  { %v13637_v39 = vadd.f32 %v13636_v16, %v13501_v11  ;;  %13787 = vmatprep.mubr.bf16.mxu1 %v13650_v5  ;;  %v13646_v32 = vmax.f32 %v13635_v3, 0.0 }
0x4523   :  { %v13638_v18 = vpop.f32.mrf.mxu0  ;;  %13788 = vmatmul.mubr.bf16.vlgmr.msra.gmra.mxu1 %v13649_v33 }
0x4524   :  { %v13639_v31 = vadd.f32 %v13638_v18, %v13505_v29  ;;  %v13647_v15 = vmax.f32 %v13637_v39, 0.0 }
0x4526   :  { %v13648_v24 = vmax.f32 %v13639_v31, 0.0  ;;  %v13651_v52 = vpack.c.bf16 %v13647_v15, %v13645_v7  ;;  %v14308_v31 = vld [vmem:[%s19837_s13 + $0x2] ss:$0 sm:$0xff] }
0x4528   :  { %v13652_v40 = vpack.c.bf16 %v13648_v24, %v13646_v32 }
0x452a   :  { %13795 = vmatprep.mubr.bf16.mxu1 %v13652_v40 }
0x452b   :  { %13796 = vmatmul.mubr.bf16.gmra.mxu1 %v13651_v52 }
0x45e3   :  { %v14825_v13 = vpop.f32.mrf.mxu1 }
0x45e5   :  { %v14826_v25 = vpop.f32.mrf.mxu1 }
0x45e6   :  { %v14827_v57 = vadd.f32 %v14826_v25, %v14825_v13 }
0x45e7   :  { %v14828_v6 = vpop.f32.mrf.mxu1 }
0x45e8   :  { %v13790_v28 = vadd.f32 %v14827_v57, %v14290_v17 }
0x45e9   :  { %v14829_v34 = vpop.f32.mrf.mxu1 }
0x45ea   :  { %v14830_v35 = vadd.f32 %v14829_v34, %v14828_v6  ;;  %v13804_v27 = vadd.f32 %v13790_v28, %v19780_v51 }
0x45eb   :  { %v14831_v26 = vpop.f32.mrf.mxu1 }
0x45ec   :  { %v13793_v8 = vadd.f32 %v14830_v35, %v14290_v17  ;;  %13808 = vadd.xlane.f32.xlu0 %v13804_v27  ;;  %v13820_v20 = vmul.f32 %v13804_v27, %v13804_v27 }
0x45ed   :  { %v14832_v61 = vpop.f32.mrf.mxu1 }
0x45ee   :  { %v14833_v45 = vadd.f32 %v14832_v61, %v14831_v26  ;;  %v13805_v9 = vadd.f32 %v13793_v8, %v19782_v62 }
0x45ef   :  { %v14834_v55 = vpop.f32.mrf.mxu1 }
0x45f0   :  { %v13798_v48 = vadd.f32 %v14833_v45, %v14290_v17  ;;  %13810 = vadd.xlane.f32.xlu1 %v13805_v9  ;;  %13824 = vadd.xlane.f32.xlu0 %v13820_v20  ;;  %v13821_v38 = vmul.f32 %v13805_v9, %v13805_v9 }
0x45f1   :  { %v14835_v50 = vpop.f32.mrf.mxu1 }
0x45f2   :  { %v14836_v44 = vadd.f32 %v14835_v50, %v14834_v55  ;;  %v13806_v1 = vadd.f32 %v13798_v48, %v19788_v10 }
0x45f4   :  { %v13801_v37 = vadd.f32 %v14836_v44, %v14290_v17  ;;  %13826 = vadd.xlane.f32.xlu1 %v13821_v38  ;;  %13812 = vadd.xlane.f32.xlu0 %v13806_v1  ;;  %v13822_v53 = vmul.f32 %v13806_v1, %v13806_v1 }
0x45f6   :  { %v13807_v51 = vadd.f32 %v13801_v37, %v19790_v14 }
0x45f8   :  { %13814 = vadd.xlane.f32.xlu1 %v13807_v51  ;;  %13828 = vadd.xlane.f32.xlu0 %v13822_v53  ;;  %v13823_v0 = vmul.f32 %v13807_v51, %v13807_v51 }
0x45fc   :  { %13830 = vadd.xlane.f32.xlu1 %v13823_v0 }
0x4675   :  { %v13809_v62 = vpop.xlane.xlu0 %13808 }
0x4676   :  { %v13816_v19 = vmul.f32 0.0078125, %v13809_v62 }
0x4678   :  { %v13836_v47 = vmul.f32 %v13816_v19, %v13816_v19  ;;  %v13844_v3 = vsub.f32 %v13804_v27, %v13816_v19 }
0x4679   :  { %v13811_v49 = vpop.xlane.xlu1 %13810  ;;  %v13825_v30 = vpop.xlane.xlu0 %13824 }
0x467a   :  { %v13817_v12 = vmul.f32 0.0078125, %v13811_v49  ;;  %v13832_v58 = vmul.f32 0.0078125, %v13825_v30 }
0x467c   :  { %v13840_v60 = vsub.f32 %v13832_v58, %v13836_v47  ;;  %v13837_v11 = vmul.f32 %v13817_v12, %v13817_v12  ;;  %v13845_v15 = vsub.f32 %v13805_v9, %v13817_v12 }
0x467d   :  { %v13827_v29 = vpop.xlane.xlu1 %13826  ;;  %v13813_v10 = vpop.xlane.xlu0 %13812 }
0x467e   :  { %v13848_v4 = vadd.f32 1e-05, %v13840_v60  ;;  %v13833_v21 = vmul.f32 0.0078125, %v13827_v29  ;;  %v13818_v36 = vmul.f32 0.0078125, %v13813_v10 }
0x4680   :  { %17002 = vrsqrt.f32 %v13848_v4  ;;  %v13841_v14 = vsub.f32 %v13833_v21, %v13837_v11  ;;  %v13838_v46 = vmul.f32 %v13818_v36, %v13818_v36  ;;  %v13846_v13 = vsub.f32 %v13806_v1, %v13818_v36 }
0x4681   :  { %v13815_v41 = vpop.xlane.xlu1 %13814  ;;  %v13829_v42 = vpop.xlane.xlu0 %13828 }
0x4682   :  { %v13849_v56 = vadd.f32 1e-05, %v13841_v14  ;;  %v13819_v2 = vmul.f32 0.0078125, %v13815_v41  ;;  %v13834_v54 = vmul.f32 0.0078125, %v13829_v42 }
0x4684   :  { %17004 = vrsqrt.f32 %v13849_v56  ;;  %v13842_v23 = vsub.f32 %v13834_v54, %v13838_v46  ;;  %v13839_v22 = vmul.f32 %v13819_v2, %v13819_v2  ;;  %v13847_v6 = vsub.f32 %v13807_v51, %v13819_v2 }
0x4685   :  { %v13831_v63 = vpop.xlane.xlu1 %13830 }
0x4686   :  { %v13850_v59 = vadd.f32 1e-05, %v13842_v23  ;;  %v13835_v5 = vmul.f32 0.0078125, %v13831_v63 }
0x4688   :  { %17006 = vrsqrt.f32 %v13850_v59  ;;  %v13843_v33 = vsub.f32 %v13835_v5, %v13839_v22 }
0x468a   :  { %v13851_v16 = vadd.f32 1e-05, %v13843_v33 }
0x468c   :  { %17008 = vrsqrt.f32 %v13851_v16 }
0x468d   :  { %v17003_v39 = vpop.eup %17002 }
0x468e   :  { %v13856_v18 = vmul.f32 %v17003_v39, %v13844_v3 }
0x4690   :  { %v13866_v32 = vmul.f32 %v14307_v43, %v13856_v18 }
0x4691   :  { %v17005_v24 = vpop.eup %17004 }
0x4692   :  { %v13876_v7 = vadd.f32 %v14308_v31, %v13866_v32  ;;  %v13857_v40 = vmul.f32 %v17005_v24, %v13845_v15 }
0x4694   :  { %13880 = vst [vmem:[%s19838_s14] sm:$0xff] %v13876_v7  ;;  %v13867_v52 = vmul.f32 %v14307_v43, %v13857_v40 }
0x4695   :  { %v17007_v17 = vpop.eup %17006 }
0x4696   :  { %v13877_v25 = vadd.f32 %v14308_v31, %v13867_v52  ;;  %v13858_v57 = vmul.f32 %v17007_v17, %v13846_v13 }
0x4698   :  { %13881 = vst [vmem:[%s19838_s14 + $0x8] sm:$0xff] %v13877_v25  ;;  %v13868_v28 = vmul.f32 %v14307_v43, %v13858_v57 }
0x4699   :  { %v17009_v34 = vpop.eup %17008 }
0x469a   :  { %v13878_v35 = vadd.f32 %v14308_v31, %v13868_v28  ;;  %v13859_v27 = vmul.f32 %v17009_v34, %v13847_v6 }
0x469c   :  { %13882 = vst [vmem:[%s19838_s14 + $0x10] sm:$0xff] %v13878_v35  ;;  %v13869_v26 = vmul.f32 %v14307_v43, %v13859_v27 }
0x469e   :  { %v13879_v8 = vadd.f32 %v14308_v31, %v13869_v26 }
0x46a0   :  { %13883 = vst [vmem:[%s19838_s14 + $0x18] sm:$0xff] %v13879_v8 }
0x46a1   :  { %13888 = vsyncpa [#allocation3], 1 }
0x46a2   :  { %13889 = vsyncpa [#allocation5], 1 }
0x46a3   :  { %13890 = vsyncpa [#allocation8], 1 }

</bundles_post_ra>
